<compile_context>
chip_gen: v7x
topology: tpu7x:2x2x1
jax: 0.10.0
libtpu: 0.0.40
codegen_flags: <defaults>
</compile_context>

<pallas_src>
import numpy as np
import jax
import jax.numpy as jnp
from jax.experimental import pallas as pl
from jax.experimental.pallas import tpu as pltpu


# ----------------------------------------------------------------------------
# Host-side (pure glue) construction of the per-layer matrices.
# ----------------------------------------------------------------------------

def _interp_matrix_np(n_in, n_out):
    """(n_out, n_in) matrix A with A @ v == 1-D bilinear resize, align_corners=True."""
    if n_out == 1:
        src = np.zeros((1,), np.float64)
    else:
        src = np.arange(n_out, dtype=np.float64) * (n_in - 1) / (n_out - 1)
    i0 = np.clip(np.floor(src).astype(np.int64), 0, n_in - 1)
    i1 = np.minimum(i0 + 1, n_in - 1)
    frac = (src - i0).astype(np.float32)
    a = np.zeros((n_out, n_in), np.float32)
    a[np.arange(n_out), i0] += (1.0 - frac)
    a[np.arange(n_out), i1] += frac
    return a


def _prep_upsample(C, H, W, scale):
    """Bilinear (align_corners) upsample as y -> AH @ y @ AWT in (C*H, W) layout."""
    Hout, Wout = H * scale, W * scale
    ah = _interp_matrix_np(H, Hout)                       # (Hout, H)
    aw = _interp_matrix_np(W, Wout)                       # (Wout, W)
    AH = np.kron(np.eye(C, dtype=np.float32), ah)         # (C*Hout, C*H) block-diag
    AWT = np.ascontiguousarray(aw.T)                      # (W, Wout)
    return AH.astype(np.float32), AWT.astype(np.float32), Hout, Wout


def _prep_conv(w, b, H, W, pad):
    """Replicate-padded KHxKW conv as y -> sum_kw A[kw] @ y @ S[kw] + b_rep.

    Layout is (C*H, W).  A[kw] (Cout*Hout, Cin*H) folds channel mix + KH taps +
    H replicate padding; S[kw] (W, Wout) folds the kw shift + W replicate pad.
    """
    w = np.asarray(w, np.float32)
    b = np.asarray(b, np.float32)
    Cout, Cin, KH, KW = w.shape
    Hout = H + 2 * pad - KH + 1
    Wout = W + 2 * pad - KW + 1

    A = np.zeros((KW, Cout, Hout, Cin, H), np.float32)
    for kh in range(KH):
        wk = np.transpose(w[:, :, kh, :], (2, 0, 1))      # (KW, Cout, Cin)
        for h in range(Hout):
            hin = min(max(h + kh - pad, 0), H - 1)        # replicate clamp in H
            A[:, :, h, :, hin] += wk                      # += sums taps at borders
    A = A.reshape(KW, Cout * Hout, Cin * H)

    S = np.zeros((KW, W, Wout), np.float32)
    cols = np.arange(Wout)
    for kw in range(KW):
        win = np.clip(cols + kw - pad, 0, W - 1)          # replicate clamp in W
        S[kw, win, cols] = 1.0

    b_rep = np.repeat(b, Hout).reshape(Cout * Hout, 1).astype(np.float32)
    return A, S, b_rep, Hout, Wout


# ----------------------------------------------------------------------------
# Fused Pallas kernel: the whole SRCNN forward for one image per grid step.
# ----------------------------------------------------------------------------

def _srcnn_kernel(x_ref,
                  ah2_ref, awt2_ref,
                  a1_ref, s1_ref, b1_ref,
                  a2_ref, s2_ref, b2_ref,
                  ah3_ref, awt3_ref,
                  a3_ref, s3_ref, b3_ref,
                  a4_ref, b4_ref,
                  o_ref):
    def mm(a, b):
        return jnp.dot(a, b, preferred_element_type=jnp.float32)

    def conv(y, a_ref, s_ref, b_ref):
        acc = None
        for kw in range(a_ref.shape[0]):                  # static unroll over KW taps
            t = mm(mm(a_ref[kw], y), s_ref[kw])
            acc = t if acc is None else acc + t
        return acc + b_ref[...]

    y = x_ref[0]                                          # (C*H0, W0)
    # Upsample x2 (two big matmuls)
    y = mm(mm(ah2_ref[...], y), awt2_ref[...])
    # Conv 9x9, replicate pad 2, + ReLU
    y = jnp.maximum(conv(y, a1_ref, s1_ref, b1_ref), 0.0)
    # Conv 1x1, replicate pad 2
    y = conv(y, a2_ref, s2_ref, b2_ref)
    # Upsample x3, then the standalone ReLU (applied exactly once)
    y = mm(mm(ah3_ref[...], y), awt3_ref[...])
    y = jnp.maximum(y, 0.0)
    # Conv 5x5, replicate pad 2, + ReLU
    y = jnp.maximum(conv(y, a3_ref, s3_ref, b3_ref), 0.0)
    # Final 1x1 conv, no padding (its S is the identity and is skipped)
    y = mm(a4_ref[...], y) + b4_ref[...]
    o_ref[0] = y.astype(o_ref.dtype)


def srcnn_forward(x, params):
    (w1, b1), (w2, b2), (w3, b3), (w4, b4) = params
    N, C, H0, W0 = x.shape

    AH2, AWT2, H1, W1 = _prep_upsample(C, H0, W0, 2)          # x2
    A1, S1, B1, H2, W2 = _prep_conv(w1, b1, H1, W1, pad=2)    # 9x9 replicate
    A2, S2, B2, H3, W3 = _prep_conv(w2, b2, H2, W2, pad=2)    # 1x1 replicate, pad 2
    AH3, AWT3, H4, W4 = _prep_upsample(C, H3, W3, 3)          # x3
    A3, S3, B3, H5, W5 = _prep_conv(w3, b3, H4, W4, pad=2)    # 5x5 replicate
    A4, S4, B4, H6, W6 = _prep_conv(w4, b4, H5, W5, pad=0)    # 1x1, pad 0
    del S4                                                    # identity -> skipped
    A4 = A4[0]                                                # (C*H6, C*H5)

    consts = [AH2, AWT2, A1, S1, B1, A2, S2, B2,
              AH3, AWT3, A3, S3, B3, A4, B4]
    consts = [jnp.asarray(c, jnp.float32) for c in consts]

    def const_spec(arr):
        nd = arr.ndim
        return pl.BlockSpec(tuple(arr.shape), lambda n, _nd=nd: (0,) * _nd)

    x2d = x.reshape(N, C * H0, W0).astype(jnp.float32)        # (C*H, W) layout

    out2d = pl.pallas_call(
        _srcnn_kernel,
        out_shape=jax.ShapeDtypeStruct((N, C * H6, W6), jnp.float32),
        grid=(N,),
        in_specs=[pl.BlockSpec((1, C * H0, W0), lambda n: (n, 0, 0))]
                 + [const_spec(c) for c in consts],
        out_specs=pl.BlockSpec((1, C * H6, W6), lambda n: (n, 0, 0)),
        compiler_params=pltpu.CompilerParams(
            dimension_semantics=("parallel",),                # batch -> both v7x TCs
            vmem_limit_bytes=32 * 1024 * 1024),               # ~5 MB weights x 2 buffers
    )(x2d, *consts)
    return out2d.reshape(N, C, H6, W6)


# ----------------------------------------------------------------------------
# Pure-JAX reference (for a self-check) and parameter init.
# ----------------------------------------------------------------------------

def srcnn_reference(x, params):
    prec = jax.lax.Precision.HIGHEST

    def up(y, s):
        _, _, h, w = y.shape
        ah = jnp.asarray(_interp_matrix_np(h, h * s))
        aw = jnp.asarray(_interp_matrix_np(w, w * s))
        y = jnp.einsum('oh,nchw->ncow', ah, y, precision=prec)
        return jnp.einsum('pw,ncow->ncop', aw, y, precision=prec)

    def conv(y, w, b, pad):
        if pad:
            y = jnp.pad(y, ((0, 0), (0, 0), (pad, pad), (pad, pad)), mode='edge')
        y = jax.lax.conv_general_dilated(
            y, w, (1, 1), 'VALID',
            dimension_numbers=('NCHW', 'OIHW', 'NCHW'), precision=prec)
        return y + b[None, :, None, None]

    (w1, b1), (w2, b2), (w3, b3), (w4, b4) = params
    y = up(x, 2)
    y = jax.nn.relu(conv(y, w1, b1, 2))
    y = conv(y, w2, b2, 2)
    y = up(y, 3)
    y = jax.nn.relu(y)
    y = jax.nn.relu(conv(y, w3, b3, 2))
    y = conv(y, w4, b4, 0)
    return y


def init_params(key, channels):
    c = channels
    specs = [(2 * c, c, 9), (c, 2 * c, 1), (c, c, 5), (c, c, 1)]
    params = []
    for k, (cout, cin, ks) in zip(jax.random.split(key, len(specs)), specs):
        kw, kb = jax.random.split(k)
        bound = (cin * ks * ks) ** -0.5
        w = jax.random.uniform(kw, (cout, cin, ks, ks), jnp.float32, -bound, bound)
        b = jax.random.uniform(kb, (cout,), jnp.float32, -bound, bound)
        params.append((w, b))
    return params


if __name__ == "__main__":
    channels = 4
    key = jax.random.PRNGKey(0)
    kx, kp = jax.random.split(key)
    x = jax.random.normal(kx, (2, channels, 16, 16), jnp.float32)
    params = init_params(kp, channels)

    out = srcnn_forward(x, params)
    out = jax.block_until_ready(out)

    # shape trace: (2,4,16,16) -> up2 (2,4,32,32) -> 9x9/p2 (2,8,28,28)
    #              -> 1x1/p2 (2,4,32,32) -> up3 (2,4,96,96) -> 5x5/p2 (2,4,96,96)
    #              -> 1x1/p0 (2,4,96,96)
    assert out.shape == (2, channels, 96, 96), out.shape
    assert bool(jnp.isfinite(out).all())

    ref = jax.block_until_ready(srcnn_reference(x, params))
    err = float(jnp.max(jnp.abs(out - ref)))
    assert err < 2e-2, f"max abs error vs reference: {err}"

    print("KERNEL_OK")
</pallas_src>

<mosaic_0001>
module attributes {stable_mosaic.version = 11 : i64} {
  func.func @_srcnn_kernel(%arg0: i32, %arg1: memref<1x64x16xf32, #tpu.memory_space<vmem>>, %arg2: memref<128x64xf32, #tpu.memory_space<vmem>>, %arg3: memref<16x32xf32, #tpu.memory_space<vmem>>, %arg4: memref<9x224x128xf32, #tpu.memory_space<vmem>>, %arg5: memref<9x32x28xf32, #tpu.memory_space<vmem>>, %arg6: memref<224x1xf32, #tpu.memory_space<vmem>>, %arg7: memref<1x128x224xf32, #tpu.memory_space<vmem>>, %arg8: memref<1x28x32xf32, #tpu.memory_space<vmem>>, %arg9: memref<128x1xf32, #tpu.memory_space<vmem>>, %arg10: memref<384x128xf32, #tpu.memory_space<vmem>>, %arg11: memref<32x96xf32, #tpu.memory_space<vmem>>, %arg12: memref<5x384x384xf32, #tpu.memory_space<vmem>>, %arg13: memref<5x96x96xf32, #tpu.memory_space<vmem>>, %arg14: memref<384x1xf32, #tpu.memory_space<vmem>>, %arg15: memref<384x384xf32, #tpu.memory_space<vmem>>, %arg16: memref<384x1xf32, #tpu.memory_space<vmem>>, %arg17: memref<1x384x96xf32, #tpu.memory_space<vmem>>) attributes {dimension_semantics = [#tpu.dimension_semantics<parallel>], iteration_bounds = array<i64: 2>, scalar_prefetch = 0 : i64, scratch_operands = 0 : i64, tpu.core_type = #tpu.core_type<tc>, window_params = [{transform_indices = @transform_0, window_bounds = array<i64: 1, 64, 16>}, {pipeline_mode = #tpu.pipeline_mode<synchronous>, transform_indices = @transform_1, window_bounds = array<i64: 128, 64>}, {pipeline_mode = #tpu.pipeline_mode<synchronous>, transform_indices = @transform_2, window_bounds = array<i64: 16, 32>}, {pipeline_mode = #tpu.pipeline_mode<synchronous>, transform_indices = @transform_3, window_bounds = array<i64: 9, 224, 128>}, {pipeline_mode = #tpu.pipeline_mode<synchronous>, transform_indices = @transform_4, window_bounds = array<i64: 9, 32, 28>}, {pipeline_mode = #tpu.pipeline_mode<synchronous>, transform_indices = @transform_5, window_bounds = array<i64: 224, 1>}, {pipeline_mode = #tpu.pipeline_mode<synchronous>, transform_indices = @transform_6, window_bounds = array<i64: 1, 128, 224>}, {pipeline_mode = #tpu.pipeline_mode<synchronous>, transform_indices = @transform_7, window_bounds = array<i64: 1, 28, 32>}, {pipeline_mode = #tpu.pipeline_mode<synchronous>, transform_indices = @transform_8, window_bounds = array<i64: 128, 1>}, {pipeline_mode = #tpu.pipeline_mode<synchronous>, transform_indices = @transform_9, window_bounds = array<i64: 384, 128>}, {pipeline_mode = #tpu.pipeline_mode<synchronous>, transform_indices = @transform_10, window_bounds = array<i64: 32, 96>}, {pipeline_mode = #tpu.pipeline_mode<synchronous>, transform_indices = @transform_11, window_bounds = array<i64: 5, 384, 384>}, {pipeline_mode = #tpu.pipeline_mode<synchronous>, transform_indices = @transform_12, window_bounds = array<i64: 5, 96, 96>}, {pipeline_mode = #tpu.pipeline_mode<synchronous>, transform_indices = @transform_13, window_bounds = array<i64: 384, 1>}, {pipeline_mode = #tpu.pipeline_mode<synchronous>, transform_indices = @transform_14, window_bounds = array<i64: 384, 384>}, {pipeline_mode = #tpu.pipeline_mode<synchronous>, transform_indices = @transform_15, window_bounds = array<i64: 384, 1>}, {transform_indices = @transform_16, window_bounds = array<i64: 1, 384, 96>}]} {
    %c0 = arith.constant 0 : index
    %c0_0 = arith.constant 0 : index
    %c0_1 = arith.constant 0 : index
    %0 = vector.load %arg1[%c0, %c0_0, %c0_1] : memref<1x64x16xf32, #tpu.memory_space<vmem>>, vector<1x64x16xf32>
    %1 = vector.shape_cast %0 : vector<1x64x16xf32> to vector<64x16xf32>
    %c0_2 = arith.constant 0 : index
    %c0_3 = arith.constant 0 : index
    %2 = vector.load %arg2[%c0_2, %c0_3] : memref<128x64xf32, #tpu.memory_space<vmem>>, vector<128x64xf32>
    %cst = arith.constant dense<0.000000e+00> : vector<128x16xf32>
    %3 = tpu.matmul %2, %1, %cst {dimension_numbers = #tpu.dot_dimension_numbers<[1], [0], [0], [1], [0, 0, 1, 1], [], []>} : vector<128x64xf32>, vector<64x16xf32>, vector<128x16xf32> -> vector<128x16xf32>
    %c0_4 = arith.constant 0 : index
    %c0_5 = arith.constant 0 : index
    %4 = vector.load %arg3[%c0_4, %c0_5] : memref<16x32xf32, #tpu.memory_space<vmem>>, vector<16x32xf32>
    %cst_6 = arith.constant dense<0.000000e+00> : vector<128x32xf32>
    %5 = tpu.matmul %3, %4, %cst_6 {dimension_numbers = #tpu.dot_dimension_numbers<[1], [0], [0], [1], [0, 0, 1, 1], [], []>} : vector<128x16xf32>, vector<16x32xf32>, vector<128x32xf32> -> vector<128x32xf32>
    %c0_7 = arith.constant 0 : index
    %c0_8 = arith.constant 0 : index
    %c0_9 = arith.constant 0 : index
    %6 = vector.load %arg4[%c0_7, %c0_8, %c0_9] : memref<9x224x128xf32, #tpu.memory_space<vmem>>, vector<1x224x128xf32>
    %7 = vector.shape_cast %6 : vector<1x224x128xf32> to vector<224x128xf32>
    %cst_10 = arith.constant dense<0.000000e+00> : vector<224x32xf32>
    %8 = tpu.matmul %7, %5, %cst_10 {dimension_numbers = #tpu.dot_dimension_numbers<[1], [0], [0], [1], [0, 0, 1, 1], [], []>} : vector<224x128xf32>, vector<128x32xf32>, vector<224x32xf32> -> vector<224x32xf32>
    %c0_11 = arith.constant 0 : index
    %c0_12 = arith.constant 0 : index
    %c0_13 = arith.constant 0 : index
    %9 = vector.load %arg5[%c0_11, %c0_12, %c0_13] : memref<9x32x28xf32, #tpu.memory_space<vmem>>, vector<1x32x28xf32>
    %10 = vector.shape_cast %9 : vector<1x32x28xf32> to vector<32x28xf32>
    %cst_14 = arith.constant dense<0.000000e+00> : vector<224x28xf32>
    %11 = tpu.matmul %8, %10, %cst_14 {dimension_numbers = #tpu.dot_dimension_numbers<[1], [0], [0], [1], [0, 0, 1, 1], [], []>} : vector<224x32xf32>, vector<32x28xf32>, vector<224x28xf32> -> vector<224x28xf32>
    %c1 = arith.constant 1 : index
    %c0_15 = arith.constant 0 : index
    %c0_16 = arith.constant 0 : index
    %12 = vector.load %arg4[%c1, %c0_15, %c0_16] : memref<9x224x128xf32, #tpu.memory_space<vmem>>, vector<1x224x128xf32>
    %13 = vector.shape_cast %12 : vector<1x224x128xf32> to vector<224x128xf32>
    %cst_17 = arith.constant dense<0.000000e+00> : vector<224x32xf32>
    %14 = tpu.matmul %13, %5, %cst_17 {dimension_numbers = #tpu.dot_dimension_numbers<[1], [0], [0], [1], [0, 0, 1, 1], [], []>} : vector<224x128xf32>, vector<128x32xf32>, vector<224x32xf32> -> vector<224x32xf32>
    %c1_18 = arith.constant 1 : index
    %c0_19 = arith.constant 0 : index
    %c0_20 = arith.constant 0 : index
    %15 = vector.load %arg5[%c1_18, %c0_19, %c0_20] : memref<9x32x28xf32, #tpu.memory_space<vmem>>, vector<1x32x28xf32>
    %16 = vector.shape_cast %15 : vector<1x32x28xf32> to vector<32x28xf32>
    %cst_21 = arith.constant dense<0.000000e+00> : vector<224x28xf32>
    %17 = tpu.matmul %14, %16, %cst_21 {dimension_numbers = #tpu.dot_dimension_numbers<[1], [0], [0], [1], [0, 0, 1, 1], [], []>} : vector<224x32xf32>, vector<32x28xf32>, vector<224x28xf32> -> vector<224x28xf32>
    %18 = arith.addf %11, %17 : vector<224x28xf32>
    %c2 = arith.constant 2 : index
    %c0_22 = arith.constant 0 : index
    %c0_23 = arith.constant 0 : index
    %19 = vector.load %arg4[%c2, %c0_22, %c0_23] : memref<9x224x128xf32, #tpu.memory_space<vmem>>, vector<1x224x128xf32>
    %20 = vector.shape_cast %19 : vector<1x224x128xf32> to vector<224x128xf32>
    %cst_24 = arith.constant dense<0.000000e+00> : vector<224x32xf32>
    %21 = tpu.matmul %20, %5, %cst_24 {dimension_numbers = #tpu.dot_dimension_numbers<[1], [0], [0], [1], [0, 0, 1, 1], [], []>} : vector<224x128xf32>, vector<128x32xf32>, vector<224x32xf32> -> vector<224x32xf32>
    %c2_25 = arith.constant 2 : index
    %c0_26 = arith.constant 0 : index
    %c0_27 = arith.constant 0 : index
    %22 = vector.load %arg5[%c2_25, %c0_26, %c0_27] : memref<9x32x28xf32, #tpu.memory_space<vmem>>, vector<1x32x28xf32>
    %23 = vector.shape_cast %22 : vector<1x32x28xf32> to vector<32x28xf32>
    %cst_28 = arith.constant dense<0.000000e+00> : vector<224x28xf32>
    %24 = tpu.matmul %21, %23, %cst_28 {dimension_numbers = #tpu.dot_dimension_numbers<[1], [0], [0], [1], [0, 0, 1, 1], [], []>} : vector<224x32xf32>, vector<32x28xf32>, vector<224x28xf32> -> vector<224x28xf32>
    %25 = arith.addf %18, %24 : vector<224x28xf32>
    %c3 = arith.constant 3 : index
    %c0_29 = arith.constant 0 : index
    %c0_30 = arith.constant 0 : index
    %26 = vector.load %arg4[%c3, %c0_29, %c0_30] : memref<9x224x128xf32, #tpu.memory_space<vmem>>, vector<1x224x128xf32>
    %27 = vector.shape_cast %26 : vector<1x224x128xf32> to vector<224x128xf32>
    %cst_31 = arith.constant dense<0.000000e+00> : vector<224x32xf32>
    %28 = tpu.matmul %27, %5, %cst_31 {dimension_numbers = #tpu.dot_dimension_numbers<[1], [0], [0], [1], [0, 0, 1, 1], [], []>} : vector<224x128xf32>, vector<128x32xf32>, vector<224x32xf32> -> vector<224x32xf32>
    %c3_32 = arith.constant 3 : index
    %c0_33 = arith.constant 0 : index
    %c0_34 = arith.constant 0 : index
    %29 = vector.load %arg5[%c3_32, %c0_33, %c0_34] : memref<9x32x28xf32, #tpu.memory_space<vmem>>, vector<1x32x28xf32>
    %30 = vector.shape_cast %29 : vector<1x32x28xf32> to vector<32x28xf32>
    %cst_35 = arith.constant dense<0.000000e+00> : vector<224x28xf32>
    %31 = tpu.matmul %28, %30, %cst_35 {dimension_numbers = #tpu.dot_dimension_numbers<[1], [0], [0], [1], [0, 0, 1, 1], [], []>} : vector<224x32xf32>, vector<32x28xf32>, vector<224x28xf32> -> vector<224x28xf32>
    %32 = arith.addf %25, %31 : vector<224x28xf32>
    %c4 = arith.constant 4 : index
    %c0_36 = arith.constant 0 : index
    %c0_37 = arith.constant 0 : index
    %33 = vector.load %arg4[%c4, %c0_36, %c0_37] : memref<9x224x128xf32, #tpu.memory_space<vmem>>, vector<1x224x128xf32>
    %34 = vector.shape_cast %33 : vector<1x224x128xf32> to vector<224x128xf32>
    %cst_38 = arith.constant dense<0.000000e+00> : vector<224x32xf32>
    %35 = tpu.matmul %34, %5, %cst_38 {dimension_numbers = #tpu.dot_dimension_numbers<[1], [0], [0], [1], [0, 0, 1, 1], [], []>} : vector<224x128xf32>, vector<128x32xf32>, vector<224x32xf32> -> vector<224x32xf32>
    %c4_39 = arith.constant 4 : index
    %c0_40 = arith.constant 0 : index
    %c0_41 = arith.constant 0 : index
    %36 = vector.load %arg5[%c4_39, %c0_40, %c0_41] : memref<9x32x28xf32, #tpu.memory_space<vmem>>, vector<1x32x28xf32>
    %37 = vector.shape_cast %36 : vector<1x32x28xf32> to vector<32x28xf32>
    %cst_42 = arith.constant dense<0.000000e+00> : vector<224x28xf32>
    %38 = tpu.matmul %35, %37, %cst_42 {dimension_numbers = #tpu.dot_dimension_numbers<[1], [0], [0], [1], [0, 0, 1, 1], [], []>} : vector<224x32xf32>, vector<32x28xf32>, vector<224x28xf32> -> vector<224x28xf32>
    %39 = arith.addf %32, %38 : vector<224x28xf32>
    %c5 = arith.constant 5 : index
    %c0_43 = arith.constant 0 : index
    %c0_44 = arith.constant 0 : index
    %40 = vector.load %arg4[%c5, %c0_43, %c0_44] : memref<9x224x128xf32, #tpu.memory_space<vmem>>, vector<1x224x128xf32>
    %41 = vector.shape_cast %40 : vector<1x224x128xf32> to vector<224x128xf32>
    %cst_45 = arith.constant dense<0.000000e+00> : vector<224x32xf32>
    %42 = tpu.matmul %41, %5, %cst_45 {dimension_numbers = #tpu.dot_dimension_numbers<[1], [0], [0], [1], [0, 0, 1, 1], [], []>} : vector<224x128xf32>, vector<128x32xf32>, vector<224x32xf32> -> vector<224x32xf32>
    %c5_46 = arith.constant 5 : index
    %c0_47 = arith.constant 0 : index
    %c0_48 = arith.constant 0 : index
    %43 = vector.load %arg5[%c5_46, %c0_47, %c0_48] : memref<9x32x28xf32, #tpu.memory_space<vmem>>, vector<1x32x28xf32>
    %44 = vector.shape_cast %43 : vector<1x32x28xf32> to vector<32x28xf32>
    %cst_49 = arith.constant dense<0.000000e+00> : vector<224x28xf32>
    %45 = tpu.matmul %42, %44, %cst_49 {dimension_numbers = #tpu.dot_dimension_numbers<[1], [0], [0], [1], [0, 0, 1, 1], [], []>} : vector<224x32xf32>, vector<32x28xf32>, vector<224x28xf32> -> vector<224x28xf32>
    %46 = arith.addf %39, %45 : vector<224x28xf32>
    %c6 = arith.constant 6 : index
    %c0_50 = arith.constant 0 : index
    %c0_51 = arith.constant 0 : index
    %47 = vector.load %arg4[%c6, %c0_50, %c0_51] : memref<9x224x128xf32, #tpu.memory_space<vmem>>, vector<1x224x128xf32>
    %48 = vector.shape_cast %47 : vector<1x224x128xf32> to vector<224x128xf32>
    %cst_52 = arith.constant dense<0.000000e+00> : vector<224x32xf32>
    %49 = tpu.matmul %48, %5, %cst_52 {dimension_numbers = #tpu.dot_dimension_numbers<[1], [0], [0], [1], [0, 0, 1, 1], [], []>} : vector<224x128xf32>, vector<128x32xf32>, vector<224x32xf32> -> vector<224x32xf32>
    %c6_53 = arith.constant 6 : index
    %c0_54 = arith.constant 0 : index
    %c0_55 = arith.constant 0 : index
    %50 = vector.load %arg5[%c6_53, %c0_54, %c0_55] : memref<9x32x28xf32, #tpu.memory_space<vmem>>, vector<1x32x28xf32>
    %51 = vector.shape_cast %50 : vector<1x32x28xf32> to vector<32x28xf32>
    %cst_56 = arith.constant dense<0.000000e+00> : vector<224x28xf32>
    %52 = tpu.matmul %49, %51, %cst_56 {dimension_numbers = #tpu.dot_dimension_numbers<[1], [0], [0], [1], [0, 0, 1, 1], [], []>} : vector<224x32xf32>, vector<32x28xf32>, vector<224x28xf32> -> vector<224x28xf32>
    %53 = arith.addf %46, %52 : vector<224x28xf32>
    %c7 = arith.constant 7 : index
    %c0_57 = arith.constant 0 : index
    %c0_58 = arith.constant 0 : index
    %54 = vector.load %arg4[%c7, %c0_57, %c0_58] : memref<9x224x128xf32, #tpu.memory_space<vmem>>, vector<1x224x128xf32>
    %55 = vector.shape_cast %54 : vector<1x224x128xf32> to vector<224x128xf32>
    %cst_59 = arith.constant dense<0.000000e+00> : vector<224x32xf32>
    %56 = tpu.matmul %55, %5, %cst_59 {dimension_numbers = #tpu.dot_dimension_numbers<[1], [0], [0], [1], [0, 0, 1, 1], [], []>} : vector<224x128xf32>, vector<128x32xf32>, vector<224x32xf32> -> vector<224x32xf32>
    %c7_60 = arith.constant 7 : index
    %c0_61 = arith.constant 0 : index
    %c0_62 = arith.constant 0 : index
    %57 = vector.load %arg5[%c7_60, %c0_61, %c0_62] : memref<9x32x28xf32, #tpu.memory_space<vmem>>, vector<1x32x28xf32>
    %58 = vector.shape_cast %57 : vector<1x32x28xf32> to vector<32x28xf32>
    %cst_63 = arith.constant dense<0.000000e+00> : vector<224x28xf32>
    %59 = tpu.matmul %56, %58, %cst_63 {dimension_numbers = #tpu.dot_dimension_numbers<[1], [0], [0], [1], [0, 0, 1, 1], [], []>} : vector<224x32xf32>, vector<32x28xf32>, vector<224x28xf32> -> vector<224x28xf32>
    %60 = arith.addf %53, %59 : vector<224x28xf32>
    %c8 = arith.constant 8 : index
    %c0_64 = arith.constant 0 : index
    %c0_65 = arith.constant 0 : index
    %61 = vector.load %arg4[%c8, %c0_64, %c0_65] : memref<9x224x128xf32, #tpu.memory_space<vmem>>, vector<1x224x128xf32>
    %62 = vector.shape_cast %61 : vector<1x224x128xf32> to vector<224x128xf32>
    %cst_66 = arith.constant dense<0.000000e+00> : vector<224x32xf32>
    %63 = tpu.matmul %62, %5, %cst_66 {dimension_numbers = #tpu.dot_dimension_numbers<[1], [0], [0], [1], [0, 0, 1, 1], [], []>} : vector<224x128xf32>, vector<128x32xf32>, vector<224x32xf32> -> vector<224x32xf32>
    %c8_67 = arith.constant 8 : index
    %c0_68 = arith.constant 0 : index
    %c0_69 = arith.constant 0 : index
    %64 = vector.load %arg5[%c8_67, %c0_68, %c0_69] : memref<9x32x28xf32, #tpu.memory_space<vmem>>, vector<1x32x28xf32>
    %65 = vector.shape_cast %64 : vector<1x32x28xf32> to vector<32x28xf32>
    %cst_70 = arith.constant dense<0.000000e+00> : vector<224x28xf32>
    %66 = tpu.matmul %63, %65, %cst_70 {dimension_numbers = #tpu.dot_dimension_numbers<[1], [0], [0], [1], [0, 0, 1, 1], [], []>} : vector<224x32xf32>, vector<32x28xf32>, vector<224x28xf32> -> vector<224x28xf32>
    %67 = arith.addf %60, %66 : vector<224x28xf32>
    %c0_71 = arith.constant 0 : index
    %c0_72 = arith.constant 0 : index
    %68 = vector.load %arg6[%c0_71, %c0_72] : memref<224x1xf32, #tpu.memory_space<vmem>>, vector<224x1xf32>
    %69 = vector.broadcast %68 : vector<224x1xf32> to vector<224x28xf32>
    %70 = arith.addf %67, %69 : vector<224x28xf32>
    %cst_73 = arith.constant 0.000000e+00 : f32
    %71 = vector.broadcast %cst_73 : f32 to vector<224x28xf32>
    %72 = arith.maximumf %70, %71 : vector<224x28xf32>
    %c0_74 = arith.constant 0 : index
    %c0_75 = arith.constant 0 : index
    %c0_76 = arith.constant 0 : index
    %73 = vector.load %arg7[%c0_74, %c0_75, %c0_76] : memref<1x128x224xf32, #tpu.memory_space<vmem>>, vector<1x128x224xf32>
    %74 = vector.shape_cast %73 : vector<1x128x224xf32> to vector<128x224xf32>
    %cst_77 = arith.constant dense<0.000000e+00> : vector<128x28xf32>
    %75 = tpu.matmul %74, %72, %cst_77 {dimension_numbers = #tpu.dot_dimension_numbers<[1], [0], [0], [1], [0, 0, 1, 1], [], []>} : vector<128x224xf32>, vector<224x28xf32>, vector<128x28xf32> -> vector<128x28xf32>
    %c0_78 = arith.constant 0 : index
    %c0_79 = arith.constant 0 : index
    %c0_80 = arith.constant 0 : index
    %76 = vector.load %arg8[%c0_78, %c0_79, %c0_80] : memref<1x28x32xf32, #tpu.memory_space<vmem>>, vector<1x28x32xf32>
    %77 = vector.shape_cast %76 : vector<1x28x32xf32> to vector<28x32xf32>
    %cst_81 = arith.constant dense<0.000000e+00> : vector<128x32xf32>
    %78 = tpu.matmul %75, %77, %cst_81 {dimension_numbers = #tpu.dot_dimension_numbers<[1], [0], [0], [1], [0, 0, 1, 1], [], []>} : vector<128x28xf32>, vector<28x32xf32>, vector<128x32xf32> -> vector<128x32xf32>
    %c0_82 = arith.constant 0 : index
    %c0_83 = arith.constant 0 : index
    %79 = vector.load %arg9[%c0_82, %c0_83] : memref<128x1xf32, #tpu.memory_space<vmem>>, vector<128x1xf32>
    %80 = vector.broadcast %79 : vector<128x1xf32> to vector<128x32xf32>
    %81 = arith.addf %78, %80 : vector<128x32xf32>
    %c0_84 = arith.constant 0 : index
    %c0_85 = arith.constant 0 : index
    %82 = vector.load %arg10[%c0_84, %c0_85] : memref<384x128xf32, #tpu.memory_space<vmem>>, vector<384x128xf32>
    %cst_86 = arith.constant dense<0.000000e+00> : vector<384x32xf32>
    %83 = tpu.matmul %82, %81, %cst_86 {dimension_numbers = #tpu.dot_dimension_numbers<[1], [0], [0], [1], [0, 0, 1, 1], [], []>} : vector<384x128xf32>, vector<128x32xf32>, vector<384x32xf32> -> vector<384x32xf32>
    %c0_87 = arith.constant 0 : index
    %c0_88 = arith.constant 0 : index
    %84 = vector.load %arg11[%c0_87, %c0_88] : memref<32x96xf32, #tpu.memory_space<vmem>>, vector<32x96xf32>
    %cst_89 = arith.constant dense<0.000000e+00> : vector<384x96xf32>
    %85 = tpu.matmul %83, %84, %cst_89 {dimension_numbers = #tpu.dot_dimension_numbers<[1], [0], [0], [1], [0, 0, 1, 1], [], []>} : vector<384x32xf32>, vector<32x96xf32>, vector<384x96xf32> -> vector<384x96xf32>
    %cst_90 = arith.constant 0.000000e+00 : f32
    %86 = vector.broadcast %cst_90 : f32 to vector<384x96xf32>
    %87 = arith.maximumf %85, %86 : vector<384x96xf32>
    %c0_91 = arith.constant 0 : index
    %c0_92 = arith.constant 0 : index
    %c0_93 = arith.constant 0 : index
    %88 = vector.load %arg12[%c0_91, %c0_92, %c0_93] : memref<5x384x384xf32, #tpu.memory_space<vmem>>, vector<1x384x384xf32>
    %89 = vector.shape_cast %88 : vector<1x384x384xf32> to vector<384x384xf32>
    %cst_94 = arith.constant dense<0.000000e+00> : vector<384x96xf32>
    %90 = tpu.matmul %89, %87, %cst_94 {dimension_numbers = #tpu.dot_dimension_numbers<[1], [0], [0], [1], [0, 0, 1, 1], [], []>} : vector<384x384xf32>, vector<384x96xf32>, vector<384x96xf32> -> vector<384x96xf32>
    %c0_95 = arith.constant 0 : index
    %c0_96 = arith.constant 0 : index
    %c0_97 = arith.constant 0 : index
    %91 = vector.load %arg13[%c0_95, %c0_96, %c0_97] : memref<5x96x96xf32, #tpu.memory_space<vmem>>, vector<1x96x96xf32>
    %92 = vector.shape_cast %91 : vector<1x96x96xf32> to vector<96x96xf32>
    %cst_98 = arith.constant dense<0.000000e+00> : vector<384x96xf32>
    %93 = tpu.matmul %90, %92, %cst_98 {dimension_numbers = #tpu.dot_dimension_numbers<[1], [0], [0], [1], [0, 0, 1, 1], [], []>} : vector<384x96xf32>, vector<96x96xf32>, vector<384x96xf32> -> vector<384x96xf32>
    %c1_99 = arith.constant 1 : index
    %c0_100 = arith.constant 0 : index
    %c0_101 = arith.constant 0 : index
    %94 = vector.load %arg12[%c1_99, %c0_100, %c0_101] : memref<5x384x384xf32, #tpu.memory_space<vmem>>, vector<1x384x384xf32>
    %95 = vector.shape_cast %94 : vector<1x384x384xf32> to vector<384x384xf32>
    %cst_102 = arith.constant dense<0.000000e+00> : vector<384x96xf32>
    %96 = tpu.matmul %95, %87, %cst_102 {dimension_numbers = #tpu.dot_dimension_numbers<[1], [0], [0], [1], [0, 0, 1, 1], [], []>} : vector<384x384xf32>, vector<384x96xf32>, vector<384x96xf32> -> vector<384x96xf32>
    %c1_103 = arith.constant 1 : index
    %c0_104 = arith.constant 0 : index
    %c0_105 = arith.constant 0 : index
    %97 = vector.load %arg13[%c1_103, %c0_104, %c0_105] : memref<5x96x96xf32, #tpu.memory_space<vmem>>, vector<1x96x96xf32>
    %98 = vector.shape_cast %97 : vector<1x96x96xf32> to vector<96x96xf32>
    %cst_106 = arith.constant dense<0.000000e+00> : vector<384x96xf32>
    %99 = tpu.matmul %96, %98, %cst_106 {dimension_numbers = #tpu.dot_dimension_numbers<[1], [0], [0], [1], [0, 0, 1, 1], [], []>} : vector<384x96xf32>, vector<96x96xf32>, vector<384x96xf32> -> vector<384x96xf32>
    %100 = arith.addf %93, %99 : vector<384x96xf32>
    %c2_107 = arith.constant 2 : index
    %c0_108 = arith.constant 0 : index
    %c0_109 = arith.constant 0 : index
    %101 = vector.load %arg12[%c2_107, %c0_108, %c0_109] : memref<5x384x384xf32, #tpu.memory_space<vmem>>, vector<1x384x384xf32>
    %102 = vector.shape_cast %101 : vector<1x384x384xf32> to vector<384x384xf32>
    %cst_110 = arith.constant dense<0.000000e+00> : vector<384x96xf32>
    %103 = tpu.matmul %102, %87, %cst_110 {dimension_numbers = #tpu.dot_dimension_numbers<[1], [0], [0], [1], [0, 0, 1, 1], [], []>} : vector<384x384xf32>, vector<384x96xf32>, vector<384x96xf32> -> vector<384x96xf32>
    %c2_111 = arith.constant 2 : index
    %c0_112 = arith.constant 0 : index
    %c0_113 = arith.constant 0 : index
    %104 = vector.load %arg13[%c2_111, %c0_112, %c0_113] : memref<5x96x96xf32, #tpu.memory_space<vmem>>, vector<1x96x96xf32>
    %105 = vector.shape_cast %104 : vector<1x96x96xf32> to vector<96x96xf32>
    %cst_114 = arith.constant dense<0.000000e+00> : vector<384x96xf32>
    %106 = tpu.matmul %103, %105, %cst_114 {dimension_numbers = #tpu.dot_dimension_numbers<[1], [0], [0], [1], [0, 0, 1, 1], [], []>} : vector<384x96xf32>, vector<96x96xf32>, vector<384x96xf32> -> vector<384x96xf32>
    %107 = arith.addf %100, %106 : vector<384x96xf32>
    %c3_115 = arith.constant 3 : index
    %c0_116 = arith.constant 0 : index
    %c0_117 = arith.constant 0 : index
    %108 = vector.load %arg12[%c3_115, %c0_116, %c0_117] : memref<5x384x384xf32, #tpu.memory_space<vmem>>, vector<1x384x384xf32>
    %109 = vector.shape_cast %108 : vector<1x384x384xf32> to vector<384x384xf32>
    %cst_118 = arith.constant dense<0.000000e+00> : vector<384x96xf32>
    %110 = tpu.matmul %109, %87, %cst_118 {dimension_numbers = #tpu.dot_dimension_numbers<[1], [0], [0], [1], [0, 0, 1, 1], [], []>} : vector<384x384xf32>, vector<384x96xf32>, vector<384x96xf32> -> vector<384x96xf32>
    %c3_119 = arith.constant 3 : index
    %c0_120 = arith.constant 0 : index
    %c0_121 = arith.constant 0 : index
    %111 = vector.load %arg13[%c3_119, %c0_120, %c0_121] : memref<5x96x96xf32, #tpu.memory_space<vmem>>, vector<1x96x96xf32>
    %112 = vector.shape_cast %111 : vector<1x96x96xf32> to vector<96x96xf32>
    %cst_122 = arith.constant dense<0.000000e+00> : vector<384x96xf32>
    %113 = tpu.matmul %110, %112, %cst_122 {dimension_numbers = #tpu.dot_dimension_numbers<[1], [0], [0], [1], [0, 0, 1, 1], [], []>} : vector<384x96xf32>, vector<96x96xf32>, vector<384x96xf32> -> vector<384x96xf32>
    %114 = arith.addf %107, %113 : vector<384x96xf32>
    %c4_123 = arith.constant 4 : index
    %c0_124 = arith.constant 0 : index
    %c0_125 = arith.constant 0 : index
    %115 = vector.load %arg12[%c4_123, %c0_124, %c0_125] : memref<5x384x384xf32, #tpu.memory_space<vmem>>, vector<1x384x384xf32>
    %116 = vector.shape_cast %115 : vector<1x384x384xf32> to vector<384x384xf32>
    %cst_126 = arith.constant dense<0.000000e+00> : vector<384x96xf32>
    %117 = tpu.matmul %116, %87, %cst_126 {dimension_numbers = #tpu.dot_dimension_numbers<[1], [0], [0], [1], [0, 0, 1, 1], [], []>} : vector<384x384xf32>, vector<384x96xf32>, vector<384x96xf32> -> vector<384x96xf32>
    %c4_127 = arith.constant 4 : index
    %c0_128 = arith.constant 0 : index
    %c0_129 = arith.constant 0 : index
    %118 = vector.load %arg13[%c4_127, %c0_128, %c0_129] : memref<5x96x96xf32, #tpu.memory_space<vmem>>, vector<1x96x96xf32>
    %119 = vector.shape_cast %118 : vector<1x96x96xf32> to vector<96x96xf32>
    %cst_130 = arith.constant dense<0.000000e+00> : vector<384x96xf32>
    %120 = tpu.matmul %117, %119, %cst_130 {dimension_numbers = #tpu.dot_dimension_numbers<[1], [0], [0], [1], [0, 0, 1, 1], [], []>} : vector<384x96xf32>, vector<96x96xf32>, vector<384x96xf32> -> vector<384x96xf32>
    %121 = arith.addf %114, %120 : vector<384x96xf32>
    %c0_131 = arith.constant 0 : index
    %c0_132 = arith.constant 0 : index
    %122 = vector.load %arg14[%c0_131, %c0_132] : memref<384x1xf32, #tpu.memory_space<vmem>>, vector<384x1xf32>
    %123 = vector.broadcast %122 : vector<384x1xf32> to vector<384x96xf32>
    %124 = arith.addf %121, %123 : vector<384x96xf32>
    %cst_133 = arith.constant 0.000000e+00 : f32
    %125 = vector.broadcast %cst_133 : f32 to vector<384x96xf32>
    %126 = arith.maximumf %124, %125 : vector<384x96xf32>
    %c0_134 = arith.constant 0 : index
    %c0_135 = arith.constant 0 : index
    %127 = vector.load %arg15[%c0_134, %c0_135] : memref<384x384xf32, #tpu.memory_space<vmem>>, vector<384x384xf32>
    %cst_136 = arith.constant dense<0.000000e+00> : vector<384x96xf32>
    %128 = tpu.matmul %127, %126, %cst_136 {dimension_numbers = #tpu.dot_dimension_numbers<[1], [0], [0], [1], [0, 0, 1, 1], [], []>} : vector<384x384xf32>, vector<384x96xf32>, vector<384x96xf32> -> vector<384x96xf32>
    %c0_137 = arith.constant 0 : index
    %c0_138 = arith.constant 0 : index
    %129 = vector.load %arg16[%c0_137, %c0_138] : memref<384x1xf32, #tpu.memory_space<vmem>>, vector<384x1xf32>
    %130 = vector.broadcast %129 : vector<384x1xf32> to vector<384x96xf32>
    %131 = arith.addf %128, %130 : vector<384x96xf32>
    %c0_139 = arith.constant 0 : index
    %c0_140 = arith.constant 0 : index
    %c0_141 = arith.constant 0 : index
    %132 = vector.load %arg17[%c0_139, %c0_140, %c0_141] : memref<1x384x96xf32, #tpu.memory_space<vmem>>, vector<1x384x96xf32>
    %133 = vector.shape_cast %132 : vector<1x384x96xf32> to vector<384x96xf32>
    %134 = vector.shape_cast %131 : vector<384x96xf32> to vector<1x384x96xf32>
    tpu.vector_store %arg17[%c0_139, %c0_140, %c0_141], %134 {strides = array<i32>} : memref<1x384x96xf32, #tpu.memory_space<vmem>>, vector<1x384x96xf32>,
    return
  }
  func.func @transform_0(%arg0: i32) -> (i32, i32, i32) {
    %c0_i32 = arith.constant 0 : i32
    %c0_i32_0 = arith.constant 0 : i32
    %c0_i32_1 = arith.constant 0 : i32
    return %arg0, %c0_i32, %c0_i32_0 : i32, i32, i32
  }
  func.func @transform_1(%arg0: i32) -> (i32, i32) {
    %c0_i32 = arith.constant 0 : i32
    %c0_i32_0 = arith.constant 0 : i32
    %c0_i32_1 = arith.constant 0 : i32
    return %c0_i32, %c0_i32_0 : i32, i32
  }
  func.func @transform_2(%arg0: i32) -> (i32, i32) {
    %c0_i32 = arith.constant 0 : i32
    %c0_i32_0 = arith.constant 0 : i32
    %c0_i32_1 = arith.constant 0 : i32
    return %c0_i32, %c0_i32_0 : i32, i32
  }
  func.func @transform_3(%arg0: i32) -> (i32, i32, i32) {
    %c0_i32 = arith.constant 0 : i32
    %c0_i32_0 = arith.constant 0 : i32
    %c0_i32_1 = arith.constant 0 : i32
    %c0_i32_2 = arith.constant 0 : i32
    return %c0_i32, %c0_i32_0, %c0_i32_1 : i32, i32, i32
  }
  func.func @transform_4(%arg0: i32) -> (i32, i32, i32) {
    %c0_i32 = arith.constant 0 : i32
    %c0_i32_0 = arith.constant 0 : i32
    %c0_i32_1 = arith.constant 0 : i32
    %c0_i32_2 = arith.constant 0 : i32
    return %c0_i32, %c0_i32_0, %c0_i32_1 : i32, i32, i32
  }
  func.func @transform_5(%arg0: i32) -> (i32, i32) {
    %c0_i32 = arith.constant 0 : i32
    %c0_i32_0 = arith.constant 0 : i32
    %c0_i32_1 = arith.constant 0 : i32
    return %c0_i32, %c0_i32_0 : i32, i32
  }
  func.func @transform_6(%arg0: i32) -> (i32, i32, i32) {
    %c0_i32 = arith.constant 0 : i32
    %c0_i32_0 = arith.constant 0 : i32
    %c0_i32_1 = arith.constant 0 : i32
    %c0_i32_2 = arith.constant 0 : i32
    return %c0_i32, %c0_i32_0, %c0_i32_1 : i32, i32, i32
  }
  func.func @transform_7(%arg0: i32) -> (i32, i32, i32) {
    %c0_i32 = arith.constant 0 : i32
    %c0_i32_0 = arith.constant 0 : i32
    %c0_i32_1 = arith.constant 0 : i32
    %c0_i32_2 = arith.constant 0 : i32
    return %c0_i32, %c0_i32_0, %c0_i32_1 : i32, i32, i32
  }
  func.func @transform_8(%arg0: i32) -> (i32, i32) {
    %c0_i32 = arith.constant 0 : i32
    %c0_i32_0 = arith.constant 0 : i32
    %c0_i32_1 = arith.constant 0 : i32
    return %c0_i32, %c0_i32_0 : i32, i32
  }
  func.func @transform_9(%arg0: i32) -> (i32, i32) {
    %c0_i32 = arith.constant 0 : i32
    %c0_i32_0 = arith.constant 0 : i32
    %c0_i32_1 = arith.constant 0 : i32
    return %c0_i32, %c0_i32_0 : i32, i32
  }
  func.func @transform_10(%arg0: i32) -> (i32, i32) {
    %c0_i32 = arith.constant 0 : i32
    %c0_i32_0 = arith.constant 0 : i32
    %c0_i32_1 = arith.constant 0 : i32
    return %c0_i32, %c0_i32_0 : i32, i32
  }
  func.func @transform_11(%arg0: i32) -> (i32, i32, i32) {
    %c0_i32 = arith.constant 0 : i32
    %c0_i32_0 = arith.constant 0 : i32
    %c0_i32_1 = arith.constant 0 : i32
    %c0_i32_2 = arith.constant 0 : i32
    return %c0_i32, %c0_i32_0, %c0_i32_1 : i32, i32, i32
  }
  func.func @transform_12(%arg0: i32) -> (i32, i32, i32) {
    %c0_i32 = arith.constant 0 : i32
    %c0_i32_0 = arith.constant 0 : i32
    %c0_i32_1 = arith.constant 0 : i32
    %c0_i32_2 = arith.constant 0 : i32
    return %c0_i32, %c0_i32_0, %c0_i32_1 : i32, i32, i32
  }
  func.func @transform_13(%arg0: i32) -> (i32, i32) {
    %c0_i32 = arith.constant 0 : i32
    %c0_i32_0 = arith.constant 0 : i32
    %c0_i32_1 = arith.constant 0 : i32
    return %c0_i32, %c0_i32_0 : i32, i32
  }
  func.func @transform_14(%arg0: i32) -> (i32, i32) {
    %c0_i32 = arith.constant 0 : i32
    %c0_i32_0 = arith.constant 0 : i32
    %c0_i32_1 = arith.constant 0 : i32
    return %c0_i32, %c0_i32_0 : i32, i32
  }
  func.func @transform_15(%arg0: i32) -> (i32, i32) {
    %c0_i32 = arith.constant 0 : i32
    %c0_i32_0 = arith.constant 0 : i32
    %c0_i32_1 = arith.constant 0 : i32
    return %c0_i32, %c0_i32_0 : i32, i32
  }
  func.func @transform_16(%arg0: i32) -> (i32, i32, i32) {
    %c0_i32 = arith.constant 0 : i32
    %c0_i32_0 = arith.constant 0 : i32
    %c0_i32_1 = arith.constant 0 : i32
    return %arg0, %c0_i32, %c0_i32_0 : i32, i32, i32
  }
}

</mosaic_0001>

<bundles_post_ra>
// kernel: tpu_custom_call.1
= control target key start
LH: loop header
LB: loop body
LE: loop exit
PB: predicated region body
PF: predicated region fallthrough
CT: control target
= control target key end

     0   :  { %s25711_s0 = inlined_call_operand.vmem [shape: f32[2,64,16], index: 0, kind: input, shape index: {}]   ;;  %s25712_s1 = inlined_call_operand.vmem [shape: f32[128,64], index: 1, kind: input, shape index: {}]   ;;  %s25713_s2 = inlined_call_operand.hbm [shape: f32[16,32], index: 2, kind: input, shape index: {}]   ;;  %s25714_s3 = inlined_call_operand.hbm [shape: f32[9,224,128], index: 3, kind: input, shape index: {}]   ;;  %s25715_s4 = inlined_call_operand.hbm [shape: f32[9,32,28], index: 4, kind: input, shape index: {}]   ;;  %s25716_s5 = inlined_call_operand.vmem [shape: f32[224,1], index: 5, kind: input, shape index: {}]   ;;  %s25717_s6 = inlined_call_operand.vmem [shape: f32[1,128,224], index: 6, kind: input, shape index: {}]   ;;  %s25718_s7 = inlined_call_operand.vmem [shape: f32[1,28,32], index: 7, kind: input, shape index: {}]   ;;  %s25719_s8 = inlined_call_operand.vmem [shape: f32[128,1], index: 8, kind: input, shape index: {}]   ;;  %s25720_s9 = inlined_call_operand.hbm [shape: f32[384,128], index: 9, kind: input, shape index: {}]   ;;  %s25721_s10 = inlined_call_operand.hbm [shape: f32[32,96], index: 10, kind: input, shape index: {}]   ;;  %s25722_s11 = inlined_call_operand.hbm [shape: f32[5,384,384], index: 11, kind: input, shape index: {}]   ;;  %s25723_s12 = inlined_call_operand.hbm [shape: f32[5,96,96], index: 12, kind: input, shape index: {}]   ;;  %s25724_s13 = inlined_call_operand.vmem [shape: f32[384,1], index: 13, kind: input, shape index: {}]   ;;  %s25725_s14 = inlined_call_operand.hbm [shape: f32[384,384], index: 14, kind: input, shape index: {}]   ;;  %s25726_s15 = inlined_call_operand.vmem [shape: f32[384,1], index: 15, kind: input, shape index: {}]   ;;  %s25727_s16 = inlined_call_operand.vmem [shape: f32[2,384,96], index: 16, kind: output, shape index: {}]  }
   0x1   :  { %25751 = sst [smem:[#allocation65_spill]] %s25711_s0 }
   0x2   :  { %25752 = sst [smem:[#allocation66_spill]] %s25717_s6 }
   0x3   :  { %25753 = sst [smem:[#allocation67_spill]] %s25718_s7 }
   0x4   :  { %25754 = sst [smem:[#allocation68_spill]] %s25727_s16 }
   0x5   :  { %21 = vsyncpa [#allocation3], 0 }
   0x6   :  { %22 = vsyncpa [#allocation5], 0 }
   0x7   :  { %23 = vsyncpa [#allocation8], 0 }
   0x8   :  { %24 = vsyncpa [#allocation11], 0 }
   0x9   :  { %25 = vsyncpa [#allocation14], 0  ;;  %s22086_s21 = smov 0  }
   0xa LB: > { %25755 = sst [smem:[#allocation20_spill]] %s21984_s21  ;;  %s22092_s22 = sadd.s32 4294967295, %s21984_s21   ;;  %s21984_s21 = sphi %s22086_s21, %s31_s21  }
   0xb   : > { %p15439_p0 = scmp.ge.s32.totalorder %s21984_s21, 1  ;;  %p403_p1 = scmp.lt.s32.totalorder %s21984_s21, 3 }
   0xc   : > { %p25735_p2 = scmp.eq.s32.totalorder %s22092_s22, 0  ;;  %s21986_s24 = smov [#allocation4]  }
   0xd   : > { %p22097_p3 = pnand %p15439_p0, %p403_p1  ;;  %s431_s25 = sshll.u32 %s21986_s24, 4  ;;  %s22101_s25 = int_to_ptr.vmem [resolvable:$true] %s431_s25 }
   0xe   : > { %s21987_s26 = smov [#allocation7]   ;;  %s21988_s29 = smov [#allocation10]  }
   0xf   : > { %s25756_s23 = scalar_select %p22097_p3, 1, 0 }
  0x10   : > { %p21668_p4 = pneg %p22097_p3  ;;  %s469_s27 = sshll.u32 %s21987_s26, 4  ;;  %s22105_s27 = int_to_ptr.vmem [resolvable:$true] %s469_s27 }
  0x11   : > { %s495_s30 = sshll.u32 %s21988_s29, 4  ;;  %s21734_s18 = scalar_lea.hbm %s25714_s3, 32256  ;;  %s22113_s30 = int_to_ptr.vmem [resolvable:$true] %s495_s30 }
  0x12   : > { %p22109_p5 = pnand %p25735_p2, %p21668_p4  ;;  %p21735_p6 = scmp.ne.s32.totalorder %s25714_s3, %s21734_s18 }
  0x13   : > { %p21741_p10 = scmp.lt.u32.totalorder %s21734_s18, %s25714_s3 }
  0x14   : > { %p22123_p7 = pneg %p22109_p5 }
  0x16   : > { %p21737_p8 = pnand %p22123_p7, %p21735_p6 }
  0x18   : > { %p21738_p9 = pneg %p21737_p8 }
  0x1a   : > { %p21743_p11 = pnand %p21741_p10, %p21738_p9 }
  0x1c   : > { %21746 = shalt.err (!%p21743_p11)
}
  0x1d   : > { %s21747_s0 = scalar_lea.vmem %s22101_s25, 32256  ;;  %p21755_p1 = scmp.lt.s32.totalorder %s22101_s25, %s22101_s25 }
  0x1e   : > { %p21748_p12 = scmp.ne.s32.totalorder %s22101_s25, %s21747_s0  ;;  %p21756_p4 = scmp.lt.s32.totalorder %s21747_s0, %s21747_s0 }
  0x20   : > { %p21750_p13 = pnand %p21748_p12, %p22123_p7  ;;  %p21757_p6 = por %p21756_p4, %p21755_p1 }
  0x22   : > { %p21751_p0 = pneg %p21750_p13 }
  0x24   : > { %p21758_p8 = pnand %p21757_p6, %p21751_p0 }
  0x26   : > { %21761 = shalt.err (!%p21758_p8)
}
  0x27   : > { %s25731_s17 = smov 128   ;;  %s25733_s18 = smov 8  }
  0x28   : > { %21674 = dma.hbm_to_vmem [thread:$0]  (!%p22109_p5), %s25714_s3, 32256, %s22101_s25, [#allocation5], %s25731_s17, %s25731_s17, %s25733_s18  }
  0x29   : > { %s21762_s0 = scalar_lea.hbm %s25720_s9, 6144 }
  0x2a   : > { %p21763_p9 = scmp.ne.s32.totalorder %s25720_s9, %s21762_s0  ;;  %p21769_p12 = scmp.lt.u32.totalorder %s21762_s0, %s25720_s9 }
  0x2c   : > { %p21765_p10 = pnand %p21763_p9, %p22123_p7 }
  0x2e   : > { %p21766_p11 = pneg %p21765_p10 }
  0x30   : > { %p21771_p13 = pnand %p21769_p12, %p21766_p11 }
  0x32   : > { %21774 = shalt.err (!%p21771_p13)
}
  0x33   : > { %s21775_s25 = scalar_lea.vmem %s22105_s27, 6144  ;;  %p21783_p6 = scmp.lt.s32.totalorder %s22105_s27, %s22105_s27 }
  0x34   : > { %p21776_p0 = scmp.ne.s32.totalorder %s22105_s27, %s21775_s25  ;;  %p21784_p8 = scmp.lt.s32.totalorder %s21775_s25, %s21775_s25 }
  0x36   : > { %p21778_p1 = pnand %p21776_p0, %p22123_p7  ;;  %p21785_p9 = por %p21784_p8, %p21783_p6 }
  0x38   : > { %p21779_p4 = pneg %p21778_p1 }
  0x3a   : > { %p21786_p10 = pnand %p21785_p9, %p21779_p4 }
  0x3c   : > { %21789 = shalt.err (!%p21786_p10)
}
  0x3d   : > { %21680 = dma.hbm_to_vmem [thread:$0]  (!%p22109_p5), %s25720_s9, 6144, %s22105_s27, [#allocation8], %s25731_s17, %s25731_s17, %s25733_s18  }
  0x3e   : > { %s21790_s19 = scalar_lea.hbm %s25722_s11, 92160 }
  0x3f   : > { %p21791_p11 = scmp.ne.s32.totalorder %s25722_s11, %s21790_s19  ;;  %p21797_p0 = scmp.lt.u32.totalorder %s21790_s19, %s25722_s11 }
  0x41   : > { %p21793_p12 = pnand %p21791_p11, %p22123_p7 }
  0x43   : > { %p21794_p13 = pneg %p21793_p12 }
  0x45   : > { %p21799_p1 = pnand %p21797_p0, %p21794_p13 }
  0x47   : > { %21802 = shalt.err (!%p21799_p1)
}
  0x48   : > { %s21803_s27 = scalar_lea.vmem %s22113_s30, 92160  ;;  %p21811_p9 = scmp.lt.s32.totalorder %s22113_s30, %s22113_s30 }
  0x49   : > { %p21804_p4 = scmp.ne.s32.totalorder %s22113_s30, %s21803_s27  ;;  %p21812_p10 = scmp.lt.s32.totalorder %s21803_s27, %s21803_s27 }
  0x4b   : > { %p21806_p6 = pnand %p21804_p4, %p22123_p7  ;;  %p21813_p11 = por %p21812_p10, %p21811_p9 }
  0x4d   : > { %p21807_p8 = pneg %p21806_p6 }
  0x4f   : > { %p21814_p12 = pnand %p21813_p11, %p21807_p8 }
  0x51   : > { %21817 = shalt.err (!%p21814_p12)
}
  0x52   : > { %s25737_s25 = smov 384   ;;  %s25738_s6 = smov 24  }
  0x53   : > { %21686 = dma.hbm_to_vmem [thread:$0]  (!%p22109_p5), %s25722_s11, 92160, %s22113_s30, [#allocation11], %s25737_s25, %s25737_s25, %s25738_s6  }
  0x54   : > { %s21993_s21 = smov [#allocation2]   ;;  %s21994_s20 = smov [#allocation6]  }
  0x55   : > { %s418_s19 = sshll.u32 %s21993_s21, 4  ;;  %s444_s26 = sshll.u32 %s21994_s20, 4  ;;  %s419_s19 = int_to_ptr.vmem [resolvable:$true] %s418_s19  ;;  %s22199_s26 = int_to_ptr.vmem [resolvable:$true] %s444_s26 }
  0x56   : > { %s21818_s27 = scalar_lea.hbm %s25713_s2, 256 }
  0x57   : > { %p21819_p13 = scmp.ne.s32.totalorder %s25713_s2, %s21818_s27  ;;  %p21825_p4 = scmp.lt.u32.totalorder %s21818_s27, %s25713_s2 }
  0x59   : > { %p21821_p0 = pnand %p21819_p13, %p22123_p7 }
  0x5b   : > { %p21822_p1 = pneg %p21821_p0 }
  0x5d   : > { %p21827_p6 = pnand %p21825_p4, %p21822_p1 }
  0x5f   : > { %21830 = shalt.err (!%p21827_p6)
}
  0x60   : > { %s21831_s16 = scalar_lea.vmem %s419_s19, 256  ;;  %p21839_p11 = scmp.lt.s32.totalorder %s419_s19, %s419_s19 }
  0x61   : > { %p21832_p8 = scmp.ne.s32.totalorder %s419_s19, %s21831_s16  ;;  %p21840_p12 = scmp.lt.s32.totalorder %s21831_s16, %s21831_s16 }
  0x63   : > { %p21834_p9 = pnand %p21832_p8, %p22123_p7  ;;  %p21841_p2 = por %p21840_p12, %p21839_p11 }
  0x65   : > { %p21835_p10 = pneg %p21834_p9 }
  0x67   : > { %p21842_p3 = pnand %p21841_p2, %p21835_p10 }
  0x69   : > { %21845 = shalt.err (!%p21842_p3)
}
  0x6a   : > { %s25759_s17 = smov 8   ;;  %s25760_s18 = smov 128  }
  0x6b   : > { %21671 = dma.hbm_to_vmem [thread:$0]  (!%p22109_p5), %s25713_s2, 256, %s419_s19, [#allocation3], %s25760_s18, %s25760_s18, %s25759_s17  }
  0x6c   : > { %s21846_s27 = scalar_lea.hbm %s25715_s4, 4608 }
  0x6d   : > { %p21847_p13 = scmp.ne.s32.totalorder %s25715_s4, %s21846_s27  ;;  %p21853_p0 = scmp.lt.u32.totalorder %s21846_s27, %s25715_s4 }
  0x6f   : > { %p21849_p2 = pnand %p21847_p13, %p22123_p7 }
  0x71   : > { %p21850_p3 = pneg %p21849_p2 }
  0x73   : > { %p21855_p1 = pnand %p21853_p0, %p21850_p3 }
  0x75   : > { %21858 = shalt.err (!%p21855_p1)
}
  0x76   : > { %s21859_s19 = scalar_lea.vmem %s22199_s26, 4608  ;;  %p21867_p9 = scmp.lt.s32.totalorder %s22199_s26, %s22199_s26 }
  0x77   : > { %p21860_p4 = scmp.ne.s32.totalorder %s22199_s26, %s21859_s19  ;;  %p21868_p10 = scmp.lt.s32.totalorder %s21859_s19, %s21859_s19 }
  0x79   : > { %p21862_p6 = pnand %p21860_p4, %p22123_p7  ;;  %p21869_p11 = por %p21868_p10, %p21867_p9 }
  0x7b   : > { %p21863_p8 = pneg %p21862_p6 }
  0x7d   : > { %p21870_p12 = pnand %p21869_p11, %p21863_p8 }
  0x7f   : > { %21873 = shalt.err (!%p21870_p12)
}
  0x80   : > { %21677 = dma.hbm_to_vmem [thread:$0]  (!%p22109_p5), %s25715_s4, 4608, %s22199_s26, [#allocation5], %s25760_s18, %s25760_s18, %s25759_s17  }
  0x81   : > { %s21995_s20 = smov [#allocation9]   ;;  %s21996_s0 = smov [#allocation12]  }
  0x82   : > { %s482_s29 = sshll.u32 %s21995_s20, 4  ;;  %s508_s27 = sshll.u32 %s21996_s0, 4  ;;  %s483_s29 = int_to_ptr.vmem [resolvable:$true] %s482_s29  ;;  %s22248_s27 = int_to_ptr.vmem [resolvable:$true] %s508_s27 }
  0x83   : > { %s21874_s16 = scalar_lea.hbm %s25721_s10, 512 }
  0x84   : > { %p21875_p13 = scmp.ne.s32.totalorder %s25721_s10, %s21874_s16  ;;  %p21881_p0 = scmp.lt.u32.totalorder %s21874_s16, %s25721_s10 }
  0x86   : > { %p21877_p2 = pnand %p21875_p13, %p22123_p7 }
  0x88   : > { %p21878_p3 = pneg %p21877_p2 }
  0x8a   : > { %p21883_p1 = pnand %p21881_p0, %p21878_p3 }
  0x8c   : > { %21886 = shalt.err (!%p21883_p1)
}
  0x8d   : > { %s21887_s21 = scalar_lea.vmem %s483_s29, 512  ;;  %p21895_p9 = scmp.lt.s32.totalorder %s483_s29, %s483_s29 }
  0x8e   : > { %p21888_p4 = scmp.ne.s32.totalorder %s483_s29, %s21887_s21  ;;  %p21896_p10 = scmp.lt.s32.totalorder %s21887_s21, %s21887_s21 }
  0x90   : > { %p21890_p6 = pnand %p21888_p4, %p22123_p7  ;;  %p21897_p11 = por %p21896_p10, %p21895_p9 }
  0x92   : > { %p21891_p8 = pneg %p21890_p6 }
  0x94   : > { %p21898_p12 = pnand %p21897_p11, %p21891_p8 }
  0x96   : > { %21901 = shalt.err (!%p21898_p12)
}
  0x97   : > { %21683 = dma.hbm_to_vmem [thread:$0]  (!%p22109_p5), %s25721_s10, 512, %s483_s29, [#allocation8], %s25760_s18, %s25760_s18, %s25759_s17  }
  0x98   : > { %s21902_s30 = scalar_lea.hbm %s25723_s12, 7680 }
  0x99   : > { %p21903_p13 = scmp.ne.s32.totalorder %s25723_s12, %s21902_s30  ;;  %p21909_p0 = scmp.lt.u32.totalorder %s21902_s30, %s25723_s12 }
  0x9b   : > { %p21905_p2 = pnand %p21903_p13, %p22123_p7 }
  0x9d   : > { %p21906_p3 = pneg %p21905_p2 }
  0x9f   : > { %p21911_p1 = pnand %p21909_p0, %p21906_p3 }
  0xa1   : > { %21914 = shalt.err (!%p21911_p1)
}
  0xa2   : > { %s21915_s29 = scalar_lea.vmem %s22248_s27, 7680  ;;  %p21923_p9 = scmp.lt.s32.totalorder %s22248_s27, %s22248_s27 }
  0xa3   : > { %p21916_p4 = scmp.ne.s32.totalorder %s22248_s27, %s21915_s29  ;;  %p21924_p10 = scmp.lt.s32.totalorder %s21915_s29, %s21915_s29 }
  0xa5   : > { %p21918_p6 = pnand %p21916_p4, %p22123_p7  ;;  %p21925_p11 = por %p21924_p10, %p21923_p9 }
  0xa7   : > { %p21919_p8 = pneg %p21918_p6 }
  0xa9   : > { %p21926_p12 = pnand %p21925_p11, %p21919_p8 }
  0xab   : > { %21929 = shalt.err (!%p21926_p12)
}
  0xac   : > { %21689 = dma.hbm_to_vmem [thread:$0]  (!%p22109_p5), %s25723_s12, 7680, %s22248_s27, [#allocation11], %s25760_s18, %s25760_s18, %s25759_s17  }
  0xad   : > { %s21997_s20 = smov [#allocation13]   ;;  %s21930_s16 = scalar_lea.hbm %s25725_s14, 18432 }
  0xae   : > { %s524_s0 = sshll.u32 %s21997_s20, 4  ;;  %p21931_p13 = scmp.ne.s32.totalorder %s25725_s14, %s21930_s16  ;;  %s525_s0 = int_to_ptr.vmem [resolvable:$true] %s524_s0 }
  0xaf   : > { %p21937_p0 = scmp.lt.u32.totalorder %s21930_s16, %s25725_s14 }
  0xb0   : > { %p21933_p2 = pnand %p21931_p13, %p22123_p7 }
  0xb2   : > { %p21934_p3 = pneg %p21933_p2 }
  0xb4   : > { %p21939_p1 = pnand %p21937_p0, %p21934_p3 }
  0xb6   : > { %21942 = shalt.err (!%p21939_p1)
}
  0xb7   : > { %s21943_s17 = scalar_lea.vmem %s525_s0, 18432  ;;  %p21951_p9 = scmp.lt.s32.totalorder %s525_s0, %s525_s0 }
  0xb8   : > { %p21944_p4 = scmp.ne.s32.totalorder %s525_s0, %s21943_s17  ;;  %p21952_p10 = scmp.lt.s32.totalorder %s21943_s17, %s21943_s17 }
  0xba   : > { %p21946_p6 = pnand %p21944_p4, %p22123_p7  ;;  %p21953_p11 = por %p21952_p10, %p21951_p9 }
  0xbc   : > { %p21947_p8 = pneg %p21946_p6 }
  0xbe   : > { %p21954_p12 = pnand %p21953_p11, %p21947_p8 }
  0xc0   : > { %21957 = shalt.err (!%p21954_p12)
}
  0xc1   : > { %s25761_s18 = smov 24   ;;  %s25762_s27 = smov 384  }
  0xc2   : > { %21692 = dma.hbm_to_vmem [thread:$0]  (!%p22109_p5), %s25725_s14, 18432, %s525_s0, [#allocation14], %s25762_s27, %s25762_s27, %s25761_s18  }
  0xc3   : > { %p25763_p13 = scmp.ne.s32.totalorder %s25756_s23, 0 }
  0xc5   : > { %551 = sbr.rel (%p25763_p13) target bundleno = 4768 (0x12a0), region = 84 }
  0xcc   : > { %p25764_p7 = scmp.eq.s32.totalorder %s22092_s22, 0 }
  0xce   : > { %21963 = dma.done.wait (%p25764_p7), [#allocation3], 256   ;;  %p25765_p2 = pmov %p25764_p7 }
  0xd0   : > { %21965 = vsyncadd (%p25765_p2), [#allocation3], 4294967040  ;;  %p25766_p3 = pmov %p25765_p2 }
  0xd1   : > { %p25767_p0 = pmov %p25765_p2 }
  0xd2   : > { %21967 = dma.done.wait (%p25766_p3), [#allocation5], 36864  }
  0xd3   : > { %21969 = vsyncadd (%p25767_p0), [#allocation5], 4294930432  ;;  %p25768_p1 = pmov %p25767_p0 }
  0xd4   : > { %p25769_p5 = pmov %p25767_p0 }
  0xd5   : > { %21971 = dma.done.wait (%p25768_p1), [#allocation8], 6656  }
  0xd6   : > { %21973 = vsyncadd (%p25769_p5), [#allocation8], 4294960640  ;;  %p25770_p4 = pmov %p25767_p0 }
  0xd7   : > { %p25771_p6 = pmov %p25767_p0 }
  0xd8   : > { %21975 = dma.done.wait (%p25770_p4), [#allocation11], 99840  }
  0xd9   : > { %21977 = vsyncadd (%p25771_p6), [#allocation11], 4294867456  ;;  %p25772_p8 = pmov %p25767_p0 }
  0xda   : > { %p25773_p9 = pmov %p25767_p0 }
  0xdb   : > { %21979 = dma.done.wait (%p25772_p8), [#allocation14], 18432  }
  0xdc   : > { %21981 = vsyncadd (%p25773_p9), [#allocation14], 4294948864  ;;  %p629_p10 = scmp.lt.s32.totalorder %s22092_s22, 1  ;;  %s25774_s20 = sld [smem:[#allocation65_spill]]  ;;  %vm663_vm0 = vcmask 523264   ;;  %v647_v8 = vld [vmem:[%s25712_s1] sm:$0xff] }
  0xdd   : > { %17631 = vmatprep.mubr.msk.f32.mxu0 %vm663_vm0, %v647_v8  ;;  %v857_v12 = vld [vmem:[#allocation2] sm:$0xff]  ;;  %v858_v13 = vld [vmem:[#allocation2 + $0x8] sm:$0xff]  ;;  %v649_v17 = vld [vmem:[%s25712_s1 + $0x10] sm:$0xff]  ;;  %vm859_vm1 = vcmask 130048   ;;  %vm1529_vm2 = vcmask 261120   ;;  %s25787_s18 = sld [smem:[#allocation66_spill]] }
  0xde   : > { %s25912_s22 = smov (!%p629_p10, %s22092_s22), 1  ;;  %v20135_v15 = vpack.c.bf16 %v858_v13, %v857_v12  ;;  %v648_v16 = vld [vmem:[%s25712_s1 + $0x8] sm:$0xff]  ;;  %v650_v18 = vld [vmem:[%s25712_s1 + $0x18] sm:$0xff]  ;;  %v651_v19 = vld [vmem:[%s25712_s1 + $0x20] sm:$0xff]  ;;  %vm6256_vm3 = vcmask 785408   ;;  %s25791_s28 = sld [smem:[#allocation67_spill]] }
  0xdf   : > { %s16068_s23 = sshll.u32 %s25912_s22, 6  ;;  %v652_v20 = vld [vmem:[%s25712_s1 + $0x28] sm:$0xff]  ;;  %v653_v21 = vld [vmem:[%s25712_s1 + $0x30] sm:$0xff]  ;;  %v654_v22 = vld [vmem:[%s25712_s1 + $0x38] sm:$0xff]  ;;  %vm6599_vm4 = vcmask 1043456   ;;  %vm22000_vm5 = vmmov 1  }
  0xe0   : > { %20136 = vmatprep.subr.bf16.mxu1 %v20135_v15  ;;  %v655_v23 = vld [vmem:[%s25712_s1 + $0x40] sm:$0xff]  ;;  %v656_v24 = vld [vmem:[%s25712_s1 + $0x48] sm:$0xff]  ;;  %v657_v25 = vld [vmem:[%s25712_s1 + $0x50] sm:$0xff]  ;;  %vm6550_vm7 = vcmask 228352   ;;  %s21635_s19 = smul.u32 384, %s25912_s22  ;;  %s25909_s29 = sld [smem:[#allocation68_spill]] }
  0xe1   : > { %20138 = vmatpush3.bf16.msra.mxu1 %v20135_v15  ;;  %v658_v26 = vld [vmem:[%s25712_s1 + $0x58] sm:$0xff]  ;;  %v659_v27 = vld [vmem:[%s25712_s1 + $0x60] sm:$0xff]  ;;  %v660_v28 = vld [vmem:[%s25712_s1 + $0x68] sm:$0xff] }
  0xe2   : > { %s633_s0 = scalar_lea.vmem %s25774_s20, %s16068_s23  ;;  %v661_v29 = vld [vmem:[%s25712_s1 + $0x70] sm:$0xff]  ;;  %v662_v30 = vld [vmem:[%s25712_s1 + $0x78] sm:$0xff]  ;;  %v1055_v12 = vld [vmem:[#allocation4 + $0x10] sm:$0xff] }
  0xe3   : > { %v639_v0 = vld [vmem:[%s633_s0] sm:$0xff]  ;;  %v640_v1 = vld [vmem:[%s633_s0 + $0x8] sm:$0xff]  ;;  %v641_v2 = vld [vmem:[%s633_s0 + $0x10] sm:$0xff] }
  0xe4   : > { %v20119_v3 = vpack.c.bf16 %v640_v1, %v639_v0  ;;  %v642_v4 = vld [vmem:[%s633_s0 + $0x18] sm:$0xff]  ;;  %v643_v6 = vld [vmem:[%s633_s0 + $0x20] sm:$0xff]  ;;  %v644_v7 = vld [vmem:[%s633_s0 + $0x28] sm:$0xff] }
  0xe5   : > { %v20123_v5 = vpack.c.bf16 %v642_v4, %v641_v2  ;;  %v20127_v9 = vpack.c.bf16 %v644_v7, %v643_v6  ;;  %v645_v10 = vld [vmem:[%s633_s0 + $0x30] sm:$0xff]  ;;  %v646_v11 = vld [vmem:[%s633_s0 + $0x38] sm:$0xff]  ;;  %v1294_v13 = vld [vmem:[#allocation4 + $0xf8] sm:$0xff] }
  0xe6   : > { %20120 = vmatprep.subr.bf16.mxu0 %v20119_v3  ;;  %v20131_v14 = vpack.c.bf16 %v646_v11, %v645_v10  ;;  %v1291_v47 = vld [vmem:[#allocation4 + $0xe0] sm:$0xff]  ;;  %v1054_v10 = vld [vmem:[#allocation4 + $0x8] sm:$0xff]  ;;  %v1293_v11 = vld [vmem:[#allocation4 + $0xf0] sm:$0xff]  ;;  %s25559_s17 = scalar_lea.vmem %s25909_s29, %s21635_s19 }
  0xe7   : > { %20122 = vmatpush3.bf16.msra.mxu0 %v20119_v3  ;;  %v1053_v48 = vld [vmem:[#allocation4] sm:$0xff]  ;;  %vm20546_vm6 = vmpackc.low %vm6599_vm4, %vm22000_vm5 }
  0xe8   : > { %20124 = vmatprep.subr.bf16.mxu0 %v20123_v5  ;;  %v1295_v15 = vld [vmem:[#allocation4 + $0x100] sm:$0xff] }
  0xeb   : > { %20126 = vmatpush3.bf16.msra.mxu0 %v20123_v5 }
  0xec   : > { %20128 = vmatprep.subr.bf16.mxu0 %v20127_v9 }
  0xef   : > { %20130 = vmatpush3.bf16.msra.mxu0 %v20127_v9  ;;  %v1292_v9 = vld [vmem:[#allocation4 + $0xe8] sm:$0xff] }
  0xf0   : > { %20132 = vmatprep.subr.bf16.mxu0 %v20131_v14 }
  0xf3   : > { %20134 = vmatpush3.bf16.msra.mxu0 %v20131_v14  ;;  %v1056_v14 = vld [vmem:[#allocation4 + $0x18] sm:$0xff] }
  0xf6   : > { %17632 = vmatmul.mubr.msk.f32.vlgmr.msra.gmra.mrb[0].mxu0 %vm663_vm0, %v648_v16  ;;  %v1057_v16 = vld [vmem:[#allocation4 + $0x20] sm:$0xff] }
  0xf7   : > { %17634 = vmatprep.mubr.msk.f32.mxu0 %vm663_vm0, %v649_v17  ;;  %v1296_v17 = vld [vmem:[#allocation4 + $0x108] sm:$0xff] }
  0xfa   : > { %17635 = vmatmul.mubr.msk.f32.gmra.mrb[2].mxu0 %vm663_vm0, %v650_v18  ;;  %v1058_v18 = vld [vmem:[#allocation4 + $0x28] sm:$0xff] }
  0xfb   : > { %17637 = vmatprep.mubr.msk.f32.mxu0 %vm663_vm0, %v651_v19  ;;  %v1297_v19 = vld [vmem:[#allocation4 + $0x110] sm:$0xff] }
  0xfe   : > { %17638 = vmatmul.mubr.msk.f32.gmra.mrb[4].mxu0 %vm663_vm0, %v652_v20  ;;  %v1059_v20 = vld [vmem:[#allocation4 + $0x30] sm:$0xff] }
  0xff   : > { %17640 = vmatprep.mubr.msk.f32.mxu0 %vm663_vm0, %v653_v21  ;;  %v1298_v21 = vld [vmem:[#allocation4 + $0x118] sm:$0xff] }
 0x102   : > { %17641 = vmatmul.mubr.msk.f32.gmra.mrb[6].mxu0 %vm663_vm0, %v654_v22  ;;  %v1060_v22 = vld [vmem:[#allocation4 + $0x38] sm:$0xff] }
 0x103   : > { %17643 = vmatprep.mubr.msk.f32.mxu0 %vm663_vm0, %v655_v23  ;;  %v1299_v23 = vld [vmem:[#allocation4 + $0x120] sm:$0xff] }
 0x106   : > { %17644 = vmatmul.mubr.msk.f32.gmra.mrb[8].mxu0 %vm663_vm0, %v656_v24  ;;  %v1061_v24 = vld [vmem:[#allocation4 + $0x40] sm:$0xff] }
 0x107   : > { %17646 = vmatprep.mubr.msk.f32.mxu0 %vm663_vm0, %v657_v25  ;;  %v1300_v25 = vld [vmem:[#allocation4 + $0x128] sm:$0xff] }
 0x10a   : > { %17647 = vmatmul.mubr.msk.f32.gmra.mrb[10].mxu0 %vm663_vm0, %v658_v26  ;;  %v1062_v26 = vld [vmem:[#allocation4 + $0x48] sm:$0xff] }
 0x10b   : > { %17649 = vmatprep.mubr.msk.f32.mxu0 %vm663_vm0, %v659_v27  ;;  %v1301_v27 = vld [vmem:[#allocation4 + $0x130] sm:$0xff] }
 0x10e   : > { %17650 = vmatmul.mubr.msk.f32.gmra.mrb[12].mxu0 %vm663_vm0, %v660_v28  ;;  %v1063_v28 = vld [vmem:[#allocation4 + $0x50] sm:$0xff] }
 0x10f   : > { %17652 = vmatprep.mubr.msk.f32.mxu0 %vm663_vm0, %v661_v29  ;;  %v1302_v29 = vld [vmem:[#allocation4 + $0x138] sm:$0xff] }
 0x112   : > { %17653 = vmatmul.mubr.msk.f32.gmra.mrb[14].mxu0 %vm663_vm0, %v662_v30  ;;  %v1064_v30 = vld [vmem:[#allocation4 + $0x58] sm:$0xff] }
 0x113   : > { %17789 = vmatprep.mubr.f32.mxu0 %v1291_v47  ;;  %v1311_v47 = vld [vmem:[#allocation4 + $0x180] sm:$0xff] }
 0x1c9   : > { %v17633_v31 = vpop.f32.mrb[0].mxu0 }
 0x1ca   : > { %v778_v32 = vpop.f32.mrb[1].mxu0 }
 0x1cb   : > { %17659 = vmatprep.mubr.msk.f32.mxu1 %vm859_vm1, %v778_v32  ;;  %v1065_v32 = vld [vmem:[#allocation4 + $0x60] sm:$0xff] }
 0x1cc   : > { %17660 = vmatmul.mubr.msk.f32.vlgmr.msra.gmra.mrb[0].mxu1 %vm859_vm1, %v17633_v31  ;;  %v1303_v31 = vld [vmem:[#allocation4 + $0x140] sm:$0xff] }
 0x1cd   : > { %v17636_v33 = vpop.f32.mrb[2].mxu0 }
 0x1ce   : > { %v788_v34 = vpop.f32.mrb[3].mxu0 }
 0x1cf   : > { %17662 = vmatprep.mubr.msk.f32.mxu1 %vm859_vm1, %v788_v34  ;;  %v1066_v34 = vld [vmem:[#allocation4 + $0x68] sm:$0xff] }
 0x1d0   : > { %17663 = vmatmul.mubr.msk.f32.gmra.mrb[2].mxu1 %vm859_vm1, %v17636_v33  ;;  %v1304_v33 = vld [vmem:[#allocation4 + $0x148] sm:$0xff] }
 0x1d1   : > { %v17639_v35 = vpop.f32.mrb[4].mxu0 }
 0x1d2   : > { %v798_v36 = vpop.f32.mrb[5].mxu0 }
 0x1d3   : > { %17665 = vmatprep.mubr.msk.f32.mxu1 %vm859_vm1, %v798_v36  ;;  %v1067_v36 = vld [vmem:[#allocation4 + $0x70] sm:$0xff] }
 0x1d4   : > { %17666 = vmatmul.mubr.msk.f32.gmra.mrb[4].mxu1 %vm859_vm1, %v17639_v35  ;;  %v1305_v35 = vld [vmem:[#allocation4 + $0x150] sm:$0xff] }
 0x1d5   : > { %v17642_v37 = vpop.f32.mrb[6].mxu0 }
 0x1d6   : > { %v808_v38 = vpop.f32.mrb[7].mxu0 }
 0x1d7   : > { %17668 = vmatprep.mubr.msk.f32.mxu1 %vm859_vm1, %v808_v38  ;;  %v1068_v38 = vld [vmem:[#allocation4 + $0x78] sm:$0xff] }
 0x1d8   : > { %17669 = vmatmul.mubr.msk.f32.gmra.mrb[6].mxu1 %vm859_vm1, %v17642_v37  ;;  %v1306_v37 = vld [vmem:[#allocation4 + $0x158] sm:$0xff] }
 0x1d9   : > { %v17645_v39 = vpop.f32.mrb[8].mxu0 }
 0x1da   : > { %v818_v40 = vpop.f32.mrb[9].mxu0 }
 0x1db   : > { %17671 = vmatprep.mubr.msk.f32.mxu1 %vm859_vm1, %v818_v40  ;;  %v1069_v40 = vld [vmem:[#allocation4 + $0x80] sm:$0xff] }
 0x1dc   : > { %17672 = vmatmul.mubr.msk.f32.gmra.mrb[8].mxu1 %vm859_vm1, %v17645_v39  ;;  %v1307_v39 = vld [vmem:[#allocation4 + $0x160] sm:$0xff] }
 0x1dd   : > { %v17648_v41 = vpop.f32.mrb[10].mxu0 }
 0x1de   : > { %v828_v42 = vpop.f32.mrb[11].mxu0 }
 0x1df   : > { %17674 = vmatprep.mubr.msk.f32.mxu1 %vm859_vm1, %v828_v42  ;;  %v1070_v42 = vld [vmem:[#allocation4 + $0x88] sm:$0xff] }
 0x1e0   : > { %17675 = vmatmul.mubr.msk.f32.gmra.mrb[10].mxu1 %vm859_vm1, %v17648_v41  ;;  %v1308_v41 = vld [vmem:[#allocation4 + $0x168] sm:$0xff] }
 0x1e1   : > { %v17651_v43 = vpop.f32.mrb[12].mxu0 }
 0x1e2   : > { %v838_v44 = vpop.f32.mrb[13].mxu0 }
 0x1e3   : > { %17677 = vmatprep.mubr.msk.f32.mxu1 %vm859_vm1, %v838_v44  ;;  %v1071_v44 = vld [vmem:[#allocation4 + $0x90] sm:$0xff] }
 0x1e4   : > { %17678 = vmatmul.mubr.msk.f32.gmra.mrb[12].mxu1 %vm859_vm1, %v17651_v43  ;;  %v1309_v43 = vld [vmem:[#allocation4 + $0x170] sm:$0xff] }
 0x1e5   : > { %v17654_v45 = vpop.f32.mrb[14].mxu0 }
 0x1e6   : > { %v848_v46 = vpop.f32.mrb[15].mxu0 }
 0x1e7   : > { %17680 = vmatprep.mubr.msk.f32.mxu1 %vm859_vm1, %v848_v46  ;;  %v1072_v46 = vld [vmem:[#allocation4 + $0x98] sm:$0xff] }
 0x1e8   : > { %17681 = vmatmul.mubr.msk.f32.gmra.mrb[14].mxu1 %vm859_vm1, %v17654_v45  ;;  %v1310_v45 = vld [vmem:[#allocation4 + $0x178] sm:$0xff] }
 0x1e9   : > { %17715 = vmatprep.mubr.f32.mxu1 %v1053_v48  ;;  %v1073_v48 = vld [vmem:[#allocation4 + $0xa0] sm:$0xff] }
 0x29f   : > { %v17661_v49 = vpop.f32.mrb[0].mxu1 }
 0x2a0   : > { %v974_v50 = vpop.f32.mrb[1].mxu1 }
 0x2a1   : > { %v22428_v51 = vpack.c.bf16 %v17661_v49, %v974_v50  ;;  %v1312_v49 = vld [vmem:[#allocation4 + $0x188] sm:$0xff] }
 0x2a2   : > { %v1074_v50 = vld [vmem:[#allocation4 + $0xa8] sm:$0xff] }
 0x2a3   : > { %v17664_v52 = vpop.f32.mrb[2].mxu1  ;;  %20140 = vmatprep.subr.bf16.mxu1 %v22428_v51  ;;  %20172 = vmatprep.subr.bf16.mxu0 %v22428_v51 }
 0x2a4   : > { %v984_v53 = vpop.f32.mrb[3].mxu1  ;;  %20142 = vmatpush3.bf16.msra.mxu1 %v22428_v51  ;;  %20174 = vmatpush3.bf16.msra.mxu0 %v22428_v51 }
 0x2a5   : > { %v22434_v54 = vpack.c.bf16 %v17664_v52, %v984_v53  ;;  %v1313_v52 = vld [vmem:[#allocation4 + $0x190] sm:$0xff] }
 0x2a6   : > { %v1075_v53 = vld [vmem:[#allocation4 + $0xb0] sm:$0xff] }
 0x2a7   : > { %v17667_v55 = vpop.f32.mrb[4].mxu1  ;;  %20144 = vmatprep.subr.bf16.mxu1 %v22434_v54  ;;  %20176 = vmatprep.subr.bf16.mxu0 %v22434_v54 }
 0x2a8   : > { %v994_v56 = vpop.f32.mrb[5].mxu1  ;;  %20146 = vmatpush3.bf16.msra.mxu1 %v22434_v54  ;;  %20178 = vmatpush3.bf16.msra.mxu0 %v22434_v54 }
 0x2a9   : > { %v22440_v57 = vpack.c.bf16 %v17667_v55, %v994_v56  ;;  %v1314_v55 = vld [vmem:[#allocation4 + $0x198] sm:$0xff] }
 0x2aa   : > { %v1076_v56 = vld [vmem:[#allocation4 + $0xb8] sm:$0xff] }
 0x2ab   : > { %v17670_v58 = vpop.f32.mrb[6].mxu1  ;;  %20148 = vmatprep.subr.bf16.mxu1 %v22440_v57  ;;  %20180 = vmatprep.subr.bf16.mxu0 %v22440_v57 }
 0x2ac   : > { %v1004_v59 = vpop.f32.mrb[7].mxu1  ;;  %20150 = vmatpush3.bf16.msra.mxu1 %v22440_v57  ;;  %20182 = vmatpush3.bf16.msra.mxu0 %v22440_v57 }
 0x2ad   : > { %v22446_v60 = vpack.c.bf16 %v17670_v58, %v1004_v59  ;;  %v1315_v58 = vld [vmem:[#allocation4 + $0x1a0] sm:$0xff] }
 0x2ae   : > { %v1077_v59 = vld [vmem:[#allocation4 + $0xc0] sm:$0xff] }
 0x2af   : > { %v17673_v61 = vpop.f32.mrb[8].mxu1  ;;  %20152 = vmatprep.subr.bf16.mxu1 %v22446_v60  ;;  %20184 = vmatprep.subr.bf16.mxu0 %v22446_v60 }
 0x2b0   : > { %v1014_v62 = vpop.f32.mrb[9].mxu1  ;;  %20154 = vmatpush3.bf16.msra.mxu1 %v22446_v60  ;;  %20186 = vmatpush3.bf16.msra.mxu0 %v22446_v60 }
 0x2b1   : > { %v22452_v63 = vpack.c.bf16 %v17673_v61, %v1014_v62  ;;  %v1316_v61 = vld [vmem:[#allocation4 + $0x1a8] sm:$0xff] }
 0x2b2   : > { %v1078_v62 = vld [vmem:[#allocation4 + $0xc8] sm:$0xff] }
 0x2b3   : > { %v17676_v0 = vpop.f32.mrb[10].mxu1  ;;  %20156 = vmatprep.subr.bf16.mxu1 %v22452_v63  ;;  %20188 = vmatprep.subr.bf16.mxu0 %v22452_v63 }
 0x2b4   : > { %v1024_v1 = vpop.f32.mrb[11].mxu1  ;;  %20158 = vmatpush3.bf16.msra.mxu1 %v22452_v63  ;;  %20190 = vmatpush3.bf16.msra.mxu0 %v22452_v63 }
 0x2b5   : > { %v22458_v2 = vpack.c.bf16 %v17676_v0, %v1024_v1  ;;  %v1317_v0 = vld [vmem:[#allocation4 + $0x1b0] sm:$0xff] }
 0x2b6   : > { %v1079_v1 = vld [vmem:[#allocation4 + $0xd0] sm:$0xff] }
 0x2b7   : > { %v17679_v3 = vpop.f32.mrb[12].mxu1  ;;  %20160 = vmatprep.subr.bf16.mxu1 %v22458_v2  ;;  %20192 = vmatprep.subr.bf16.mxu0 %v22458_v2 }
 0x2b8   : > { %v1034_v4 = vpop.f32.mrb[13].mxu1  ;;  %20162 = vmatpush3.bf16.msra.mxu1 %v22458_v2  ;;  %20194 = vmatpush3.bf16.msra.mxu0 %v22458_v2 }
 0x2b9   : > { %v22464_v5 = vpack.c.bf16 %v17679_v3, %v1034_v4  ;;  %v1318_v3 = vld [vmem:[#allocation4 + $0x1b8] sm:$0xff] }
 0x2ba   : > { %v1080_v4 = vld [vmem:[#allocation4 + $0xd8] sm:$0xff] }
 0x2bb   : > { %v17682_v6 = vpop.f32.mrb[14].mxu1  ;;  %20164 = vmatprep.subr.bf16.mxu1 %v22464_v5  ;;  %20196 = vmatprep.subr.bf16.mxu0 %v22464_v5 }
 0x2bc   : > { %v1044_v7 = vpop.f32.mrb[15].mxu1  ;;  %20166 = vmatpush3.bf16.msra.mxu1 %v22464_v5  ;;  %20198 = vmatpush3.bf16.msra.mxu0 %v22464_v5 }
 0x2bd   : > { %v22470_v8 = vpack.c.bf16 %v17682_v6, %v1044_v7  ;;  %v2109_v6 = vld [vmem:[#allocation4 + $0x1c0] sm:$0xff]  ;;  %v2110_v7 = vld [vmem:[#allocation4 + $0x1c8] sm:$0xff] }
 0x2bf   : > { %20168 = vmatprep.subr.bf16.mxu1 %v22470_v8  ;;  %20200 = vmatprep.subr.bf16.mxu0 %v22470_v8 }
 0x2c0   : > { %20170 = vmatpush3.bf16.msra.mxu1 %v22470_v8  ;;  %20202 = vmatpush3.bf16.msra.mxu0 %v22470_v8 }
 0x2c1   : > { %20220 = vmatprep.subr.bf16.mxu0 %v22428_v51 }
 0x2c3   : > { %17790 = vmatmul.mubr.f32.vlgmr.msra.gmra.mrb[16].mxu0 %v1292_v9  ;;  %17716 = vmatmul.mubr.f32.vlgmr.msra.gmra.mrb[16].mxu1 %v1054_v10  ;;  %v2111_v9 = vld [vmem:[#allocation4 + $0x1d0] sm:$0xff]  ;;  %v2112_v10 = vld [vmem:[#allocation4 + $0x1d8] sm:$0xff] }
 0x2c4   : > { %20222 = vmatpush3.bf16.msra.mxu0 %v22428_v51  ;;  %17792 = vmatprep.mubr.f32.mxu0 %v1293_v11  ;;  %v2113_v11 = vld [vmem:[#allocation4 + $0x1e0] sm:$0xff] }
 0x2c5   : > { %20224 = vmatprep.subr.bf16.mxu0 %v22434_v54  ;;  %17718 = vmatprep.mubr.f32.mxu1 %v1055_v12  ;;  %v2114_v12 = vld [vmem:[#allocation4 + $0x1e8] sm:$0xff] }
 0x2c7   : > { %17793 = vmatmul.mubr.f32.gmra.mrb[18].mxu0 %v1294_v13  ;;  %17719 = vmatmul.mubr.f32.gmra.mrb[18].mxu1 %v1056_v14  ;;  %v2115_v13 = vld [vmem:[#allocation4 + $0x1f0] sm:$0xff]  ;;  %v2116_v14 = vld [vmem:[#allocation4 + $0x1f8] sm:$0xff] }
 0x2c8   : > { %20226 = vmatpush3.bf16.msra.mxu0 %v22434_v54  ;;  %17795 = vmatprep.mubr.f32.mxu0 %v1295_v15  ;;  %v2117_v15 = vld [vmem:[#allocation4 + $0x200] sm:$0xff] }
 0x2c9   : > { %20228 = vmatprep.subr.bf16.mxu0 %v22440_v57  ;;  %17721 = vmatprep.mubr.f32.mxu1 %v1057_v16  ;;  %v2118_v16 = vld [vmem:[#allocation4 + $0x208] sm:$0xff] }
 0x2cb   : > { %17796 = vmatmul.mubr.f32.gmra.mrb[20].mxu0 %v1296_v17  ;;  %17722 = vmatmul.mubr.f32.gmra.mrb[20].mxu1 %v1058_v18  ;;  %v2119_v17 = vld [vmem:[#allocation4 + $0x210] sm:$0xff]  ;;  %v2120_v18 = vld [vmem:[#allocation4 + $0x218] sm:$0xff] }
 0x2cc   : > { %20230 = vmatpush3.bf16.msra.mxu0 %v22440_v57  ;;  %17798 = vmatprep.mubr.f32.mxu0 %v1297_v19  ;;  %v2121_v19 = vld [vmem:[#allocation4 + $0x220] sm:$0xff] }
 0x2cd   : > { %20232 = vmatprep.subr.bf16.mxu0 %v22446_v60  ;;  %17724 = vmatprep.mubr.f32.mxu1 %v1059_v20  ;;  %v1525_v20 = vld [vmem:[#allocation6 + $0x20] sm:$0xff] }
 0x2cf   : > { %17799 = vmatmul.mubr.f32.gmra.mrb[22].mxu0 %v1298_v21  ;;  %17725 = vmatmul.mubr.f32.gmra.mrb[22].mxu1 %v1060_v22  ;;  %v1526_v21 = vld [vmem:[#allocation6 + $0x28] sm:$0xff] }
 0x2d0   : > { %20234 = vmatpush3.bf16.msra.mxu0 %v22446_v60  ;;  %17801 = vmatprep.mubr.f32.mxu0 %v1299_v23  ;;  %v2122_v22 = vld [vmem:[#allocation4 + $0x228] sm:$0xff]  ;;  %v20203_v23 = vpack.c.bf16 %v1526_v21, %v1525_v20  ;;  %v3225_v20 = vld [vmem:[#allocation4 + $0x3a0] sm:$0xff] }
 0x2d1   : > { %20236 = vmatprep.subr.bf16.mxu0 %v22452_v63  ;;  %17727 = vmatprep.mubr.f32.mxu1 %v1061_v24  ;;  %v2123_v24 = vld [vmem:[#allocation4 + $0x230] sm:$0xff]  ;;  %v3226_v21 = vld [vmem:[#allocation4 + $0x3a8] sm:$0xff] }
 0x2d2   : > { %20204 = vmatprep.subr.bf16.mxu1 %v20203_v23 }
 0x2d3   : > { %17802 = vmatmul.mubr.f32.gmra.mrb[24].mxu0 %v1300_v25  ;;  %17728 = vmatmul.mubr.f32.gmra.mrb[24].mxu1 %v1062_v26  ;;  %v1527_v25 = vld [vmem:[#allocation6 + $0x30] sm:$0xff]  ;;  %v1528_v26 = vld [vmem:[#allocation6 + $0x38] sm:$0xff] }
 0x2d4   : > { %20238 = vmatpush3.bf16.msra.mxu0 %v22452_v63  ;;  %17804 = vmatprep.mubr.f32.mxu0 %v1301_v27  ;;  %v2124_v27 = vld [vmem:[#allocation4 + $0x238] sm:$0xff] }
 0x2d5   : > { %20240 = vmatprep.subr.bf16.mxu0 %v22458_v2  ;;  %17730 = vmatprep.mubr.f32.mxu1 %v1063_v28  ;;  %v20207_v28 = vpack.c.bf16 %v1528_v26, %v1527_v25  ;;  %v3230_v25 = vld [vmem:[#allocation4 + $0x3c8] sm:$0xff]  ;;  %v3231_v26 = vld [vmem:[#allocation4 + $0x3d0] sm:$0xff] }
 0x2d6   : > { %20206 = vmatpush3.bf16.msra.mxu1 %v20203_v23  ;;  %v3228_v23 = vld [vmem:[#allocation4 + $0x3b8] sm:$0xff] }
 0x2d7   : > { %17805 = vmatmul.mubr.f32.gmra.mrb[26].mxu0 %v1302_v29  ;;  %17731 = vmatmul.mubr.f32.gmra.mrb[26].mxu1 %v1064_v30  ;;  %v2125_v29 = vld [vmem:[#allocation4 + $0x240] sm:$0xff]  ;;  %v2126_v30 = vld [vmem:[#allocation4 + $0x248] sm:$0xff] }
 0x2d8   : > { %20242 = vmatpush3.bf16.msra.mxu0 %v22458_v2  ;;  %17807 = vmatprep.mubr.f32.mxu0 %v1303_v31  ;;  %v2127_v31 = vld [vmem:[#allocation4 + $0x250] sm:$0xff] }
 0x2d9   : > { %20244 = vmatprep.subr.bf16.mxu0 %v22464_v5  ;;  %17733 = vmatprep.mubr.f32.mxu1 %v1065_v32  ;;  %v2128_v32 = vld [vmem:[#allocation4 + $0x258] sm:$0xff] }
 0x2da   : > { %20208 = vmatprep.subr.bf16.mxu1 %v20207_v28 }
 0x2db   : > { %17808 = vmatmul.mubr.f32.gmra.mrb[28].mxu0 %v1304_v33  ;;  %17734 = vmatmul.mubr.f32.gmra.mrb[28].mxu1 %v1066_v34  ;;  %v2129_v33 = vld [vmem:[#allocation4 + $0x260] sm:$0xff]  ;;  %v2130_v34 = vld [vmem:[#allocation4 + $0x268] sm:$0xff] }
 0x2dc   : > { %20246 = vmatpush3.bf16.msra.mxu0 %v22464_v5  ;;  %17810 = vmatprep.mubr.f32.mxu0 %v1305_v35  ;;  %v2131_v35 = vld [vmem:[#allocation4 + $0x270] sm:$0xff] }
 0x2dd   : > { %20248 = vmatprep.subr.bf16.mxu0 %v22470_v8  ;;  %17736 = vmatprep.mubr.f32.mxu1 %v1067_v36  ;;  %v2132_v36 = vld [vmem:[#allocation4 + $0x278] sm:$0xff] }
 0x2de   : > { %20210 = vmatpush3.bf16.msra.mxu1 %v20207_v28  ;;  %v3233_v28 = vld [vmem:[#allocation4 + $0x3e0] sm:$0xff] }
 0x2df   : > { %17811 = vmatmul.mubr.f32.gmra.mrb[30].mxu0 %v1306_v37  ;;  %17737 = vmatmul.mubr.f32.gmra.mrb[30].mxu1 %v1068_v38  ;;  %v2133_v37 = vld [vmem:[#allocation4 + $0x280] sm:$0xff]  ;;  %v2134_v38 = vld [vmem:[#allocation4 + $0x288] sm:$0xff] }
 0x2e0   : > { %20250 = vmatpush3.bf16.msra.mxu0 %v22470_v8  ;;  %17813 = vmatprep.mubr.f32.mxu0 %v1307_v39  ;;  %v2135_v39 = vld [vmem:[#allocation4 + $0x290] sm:$0xff] }
 0x2e1   : > { %20260 = vmatprep.subr.bf16.mxu0 %v22428_v51  ;;  %17739 = vmatprep.mubr.f32.mxu1 %v1069_v40  ;;  %v2136_v40 = vld [vmem:[#allocation4 + $0x298] sm:$0xff] }
 0x2e3   : > { %17814 = vmatmul.mubr.f32.gmra.mrb[32].mxu0 %v1308_v41  ;;  %17740 = vmatmul.mubr.f32.gmra.mrb[32].mxu1 %v1070_v42  ;;  %v2665_v41 = vld [vmem:[#allocation4 + $0x2a0] sm:$0xff]  ;;  %v2666_v42 = vld [vmem:[#allocation4 + $0x2a8] sm:$0xff] }
 0x2e4   : > { %17816 = vmatprep.mubr.f32.mxu0 %v1309_v43  ;;  %17742 = vmatprep.mubr.f32.mxu1 %v1071_v44  ;;  %v2667_v43 = vld [vmem:[#allocation4 + $0x2b0] sm:$0xff]  ;;  %v2668_v44 = vld [vmem:[#allocation4 + $0x2b8] sm:$0xff] }
 0x2e7   : > { %17817 = vmatmul.mubr.f32.gmra.mrb[34].mxu0 %v1310_v45  ;;  %17743 = vmatmul.mubr.f32.gmra.mrb[34].mxu1 %v1072_v46  ;;  %v2669_v45 = vld [vmem:[#allocation4 + $0x2c0] sm:$0xff]  ;;  %v2670_v46 = vld [vmem:[#allocation4 + $0x2c8] sm:$0xff] }
 0x2e8   : > { %17819 = vmatprep.mubr.f32.mxu0 %v1311_v47  ;;  %17745 = vmatprep.mubr.f32.mxu1 %v1073_v48  ;;  %v2671_v47 = vld [vmem:[#allocation4 + $0x2d0] sm:$0xff]  ;;  %v2672_v48 = vld [vmem:[#allocation4 + $0x2d8] sm:$0xff] }
 0x2eb   : > { %17820 = vmatmul.mubr.f32.gmra.mrb[36].mxu0 %v1312_v49  ;;  %17746 = vmatmul.mubr.f32.gmra.mrb[36].mxu1 %v1074_v50  ;;  %v2673_v49 = vld [vmem:[#allocation4 + $0x2e0] sm:$0xff]  ;;  %v2674_v50 = vld [vmem:[#allocation4 + $0x2e8] sm:$0xff] }
 0x2ec   : > { %17822 = vmatprep.mubr.f32.mxu0 %v1313_v52  ;;  %17748 = vmatprep.mubr.f32.mxu1 %v1075_v53  ;;  %v2675_v52 = vld [vmem:[#allocation4 + $0x2f0] sm:$0xff]  ;;  %v2676_v53 = vld [vmem:[#allocation4 + $0x2f8] sm:$0xff] }
 0x2ef   : > { %17823 = vmatmul.mubr.f32.gmra.mrb[38].mxu0 %v1314_v55  ;;  %17749 = vmatmul.mubr.f32.gmra.mrb[38].mxu1 %v1076_v56  ;;  %v2677_v55 = vld [vmem:[#allocation4 + $0x300] sm:$0xff] }
 0x2f0   : > { %17825 = vmatprep.mubr.f32.mxu0 %v1315_v58  ;;  %17751 = vmatprep.mubr.f32.mxu1 %v1077_v59  ;;  %v1286_v56 = vld [vmem:[#allocation6] sm:$0xff]  ;;  %v1287_v58 = vld [vmem:[#allocation6 + $0x8] sm:$0xff] }
 0x2f1   : > { %v2678_v59 = vld [vmem:[#allocation4 + $0x308] sm:$0xff] }
 0x2f3   : > { %17826 = vmatmul.mubr.f32.gmra.mrb[40].mxu0 %v1316_v61  ;;  %17752 = vmatmul.mubr.f32.gmra.mrb[40].mxu1 %v1078_v62  ;;  %v22520_v61 = vpack.c.bf16 %v1287_v58, %v1286_v56  ;;  %v2679_v62 = vld [vmem:[#allocation4 + $0x310] sm:$0xff] }
 0x2f4   : > { %17828 = vmatprep.mubr.f32.mxu0 %v1317_v0  ;;  %17754 = vmatprep.mubr.f32.mxu1 %v1079_v1  ;;  %v2680_v0 = vld [vmem:[#allocation4 + $0x318] sm:$0xff]  ;;  %v2681_v1 = vld [vmem:[#allocation4 + $0x320] sm:$0xff] }
 0x2f5   : > { %20212 = vmatprep.subr.bf16.mxu1 %v22520_v61 }
 0x2f7   : > { %17829 = vmatmul.mubr.f32.gmra.mrb[42].mxu0 %v1318_v3  ;;  %17755 = vmatmul.mubr.f32.gmra.mrb[42].mxu1 %v1080_v4  ;;  %v2682_v3 = vld [vmem:[#allocation4 + $0x328] sm:$0xff]  ;;  %v2683_v4 = vld [vmem:[#allocation4 + $0x330] sm:$0xff] }
 0x2f8   : > { %17963 = vmatprep.mubr.f32.mxu0 %v2109_v6  ;;  %v2684_v6 = vld [vmem:[#allocation4 + $0x338] sm:$0xff] }
 0x2fb   : > { %17964 = vmatmul.mubr.f32.vlgmr.msra.gmra.mrb[44].mxu0 %v2110_v7  ;;  %v2685_v7 = vld [vmem:[#allocation4 + $0x340] sm:$0xff] }
 0x2fc   : > { %20262 = vmatpush3.bf16.msra.mxu0 %v22428_v51  ;;  %17966 = vmatprep.mubr.f32.mxu0 %v2111_v9  ;;  %v2686_v9 = vld [vmem:[#allocation4 + $0x348] sm:$0xff] }
 0x2fd   : > { %20264 = vmatprep.subr.bf16.mxu0 %v22434_v54 }
 0x2ff   : > { %17967 = vmatmul.mubr.f32.gmra.mrb[46].mxu0 %v2112_v10  ;;  %v2687_v10 = vld [vmem:[#allocation4 + $0x350] sm:$0xff] }
 0x300   : > { %20266 = vmatpush3.bf16.msra.mxu0 %v22434_v54  ;;  %17969 = vmatprep.mubr.f32.mxu0 %v2113_v11  ;;  %v2688_v11 = vld [vmem:[#allocation4 + $0x358] sm:$0xff] }
 0x301   : > { %20268 = vmatprep.subr.bf16.mxu0 %v22440_v57 }
 0x303   : > { %17970 = vmatmul.mubr.f32.gmra.mrb[48].mxu0 %v2114_v12  ;;  %v2689_v12 = vld [vmem:[#allocation4 + $0x360] sm:$0xff] }
 0x304   : > { %20270 = vmatpush3.bf16.msra.mxu0 %v22440_v57  ;;  %17972 = vmatprep.mubr.f32.mxu0 %v2115_v13  ;;  %v2690_v13 = vld [vmem:[#allocation4 + $0x368] sm:$0xff] }
 0x305   : > { %20272 = vmatprep.subr.bf16.mxu0 %v22446_v60 }
 0x307   : > { %17973 = vmatmul.mubr.f32.gmra.mrb[50].mxu0 %v2116_v14  ;;  %v2691_v14 = vld [vmem:[#allocation4 + $0x370] sm:$0xff] }
 0x308   : > { %20274 = vmatpush3.bf16.msra.mxu0 %v22446_v60  ;;  %17975 = vmatprep.mubr.f32.mxu0 %v2117_v15  ;;  %v2692_v15 = vld [vmem:[#allocation4 + $0x378] sm:$0xff] }
 0x309   : > { %20276 = vmatprep.subr.bf16.mxu0 %v22452_v63 }
 0x30b   : > { %17976 = vmatmul.mubr.f32.gmra.mrb[52].mxu0 %v2118_v16  ;;  %v3221_v16 = vld [vmem:[#allocation4 + $0x380] sm:$0xff] }
 0x30c   : > { %20278 = vmatpush3.bf16.msra.mxu0 %v22452_v63  ;;  %17978 = vmatprep.mubr.f32.mxu0 %v2119_v17  ;;  %v3222_v17 = vld [vmem:[#allocation4 + $0x388] sm:$0xff] }
 0x30d   : > { %20280 = vmatprep.subr.bf16.mxu0 %v22458_v2 }
 0x30f   : > { %17979 = vmatmul.mubr.f32.gmra.mrb[54].mxu0 %v2120_v18  ;;  %v3223_v18 = vld [vmem:[#allocation4 + $0x390] sm:$0xff] }
 0x310   : > { %20282 = vmatpush3.bf16.msra.mxu0 %v22458_v2  ;;  %17981 = vmatprep.mubr.f32.mxu0 %v2121_v19  ;;  %v3224_v19 = vld [vmem:[#allocation4 + $0x398] sm:$0xff] }
 0x311   : > { %20284 = vmatprep.subr.bf16.mxu0 %v22464_v5 }
 0x313   : > { %17982 = vmatmul.mubr.f32.gmra.mrb[56].mxu0 %v2122_v22  ;;  %v3227_v22 = vld [vmem:[#allocation4 + $0x3b0] sm:$0xff] }
 0x314   : > { %20286 = vmatpush3.bf16.msra.mxu0 %v22464_v5  ;;  %17984 = vmatprep.mubr.f32.mxu0 %v2123_v24  ;;  %v3229_v24 = vld [vmem:[#allocation4 + $0x3c0] sm:$0xff] }
 0x315   : > { %20288 = vmatprep.subr.bf16.mxu0 %v22470_v8 }
 0x317   : > { %17985 = vmatmul.mubr.f32.gmra.mrb[58].mxu0 %v2124_v27  ;;  %v3232_v27 = vld [vmem:[#allocation4 + $0x3d8] sm:$0xff] }
 0x318   : > { %20290 = vmatpush3.bf16.msra.mxu0 %v22470_v8  ;;  %17987 = vmatprep.mubr.f32.mxu0 %v2125_v29  ;;  %v3234_v29 = vld [vmem:[#allocation4 + $0x3e8] sm:$0xff] }
 0x319   : > { %20300 = vmatprep.subr.bf16.mxu0 %v22428_v51 }
 0x31b   : > { %17988 = vmatmul.mubr.f32.gmra.mrb[60].mxu0 %v2126_v30  ;;  %v3235_v30 = vld [vmem:[#allocation4 + $0x3f0] sm:$0xff] }
 0x31c   : > { %17990 = vmatprep.mubr.f32.mxu0 %v2127_v31  ;;  %v3236_v31 = vld [vmem:[#allocation4 + $0x3f8] sm:$0xff] }
 0x31f   : > { %17991 = vmatmul.mubr.f32.gmra.mrb[62].mxu0 %v2128_v32  ;;  %v3237_v32 = vld [vmem:[#allocation4 + $0x400] sm:$0xff] }
 0x320   : > { %17993 = vmatprep.mubr.f32.mxu0 %v2129_v33  ;;  %v3238_v33 = vld [vmem:[#allocation4 + $0x408] sm:$0xff] }
 0x323   : > { %17994 = vmatmul.mubr.f32.gmra.mrb[64].mxu0 %v2130_v34  ;;  %v3239_v34 = vld [vmem:[#allocation4 + $0x410] sm:$0xff] }
 0x324   : > { %17996 = vmatprep.mubr.f32.mxu0 %v2131_v35  ;;  %v3240_v35 = vld [vmem:[#allocation4 + $0x418] sm:$0xff] }
 0x327   : > { %17997 = vmatmul.mubr.f32.gmra.mrb[66].mxu0 %v2132_v36  ;;  %v3241_v36 = vld [vmem:[#allocation4 + $0x420] sm:$0xff] }
 0x328   : > { %17999 = vmatprep.mubr.f32.mxu0 %v2133_v37  ;;  %v3242_v37 = vld [vmem:[#allocation4 + $0x428] sm:$0xff] }
 0x32b   : > { %18000 = vmatmul.mubr.f32.gmra.mrb[68].mxu0 %v2134_v38  ;;  %v3243_v38 = vld [vmem:[#allocation4 + $0x430] sm:$0xff] }
 0x32c   : > { %18002 = vmatprep.mubr.f32.mxu0 %v2135_v39  ;;  %v3244_v39 = vld [vmem:[#allocation4 + $0x438] sm:$0xff] }
 0x32f   : > { %18003 = vmatmul.mubr.f32.gmra.mrb[70].mxu0 %v2136_v40  ;;  %v1288_v40 = vld [vmem:[#allocation6 + $0x10] sm:$0xff] }
 0x330   : > { %18087 = vmatprep.mubr.f32.mxu0 %v2665_v41  ;;  %v1289_v41 = vld [vmem:[#allocation6 + $0x18] sm:$0xff] }
 0x333   : > { %18088 = vmatmul.mubr.f32.vlgmr.msra.gmra.mrb[72].mxu0 %v2666_v42  ;;  %v3245_v42 = vld [vmem:[#allocation4 + $0x440] sm:$0xff] }
 0x334   : > { %20302 = vmatpush3.bf16.msra.mxu0 %v22428_v51  ;;  %18090 = vmatprep.mubr.f32.mxu0 %v2667_v43 }
 0x335   : > { %20304 = vmatprep.subr.bf16.mxu0 %v22434_v54 }
 0x337   : > { %18091 = vmatmul.mubr.f32.gmra.mrb[74].mxu0 %v2668_v44 }
 0x338   : > { %20306 = vmatpush3.bf16.msra.mxu0 %v22434_v54  ;;  %18093 = vmatprep.mubr.f32.mxu0 %v2669_v45 }
 0x339   : > { %20308 = vmatprep.subr.bf16.mxu0 %v22440_v57 }
 0x33b   : > { %18094 = vmatmul.mubr.f32.gmra.mrb[76].mxu0 %v2670_v46  ;;  %v20215_v46 = vpack.c.bf16 %v1289_v41, %v1288_v40  ;;  %v3789_v41 = vld [vmem:[#allocation4 + $0x4c0] sm:$0xff] }
 0x33c   : > { %20310 = vmatpush3.bf16.msra.mxu0 %v22440_v57  ;;  %18096 = vmatprep.mubr.f32.mxu0 %v2671_v47 }
 0x33d   : > { %20312 = vmatprep.subr.bf16.mxu0 %v22446_v60 }
 0x33f   : > { %18097 = vmatmul.mubr.f32.gmra.mrb[78].mxu0 %v2672_v48  ;;  %v3246_v48 = vld [vmem:[#allocation4 + $0x448] sm:$0xff] }
 0x340   : > { %20314 = vmatpush3.bf16.msra.mxu0 %v22446_v60  ;;  %18099 = vmatprep.mubr.f32.mxu0 %v2673_v49  ;;  %v2343_v49 = vld [vmem:[#allocation6 + $0x40] sm:$0xff] }
 0x341   : > { %20316 = vmatprep.subr.bf16.mxu0 %v22452_v63 }
 0x343   : > { %18100 = vmatmul.mubr.f32.gmra.mrb[80].mxu0 %v2674_v50  ;;  %v2344_v50 = vld [vmem:[#allocation6 + $0x48] sm:$0xff] }
 0x344   : > { %20318 = vmatpush3.bf16.msra.mxu0 %v22452_v63  ;;  %18102 = vmatprep.mubr.f32.mxu0 %v2675_v52  ;;  %v3247_v52 = vld [vmem:[#allocation4 + $0x450] sm:$0xff] }
 0x345   : > { %20320 = vmatprep.subr.bf16.mxu0 %v22458_v2 }
 0x347   : > { %18103 = vmatmul.mubr.f32.gmra.mrb[82].mxu0 %v2676_v53 }
 0x348   : > { %20322 = vmatpush3.bf16.msra.mxu0 %v22458_v2  ;;  %18105 = vmatprep.mubr.f32.mxu0 %v2677_v55 }
 0x349   : > { %20324 = vmatprep.subr.bf16.mxu0 %v22464_v5 }
 0x34b   : > { %18106 = vmatmul.mubr.f32.gmra.mrb[84].mxu0 %v2678_v59  ;;  %v22555_v59 = vpack.c.bf16 %v2344_v50, %v2343_v49  ;;  %v3791_v49 = vld [vmem:[#allocation4 + $0x4d0] sm:$0xff] }
 0x34c   : > { %20326 = vmatpush3.bf16.msra.mxu0 %v22464_v5  ;;  %18108 = vmatprep.mubr.f32.mxu0 %v2679_v62  ;;  %v3248_v62 = vld [vmem:[#allocation4 + $0x458] sm:$0xff] }
 0x34d   : > { %20328 = vmatprep.subr.bf16.mxu0 %v22470_v8 }
 0x34f   : > { %18109 = vmatmul.mubr.f32.gmra.mrb[86].mxu0 %v2680_v0  ;;  %v3777_v0 = vld [vmem:[#allocation4 + $0x460] sm:$0xff] }
 0x350   : > { %20330 = vmatpush3.bf16.msra.mxu0 %v22470_v8  ;;  %18111 = vmatprep.mubr.f32.mxu0 %v2681_v1 }
 0x351   : > { %20340 = vmatprep.subr.bf16.mxu0 %v22428_v51 }
 0x353   : > { %18112 = vmatmul.mubr.f32.gmra.mrb[88].mxu0 %v2682_v3 }
 0x354   : > { %18114 = vmatprep.mubr.f32.mxu0 %v2683_v4 }
 0x357   : > { %18115 = vmatmul.mubr.f32.gmra.mrb[90].mxu0 %v2684_v6  ;;  %v3778_v6 = vld [vmem:[#allocation4 + $0x468] sm:$0xff] }
 0x358   : > { %18117 = vmatprep.mubr.f32.mxu0 %v2685_v7 }
 0x35b   : > { %18118 = vmatmul.mubr.f32.gmra.mrb[92].mxu0 %v2686_v9 }
 0x35c   : > { %18120 = vmatprep.mubr.f32.mxu0 %v2687_v10 }
 0x35f   : > { %18121 = vmatmul.mubr.f32.gmra.mrb[94].mxu0 %v2688_v11  ;;  %v3779_v11 = vld [vmem:[#allocation4 + $0x470] sm:$0xff] }
 0x360   : > { %18123 = vmatprep.mubr.f32.mxu0 %v2689_v12 }
 0x363   : > { %18124 = vmatmul.mubr.f32.gmra.mrb[96].mxu0 %v2690_v13  ;;  %v3780_v13 = vld [vmem:[#allocation4 + $0x478] sm:$0xff] }
 0x364   : > { %18126 = vmatprep.mubr.f32.mxu0 %v2691_v14 }
 0x367   : > { %18127 = vmatmul.mubr.f32.gmra.mrb[98].mxu0 %v2692_v15 }
 0x368   : > { %18211 = vmatprep.mubr.f32.mxu0 %v3221_v16 }
 0x36b   : > { %18212 = vmatmul.mubr.f32.vlgmr.msra.gmra.mrb[100].mxu0 %v3222_v17  ;;  %v3781_v17 = vld [vmem:[#allocation4 + $0x480] sm:$0xff] }
 0x36c   : > { %20342 = vmatpush3.bf16.msra.mxu0 %v22428_v51  ;;  %18214 = vmatprep.mubr.f32.mxu0 %v3223_v18 }
 0x36d   : > { %20344 = vmatprep.subr.bf16.mxu0 %v22434_v54 }
 0x36f   : > { %18215 = vmatmul.mubr.f32.gmra.mrb[102].mxu0 %v3224_v19  ;;  %v3782_v19 = vld [vmem:[#allocation4 + $0x488] sm:$0xff] }
 0x370   : > { %20346 = vmatpush3.bf16.msra.mxu0 %v22434_v54  ;;  %18217 = vmatprep.mubr.f32.mxu0 %v3225_v20 }
 0x371   : > { %20348 = vmatprep.subr.bf16.mxu0 %v22440_v57 }
 0x373   : > { %18218 = vmatmul.mubr.f32.gmra.mrb[104].mxu0 %v3226_v21 }
 0x374   : > { %20350 = vmatpush3.bf16.msra.mxu0 %v22440_v57  ;;  %18220 = vmatprep.mubr.f32.mxu0 %v3227_v22 }
 0x375   : > { %20352 = vmatprep.subr.bf16.mxu0 %v22446_v60 }
 0x377   : > { %18221 = vmatmul.mubr.f32.gmra.mrb[106].mxu0 %v3228_v23  ;;  %v3783_v23 = vld [vmem:[#allocation4 + $0x490] sm:$0xff] }
 0x378   : > { %20354 = vmatpush3.bf16.msra.mxu0 %v22446_v60  ;;  %18223 = vmatprep.mubr.f32.mxu0 %v3229_v24 }
 0x379   : > { %20356 = vmatprep.subr.bf16.mxu0 %v22452_v63 }
 0x37b   : > { %18224 = vmatmul.mubr.f32.gmra.mrb[108].mxu0 %v3230_v25  ;;  %v3784_v25 = vld [vmem:[#allocation4 + $0x498] sm:$0xff] }
 0x37c   : > { %20358 = vmatpush3.bf16.msra.mxu0 %v22452_v63  ;;  %18226 = vmatprep.mubr.f32.mxu0 %v3231_v26 }
 0x37d   : > { %20360 = vmatprep.subr.bf16.mxu0 %v22458_v2 }
 0x37f   : > { %18227 = vmatmul.mubr.f32.gmra.mrb[110].mxu0 %v3232_v27 }
 0x380   : > { %20362 = vmatpush3.bf16.msra.mxu0 %v22458_v2  ;;  %18229 = vmatprep.mubr.f32.mxu0 %v3233_v28 }
 0x381   : > { %20364 = vmatprep.subr.bf16.mxu0 %v22464_v5 }
 0x383   : > { %18230 = vmatmul.mubr.f32.gmra.mrb[112].mxu0 %v3234_v29  ;;  %v3785_v29 = vld [vmem:[#allocation4 + $0x4a0] sm:$0xff] }
 0x384   : > { %20366 = vmatpush3.bf16.msra.mxu0 %v22464_v5  ;;  %18232 = vmatprep.mubr.f32.mxu0 %v3235_v30 }
 0x385   : > { %20368 = vmatprep.subr.bf16.mxu0 %v22470_v8 }
 0x387   : > { %18233 = vmatmul.mubr.f32.gmra.mrb[114].mxu0 %v3236_v31  ;;  %v3786_v31 = vld [vmem:[#allocation4 + $0x4a8] sm:$0xff] }
 0x388   : > { %20370 = vmatpush3.bf16.msra.mxu0 %v22470_v8  ;;  %18235 = vmatprep.mubr.f32.mxu0 %v3237_v32 }
 0x389   : > { %20380 = vmatprep.subr.bf16.mxu0 %v22428_v51 }
 0x38b   : > { %18236 = vmatmul.mubr.f32.gmra.mrb[116].mxu0 %v3238_v33 }
 0x38c   : > { %18238 = vmatprep.mubr.f32.mxu0 %v3239_v34 }
 0x38f   : > { %18239 = vmatmul.mubr.f32.gmra.mrb[118].mxu0 %v3240_v35  ;;  %v3787_v35 = vld [vmem:[#allocation4 + $0x4b0] sm:$0xff] }
 0x390   : > { %18241 = vmatprep.mubr.f32.mxu0 %v3241_v36 }
 0x393   : > { %18242 = vmatmul.mubr.f32.gmra.mrb[120].mxu0 %v3242_v37  ;;  %v3788_v37 = vld [vmem:[#allocation4 + $0x4b8] sm:$0xff] }
 0x394   : > { %18244 = vmatprep.mubr.f32.mxu0 %v3243_v38 }
 0x396   : > { %v17791_v43 = vpop.f32.mrb[16].mxu0  ;;  %v22544_v44 = vpop.f32.mrb[16].mxu1 }
 0x397   : > { %v1385_v45 = vpop.f32.mrb[17].mxu0  ;;  %18245 = vmatmul.mubr.f32.gmra.mrb[122].mxu0 %v3244_v39  ;;  %v22546_v47 = vpop.f32.mrb[17].mxu1 }
 0x398   : > { %17839 = vmatprep.mubr.msk.f32.mxu1 %vm1529_vm2, %v1385_v45  ;;  %18247 = vmatprep.mubr.f32.mxu0 %v3245_v42 }
 0x399   : > { %17840 = vmatmul.mubr.msk.f32.vlgmr.msra.gmra.mrb[44].mxu1 %vm1529_vm2, %v17791_v43  ;;  %v3790_v43 = vld [vmem:[#allocation4 + $0x4c8] sm:$0xff] }
 0x39a   : > { %v17794_v53 = vpop.f32.mrb[18].mxu0  ;;  %20214 = vmatpush3.bf16.msra.mxu1 %v22520_v61  ;;  %v22551_v55 = vpop.f32.mrb[18].mxu1 }
 0x39b   : > { %v1395_v56 = vpop.f32.mrb[19].mxu0  ;;  %18248 = vmatmul.mubr.f32.gmra.mrb[124].mxu0 %v3246_v48  ;;  %20216 = vmatprep.subr.bf16.mxu1 %v20215_v46  ;;  %v22553_v58 = vpop.f32.mrb[19].mxu1 }
 0x39c   : > { %17842 = vmatprep.mubr.msk.f32.mxu1 %vm1529_vm2, %v1395_v56  ;;  %18250 = vmatprep.mubr.f32.mxu0 %v3247_v52  ;;  %v3792_v52 = vld [vmem:[#allocation4 + $0x4d8] sm:$0xff] }
 0x39d   : > { %17843 = vmatmul.mubr.msk.f32.gmra.mrb[46].mxu1 %vm1529_vm2, %v17794_v53 }
 0x39e   : > { %v17797_v1 = vpop.f32.mrb[20].mxu0  ;;  %20218 = vmatpush3.bf16.msra.mxu1 %v20215_v46  ;;  %v22559_v3 = vpop.f32.mrb[20].mxu1 }
 0x39f   : > { %v1405_v61 = vpop.f32.mrb[21].mxu0  ;;  %18251 = vmatmul.mubr.f32.gmra.mrb[126].mxu0 %v3248_v62  ;;  %v22561_v4 = vpop.f32.mrb[21].mxu1  ;;  %20252 = vmatprep.subr.bf16.mxu1 %v22555_v59 }
 0x3a0   : > { %17845 = vmatprep.mubr.msk.f32.mxu1 %vm1529_vm2, %v1405_v61  ;;  %18335 = vmatprep.mubr.f32.mxu0 %v3777_v0  ;;  %v3793_v0 = vld [vmem:[#allocation4 + $0x4e0] sm:$0xff]  ;;  %v3794_v61 = vld [vmem:[#allocation4 + $0x4e8] sm:$0xff] }
 0x3a1   : > { %17846 = vmatmul.mubr.msk.f32.gmra.mrb[48].mxu1 %vm1529_vm2, %v17797_v1 }
 0x3a2   : > { %v17800_v7 = vpop.f32.mrb[22].mxu0  ;;  %v22566_v9 = vpop.f32.mrb[22].mxu1 }
 0x3a3   : > { %v1415_v10 = vpop.f32.mrb[23].mxu0  ;;  %18336 = vmatmul.mubr.f32.vlgmr.msra.gmra.mrb[128].mxu0 %v3778_v6  ;;  %v22568_v12 = vpop.f32.mrb[23].mxu1  ;;  %v3795_v6 = vld [vmem:[#allocation4 + $0x4f0] sm:$0xff] }
 0x3a4   : > { %20382 = vmatpush3.bf16.msra.mxu0 %v22428_v51  ;;  %17848 = vmatprep.mubr.msk.f32.mxu1 %vm1529_vm2, %v1415_v10 }
 0x3a5   : > { %20384 = vmatprep.subr.bf16.mxu0 %v22434_v54  ;;  %17849 = vmatmul.mubr.msk.f32.gmra.mrb[50].mxu1 %vm1529_vm2, %v17800_v7 }
 0x3a6   : > { %v17803_v14 = vpop.f32.mrb[24].mxu0  ;;  %18338 = vmatprep.mubr.f32.mxu0 %v3779_v11  ;;  %v22574_v15 = vpop.f32.mrb[24].mxu1 }
 0x3a7   : > { %v1425_v16 = vpop.f32.mrb[25].mxu0  ;;  %18339 = vmatmul.mubr.f32.gmra.mrb[130].mxu0 %v3780_v13  ;;  %v22576_v18 = vpop.f32.mrb[25].mxu1 }
 0x3a8   : > { %20386 = vmatpush3.bf16.msra.mxu0 %v22434_v54  ;;  %17851 = vmatprep.mubr.msk.f32.mxu1 %vm1529_vm2, %v1425_v16  ;;  %v3797_v16 = vld [vmem:[#allocation4 + $0x500] sm:$0xff] }
 0x3a9   : > { %20388 = vmatprep.subr.bf16.mxu0 %v22440_v57  ;;  %17852 = vmatmul.mubr.msk.f32.gmra.mrb[52].mxu1 %vm1529_vm2, %v17803_v14  ;;  %v3796_v14 = vld [vmem:[#allocation4 + $0x4f8] sm:$0xff] }
 0x3aa   : > { %v17806_v20 = vpop.f32.mrb[26].mxu0  ;;  %18341 = vmatprep.mubr.f32.mxu0 %v3781_v17  ;;  %v22582_v21 = vpop.f32.mrb[26].mxu1 }
 0x3ab   : > { %v1435_v22 = vpop.f32.mrb[27].mxu0  ;;  %18342 = vmatmul.mubr.f32.gmra.mrb[132].mxu0 %v3782_v19  ;;  %v22584_v24 = vpop.f32.mrb[27].mxu1 }
 0x3ac   : > { %20390 = vmatpush3.bf16.msra.mxu0 %v22440_v57  ;;  %17854 = vmatprep.mubr.msk.f32.mxu1 %vm1529_vm2, %v1435_v22 }
 0x3ad   : > { %20392 = vmatprep.subr.bf16.mxu0 %v22446_v60  ;;  %17855 = vmatmul.mubr.msk.f32.gmra.mrb[54].mxu1 %vm1529_vm2, %v17806_v20 }
 0x3ae   : > { %v17809_v26 = vpop.f32.mrb[28].mxu0  ;;  %18344 = vmatprep.mubr.f32.mxu0 %v3783_v23  ;;  %v22590_v27 = vpop.f32.mrb[28].mxu1  ;;  %v3798_v23 = vld [vmem:[#allocation4 + $0x508] sm:$0xff] }
 0x3af   : > { %v1445_v28 = vpop.f32.mrb[29].mxu0  ;;  %18345 = vmatmul.mubr.f32.gmra.mrb[134].mxu0 %v3784_v25  ;;  %v22592_v30 = vpop.f32.mrb[29].mxu1  ;;  %v3799_v25 = vld [vmem:[#allocation4 + $0x510] sm:$0xff] }
 0x3b0   : > { %20394 = vmatpush3.bf16.msra.mxu0 %v22446_v60  ;;  %17857 = vmatprep.mubr.msk.f32.mxu1 %vm1529_vm2, %v1445_v28 }
 0x3b1   : > { %20396 = vmatprep.subr.bf16.mxu0 %v22452_v63  ;;  %17858 = vmatmul.mubr.msk.f32.gmra.mrb[56].mxu1 %vm1529_vm2, %v17809_v26 }
 0x3b2   : > { %v17812_v32 = vpop.f32.mrb[30].mxu0  ;;  %18347 = vmatprep.mubr.f32.mxu0 %v3785_v29  ;;  %v22598_v33 = vpop.f32.mrb[30].mxu1 }
 0x3b3   : > { %v1455_v34 = vpop.f32.mrb[31].mxu0  ;;  %18348 = vmatmul.mubr.f32.gmra.mrb[136].mxu0 %v3786_v31  ;;  %v22600_v36 = vpop.f32.mrb[31].mxu1 }
 0x3b4   : > { %20398 = vmatpush3.bf16.msra.mxu0 %v22452_v63  ;;  %17860 = vmatprep.mubr.msk.f32.mxu1 %vm1529_vm2, %v1455_v34  ;;  %v2345_v34 = vld [vmem:[#allocation6 + $0x50] sm:$0xff] }
 0x3b5   : > { %20400 = vmatprep.subr.bf16.mxu0 %v22458_v2  ;;  %17861 = vmatmul.mubr.msk.f32.gmra.mrb[58].mxu1 %vm1529_vm2, %v17812_v32  ;;  %v3800_v32 = vld [vmem:[#allocation4 + $0x518] sm:$0xff] }
 0x3b6   : > { %v17815_v38 = vpop.f32.mrb[32].mxu0  ;;  %18350 = vmatprep.mubr.f32.mxu0 %v3787_v35  ;;  %v22606_v39 = vpop.f32.mrb[32].mxu1  ;;  %v2346_v35 = vld [vmem:[#allocation6 + $0x58] sm:$0xff] }
 0x3b7   : > { %v1465_v40 = vpop.f32.mrb[33].mxu0  ;;  %18351 = vmatmul.mubr.f32.gmra.mrb[138].mxu0 %v3788_v37  ;;  %v22608_v42 = vpop.f32.mrb[33].mxu1  ;;  %v3801_v37 = vld [vmem:[#allocation4 + $0x520] sm:$0xff] }
 0x3b8   : > { %20402 = vmatpush3.bf16.msra.mxu0 %v22458_v2  ;;  %17863 = vmatprep.mubr.msk.f32.mxu1 %vm1529_vm2, %v1465_v40  ;;  %v20255_v40 = vpack.c.bf16 %v2346_v35, %v2345_v34  ;;  %v4348_v34 = vld [vmem:[#allocation4 + $0x5b8] sm:$0xff]  ;;  %v4349_v35 = vld [vmem:[#allocation4 + $0x5c0] sm:$0xff] }
 0x3b9   : > { %20404 = vmatprep.subr.bf16.mxu0 %v22464_v5  ;;  %17864 = vmatmul.mubr.msk.f32.gmra.mrb[60].mxu1 %vm1529_vm2, %v17815_v38 }
 0x3ba   : > { %v17818_v45 = vpop.f32.mrb[34].mxu0  ;;  %18353 = vmatprep.mubr.f32.mxu0 %v3789_v41  ;;  %v22614_v46 = vpop.f32.mrb[34].mxu1 }
 0x3bb   : > { %v1475_v48 = vpop.f32.mrb[35].mxu0  ;;  %18354 = vmatmul.mubr.f32.gmra.mrb[140].mxu0 %v3790_v43  ;;  %v22616_v50 = vpop.f32.mrb[35].mxu1  ;;  %v3802_v43 = vld [vmem:[#allocation4 + $0x528] sm:$0xff] }
 0x3bc   : > { %20406 = vmatpush3.bf16.msra.mxu0 %v22464_v5  ;;  %17866 = vmatprep.mubr.msk.f32.mxu1 %vm1529_vm2, %v1475_v48  ;;  %v2900_v48 = vld [vmem:[#allocation6 + $0x68] sm:$0xff] }
 0x3bd   : > { %20408 = vmatprep.subr.bf16.mxu0 %v22470_v8  ;;  %17867 = vmatmul.mubr.msk.f32.gmra.mrb[62].mxu1 %vm1529_vm2, %v17818_v45  ;;  %v2899_v45 = vld [vmem:[#allocation6 + $0x60] sm:$0xff] }
 0x3be   : > { %v17821_v53 = vpop.f32.mrb[36].mxu0  ;;  %18356 = vmatprep.mubr.f32.mxu0 %v3791_v49  ;;  %v22622_v56 = vpop.f32.mrb[36].mxu1  ;;  %v3803_v49 = vld [vmem:[#allocation4 + $0x530] sm:$0xff] }
 0x3bf   : > { %v1485_v62 = vpop.f32.mrb[37].mxu0  ;;  %18357 = vmatmul.mubr.f32.gmra.mrb[142].mxu0 %v3792_v52  ;;  %v22624_v1 = vpop.f32.mrb[37].mxu1 }
 0x3c0   : > { %20410 = vmatpush3.bf16.msra.mxu0 %v22470_v8  ;;  %17869 = vmatprep.mubr.msk.f32.mxu1 %vm1529_vm2, %v1485_v62  ;;  %v3804_v62 = vld [vmem:[#allocation4 + $0x538] sm:$0xff] }
 0x3c1   : > { %20420 = vmatprep.subr.bf16.mxu0 %v22428_v51  ;;  %17870 = vmatmul.mubr.msk.f32.gmra.mrb[64].mxu1 %vm1529_vm2, %v17821_v53  ;;  %v22663_v53 = vpack.c.bf16 %v2900_v48, %v2899_v45  ;;  %v4353_v45 = vld [vmem:[#allocation4 + $0x5e0] sm:$0xff] }
 0x3c2   : > { %v17824_v7 = vpop.f32.mrb[38].mxu0  ;;  %18359 = vmatprep.mubr.f32.mxu0 %v3793_v0  ;;  %v22630_v10 = vpop.f32.mrb[38].mxu1  ;;  %v4334_v0 = vld [vmem:[#allocation4 + $0x548] sm:$0xff] }
 0x3c3   : > { %v1495_v11 = vpop.f32.mrb[39].mxu0  ;;  %18360 = vmatmul.mubr.f32.gmra.mrb[144].mxu0 %v3794_v61  ;;  %v22632_v13 = vpop.f32.mrb[39].mxu1  ;;  %v4335_v61 = vld [vmem:[#allocation4 + $0x550] sm:$0xff] }
 0x3c4   : > { %17872 = vmatprep.mubr.msk.f32.mxu1 %vm1529_vm2, %v1495_v11  ;;  %18362 = vmatprep.mubr.f32.mxu0 %v3795_v6  ;;  %v4336_v6 = vld [vmem:[#allocation4 + $0x558] sm:$0xff]  ;;  %v4338_v11 = vld [vmem:[#allocation4 + $0x568] sm:$0xff] }
 0x3c5   : > { %17873 = vmatmul.mubr.msk.f32.gmra.mrb[66].mxu1 %vm1529_vm2, %v17824_v7  ;;  %v4337_v7 = vld [vmem:[#allocation4 + $0x560] sm:$0xff] }
 0x3c6   : > { %v17827_v17 = vpop.f32.mrb[40].mxu0  ;;  %v22636_v19 = vpop.f32.mrb[40].mxu1 }
 0x3c7   : > { %v1505_v20 = vpop.f32.mrb[41].mxu0  ;;  %18363 = vmatmul.mubr.f32.gmra.mrb[146].mxu0 %v3796_v14  ;;  %v22638_v22 = vpop.f32.mrb[41].mxu1  ;;  %v4339_v14 = vld [vmem:[#allocation4 + $0x570] sm:$0xff] }
 0x3c8   : > { %17875 = vmatprep.mubr.msk.f32.mxu1 %vm1529_vm2, %v1505_v20  ;;  %18365 = vmatprep.mubr.f32.mxu0 %v3797_v16  ;;  %v4340_v16 = vld [vmem:[#allocation4 + $0x578] sm:$0xff]  ;;  %v4342_v20 = vld [vmem:[#allocation4 + $0x588] sm:$0xff] }
 0x3c9   : > { %17876 = vmatmul.mubr.msk.f32.gmra.mrb[68].mxu1 %vm1529_vm2, %v17827_v17  ;;  %v4341_v17 = vld [vmem:[#allocation4 + $0x580] sm:$0xff] }
 0x3ca   : > { %v17830_v26 = vpop.f32.mrb[42].mxu0  ;;  %v22642_v28 = vpop.f32.mrb[42].mxu1 }
 0x3cb   : > { %v1515_v29 = vpop.f32.mrb[43].mxu0  ;;  %18366 = vmatmul.mubr.f32.gmra.mrb[148].mxu0 %v3798_v23  ;;  %v22644_v31 = vpop.f32.mrb[43].mxu1  ;;  %v4343_v23 = vld [vmem:[#allocation4 + $0x590] sm:$0xff] }
 0x3cc   : > { %17878 = vmatprep.mubr.msk.f32.mxu1 %vm1529_vm2, %v1515_v29  ;;  %18368 = vmatprep.mubr.f32.mxu0 %v3799_v25  ;;  %v4344_v25 = vld [vmem:[#allocation4 + $0x598] sm:$0xff]  ;;  %v4346_v29 = vld [vmem:[#allocation4 + $0x5a8] sm:$0xff] }
 0x3cd   : > { %17879 = vmatmul.mubr.msk.f32.gmra.mrb[70].mxu1 %vm1529_vm2, %v17830_v26  ;;  %v4345_v26 = vld [vmem:[#allocation4 + $0x5a0] sm:$0xff] }
 0x3ce   : > { %17889 = vmatprep.mubr.msk.f32.mxu1 %vm1529_vm2, %v22546_v47  ;;  %v22650_v38 = vpop.f32.mrb[44].mxu0 }
 0x3cf   : > { %18369 = vmatmul.mubr.f32.gmra.mrb[150].mxu0 %v3800_v32  ;;  %v22652_v41 = vpop.f32.mrb[45].mxu0  ;;  %v4347_v32 = vld [vmem:[#allocation4 + $0x5b0] sm:$0xff] }
 0x3d0   : > { %18371 = vmatprep.mubr.f32.mxu0 %v3801_v37  ;;  %v4350_v37 = vld [vmem:[#allocation4 + $0x5c8] sm:$0xff] }
 0x3d1   : > { %17890 = vmatmul.mubr.msk.f32.vlgmr.msra.gmra.mrb[44].mxu1 %vm1529_vm2, %v22544_v44  ;;  %v4333_v44 = vld [vmem:[#allocation4 + $0x540] sm:$0xff] }
 0x3d2   : > { %17892 = vmatprep.mubr.msk.f32.mxu1 %vm1529_vm2, %v22553_v58  ;;  %20254 = vmatpush3.bf16.msra.mxu1 %v22555_v59  ;;  %v22659_v47 = vpop.f32.mrb[46].mxu0 }
 0x3d3   : > { %18372 = vmatmul.mubr.f32.gmra.mrb[152].mxu0 %v3802_v43  ;;  %20256 = vmatprep.subr.bf16.mxu1 %v20255_v40  ;;  %v22661_v52 = vpop.f32.mrb[47].mxu0  ;;  %v4352_v43 = vld [vmem:[#allocation4 + $0x5d8] sm:$0xff] }
 0x3d4   : > { %18374 = vmatprep.mubr.f32.mxu0 %v3803_v49  ;;  %v4355_v49 = vld [vmem:[#allocation4 + $0x5f0] sm:$0xff] }
 0x3d5   : > { %17893 = vmatmul.mubr.msk.f32.gmra.mrb[46].mxu1 %vm1529_vm2, %v22551_v55 }
 0x3d6   : > { %17895 = vmatprep.mubr.msk.f32.mxu1 %vm1529_vm2, %v22561_v4  ;;  %20258 = vmatpush3.bf16.msra.mxu1 %v20255_v40  ;;  %v22669_v58 = vpop.f32.mrb[48].mxu0  ;;  %v4351_v40 = vld [vmem:[#allocation4 + $0x5d0] sm:$0xff] }
 0x3d7   : > { %18375 = vmatmul.mubr.f32.gmra.mrb[154].mxu0 %v3804_v62  ;;  %v22671_v59 = vpop.f32.mrb[49].mxu0  ;;  %20292 = vmatprep.subr.bf16.mxu1 %v22663_v53 }
 0x3d8   : > { %18459 = vmatprep.mubr.f32.mxu0 %v4333_v44  ;;  %v2901_v44 = vld [vmem:[#allocation6 + $0x70] sm:$0xff] }
 0x3d9   : > { %17896 = vmatmul.mubr.msk.f32.gmra.mrb[48].mxu1 %vm1529_vm2, %v22559_v3 }
 0x3da   : > { %17898 = vmatprep.mubr.msk.f32.mxu1 %vm1529_vm2, %v22568_v12  ;;  %v22678_v55 = vpop.f32.mrb[50].mxu0 }
 0x3db   : > { %18460 = vmatmul.mubr.f32.vlgmr.msra.gmra.mrb[156].mxu0 %v4334_v0  ;;  %v22680_v4 = vpop.f32.mrb[51].mxu0  ;;  %v2902_v0 = vld [vmem:[#allocation6 + $0x78] sm:$0xff] }
 0x3dc   : > { %20422 = vmatpush3.bf16.msra.mxu0 %v22428_v51  ;;  %18462 = vmatprep.mubr.f32.mxu0 %v4335_v61  ;;  %v4357_v61 = vld [vmem:[#allocation4 + $0x600] sm:$0xff] }
 0x3dd   : > { %20424 = vmatprep.subr.bf16.mxu0 %v22434_v54  ;;  %17899 = vmatmul.mubr.msk.f32.gmra.mrb[50].mxu1 %vm1529_vm2, %v22566_v9 }
 0x3de   : > { %17901 = vmatprep.mubr.msk.f32.mxu1 %vm1529_vm2, %v22576_v18  ;;  %v22688_v3 = vpop.f32.mrb[52].mxu0 }
 0x3df   : > { %18463 = vmatmul.mubr.f32.gmra.mrb[158].mxu0 %v4336_v6  ;;  %v22690_v12 = vpop.f32.mrb[53].mxu0 }
 0x3e0   : > { %20426 = vmatpush3.bf16.msra.mxu0 %v22434_v54  ;;  %18465 = vmatprep.mubr.f32.mxu0 %v4337_v7  ;;  %v4358_v7 = vld [vmem:[#allocation4 + $0x608] sm:$0xff] }
 0x3e1   : > { %20428 = vmatprep.subr.bf16.mxu0 %v22440_v57  ;;  %17902 = vmatmul.mubr.msk.f32.gmra.mrb[52].mxu1 %vm1529_vm2, %v22574_v15 }
 0x3e2   : > { %17904 = vmatprep.mubr.msk.f32.mxu1 %vm1529_vm2, %v22584_v24  ;;  %v22698_v9 = vpop.f32.mrb[54].mxu0 }
 0x3e3   : > { %18466 = vmatmul.mubr.f32.gmra.mrb[160].mxu0 %v4338_v11  ;;  %v22700_v18 = vpop.f32.mrb[55].mxu0  ;;  %v3455_v11 = vld [vmem:[#allocation6 + $0x80] sm:$0xff] }
 0x3e4   : > { %20430 = vmatpush3.bf16.msra.mxu0 %v22440_v57  ;;  %18468 = vmatprep.mubr.f32.mxu0 %v4339_v14  ;;  %v3456_v14 = vld [vmem:[#allocation6 + $0x88] sm:$0xff] }
 0x3e5   : > { %20432 = vmatprep.subr.bf16.mxu0 %v22446_v60  ;;  %17905 = vmatmul.mubr.msk.f32.gmra.mrb[54].mxu1 %vm1529_vm2, %v22582_v21 }
 0x3e6   : > { %17907 = vmatprep.mubr.msk.f32.mxu1 %vm1529_vm2, %v22592_v30  ;;  %v22708_v15 = vpop.f32.mrb[56].mxu0 }
 0x3e7   : > { %18469 = vmatmul.mubr.f32.gmra.mrb[162].mxu0 %v4340_v16  ;;  %v22710_v24 = vpop.f32.mrb[57].mxu0  ;;  %v4359_v16 = vld [vmem:[#allocation4 + $0x610] sm:$0xff] }
 0x3e8   : > { %20434 = vmatpush3.bf16.msra.mxu0 %v22446_v60  ;;  %18471 = vmatprep.mubr.f32.mxu0 %v4341_v17  ;;  %v22795_v17 = vpack.c.bf16 %v3456_v14, %v3455_v11  ;;  %v4905_v14 = vld [vmem:[#allocation4 + $0x6a0] sm:$0xff] }
 0x3e9   : > { %20436 = vmatprep.subr.bf16.mxu0 %v22452_v63  ;;  %17908 = vmatmul.mubr.msk.f32.gmra.mrb[56].mxu1 %vm1529_vm2, %v22590_v27 }
 0x3ea   : > { %17910 = vmatprep.mubr.msk.f32.mxu1 %vm1529_vm2, %v22600_v36  ;;  %v22718_v21 = vpop.f32.mrb[58].mxu0 }
 0x3eb   : > { %18472 = vmatmul.mubr.f32.gmra.mrb[164].mxu0 %v4342_v20  ;;  %v22720_v30 = vpop.f32.mrb[59].mxu0  ;;  %v4360_v20 = vld [vmem:[#allocation4 + $0x618] sm:$0xff] }
 0x3ec   : > { %20438 = vmatpush3.bf16.msra.mxu0 %v22452_v63  ;;  %18474 = vmatprep.mubr.f32.mxu0 %v4343_v23  ;;  %v4890_v23 = vld [vmem:[#allocation4 + $0x628] sm:$0xff] }
 0x3ed   : > { %20440 = vmatprep.subr.bf16.mxu0 %v22458_v2  ;;  %17911 = vmatmul.mubr.msk.f32.gmra.mrb[58].mxu1 %vm1529_vm2, %v22598_v33 }
 0x3ee   : > { %17913 = vmatprep.mubr.msk.f32.mxu1 %vm1529_vm2, %v22608_v42  ;;  %v22728_v27 = vpop.f32.mrb[60].mxu0 }
 0x3ef   : > { %18475 = vmatmul.mubr.f32.gmra.mrb[166].mxu0 %v4344_v25  ;;  %v22730_v36 = vpop.f32.mrb[61].mxu0  ;;  %v4891_v25 = vld [vmem:[#allocation4 + $0x630] sm:$0xff] }
 0x3f0   : > { %20442 = vmatpush3.bf16.msra.mxu0 %v22458_v2  ;;  %18477 = vmatprep.mubr.f32.mxu0 %v4345_v26  ;;  %v21998_v26 = vmov 0  }
 0x3f1   : > { %20444 = vmatprep.subr.bf16.mxu0 %v22464_v5  ;;  %17914 = vmatmul.mubr.msk.f32.gmra.mrb[60].mxu1 %vm1529_vm2, %v22606_v39 }
 0x3f2   : > { %17916 = vmatprep.mubr.msk.f32.mxu1 %vm1529_vm2, %v22616_v50  ;;  %v22738_v33 = vpop.f32.mrb[62].mxu0  ;;  %21732 = vset.pattern.permute.xlu0 %v21998_v26 }
 0x3f3   : > { %18478 = vmatmul.mubr.f32.gmra.mrb[168].mxu0 %v4346_v29  ;;  %v22740_v42 = vpop.f32.mrb[63].mxu0  ;;  %v4892_v29 = vld [vmem:[#allocation4 + $0x638] sm:$0xff]  ;;  %21733 = vset.pattern.permute.xlu1 %v21998_v26  ;;  %v4909_v26 = vld [vmem:[#allocation4 + $0x6c0] sm:$0xff] }
 0x3f4   : > { %20446 = vmatpush3.bf16.msra.mxu0 %v22464_v5  ;;  %18480 = vmatprep.mubr.f32.mxu0 %v4347_v32 }
 0x3f5   : > { %20448 = vmatprep.subr.bf16.mxu0 %v22470_v8  ;;  %17917 = vmatmul.mubr.msk.f32.gmra.mrb[62].mxu1 %vm1529_vm2, %v22614_v46 }
 0x3f6   : > { %17919 = vmatprep.mubr.msk.f32.mxu1 %vm1529_vm2, %v22624_v1  ;;  %v22748_v39 = vpop.f32.mrb[64].mxu0 }
 0x3f7   : > { %18481 = vmatmul.mubr.f32.gmra.mrb[170].mxu0 %v4348_v34  ;;  %v22750_v50 = vpop.f32.mrb[65].mxu0 }
 0x3f8   : > { %20450 = vmatpush3.bf16.msra.mxu0 %v22470_v8  ;;  %18483 = vmatprep.mubr.f32.mxu0 %v4349_v35  ;;  %v6001_v35 = vld [vmem:[%s25716_s5 + $0x8] sm:$0xff] }
 0x3f9   : > { %20460 = vmatprep.subr.bf16.mxu0 %v22428_v51  ;;  %17920 = vmatmul.mubr.msk.f32.gmra.mrb[64].mxu1 %vm1529_vm2, %v22622_v56 }
 0x3fa   : > { %17922 = vmatprep.mubr.msk.f32.mxu1 %vm1529_vm2, %v22632_v13  ;;  %v22758_v46 = vpop.f32.mrb[66].mxu0  ;;  %v4354_v13 = vld [vmem:[#allocation4 + $0x5e8] sm:$0xff] }
 0x3fb   : > { %18484 = vmatmul.mubr.f32.gmra.mrb[172].mxu0 %v4350_v37  ;;  %v22760_v1 = vpop.f32.mrb[67].mxu0 }
 0x3fc   : > { %18486 = vmatprep.mubr.f32.mxu0 %v4351_v40  ;;  %v4897_v40 = vld [vmem:[#allocation4 + $0x660] sm:$0xff] }
 0x3fd   : > { %17923 = vmatmul.mubr.msk.f32.gmra.mrb[66].mxu1 %vm1529_vm2, %v22630_v10 }
 0x3fe   : > { %17925 = vmatprep.mubr.msk.f32.mxu1 %vm1529_vm2, %v22638_v22  ;;  %v22766_v48 = vpop.f32.mrb[68].mxu0  ;;  %v4356_v22 = vld [vmem:[#allocation4 + $0x5f8] sm:$0xff] }
 0x3ff   : > { %18487 = vmatmul.mubr.f32.gmra.mrb[174].mxu0 %v4352_v43  ;;  %v22768_v56 = vpop.f32.mrb[69].mxu0  ;;  %v6004_v43 = vld [vmem:[%s25716_s5 + $0x20] sm:$0xff] }
 0x400   : > { %18489 = vmatprep.mubr.f32.mxu0 %v4353_v45 }
 0x401   : > { %17926 = vmatmul.mubr.msk.f32.gmra.mrb[68].mxu1 %vm1529_vm2, %v22636_v19 }
 0x402   : > { %17928 = vmatprep.mubr.msk.f32.mxu1 %vm1529_vm2, %v22644_v31  ;;  %v22774_v62 = vpop.f32.mrb[70].mxu0  ;;  %v20295_v31 = vpack.c.bf16 %v2902_v0, %v2901_v44  ;;  %v4901_v44 = vld [vmem:[#allocation4 + $0x680] sm:$0xff]  ;;  %v6008_v0 = vld [vmem:[%s25716_s5 + $0x40] sm:$0xff] }
 0x403   : > { %18490 = vmatmul.mubr.f32.gmra.mrb[176].mxu0 %v4354_v13  ;;  %v22776_v10 = vpop.f32.mrb[71].mxu0  ;;  %v4899_v13 = vld [vmem:[#allocation4 + $0x670] sm:$0xff] }
 0x404   : > { %18492 = vmatprep.mubr.f32.mxu0 %v4355_v49  ;;  %v6006_v49 = vld [vmem:[%s25716_s5 + $0x30] sm:$0xff] }
 0x405   : > { %17929 = vmatmul.mubr.msk.f32.gmra.mrb[70].mxu1 %vm1529_vm2, %v22642_v28 }
 0x406   : > { %18013 = vmatprep.mubr.msk.f32.mxu1 %vm1529_vm2, %v22652_v41  ;;  %v22782_v19 = vpop.f32.mrb[72].mxu0 }
 0x407   : > { %18493 = vmatmul.mubr.f32.gmra.mrb[178].mxu0 %v4356_v22  ;;  %v22784_v6 = vpop.f32.mrb[73].mxu0 }
 0x408   : > { %18495 = vmatprep.mubr.f32.mxu0 %v4357_v61 }
 0x409   : > { %18014 = vmatmul.mubr.msk.f32.vlgmr.msra.gmra.mrb[44].mxu1 %vm1529_vm2, %v22650_v38  ;;  %v4889_v38 = vld [vmem:[#allocation4 + $0x620] sm:$0xff] }
 0x40a   : > { %18016 = vmatprep.mubr.msk.f32.mxu1 %vm1529_vm2, %v22661_v52  ;;  %20294 = vmatpush3.bf16.msra.mxu1 %v22663_v53  ;;  %v22791_v28 = vpop.f32.mrb[74].mxu0 }
 0x40b   : > { %18496 = vmatmul.mubr.f32.gmra.mrb[180].mxu0 %v4358_v7  ;;  %20296 = vmatprep.subr.bf16.mxu1 %v20295_v31  ;;  %v22793_v41 = vpop.f32.mrb[75].mxu0  ;;  %v6010_v7 = vld [vmem:[%s25716_s5 + $0x50] sm:$0xff] }
 0x40c   : > { %18498 = vmatprep.mubr.f32.mxu0 %v4359_v16  ;;  %v6012_v16 = vld [vmem:[%s25716_s5 + $0x60] sm:$0xff] }
 0x40d   : > { %18017 = vmatmul.mubr.msk.f32.gmra.mrb[46].mxu1 %vm1529_vm2, %v22659_v47 }
 0x40e   : > { %18019 = vmatprep.mubr.msk.f32.mxu1 %vm1529_vm2, %v22671_v59  ;;  %20298 = vmatpush3.bf16.msra.mxu1 %v20295_v31  ;;  %v22801_v52 = vpop.f32.mrb[76].mxu0  ;;  %v4903_v31 = vld [vmem:[#allocation4 + $0x690] sm:$0xff] }
 0x40f   : > { %18499 = vmatmul.mubr.f32.gmra.mrb[182].mxu0 %v4360_v20  ;;  %v22803_v53 = vpop.f32.mrb[77].mxu0  ;;  %20332 = vmatprep.subr.bf16.mxu1 %v22795_v17 }
 0x410   : > { %18583 = vmatprep.mubr.f32.mxu0 %v4889_v38  ;;  %v4907_v38 = vld [vmem:[#allocation4 + $0x6b0] sm:$0xff] }
 0x411   : > { %18020 = vmatmul.mubr.msk.f32.gmra.mrb[48].mxu1 %vm1529_vm2, %v22669_v58  ;;  %v4893_v58 = vld [vmem:[#allocation4 + $0x640] sm:$0xff] }
 0x412   : > { %18022 = vmatprep.mubr.msk.f32.mxu1 %vm1529_vm2, %v22680_v4  ;;  %v22810_v47 = vpop.f32.mrb[78].mxu0  ;;  %v6000_v4 = vld [vmem:[%s25716_s5] sm:$0xff] }
 0x413   : > { %18584 = vmatmul.mubr.f32.vlgmr.msra.gmra.mrb[184].mxu0 %v4890_v23  ;;  %v22812_v59 = vpop.f32.mrb[79].mxu0  ;;  %6030 = vperm.xlu0 %21732, %v6000_v4   ;;  %v6013_v23 = vld [vmem:[%s25716_s5 + $0x68] sm:$0xff] }
 0x414   : > { %20462 = vmatpush3.bf16.msra.mxu0 %v22428_v51  ;;  %18586 = vmatprep.mubr.f32.mxu0 %v4891_v25  ;;  %v4894_v51 = vld [vmem:[#allocation4 + $0x648] sm:$0xff] }
 0x415   : > { %20464 = vmatprep.subr.bf16.mxu0 %v22434_v54  ;;  %18023 = vmatmul.mubr.msk.f32.gmra.mrb[50].mxu1 %vm1529_vm2, %v22678_v55  ;;  %v4895_v55 = vld [vmem:[#allocation4 + $0x650] sm:$0xff] }
 0x416   : > { %18025 = vmatprep.mubr.msk.f32.mxu1 %vm1529_vm2, %v22690_v12  ;;  %v22823_v32 = vpop.f32.mrb[80].mxu0  ;;  %v6002_v12 = vld [vmem:[%s25716_s5 + $0x10] sm:$0xff] }
 0x417   : > { %v22825_v34 = vpop.f32.mrb[81].mxu0  ;;  %18587 = vmatmul.mubr.f32.gmra.mrb[186].mxu0 %v4892_v29  ;;  %6040 = vperm.xlu1 %21733, %v6002_v12   ;;  %v6015_v29 = vld [vmem:[%s25716_s5 + $0x78] sm:$0xff] }
 0x418   : > { %20466 = vmatpush3.bf16.msra.mxu0 %v22434_v54  ;;  %18589 = vmatprep.mubr.f32.mxu0 %v4893_v58 }
 0x419   : > { %20468 = vmatprep.subr.bf16.mxu0 %v22440_v57  ;;  %18026 = vmatmul.mubr.msk.f32.gmra.mrb[52].mxu1 %vm1529_vm2, %v22688_v3  ;;  %v4896_v3 = vld [vmem:[#allocation4 + $0x658] sm:$0xff] }
 0x41a   : > { %18028 = vmatprep.mubr.msk.f32.mxu1 %vm1529_vm2, %v22700_v18  ;;  %v22839_v54 = vpop.f32.mrb[82].mxu0  ;;  %6035 = vperm.xlu0 %21732, %v6001_v35   ;;  %v6003_v18 = vld [vmem:[%s25716_s5 + $0x18] sm:$0xff] }
 0x41b   : > { %v22841_v37 = vpop.f32.mrb[83].mxu0  ;;  %18590 = vmatmul.mubr.f32.gmra.mrb[188].mxu0 %v4894_v51  ;;  %6045 = vperm.xlu1 %21733, %v6003_v18   ;;  %v4911_v51 = vld [vmem:[#allocation4 + $0x6d0] sm:$0xff]  ;;  %v4913_v18 = vld [vmem:[#allocation4 + $0x6e0] sm:$0xff] }
 0x41c   : > { %20470 = vmatpush3.bf16.msra.mxu0 %v22440_v57  ;;  %18592 = vmatprep.mubr.f32.mxu0 %v4895_v55  ;;  %v6017_v55 = vld [vmem:[%s25716_s5 + $0x88] sm:$0xff] }
 0x41d   : > { %20472 = vmatprep.subr.bf16.mxu0 %v22446_v60  ;;  %18029 = vmatmul.mubr.msk.f32.gmra.mrb[54].mxu1 %vm1529_vm2, %v22698_v9  ;;  %v4898_v9 = vld [vmem:[#allocation4 + $0x668] sm:$0xff] }
 0x41e   : > { %18031 = vmatprep.mubr.msk.f32.mxu1 %vm1529_vm2, %v22710_v24  ;;  %v22855_v57 = vpop.f32.mrb[84].mxu0  ;;  %6050 = vperm.xlu0 %21732, %v6004_v43   ;;  %v6005_v24 = vld [vmem:[%s25716_s5 + $0x28] sm:$0xff]  ;;  %v6019_v43 = vld [vmem:[%s25716_s5 + $0x98] sm:$0xff] }
 0x41f   : > { %v22857_v45 = vpop.f32.mrb[85].mxu0  ;;  %18593 = vmatmul.mubr.f32.gmra.mrb[190].mxu0 %v4896_v3  ;;  %6055 = vperm.xlu1 %21733, %v6005_v24   ;;  %v3458_v3 = vld [vmem:[#allocation6 + $0x98] sm:$0xff] }
 0x420   : > { %20474 = vmatpush3.bf16.msra.mxu0 %v22446_v60  ;;  %18595 = vmatprep.mubr.f32.mxu0 %v4897_v40  ;;  %v4912_v40 = vld [vmem:[#allocation4 + $0x6d8] sm:$0xff] }
 0x421   : > { %20476 = vmatprep.subr.bf16.mxu0 %v22452_v63  ;;  %18032 = vmatmul.mubr.msk.f32.gmra.mrb[56].mxu1 %vm1529_vm2, %v22708_v15  ;;  %v4900_v15 = vld [vmem:[#allocation4 + $0x678] sm:$0xff] }
 0x422   : > { %18034 = vmatprep.mubr.msk.f32.mxu1 %vm1529_vm2, %v22720_v30  ;;  %v22871_v60 = vpop.f32.mrb[86].mxu0  ;;  %6060 = vperm.xlu0 %21732, %v6006_v49   ;;  %v6007_v30 = vld [vmem:[%s25716_s5 + $0x38] sm:$0xff]  ;;  %v4011_v49 = vld [vmem:[#allocation6 + $0xa0] sm:$0xff] }
 0x423   : > { %v22873_v22 = vpop.f32.mrb[87].mxu0  ;;  %18596 = vmatmul.mubr.f32.gmra.mrb[192].mxu0 %v4898_v9  ;;  %6065 = vperm.xlu1 %21733, %v6007_v30  }
 0x424   : > { %20478 = vmatpush3.bf16.msra.mxu0 %v22452_v63  ;;  %18598 = vmatprep.mubr.f32.mxu0 %v4899_v13 }
 0x425   : > { %20480 = vmatprep.subr.bf16.mxu0 %v22458_v2  ;;  %18035 = vmatmul.mubr.msk.f32.gmra.mrb[58].mxu1 %vm1529_vm2, %v22718_v21  ;;  %v4902_v21 = vld [vmem:[#allocation4 + $0x688] sm:$0xff] }
 0x426   : > { %18037 = vmatprep.mubr.msk.f32.mxu1 %vm1529_vm2, %v22730_v36  ;;  %v22887_v63 = vpop.f32.mrb[88].mxu0  ;;  %6070 = vperm.xlu0 %21732, %v6008_v0   ;;  %v6009_v36 = vld [vmem:[%s25716_s5 + $0x48] sm:$0xff]  ;;  %v6022_v0 = vld [vmem:[%s25716_s5 + $0xb0] sm:$0xff] }
 0x427   : > { %v22889_v61 = vpop.f32.mrb[89].mxu0  ;;  %18599 = vmatmul.mubr.f32.gmra.mrb[194].mxu0 %v4900_v15  ;;  %6075 = vperm.xlu1 %21733, %v6009_v36   ;;  %v4012_v15 = vld [vmem:[#allocation6 + $0xa8] sm:$0xff] }
 0x428   : > { %20482 = vmatpush3.bf16.msra.mxu0 %v22458_v2  ;;  %18601 = vmatprep.mubr.f32.mxu0 %v4901_v44  ;;  %v4915_v44 = vld [vmem:[#allocation4 + $0x6f0] sm:$0xff] }
 0x429   : > { %20484 = vmatprep.subr.bf16.mxu0 %v22464_v5  ;;  %18038 = vmatmul.mubr.msk.f32.gmra.mrb[60].mxu1 %vm1529_vm2, %v22728_v27  ;;  %v4904_v27 = vld [vmem:[#allocation4 + $0x698] sm:$0xff] }
 0x42a   : > { %18040 = vmatprep.mubr.msk.f32.mxu1 %vm1529_vm2, %v22740_v42  ;;  %v22903_v2 = vpop.f32.mrb[90].mxu0  ;;  %6080 = vperm.xlu0 %21732, %v6010_v7   ;;  %v6011_v42 = vld [vmem:[%s25716_s5 + $0x58] sm:$0xff]  ;;  %v6024_v7 = vld [vmem:[%s25716_s5 + $0xc0] sm:$0xff] }
 0x42b   : > { %v22905_v11 = vpop.f32.mrb[91].mxu0  ;;  %18602 = vmatmul.mubr.f32.gmra.mrb[196].mxu0 %v4902_v21  ;;  %6085 = vperm.xlu1 %21733, %v6011_v42  }
 0x42c   : > { %20486 = vmatpush3.bf16.msra.mxu0 %v22464_v5  ;;  %18604 = vmatprep.mubr.f32.mxu0 %v4903_v31  ;;  %v4916_v31 = vld [vmem:[#allocation4 + $0x6f8] sm:$0xff] }
 0x42d   : > { %20488 = vmatprep.subr.bf16.mxu0 %v22470_v8  ;;  %18041 = vmatmul.mubr.msk.f32.gmra.mrb[62].mxu1 %vm1529_vm2, %v22738_v33  ;;  %v4906_v33 = vld [vmem:[#allocation4 + $0x6a8] sm:$0xff] }
 0x42e   : > { %18043 = vmatprep.mubr.msk.f32.mxu1 %vm1529_vm2, %v22750_v50  ;;  %v22919_v5 = vpop.f32.mrb[92].mxu0  ;;  %6090 = vperm.xlu0 %21732, %v6012_v16   ;;  %v6014_v50 = vld [vmem:[%s25716_s5 + $0x70] sm:$0xff] }
 0x42f   : > { %v22921_v20 = vpop.f32.mrb[93].mxu0  ;;  %18605 = vmatmul.mubr.f32.gmra.mrb[198].mxu0 %v4904_v27  ;;  %6095 = vperm.xlu1 %21733, %v6013_v23   ;;  %v6026_v16 = vld [vmem:[%s25716_s5 + $0xd0] sm:$0xff] }
 0x430   : > { %20490 = vmatpush3.bf16.msra.mxu0 %v22470_v8  ;;  %18607 = vmatprep.mubr.f32.mxu0 %v4905_v14  ;;  %v5447_v14 = vld [vmem:[#allocation4 + $0x710] sm:$0xff] }
 0x431   : > { %18044 = vmatmul.mubr.msk.f32.gmra.mrb[64].mxu1 %vm1529_vm2, %v22748_v39  ;;  %v4908_v39 = vld [vmem:[#allocation4 + $0x6b8] sm:$0xff] }
 0x432   : > { %18046 = vmatprep.mubr.msk.f32.mxu1 %vm1529_vm2, %v22760_v1  ;;  %v22934_v25 = vpop.f32.mrb[94].mxu0  ;;  %6100 = vperm.xlu0 %21732, %v6014_v50   ;;  %v6016_v1 = vld [vmem:[%s25716_s5 + $0x80] sm:$0xff] }
 0x433   : > { %v22936_v8 = vpop.f32.mrb[95].mxu0  ;;  %18608 = vmatmul.mubr.f32.gmra.mrb[200].mxu0 %v4906_v33  ;;  %6105 = vperm.xlu1 %21733, %v6015_v29   ;;  %v6454_v50 = vld [vmem:[%s25719_s8] sm:$0xff] }
 0x434   : > { %18610 = vmatprep.mubr.f32.mxu0 %v4907_v38  ;;  %v5449_v38 = vld [vmem:[#allocation4 + $0x720] sm:$0xff] }
 0x435   : > { %18047 = vmatmul.mubr.msk.f32.gmra.mrb[66].mxu1 %vm1529_vm2, %v22758_v46  ;;  %v4910_v46 = vld [vmem:[#allocation4 + $0x6c8] sm:$0xff] }
 0x436   : > { %18049 = vmatprep.mubr.msk.f32.mxu1 %vm1529_vm2, %v22768_v56  ;;  %v22948_v58 = vpop.f32.mrb[96].mxu0  ;;  %6110 = vperm.xlu0 %21732, %v6016_v1   ;;  %v6018_v56 = vld [vmem:[%s25716_s5 + $0x90] sm:$0xff] }
 0x437   : > { %v22950_v4 = vpop.f32.mrb[97].mxu0  ;;  %18611 = vmatmul.mubr.f32.gmra.mrb[202].mxu0 %v4908_v39  ;;  %6115 = vperm.xlu1 %21733, %v6017_v55   ;;  %v6456_v1 = vld [vmem:[%s25719_s8 + $0x10] sm:$0xff] }
 0x438   : > { %18613 = vmatprep.mubr.f32.mxu0 %v4909_v26  ;;  %v5451_v26 = vld [vmem:[#allocation4 + $0x730] sm:$0xff] }
 0x439   : > { %18050 = vmatmul.mubr.msk.f32.gmra.mrb[68].mxu1 %vm1529_vm2, %v22766_v48  ;;  %v3457_v48 = vld [vmem:[#allocation6 + $0x90] sm:$0xff] }
 0x43a   : > { %18052 = vmatprep.mubr.msk.f32.mxu1 %vm1529_vm2, %v22776_v10  ;;  %v22962_v12 = vpop.f32.mrb[98].mxu0  ;;  %6120 = vperm.xlu0 %21732, %v6018_v56   ;;  %v6020_v10 = vld [vmem:[%s25716_s5 + $0xa0] sm:$0xff]  ;;  %v20335_v13 = vpack.c.bf16 %v3458_v3, %v3457_v48 }
 0x43b   : > { %v22964_v35 = vpop.f32.mrb[99].mxu0  ;;  %18614 = vmatmul.mubr.f32.gmra.mrb[204].mxu0 %v4910_v46  ;;  %6125 = vperm.xlu1 %21733, %v6019_v43   ;;  %v6458_v56 = vld [vmem:[%s25719_s8 + $0x20] sm:$0xff] }
 0x43c   : > { %18616 = vmatprep.mubr.f32.mxu0 %v4911_v51  ;;  %v5453_v51 = vld [vmem:[#allocation4 + $0x740] sm:$0xff]  ;;  %v5455_v3 = vld [vmem:[#allocation4 + $0x750] sm:$0xff] }
 0x43d   : > { %18053 = vmatmul.mubr.msk.f32.gmra.mrb[70].mxu1 %vm1529_vm2, %v22774_v62  ;;  %v4914_v62 = vld [vmem:[#allocation4 + $0x6e8] sm:$0xff] }
 0x43e   : > { %18137 = vmatprep.mubr.msk.f32.mxu1 %vm1529_vm2, %v22784_v6  ;;  %v22976_v9 = vpop.f32.mrb[100].mxu0  ;;  %6130 = vperm.xlu0 %21732, %v6020_v10   ;;  %v6021_v6 = vld [vmem:[%s25716_s5 + $0xa8] sm:$0xff]  ;;  %v5457_v10 = vld [vmem:[#allocation4 + $0x760] sm:$0xff] }
 0x43f   : > { %v22978_v24 = vpop.f32.mrb[101].mxu0  ;;  %18617 = vmatmul.mubr.f32.gmra.mrb[206].mxu0 %v4912_v40  ;;  %6135 = vperm.xlu1 %21733, %v6021_v6   ;;  %v6464_v6 = vld [vmem:[%s25719_s8 + $0x50] sm:$0xff] }
 0x440   : > { %18619 = vmatprep.mubr.f32.mxu0 %v4913_v18  ;;  %v6460_v18 = vld [vmem:[%s25719_s8 + $0x30] sm:$0xff] }
 0x441   : > { %18138 = vmatmul.mubr.msk.f32.vlgmr.msra.gmra.mrb[44].mxu1 %vm1529_vm2, %v22782_v19  ;;  %v22995_v19 = vpack.c.bf16 %v4012_v15, %v4011_v49  ;;  %v5459_v15 = vld [vmem:[#allocation4 + $0x770] sm:$0xff] }
 0x442   : > { %18140 = vmatprep.mubr.msk.f32.mxu1 %vm1529_vm2, %v22793_v41  ;;  %20334 = vmatpush3.bf16.msra.mxu1 %v22795_v17  ;;  %v22988_v30 = vpop.f32.mrb[102].mxu0  ;;  %v5445_v41 = vld [vmem:[#allocation4 + $0x700] sm:$0xff]  ;;  %v6023_v17 = vld [vmem:[%s25716_s5 + $0xb8] sm:$0xff] }
 0x443   : > { %20336 = vmatprep.subr.bf16.mxu1 %v20335_v13  ;;  %v22993_v21 = vpop.f32.mrb[103].mxu0  ;;  %18620 = vmatmul.mubr.f32.gmra.mrb[208].mxu0 %v4914_v62  ;;  %v6462_v62 = vld [vmem:[%s25719_s8 + $0x40] sm:$0xff] }
 0x444   : > { %18622 = vmatprep.mubr.f32.mxu0 %v4915_v44  ;;  %6140 = vperm.xlu0 %21732, %v6022_v0  }
 0x445   : > { %18141 = vmatmul.mubr.msk.f32.gmra.mrb[46].mxu1 %vm1529_vm2, %v22791_v28  ;;  %v5446_v28 = vld [vmem:[#allocation4 + $0x708] sm:$0xff]  ;;  %6145 = vperm.xlu1 %21733, %v6023_v17   ;;  %v6466_v17 = vld [vmem:[%s25719_s8 + $0x60] sm:$0xff] }
 0x446   : > { %18143 = vmatprep.mubr.msk.f32.mxu1 %vm1529_vm2, %v22803_v53  ;;  %20338 = vmatpush3.bf16.msra.mxu1 %v20335_v13  ;;  %v23004_v36 = vpop.f32.mrb[104].mxu0  ;;  %v6025_v53 = vld [vmem:[%s25716_s5 + $0xc8] sm:$0xff] }
 0x447   : > { %v23009_v27 = vpop.f32.mrb[105].mxu0  ;;  %18623 = vmatmul.mubr.f32.gmra.mrb[210].mxu0 %v4916_v31  ;;  %20372 = vmatprep.subr.bf16.mxu1 %v22995_v19  ;;  %v5461_v31 = vld [vmem:[#allocation4 + $0x780] sm:$0xff] }
 0x448   : > { %18707 = vmatprep.mubr.f32.mxu0 %v5445_v41  ;;  %6150 = vperm.xlu0 %21732, %v6024_v7  }
 0x449   : > { %18144 = vmatmul.mubr.msk.f32.gmra.mrb[48].mxu1 %vm1529_vm2, %v22801_v52  ;;  %v5448_v52 = vld [vmem:[#allocation4 + $0x718] sm:$0xff]  ;;  %6155 = vperm.xlu1 %21733, %v6025_v53   ;;  %v6468_v53 = vld [vmem:[%s25719_s8 + $0x70] sm:$0xff] }
 0x44a   : > { %18146 = vmatprep.mubr.msk.f32.mxu1 %vm1529_vm2, %v22812_v59  ;;  %v23019_v42 = vpop.f32.mrb[106].mxu0  ;;  %v6027_v59 = vld [vmem:[%s25716_s5 + $0xd8] sm:$0xff] }
 0x44b   : > { %v23024_v33 = vpop.f32.mrb[107].mxu0  ;;  %18708 = vmatmul.mubr.f32.vlgmr.msra.gmra.mrb[212].mxu0 %v5446_v28  ;;  %v5463_v28 = vld [vmem:[#allocation4 + $0x790] sm:$0xff] }
 0x44c   : > { %18710 = vmatprep.mubr.f32.mxu0 %v5447_v14  ;;  %6160 = vperm.xlu0 %21732, %v6026_v16  }
 0x44d   : > { %18147 = vmatmul.mubr.msk.f32.gmra.mrb[50].mxu1 %vm1529_vm2, %v22810_v47  ;;  %v5450_v47 = vld [vmem:[#allocation4 + $0x728] sm:$0xff]  ;;  %6165 = vperm.xlu1 %21733, %v6027_v59   ;;  %v13829_v59 = vld [vmem:[%s25724_s13] sm:$0xff] }
 0x44e   : > { %18149 = vmatprep.mubr.msk.f32.mxu1 %vm1529_vm2, %v22825_v34  ;;  %v23033_v23 = vpop.f32.mrb[108].mxu0  ;;  %v6455_v34 = vld [vmem:[%s25719_s8 + $0x8] sm:$0xff] }
 0x44f   : > { %v23038_v39 = vpop.f32.mrb[109].mxu0  ;;  %18711 = vmatmul.mubr.f32.gmra.mrb[214].mxu0 %v5448_v52  ;;  %v5465_v52 = vld [vmem:[#allocation4 + $0x7a0] sm:$0xff] }
 0x450   : > { %18713 = vmatprep.mubr.f32.mxu0 %v5449_v38  ;;  %6472 = vperm.xlu0 %21732, %v6454_v50  }
 0x451   : > { %18150 = vmatmul.mubr.msk.f32.gmra.mrb[52].mxu1 %vm1529_vm2, %v22823_v32  ;;  %v5452_v32 = vld [vmem:[#allocation4 + $0x738] sm:$0xff]  ;;  %6477 = vperm.xlu1 %21733, %v6455_v34   ;;  %v13831_v34 = vld [vmem:[%s25724_s13 + $0x10] sm:$0xff] }
 0x452   : > { %18152 = vmatprep.mubr.msk.f32.mxu1 %vm1529_vm2, %v22841_v37  ;;  %v23047_v29 = vpop.f32.mrb[110].mxu0  ;;  %v6457_v37 = vld [vmem:[%s25719_s8 + $0x18] sm:$0xff] }
 0x453   : > { %v23052_v46 = vpop.f32.mrb[111].mxu0  ;;  %18714 = vmatmul.mubr.f32.gmra.mrb[216].mxu0 %v5450_v47  ;;  %v5467_v47 = vld [vmem:[#allocation4 + $0x7b0] sm:$0xff] }
 0x454   : > { %18716 = vmatprep.mubr.f32.mxu0 %v5451_v26  ;;  %6482 = vperm.xlu0 %21732, %v6456_v1  }
 0x455   : > { %18153 = vmatmul.mubr.msk.f32.gmra.mrb[54].mxu1 %vm1529_vm2, %v22839_v54  ;;  %v5454_v54 = vld [vmem:[#allocation4 + $0x748] sm:$0xff]  ;;  %6487 = vperm.xlu1 %21733, %v6457_v37   ;;  %v5469_v37 = vld [vmem:[#allocation4 + $0x7c0] sm:$0xff] }
 0x456   : > { %18155 = vmatprep.mubr.msk.f32.mxu1 %vm1529_vm2, %v22857_v45  ;;  %v23061_v55 = vpop.f32.mrb[112].mxu0  ;;  %v6459_v45 = vld [vmem:[%s25719_s8 + $0x28] sm:$0xff] }
 0x457   : > { %v23066_v48 = vpop.f32.mrb[113].mxu0  ;;  %18717 = vmatmul.mubr.f32.gmra.mrb[218].mxu0 %v5452_v32  ;;  %v4013_v32 = vld [vmem:[#allocation6 + $0xb0] sm:$0xff] }
 0x458   : > { %18719 = vmatprep.mubr.f32.mxu0 %v5453_v51  ;;  %6492 = vperm.xlu0 %21732, %v6458_v56   ;;  %v5468_v51 = vld [vmem:[#allocation4 + $0x7b8] sm:$0xff] }
 0x459   : > { %18156 = vmatmul.mubr.msk.f32.gmra.mrb[56].mxu1 %vm1529_vm2, %v22855_v57  ;;  %v5456_v57 = vld [vmem:[#allocation4 + $0x758] sm:$0xff]  ;;  %6497 = vperm.xlu1 %21733, %v6459_v45  }
 0x45a   : > { %18158 = vmatprep.mubr.msk.f32.mxu1 %vm1529_vm2, %v22873_v22  ;;  %v23075_v40 = vpop.f32.mrb[114].mxu0  ;;  %v6461_v22 = vld [vmem:[%s25719_s8 + $0x38] sm:$0xff] }
 0x45b   : > { %v23080_v43 = vpop.f32.mrb[115].mxu0  ;;  %18720 = vmatmul.mubr.f32.gmra.mrb[220].mxu0 %v5454_v54  ;;  %v13833_v54 = vld [vmem:[%s25724_s13 + $0x20] sm:$0xff] }
 0x45c   : > { %18722 = vmatprep.mubr.f32.mxu0 %v5455_v3  ;;  %6502 = vperm.xlu0 %21732, %v6460_v18   ;;  %v4567_v18 = vld [vmem:[#allocation6 + $0xc0] sm:$0xff] }
 0x45d   : > { %18159 = vmatmul.mubr.msk.f32.gmra.mrb[58].mxu1 %vm1529_vm2, %v22871_v60  ;;  %v5458_v60 = vld [vmem:[#allocation4 + $0x768] sm:$0xff]  ;;  %6507 = vperm.xlu1 %21733, %v6461_v22  }
 0x45e   : > { %18161 = vmatprep.mubr.msk.f32.mxu1 %vm1529_vm2, %v22889_v61  ;;  %v23089_v13 = vpop.f32.mrb[116].mxu0  ;;  %v6463_v61 = vld [vmem:[%s25719_s8 + $0x48] sm:$0xff] }
 0x45f   : > { %v23094_v49 = vpop.f32.mrb[117].mxu0  ;;  %18723 = vmatmul.mubr.f32.gmra.mrb[222].mxu0 %v5456_v57  ;;  %v4568_v57 = vld [vmem:[#allocation6 + $0xc8] sm:$0xff] }
 0x460   : > { %18725 = vmatprep.mubr.f32.mxu0 %v5457_v10  ;;  %6512 = vperm.xlu0 %21732, %v6462_v62   ;;  %v5471_v10 = vld [vmem:[#allocation4 + $0x7d0] sm:$0xff]  ;;  %v13835_v62 = vld [vmem:[%s25724_s13 + $0x30] sm:$0xff] }
 0x461   : > { %18162 = vmatmul.mubr.msk.f32.gmra.mrb[60].mxu1 %vm1529_vm2, %v22887_v63  ;;  %v5460_v63 = vld [vmem:[#allocation4 + $0x778] sm:$0xff]  ;;  %6517 = vperm.xlu1 %21733, %v6463_v61   ;;  %v13837_v61 = vld [vmem:[%s25724_s13 + $0x40] sm:$0xff] }
 0x462   : > { %18164 = vmatprep.mubr.msk.f32.mxu1 %vm1529_vm2, %v22905_v11  ;;  %v23103_v44 = vpop.f32.mrb[118].mxu0  ;;  %v6465_v11 = vld [vmem:[%s25719_s8 + $0x58] sm:$0xff] }
 0x463   : > { %v23108_v0 = vpop.f32.mrb[119].mxu0  ;;  %18726 = vmatmul.mubr.f32.gmra.mrb[224].mxu0 %v5458_v60 }
 0x464   : > { %18728 = vmatprep.mubr.f32.mxu0 %v5459_v15  ;;  %6522 = vperm.xlu0 %21732, %v6464_v6   ;;  %v5472_v15 = vld [vmem:[#allocation4 + $0x7d8] sm:$0xff] }
 0x465   : > { %18165 = vmatmul.mubr.msk.f32.gmra.mrb[62].mxu1 %vm1529_vm2, %v22903_v2  ;;  %v5462_v2 = vld [vmem:[#allocation4 + $0x788] sm:$0xff]  ;;  %6527 = vperm.xlu1 %21733, %v6465_v11   ;;  %v13841_v11 = vld [vmem:[%s25724_s13 + $0x60] sm:$0xff] }
 0x466   : > { %18167 = vmatprep.mubr.msk.f32.mxu1 %vm1529_vm2, %v22921_v20  ;;  %v23117_v41 = vpop.f32.mrb[120].mxu0  ;;  %v6467_v20 = vld [vmem:[%s25719_s8 + $0x68] sm:$0xff] }
 0x467   : > { %v23122_v7 = vpop.f32.mrb[121].mxu0  ;;  %18729 = vmatmul.mubr.f32.gmra.mrb[226].mxu0 %v5460_v63  ;;  %v13839_v63 = vld [vmem:[%s25724_s13 + $0x50] sm:$0xff] }
 0x468   : > { %18731 = vmatprep.mubr.f32.mxu0 %v5461_v31  ;;  %6532 = vperm.xlu0 %21732, %v6466_v17  }
 0x469   : > { %18168 = vmatmul.mubr.msk.f32.gmra.mrb[64].mxu1 %vm1529_vm2, %v22919_v5  ;;  %v5464_v5 = vld [vmem:[#allocation4 + $0x798] sm:$0xff]  ;;  %6537 = vperm.xlu1 %21733, %v6467_v20   ;;  %v13845_v20 = vld [vmem:[%s25724_s13 + $0x80] sm:$0xff] }
 0x46a   : > { %18170 = vmatprep.mubr.msk.f32.mxu1 %vm1529_vm2, %v22936_v8  ;;  %v23131_v14 = vpop.f32.mrb[122].mxu0  ;;  %v6469_v8 = vld [vmem:[%s25719_s8 + $0x78] sm:$0xff] }
 0x46b   : > { %v23136_v16 = vpop.f32.mrb[123].mxu0  ;;  %18732 = vmatmul.mubr.f32.gmra.mrb[228].mxu0 %v5462_v2  ;;  %v13843_v2 = vld [vmem:[%s25724_s13 + $0x70] sm:$0xff] }
 0x46c   : > { %18734 = vmatprep.mubr.f32.mxu0 %v5463_v28  ;;  %6542 = vperm.xlu0 %21732, %v6468_v53  }
 0x46d   : > { %18171 = vmatmul.mubr.msk.f32.gmra.mrb[66].mxu1 %vm1529_vm2, %v22934_v25  ;;  %v5466_v25 = vld [vmem:[#allocation4 + $0x7a8] sm:$0xff]  ;;  %6547 = vperm.xlu1 %21733, %v6469_v8   ;;  %v13849_v8 = vld [vmem:[%s25724_s13 + $0xa0] sm:$0xff] }
 0x46e   : > { %18173 = vmatprep.mubr.msk.f32.mxu1 %vm1529_vm2, %v22950_v4  ;;  %v23145_v38 = vpop.f32.mrb[124].mxu0  ;;  %v13830_v4 = vld [vmem:[%s25724_s13 + $0x8] sm:$0xff] }
 0x46f   : > { %v23150_v50 = vpop.f32.mrb[125].mxu0  ;;  %18735 = vmatmul.mubr.f32.gmra.mrb[230].mxu0 %v5464_v5  ;;  %v13847_v5 = vld [vmem:[%s25724_s13 + $0x90] sm:$0xff] }
 0x470   : > { %18737 = vmatprep.mubr.f32.mxu0 %v5465_v52  ;;  %13879 = vperm.xlu0 %21732, %v13829_v59  }
 0x471   : > { %18174 = vmatmul.mubr.msk.f32.gmra.mrb[68].mxu1 %vm1529_vm2, %v22948_v58  ;;  %v4014_v58 = vld [vmem:[#allocation6 + $0xb8] sm:$0xff]  ;;  %13884 = vperm.xlu1 %21733, %v13830_v4   ;;  %v13853_v4 = vld [vmem:[%s25724_s13 + $0xc0] sm:$0xff] }
 0x472   : > { %18176 = vmatprep.mubr.msk.f32.mxu1 %vm1529_vm2, %v22964_v35  ;;  %v23159_v26 = vpop.f32.mrb[126].mxu0  ;;  %v13832_v35 = vld [vmem:[%s25724_s13 + $0x18] sm:$0xff]  ;;  %v20375_v3 = vpack.c.bf16 %v4014_v58, %v4013_v32  ;;  %v13855_v32 = vld [vmem:[%s25724_s13 + $0xd0] sm:$0xff] }
 0x473   : > { %v23164_v1 = vpop.f32.mrb[127].mxu0  ;;  %18738 = vmatmul.mubr.f32.gmra.mrb[232].mxu0 %v5466_v25  ;;  %v13851_v25 = vld [vmem:[%s25724_s13 + $0xb0] sm:$0xff] }
 0x474   : > { %18740 = vmatprep.mubr.f32.mxu0 %v5467_v47  ;;  %13889 = vperm.xlu0 %21732, %v13831_v34  }
 0x475   : > { %18177 = vmatmul.mubr.msk.f32.gmra.mrb[70].mxu1 %vm1529_vm2, %v22962_v12  ;;  %v5470_v12 = vld [vmem:[#allocation4 + $0x7c8] sm:$0xff]  ;;  %13894 = vperm.xlu1 %21733, %v13832_v35   ;;  %v13859_v35 = vld [vmem:[%s25724_s13 + $0xf0] sm:$0xff] }
 0x476   : > { %18261 = vmatprep.mubr.msk.f32.mxu1 %vm1529_vm2, %v22978_v24  ;;  %v23173_v56 = vpop.f32.mrb[128].mxu0  ;;  %v13834_v24 = vld [vmem:[%s25724_s13 + $0x28] sm:$0xff] }
 0x477   : > { %v23178_v45 = vpop.f32.mrb[129].mxu0  ;;  %18741 = vmatmul.mubr.f32.gmra.mrb[234].mxu0 %v5468_v51  ;;  %v13857_v51 = vld [vmem:[%s25724_s13 + $0xe0] sm:$0xff] }
 0x478   : > { %18743 = vmatprep.mubr.f32.mxu0 %v5469_v37  ;;  %13899 = vperm.xlu0 %21732, %v13833_v54  }
 0x479   : > { %18262 = vmatmul.mubr.msk.f32.vlgmr.msra.gmra.mrb[44].mxu1 %vm1529_vm2, %v22976_v9  ;;  %v23195_v9 = vpack.c.bf16 %v4568_v57, %v4567_v18  ;;  %13904 = vperm.xlu1 %21733, %v13834_v24   ;;  %v13861_v18 = vld [vmem:[%s25724_s13 + $0x100] sm:$0xff]  ;;  %v5123_v24 = vld [vmem:[#allocation6 + $0xe0] sm:$0xff] }
 0x47a   : > { %18264 = vmatprep.mubr.msk.f32.mxu1 %vm1529_vm2, %v22993_v21  ;;  %20374 = vmatpush3.bf16.msra.mxu1 %v22995_v19  ;;  %v23188_v22 = vpop.f32.mrb[130].mxu0  ;;  %v13836_v21 = vld [vmem:[%s25724_s13 + $0x38] sm:$0xff] }
 0x47b   : > { %20376 = vmatprep.subr.bf16.mxu1 %v20375_v3  ;;  %v23193_v60 = vpop.f32.mrb[131].mxu0  ;;  %18744 = vmatmul.mubr.f32.gmra.mrb[236].mxu0 %v5470_v12  ;;  %v4570_v12 = vld [vmem:[#allocation6 + $0xd8] sm:$0xff] }
 0x47c   : > { %18746 = vmatprep.mubr.f32.mxu0 %v5471_v10  ;;  %13909 = vperm.xlu0 %21732, %v13835_v62   ;;  %v5124_v62 = vld [vmem:[#allocation6 + $0xe8] sm:$0xff] }
 0x47d   : > { %18265 = vmatmul.mubr.msk.f32.gmra.mrb[46].mxu1 %vm1529_vm2, %v22988_v30  ;;  %13914 = vperm.xlu1 %21733, %v13836_v21   ;;  %v13838_v30 = vld [vmem:[%s25724_s13 + $0x48] sm:$0xff] }
 0x47e   : > { %18267 = vmatprep.mubr.msk.f32.mxu1 %vm1529_vm2, %v23009_v27  ;;  %20378 = vmatpush3.bf16.msra.mxu1 %v20375_v3  ;;  %v23204_v19 = vpop.f32.mrb[132].mxu0  ;;  %v4569_v3 = vld [vmem:[#allocation6 + $0xd0] sm:$0xff] }
 0x47f   : > { %v23209_v6 = vpop.f32.mrb[133].mxu0  ;;  %18747 = vmatmul.mubr.f32.gmra.mrb[238].mxu0 %v5472_v15  ;;  %20412 = vmatprep.subr.bf16.mxu1 %v23195_v9  ;;  %v20415_v57 = vpack.c.bf16 %v4570_v12, %v4569_v3  ;;  %v13863_v15 = vld [vmem:[%s25724_s13 + $0x110] sm:$0xff] }
 0x480   : > { %13919 = vperm.xlu0 %21732, %v13837_v61   ;;  %v14359_v12 = vld [vmem:[%s25726_s15 + $0x10] sm:$0xff] }
 0x481   : > { %18268 = vmatmul.mubr.msk.f32.gmra.mrb[48].mxu1 %vm1529_vm2, %v23004_v36  ;;  %13924 = vperm.xlu1 %21733, %v13838_v30   ;;  %v13840_v36 = vld [vmem:[%s25724_s13 + $0x58] sm:$0xff]  ;;  %v13865_v30 = vld [vmem:[%s25724_s13 + $0x120] sm:$0xff] }
 0x482   : > { %18270 = vmatprep.mubr.msk.f32.mxu1 %vm1529_vm2, %v23024_v33  ;;  %v23219_v27 = vpop.f32.mrb[134].mxu0 }
 0x483   : > { %v23224_v31 = vpop.f32.mrb[135].mxu0 }
 0x484   : > { %13929 = vperm.xlu0 %21732, %v13839_v63  }
 0x485   : > { %18271 = vmatmul.mubr.msk.f32.gmra.mrb[50].mxu1 %vm1529_vm2, %v23019_v42  ;;  %13934 = vperm.xlu1 %21733, %v13840_v36   ;;  %v13842_v42 = vld [vmem:[%s25724_s13 + $0x68] sm:$0xff] }
 0x486   : > { %18273 = vmatprep.mubr.msk.f32.mxu1 %vm1529_vm2, %v23038_v39  ;;  %v23233_v33 = vpop.f32.mrb[136].mxu0 }
 0x487   : > { %v23238_v17 = vpop.f32.mrb[137].mxu0 }
 0x488   : > { %13939 = vperm.xlu0 %21732, %v13841_v11   ;;  %v13867_v11 = vld [vmem:[%s25724_s13 + $0x130] sm:$0xff] }
 0x489   : > { %18274 = vmatmul.mubr.msk.f32.gmra.mrb[52].mxu1 %vm1529_vm2, %v23033_v23  ;;  %13944 = vperm.xlu1 %21733, %v13842_v42   ;;  %v13844_v23 = vld [vmem:[%s25724_s13 + $0x78] sm:$0xff] }
 0x48a   : > { %18276 = vmatprep.mubr.msk.f32.mxu1 %vm1529_vm2, %v23052_v46  ;;  %v23247_v39 = vpop.f32.mrb[138].mxu0 }
 0x48b   : > { %v23252_v28 = vpop.f32.mrb[139].mxu0 }
 0x48c   : > { %13949 = vperm.xlu0 %21732, %v13843_v2  }
 0x48d   : > { %18277 = vmatmul.mubr.msk.f32.gmra.mrb[54].mxu1 %vm1529_vm2, %v23047_v29  ;;  %13954 = vperm.xlu1 %21733, %v13844_v23   ;;  %v13846_v29 = vld [vmem:[%s25724_s13 + $0x88] sm:$0xff] }
 0x48e   : > { %18279 = vmatprep.mubr.msk.f32.mxu1 %vm1529_vm2, %v23066_v48  ;;  %v23261_v46 = vpop.f32.mrb[140].mxu0 }
 0x48f   : > { %v23266_v53 = vpop.f32.mrb[141].mxu0 }
 0x490   : > { %13959 = vperm.xlu0 %21732, %v13845_v20   ;;  %v13869_v20 = vld [vmem:[%s25724_s13 + $0x140] sm:$0xff] }
 0x491   : > { %18280 = vmatmul.mubr.msk.f32.gmra.mrb[56].mxu1 %vm1529_vm2, %v23061_v55  ;;  %13964 = vperm.xlu1 %21733, %v13846_v29   ;;  %v13848_v55 = vld [vmem:[%s25724_s13 + $0x98] sm:$0xff] }
 0x492   : > { %18282 = vmatprep.mubr.msk.f32.mxu1 %vm1529_vm2, %v23080_v43  ;;  %v23275_v48 = vpop.f32.mrb[142].mxu0  ;;  %v23399_v61 = vpop.permute.xlu0 %6030 }
 0x493   : > { %v23280_v52 = vpop.f32.mrb[143].mxu0 }
 0x494   : > { %13969 = vperm.xlu0 %21732, %v13847_v5  }
 0x495   : > { %18283 = vmatmul.mubr.msk.f32.gmra.mrb[58].mxu1 %vm1529_vm2, %v23075_v40  ;;  %13974 = vperm.xlu1 %21733, %v13848_v55   ;;  %v13850_v40 = vld [vmem:[%s25724_s13 + $0xa8] sm:$0xff]  ;;  %v13871_v55 = vld [vmem:[%s25724_s13 + $0x150] sm:$0xff] }
 0x496   : > { %18285 = vmatprep.mubr.msk.f32.mxu1 %vm1529_vm2, %v23094_v49  ;;  %v23289_v43 = vpop.f32.mrb[144].mxu0 }
 0x497   : > { %v23294_v59 = vpop.f32.mrb[145].mxu0 }
 0x498   : > { %13979 = vperm.xlu0 %21732, %v13849_v8  }
 0x499   : > { %18286 = vmatmul.mubr.msk.f32.gmra.mrb[60].mxu1 %vm1529_vm2, %v23089_v13  ;;  %13984 = vperm.xlu1 %21733, %v13850_v40   ;;  %v13852_v13 = vld [vmem:[%s25724_s13 + $0xb8] sm:$0xff]  ;;  %v23430_v2 = vpop.permute.xlu0 %6035 }
 0x49a   : > { %18288 = vmatprep.mubr.msk.f32.mxu1 %vm1529_vm2, %v23108_v0  ;;  %v23303_v49 = vpop.f32.mrb[146].mxu0 }
 0x49b   : > { %v23308_v47 = vpop.f32.mrb[147].mxu0 }
 0x49c   : > { %13989 = vperm.xlu0 %21732, %v13851_v25   ;;  %v13873_v25 = vld [vmem:[%s25724_s13 + $0x160] sm:$0xff] }
 0x49d   : > { %18289 = vmatmul.mubr.msk.f32.gmra.mrb[62].mxu1 %vm1529_vm2, %v23103_v44  ;;  %13994 = vperm.xlu1 %21733, %v13852_v13   ;;  %v13854_v44 = vld [vmem:[%s25724_s13 + $0xc8] sm:$0xff] }
 0x49e   : > { %18291 = vmatprep.mubr.msk.f32.mxu1 %vm1529_vm2, %v23122_v7  ;;  %v23317_v0 = vpop.f32.mrb[148].mxu0 }
 0x49f   : > { %v23322_v34 = vpop.f32.mrb[149].mxu0 }
 0x4a0   : > { %13999 = vperm.xlu0 %21732, %v13853_v4  }
 0x4a1   : > { %18292 = vmatmul.mubr.msk.f32.gmra.mrb[64].mxu1 %vm1529_vm2, %v23117_v41  ;;  %14004 = vperm.xlu1 %21733, %v13854_v44   ;;  %v13856_v41 = vld [vmem:[%s25724_s13 + $0xd8] sm:$0xff] }
 0x4a2   : > { %18294 = vmatprep.mubr.msk.f32.mxu1 %vm1529_vm2, %v23136_v16  ;;  %v23331_v7 = vpop.f32.mrb[150].mxu0 }
 0x4a3   : > { %v23336_v58 = vpop.f32.mrb[151].mxu0 }
 0x4a4   : > { %14009 = vperm.xlu0 %21732, %v13855_v32   ;;  %v13875_v32 = vld [vmem:[%s25724_s13 + $0x170] sm:$0xff] }
 0x4a5   : > { %18295 = vmatmul.mubr.msk.f32.gmra.mrb[66].mxu1 %vm1529_vm2, %v23131_v14  ;;  %14014 = vperm.xlu1 %21733, %v13856_v41   ;;  %v13858_v14 = vld [vmem:[%s25724_s13 + $0xe8] sm:$0xff] }
 0x4a6   : > { %18297 = vmatprep.mubr.msk.f32.mxu1 %vm1529_vm2, %v23150_v50  ;;  %v23345_v16 = vpop.f32.mrb[152].mxu0 }
 0x4a7   : > { %v23350_v37 = vpop.f32.mrb[153].mxu0 }
 0x4a8   : > { %14019 = vperm.xlu0 %21732, %v13857_v51  }
 0x4a9   : > { %18298 = vmatmul.mubr.msk.f32.gmra.mrb[68].mxu1 %vm1529_vm2, %v23145_v38  ;;  %14024 = vperm.xlu1 %21733, %v13858_v14   ;;  %v13860_v38 = vld [vmem:[%s25724_s13 + $0xf8] sm:$0xff]  ;;  %v14357_v14 = vld [vmem:[%s25726_s15] sm:$0xff] }
 0x4aa   : > { %18300 = vmatprep.mubr.msk.f32.mxu1 %vm1529_vm2, %v23164_v1  ;;  %v23359_v50 = vpop.f32.mrb[154].mxu0 }
 0x4ab   : > { %v23364_v54 = vpop.f32.mrb[155].mxu0 }
 0x4ac   : > { %14029 = vperm.xlu0 %21732, %v13859_v35  }
 0x4ad   : > { %18301 = vmatmul.mubr.msk.f32.gmra.mrb[70].mxu1 %vm1529_vm2, %v23159_v26  ;;  %14034 = vperm.xlu1 %21733, %v13860_v38   ;;  %v13862_v26 = vld [vmem:[%s25724_s13 + $0x108] sm:$0xff] }
 0x4ae   : > { %18385 = vmatprep.mubr.msk.f32.mxu1 %vm1529_vm2, %v23178_v45  ;;  %v23373_v1 = vpop.f32.mrb[156].mxu0 }
 0x4af   : > { %v23378_v10 = vpop.f32.mrb[157].mxu0 }
 0x4b0   : > { %14039 = vperm.xlu0 %21732, %v13861_v18  }
 0x4b1   : > { %18386 = vmatmul.mubr.msk.f32.vlgmr.msra.gmra.mrb[44].mxu1 %vm1529_vm2, %v23173_v56  ;;  %v23395_v56 = vpack.c.bf16 %v5124_v62, %v5123_v24  ;;  %14044 = vperm.xlu1 %21733, %v13862_v26   ;;  %v14361_v24 = vld [vmem:[%s25726_s15 + $0x20] sm:$0xff] }
 0x4b2   : > { %18388 = vmatprep.mubr.msk.f32.mxu1 %vm1529_vm2, %v23193_v60  ;;  %20414 = vmatpush3.bf16.msra.mxu1 %v23195_v9  ;;  %v23388_v45 = vpop.f32.mrb[158].mxu0  ;;  %v13864_v60 = vld [vmem:[%s25724_s13 + $0x118] sm:$0xff] }
 0x4b3   : > { %20416 = vmatprep.subr.bf16.mxu1 %v20415_v57  ;;  %v23393_v21 = vpop.f32.mrb[159].mxu0 }
 0x4b4   : > { %14049 = vperm.xlu0 %21732, %v13863_v15   ;;  %v14363_v15 = vld [vmem:[%s25726_s15 + $0x30] sm:$0xff] }
 0x4b5   : > { %18389 = vmatmul.mubr.msk.f32.gmra.mrb[46].mxu1 %vm1529_vm2, %v23188_v22  ;;  %v23414_v22 = vpop.permute.xlu1 %6040  ;;  %14054 = vperm.xlu1 %21733, %v13864_v60  }
 0x4b6   : > { %18391 = vmatprep.mubr.msk.f32.mxu1 %vm1529_vm2, %v23209_v6  ;;  %20418 = vmatpush3.bf16.msra.mxu1 %v20415_v57  ;;  %v23406_v9 = vpop.f32.mrb[160].mxu0  ;;  %v13866_v6 = vld [vmem:[%s25724_s13 + $0x128] sm:$0xff] }
 0x4b7   : > { %v23411_v63 = vpop.f32.mrb[161].mxu0  ;;  %20452 = vmatprep.subr.bf16.mxu1 %v23395_v56 }
 0x4b8   : > { %14059 = vperm.xlu0 %21732, %v13865_v30  }
 0x4b9   : > { %18392 = vmatmul.mubr.msk.f32.gmra.mrb[48].mxu1 %vm1529_vm2, %v23204_v19  ;;  %14064 = vperm.xlu1 %21733, %v13866_v6   ;;  %v13868_v19 = vld [vmem:[%s25724_s13 + $0x138] sm:$0xff]  ;;  %v23441_v23 = vpop.permute.xlu1 %6045  ;;  %v14365_v6 = vld [vmem:[%s25726_s15 + $0x40] sm:$0xff] }
 0x4ba   : > { %18394 = vmatprep.mubr.msk.f32.mxu1 %vm1529_vm2, %v23224_v31  ;;  %v23423_v36 = vpop.f32.mrb[162].mxu0 }
 0x4bb   : > { %v23428_v42 = vpop.f32.mrb[163].mxu0 }
 0x4bc   : > { %14069 = vperm.xlu0 %21732, %v13867_v11  }
 0x4bd   : > { %18395 = vmatmul.mubr.msk.f32.gmra.mrb[50].mxu1 %vm1529_vm2, %v23219_v27  ;;  %14074 = vperm.xlu1 %21733, %v13868_v19   ;;  %v23450_v27 = vpop.permute.xlu0 %6050  ;;  %v23464_v40 = vpop.permute.xlu1 %6055 }
 0x4be   : > { %18397 = vmatprep.mubr.msk.f32.mxu1 %vm1529_vm2, %v23238_v17  ;;  %v23439_v31 = vpop.f32.mrb[164].mxu0  ;;  %v13870_v17 = vld [vmem:[%s25724_s13 + $0x148] sm:$0xff] }
 0x4bf   : > { %v23446_v29 = vpop.f32.mrb[165].mxu0 }
 0x4c0   : > { %14079 = vperm.xlu0 %21732, %v13869_v20  }
 0x4c1   : > { %18398 = vmatmul.mubr.msk.f32.gmra.mrb[52].mxu1 %vm1529_vm2, %v23233_v33  ;;  %14084 = vperm.xlu1 %21733, %v13870_v17   ;;  %v13872_v33 = vld [vmem:[%s25724_s13 + $0x158] sm:$0xff]  ;;  %v23480_v4 = vpop.permute.xlu0 %6060  ;;  %v23491_v44 = vpop.permute.xlu1 %6065  ;;  %v14367_v17 = vld [vmem:[%s25726_s15 + $0x50] sm:$0xff] }
 0x4c2   : > { %18400 = vmatprep.mubr.msk.f32.mxu1 %vm1529_vm2, %v23252_v28  ;;  %v23457_v5 = vpop.f32.mrb[166].mxu0 }
 0x4c3   : > { %v23462_v8 = vpop.f32.mrb[167].mxu0 }
 0x4c4   : > { %14089 = vperm.xlu0 %21732, %v13871_v55  }
 0x4c5   : > { %18401 = vmatmul.mubr.msk.f32.gmra.mrb[54].mxu1 %vm1529_vm2, %v23247_v39  ;;  %14094 = vperm.xlu1 %21733, %v13872_v33   ;;  %v13874_v39 = vld [vmem:[%s25724_s13 + $0x168] sm:$0xff]  ;;  %v23514_v3 = vpop.permute.xlu1 %6075  ;;  %v5125_v33 = vld [vmem:[#allocation6 + $0xf0] sm:$0xff] }
 0x4c6   : > { %18403 = vmatprep.mubr.msk.f32.mxu1 %vm1529_vm2, %v23266_v53  ;;  %v23473_v28 = vpop.f32.mrb[168].mxu0 }
 0x4c7   : > { %v23478_v13 = vpop.f32.mrb[169].mxu0 }
 0x4c8   : > { %14099 = vperm.xlu0 %21732, %v13873_v25  }
 0x4c9   : > { %18404 = vmatmul.mubr.msk.f32.gmra.mrb[56].mxu1 %vm1529_vm2, %v23261_v46  ;;  %14104 = vperm.xlu1 %21733, %v13874_v39   ;;  %v23500_v46 = vpop.permute.xlu0 %6070  ;;  %v23541_v57 = vpop.permute.xlu1 %6085 }
 0x4ca   : > { %18406 = vmatprep.mubr.msk.f32.mxu1 %vm1529_vm2, %v23280_v52  ;;  %v23489_v53 = vpop.f32.mrb[170].mxu0  ;;  %v13876_v52 = vld [vmem:[%s25724_s13 + $0x178] sm:$0xff] }
 0x4cb   : > { %v23496_v41 = vpop.f32.mrb[171].mxu0 }
 0x4cc   : > { %14109 = vperm.xlu0 %21732, %v13875_v32   ;;  %v14369_v32 = vld [vmem:[%s25726_s15 + $0x60] sm:$0xff] }
 0x4cd   : > { %18407 = vmatmul.mubr.msk.f32.gmra.mrb[58].mxu1 %vm1529_vm2, %v23275_v48  ;;  %14114 = vperm.xlu1 %21733, %v13876_v52   ;;  %v14358_v48 = vld [vmem:[%s25726_s15 + $0x8] sm:$0xff]  ;;  %v23530_v18 = vpop.permute.xlu0 %6080  ;;  %v23564_v30 = vpop.permute.xlu1 %6095 }
 0x4ce   : > { %18409 = vmatprep.mubr.msk.f32.mxu1 %vm1529_vm2, %v23294_v59  ;;  %v23507_v51 = vpop.f32.mrb[172].mxu0 }
 0x4cf   : > { %v23512_v35 = vpop.f32.mrb[173].mxu0 }
 0x4d0   : > { %14407 = vperm.xlu0 %21732, %v14357_v14  }
 0x4d1   : > { %18410 = vmatmul.mubr.msk.f32.gmra.mrb[60].mxu1 %vm1529_vm2, %v23289_v43  ;;  %14412 = vperm.xlu1 %21733, %v14358_v48   ;;  %v14360_v43 = vld [vmem:[%s25726_s15 + $0x18] sm:$0xff]  ;;  %v23591_v20 = vpop.permute.xlu1 %6105  ;;  %v5679_v48 = vld [vmem:[#allocation6 + $0x100] sm:$0xff] }
 0x4d2   : > { %18412 = vmatprep.mubr.msk.f32.mxu1 %vm1529_vm2, %v23308_v47  ;;  %v23523_v59 = vpop.f32.mrb[174].mxu0 }
 0x4d3   : > { %v23528_v38 = vpop.f32.mrb[175].mxu0 }
 0x4d4   : > { %14417 = vperm.xlu0 %21732, %v14359_v12   ;;  %v5680_v12 = vld [vmem:[#allocation6 + $0x108] sm:$0xff] }
 0x4d5   : > { %18413 = vmatmul.mubr.msk.f32.gmra.mrb[62].mxu1 %vm1529_vm2, %v23303_v49  ;;  %14422 = vperm.xlu1 %21733, %v14360_v43   ;;  %v23550_v49 = vpop.permute.xlu0 %6090 }
 0x4d6   : > { %18415 = vmatprep.mubr.msk.f32.mxu1 %vm1529_vm2, %v23322_v34  ;;  %v23539_v47 = vpop.f32.mrb[176].mxu0  ;;  %v14362_v34 = vld [vmem:[%s25726_s15 + $0x28] sm:$0xff] }
 0x4d7   : > { %v23546_v62 = vpop.f32.mrb[177].mxu0 }
 0x4d8   : > { %14427 = vperm.xlu0 %21732, %v14361_v24   ;;  %v14371_v24 = vld [vmem:[%s25726_s15 + $0x70] sm:$0xff] }
 0x4d9   : > { %18416 = vmatmul.mubr.msk.f32.gmra.mrb[64].mxu1 %vm1529_vm2, %v23317_v0  ;;  %14432 = vperm.xlu1 %21733, %v14362_v34   ;;  %v14364_v0 = vld [vmem:[%s25726_s15 + $0x38] sm:$0xff]  ;;  %v23580_v19 = vpop.permute.xlu0 %6100 }
 0x4da   : > { %18418 = vmatprep.mubr.msk.f32.mxu1 %vm1529_vm2, %v23336_v58  ;;  %v23557_v26 = vpop.f32.mrb[178].mxu0 }
 0x4db   : > { %v23562_v60 = vpop.f32.mrb[179].mxu0 }
 0x4dc   : > { %14437 = vperm.xlu0 %21732, %v14363_v15   ;;  %v23633_v15 = vpack.c.bf16 %v5680_v12, %v5679_v48 }
 0x4dd   : > { %18419 = vmatmul.mubr.msk.f32.gmra.mrb[66].mxu1 %vm1529_vm2, %v23331_v7  ;;  %14442 = vperm.xlu1 %21733, %v14364_v0   ;;  %v14366_v7 = vld [vmem:[%s25726_s15 + $0x48] sm:$0xff]  ;;  %v23600_v25 = vpop.permute.xlu0 %6110 }
 0x4de   : > { %18421 = vmatprep.mubr.msk.f32.mxu1 %vm1529_vm2, %v23350_v37  ;;  %v23573_v58 = vpop.f32.mrb[180].mxu0 }
 0x4df   : > { %v23578_v11 = vpop.f32.mrb[181].mxu0 }
 0x4e0   : > { %14447 = vperm.xlu0 %21732, %v14365_v6   ;;  %v14373_v6 = vld [vmem:[%s25726_s15 + $0x80] sm:$0xff] }
 0x4e1   : > { %18422 = vmatmul.mubr.msk.f32.gmra.mrb[68].mxu1 %vm1529_vm2, %v23345_v16  ;;  %v5126_v16 = vld [vmem:[#allocation6 + $0xf8] sm:$0xff]  ;;  %14452 = vperm.xlu1 %21733, %v14366_v7  }
 0x4e2   : > { %18424 = vmatprep.mubr.msk.f32.mxu1 %vm1529_vm2, %v23364_v54  ;;  %v23589_v37 = vpop.f32.mrb[182].mxu0  ;;  %v14368_v54 = vld [vmem:[%s25726_s15 + $0x58] sm:$0xff]  ;;  %v20455_v52 = vpack.c.bf16 %v5126_v16, %v5125_v33  ;;  %v14375_v33 = vld [vmem:[%s25726_s15 + $0x90] sm:$0xff] }
 0x4e3   : > { %v23596_v55 = vpop.f32.mrb[183].mxu0 }
 0x4e4   : > { %14457 = vperm.xlu0 %21732, %v14367_v17  }
 0x4e5   : > { %18425 = vmatmul.mubr.msk.f32.gmra.mrb[70].mxu1 %vm1529_vm2, %v23359_v50  ;;  %v23614_v50 = vpop.permute.xlu1 %6115  ;;  %14462 = vperm.xlu1 %21733, %v14368_v54  }
 0x4e6   : > { %18509 = vmatprep.mubr.msk.f32.mxu1 %vm1529_vm2, %v23378_v10  ;;  %v23607_v39 = vpop.f32.mrb[184].mxu0  ;;  %v14370_v10 = vld [vmem:[%s25726_s15 + $0x68] sm:$0xff] }
 0x4e7   : > { %v23612_v14 = vpop.f32.mrb[185].mxu0 }
 0x4e8   : > { %14467 = vperm.xlu0 %21732, %v14369_v32   ;;  %v14377_v32 = vld [vmem:[%s25726_s15 + $0xa0] sm:$0xff] }
 0x4e9   : > { %18510 = vmatmul.mubr.msk.f32.vlgmr.msra.gmra.mrb[44].mxu1 %vm1529_vm2, %v23373_v1  ;;  %v23631_v1 = vpop.permute.xlu0 %6120  ;;  %14472 = vperm.xlu1 %21733, %v14370_v10   ;;  %v23644_v0 = vpop.permute.xlu1 %6125  ;;  %v14379_v10 = vld [vmem:[%s25726_s15 + $0xb0] sm:$0xff] }
 0x4ea   : > { %18512 = vmatprep.mubr.msk.f32.mxu1 %vm1529_vm2, %v23393_v21  ;;  %20454 = vmatpush3.bf16.msra.mxu1 %v23395_v56  ;;  %v23624_v43 = vpop.f32.mrb[186].mxu0  ;;  %v14372_v21 = vld [vmem:[%s25726_s15 + $0x78] sm:$0xff] }
 0x4eb   : > { %20456 = vmatprep.subr.bf16.mxu1 %v20455_v52  ;;  %v23629_v34 = vpop.f32.mrb[187].mxu0 }
 0x4ec   : > { %14477 = vperm.xlu0 %21732, %v14371_v24  }
 0x4ed   : > { %18513 = vmatmul.mubr.msk.f32.gmra.mrb[46].mxu1 %vm1529_vm2, %v23388_v45  ;;  %14482 = vperm.xlu1 %21733, %v14372_v21   ;;  %v23654_v45 = vpop.permute.xlu0 %6130  ;;  %v23668_v54 = vpop.permute.xlu1 %6135 }
 0x4ee   : > { %18515 = vmatprep.mubr.msk.f32.mxu1 %vm1529_vm2, %v23411_v63  ;;  %20458 = vmatpush3.bf16.msra.mxu1 %v20455_v52  ;;  %v23642_v56 = vpop.f32.mrb[188].mxu0  ;;  %v14374_v63 = vld [vmem:[%s25726_s15 + $0x88] sm:$0xff] }
 0x4ef   : > { %v23649_v7 = vpop.f32.mrb[189].mxu0  ;;  %20492 = vmatprep.subr.bf16.mxu1 %v23633_v15 }
 0x4f0   : > { %14487 = vperm.xlu0 %21732, %v14373_v6   ;;  %v14381_v6 = vld [vmem:[%s25726_s15 + $0xc0] sm:$0xff] }
 0x4f1   : > { %18516 = vmatmul.mubr.msk.f32.gmra.mrb[48].mxu1 %vm1529_vm2, %v23406_v9  ;;  %14492 = vperm.xlu1 %21733, %v14374_v63   ;;  %v14376_v9 = vld [vmem:[%s25726_s15 + $0x98] sm:$0xff]  ;;  %v23684_v48 = vpop.permute.xlu0 %6140  ;;  %v23695_v12 = vpop.permute.xlu1 %6145 }
 0x4f2   : > { %18518 = vmatprep.mubr.msk.f32.mxu1 %vm1529_vm2, %v23428_v42  ;;  %v23661_v17 = vpop.f32.mrb[190].mxu0 }
 0x4f3   : > { %v23666_v16 = vpop.f32.mrb[191].mxu0 }
 0x4f4   : > { %14497 = vperm.xlu0 %21732, %v14375_v33  }
 0x4f5   : > { %18519 = vmatmul.mubr.msk.f32.gmra.mrb[50].mxu1 %vm1529_vm2, %v23423_v36  ;;  %14502 = vperm.xlu1 %21733, %v14376_v9   ;;  %v14378_v36 = vld [vmem:[%s25726_s15 + $0xa8] sm:$0xff]  ;;  %v23718_v33 = vpop.permute.xlu1 %6155  ;;  %v14383_v9 = vld [vmem:[%s25726_s15 + $0xd0] sm:$0xff] }
 0x4f6   : > { %18521 = vmatprep.mubr.msk.f32.mxu1 %vm1529_vm2, %v23446_v29  ;;  %v23677_v42 = vpop.f32.mrb[192].mxu0 }
 0x4f7   : > { %v23682_v52 = vpop.f32.mrb[193].mxu0 }
 0x4f8   : > { %14507 = vperm.xlu0 %21732, %v14377_v32  }
 0x4f9   : > { %18522 = vmatmul.mubr.msk.f32.gmra.mrb[52].mxu1 %vm1529_vm2, %v23439_v31  ;;  %14512 = vperm.xlu1 %21733, %v14378_v36   ;;  %v23704_v31 = vpop.permute.xlu0 %6150 }
 0x4fa   : > { %18524 = vmatprep.mubr.msk.f32.mxu1 %vm1529_vm2, %v23462_v8  ;;  %v23693_v29 = vpop.f32.mrb[194].mxu0  ;;  %25775 = vst [vmem:[#allocation21_spill] sm:$0xff] %v23704_v31  ;;  %v14380_v8 = vld [vmem:[%s25726_s15 + $0xb8] sm:$0xff] }
 0x4fb   : > { %v23700_v24 = vpop.f32.mrb[195].mxu0 }
 0x4fc   : > { %14517 = vperm.xlu0 %21732, %v14379_v10   ;;  %v23745_v10 = vpop.permute.xlu1 %6165 }
 0x4fd   : > { %18525 = vmatmul.mubr.msk.f32.gmra.mrb[54].mxu1 %vm1529_vm2, %v23457_v5  ;;  %14522 = vperm.xlu1 %21733, %v14380_v8   ;;  %v14382_v5 = vld [vmem:[%s25726_s15 + $0xc8] sm:$0xff]  ;;  %v23734_v36 = vpop.permute.xlu0 %6160  ;;  %25777 = vst [vmem:[#allocation23_spill] sm:$0xff] %v23745_v10  ;;  %v14385_v8 = vld [vmem:[%s25726_s15 + $0xe0] sm:$0xff] }
 0x4fe   : > { %18527 = vmatprep.mubr.msk.f32.mxu1 %vm1529_vm2, %v23478_v13  ;;  %v23711_v21 = vpop.f32.mrb[196].mxu0  ;;  %25776 = vst [vmem:[#allocation22_spill] sm:$0xff] %v23734_v36 }
 0x4ff   : > { %v23716_v63 = vpop.f32.mrb[197].mxu0 }
 0x500   : > { %14527 = vperm.xlu0 %21732, %v14381_v6   ;;  %v23768_v36 = vpop.permute.xlu1 %6477 }
 0x501   : > { %18528 = vmatmul.mubr.msk.f32.gmra.mrb[56].mxu1 %vm1529_vm2, %v23473_v28  ;;  %14532 = vperm.xlu1 %21733, %v14382_v5   ;;  %v14384_v28 = vld [vmem:[%s25726_s15 + $0xd8] sm:$0xff]  ;;  %25779 = vst [vmem:[#allocation25_spill] sm:$0xff] %v23768_v36 }
 0x502   : > { %18530 = vmatprep.mubr.msk.f32.mxu1 %vm1529_vm2, %v23496_v41  ;;  %v23727_v13 = vpop.f32.mrb[198].mxu0 }
 0x503   : > { %v23732_v32 = vpop.f32.mrb[199].mxu0 }
 0x504   : > { %14537 = vperm.xlu0 %21732, %v14383_v9   ;;  %v14387_v9 = vld [vmem:[%s25726_s15 + $0xf0] sm:$0xff] }
 0x505   : > { %18531 = vmatmul.mubr.msk.f32.gmra.mrb[58].mxu1 %vm1529_vm2, %v23489_v53  ;;  %14542 = vperm.xlu1 %21733, %v14384_v28   ;;  %v23754_v53 = vpop.permute.xlu0 %6472 }
 0x506   : > { %18533 = vmatprep.mubr.msk.f32.mxu1 %vm1529_vm2, %v23512_v35  ;;  %v23743_v41 = vpop.f32.mrb[200].mxu0  ;;  %25778 = vst [vmem:[#allocation24_spill] sm:$0xff] %v23754_v53  ;;  %v14386_v35 = vld [vmem:[%s25726_s15 + $0xe8] sm:$0xff] }
 0x507   : > { %v23750_v6 = vpop.f32.mrb[201].mxu0 }
 0x508   : > { %14547 = vperm.xlu0 %21732, %v14385_v8   ;;  %v14389_v8 = vld [vmem:[%s25726_s15 + $0x100] sm:$0xff] }
 0x509   : > { %18534 = vmatmul.mubr.msk.f32.gmra.mrb[60].mxu1 %vm1529_vm2, %v23507_v51  ;;  %14552 = vperm.xlu1 %21733, %v14386_v35   ;;  %v14388_v51 = vld [vmem:[%s25726_s15 + $0xf8] sm:$0xff]  ;;  %v23784_v35 = vpop.permute.xlu0 %6482 }
 0x50a   : > { %18536 = vmatprep.mubr.msk.f32.mxu1 %vm1529_vm2, %v23528_v38  ;;  %v23761_v5 = vpop.f32.mrb[202].mxu0  ;;  %25780 = vst [vmem:[#allocation26_spill] sm:$0xff] %v23784_v35  ;;  %v14391_v35 = vld [vmem:[%s25726_s15 + $0x110] sm:$0xff] }
 0x50b   : > { %v23766_v28 = vpop.f32.mrb[203].mxu0 }
 0x50c   : > { %14557 = vperm.xlu0 %21732, %v14387_v9   ;;  %v23795_v9 = vpop.permute.xlu1 %6487 }
 0x50d   : > { %18537 = vmatmul.mubr.msk.f32.gmra.mrb[62].mxu1 %vm1529_vm2, %v23523_v59  ;;  %14562 = vperm.xlu1 %21733, %v14388_v51   ;;  %v14390_v59 = vld [vmem:[%s25726_s15 + $0x108] sm:$0xff]  ;;  %25781 = vst [vmem:[#allocation27_spill] sm:$0xff] %v23795_v9  ;;  %v14393_v9 = vld [vmem:[%s25726_s15 + $0x120] sm:$0xff] }
 0x50e   : > { %18539 = vmatprep.mubr.msk.f32.mxu1 %vm1529_vm2, %v23546_v62  ;;  %v23777_v38 = vpop.f32.mrb[204].mxu0 }
 0x50f   : > { %v23782_v53 = vpop.f32.mrb[205].mxu0 }
 0x510   : > { %14567 = vperm.xlu0 %21732, %v14389_v8   ;;  %v23818_v36 = vpop.permute.xlu1 %6497 }
 0x511   : > { %18540 = vmatmul.mubr.msk.f32.gmra.mrb[64].mxu1 %vm1529_vm2, %v23539_v47  ;;  %14572 = vperm.xlu1 %21733, %v14390_v59   ;;  %v23804_v47 = vpop.permute.xlu0 %6492  ;;  %25783 = vst [vmem:[#allocation29_spill] sm:$0xff] %v23818_v36  ;;  %v5681_v36 = vld [vmem:[#allocation6 + $0x110] sm:$0xff] }
 0x512   : > { %18542 = vmatprep.mubr.msk.f32.mxu1 %vm1529_vm2, %v23562_v60  ;;  %v23793_v62 = vpop.f32.mrb[206].mxu0  ;;  %25782 = vst [vmem:[#allocation28_spill] sm:$0xff] %v23804_v47  ;;  %v14392_v60 = vld [vmem:[%s25726_s15 + $0x118] sm:$0xff] }
 0x513   : > { %v23800_v51 = vpop.f32.mrb[207].mxu0 }
 0x514   : > { %14577 = vperm.xlu0 %21732, %v14391_v35   ;;  %v14395_v35 = vld [vmem:[%s25726_s15 + $0x130] sm:$0xff]  ;;  %v23845_v10 = vpop.permute.xlu1 %6507 }
 0x515   : > { %18543 = vmatmul.mubr.msk.f32.gmra.mrb[66].mxu1 %vm1529_vm2, %v23557_v26  ;;  %14582 = vperm.xlu1 %21733, %v14392_v60   ;;  %v14394_v26 = vld [vmem:[%s25726_s15 + $0x128] sm:$0xff]  ;;  %v23834_v60 = vpop.permute.xlu0 %6502 }
 0x516   : > { %18545 = vmatprep.mubr.msk.f32.mxu1 %vm1529_vm2, %v23578_v11  ;;  %v23811_v8 = vpop.f32.mrb[208].mxu0  ;;  %25784 = vst [vmem:[#allocation30_spill] sm:$0xff] %v23834_v60  ;;  %v14397_v60 = vld [vmem:[%s25726_s15 + $0x140] sm:$0xff] }
 0x517   : > { %v23816_v59 = vpop.f32.mrb[209].mxu0 }
 0x518   : > { %14587 = vperm.xlu0 %21732, %v14393_v9  }
 0x519   : > { %18546 = vmatmul.mubr.msk.f32.gmra.mrb[68].mxu1 %vm1529_vm2, %v23573_v58  ;;  %v5682_v58 = vld [vmem:[#allocation6 + $0x118] sm:$0xff]  ;;  %14592 = vperm.xlu1 %21733, %v14394_v26  }
 0x51a   : > { %18548 = vmatprep.mubr.msk.f32.mxu1 %vm1529_vm2, %v23596_v55  ;;  %v23827_v11 = vpop.f32.mrb[210].mxu0  ;;  %v14396_v55 = vld [vmem:[%s25726_s15 + $0x138] sm:$0xff]  ;;  %v20495_v26 = vpack.c.bf16 %v5682_v58, %v5681_v36  ;;  %v14399_v36 = vld [vmem:[%s25726_s15 + $0x150] sm:$0xff]  ;;  %v23869_v58 = vpop.permute.xlu1 %6517 }
 0x51b   : > { %v23832_v47 = vpop.f32.mrb[211].mxu0 }
 0x51c   : > { %14597 = vperm.xlu0 %21732, %v14395_v35  }
 0x51d   : > { %18549 = vmatmul.mubr.msk.f32.gmra.mrb[70].mxu1 %vm1529_vm2, %v23589_v37  ;;  %14602 = vperm.xlu1 %21733, %v14396_v55   ;;  %v23854_v37 = vpop.permute.xlu0 %6512 }
 0x51e   : > { %18633 = vmatprep.mubr.msk.f32.mxu1 %vm1529_vm2, %v23612_v14  ;;  %v23843_v9 = vpop.f32.mrb[212].mxu0  ;;  %v14398_v14 = vld [vmem:[%s25726_s15 + $0x148] sm:$0xff] }
 0x51f   : > { %v23850_v31 = vpop.f32.mrb[213].mxu0 }
 0x520   : > { %14607 = vperm.xlu0 %21732, %v14397_v60   ;;  %v14401_v60 = vld [vmem:[%s25726_s15 + $0x160] sm:$0xff] }
 0x521   : > { %18634 = vmatmul.mubr.msk.f32.vlgmr.msra.gmra.mrb[44].mxu1 %vm1529_vm2, %v23607_v39  ;;  %14612 = vperm.xlu1 %21733, %v14398_v14   ;;  %v23883_v14 = vpop.permute.xlu0 %6522 }
 0x522   : > { %18636 = vmatprep.mubr.msk.f32.mxu1 %vm1529_vm2, %v23629_v34  ;;  %20494 = vmatpush3.bf16.msra.mxu1 %v23633_v15  ;;  %v23862_v35 = vpop.f32.mrb[214].mxu0  ;;  %v14400_v34 = vld [vmem:[%s25726_s15 + $0x158] sm:$0xff]  ;;  %25785 = vst [vmem:[#allocation31_spill] sm:$0xff] %v23883_v14 }
 0x523   : > { %20496 = vmatprep.subr.bf16.mxu1 %v20495_v26  ;;  %v23867_v39 = vpop.f32.mrb[215].mxu0 }
 0x524   : > { %14617 = vperm.xlu0 %21732, %v14399_v36   ;;  %v14403_v36 = vld [vmem:[%s25726_s15 + $0x170] sm:$0xff] }
 0x525   : > { %18637 = vmatmul.mubr.msk.f32.gmra.mrb[46].mxu1 %vm1529_vm2, %v23624_v43  ;;  %14622 = vperm.xlu1 %21733, %v14400_v34   ;;  %v14402_v43 = vld [vmem:[%s25726_s15 + $0x168] sm:$0xff]  ;;  %v14404_v34 = vld [vmem:[%s25726_s15 + $0x178] sm:$0xff] }
 0x526   : > { %18639 = vmatprep.mubr.msk.f32.mxu1 %vm1529_vm2, %v23649_v7  ;;  %20498 = vmatpush3.bf16.msra.mxu1 %v20495_v26  ;;  %v23878_v15 = vpop.f32.mrb[216].mxu0  ;;  %v23892_v26 = vpop.permute.xlu1 %6527 }
 0x527   : > { %v5559_v55 = vpop.f32.mrb[217].mxu0  ;;  %25786 = vst [vmem:[#allocation32_spill] sm:$0xff] %v23892_v26 }
 0x528   : > { %14627 = vperm.xlu0 %21732, %v14401_v60  }
 0x529   : > { %18640 = vmatmul.mubr.msk.f32.gmra.mrb[48].mxu1 %vm1529_vm2, %v23642_v56  ;;  %14632 = vperm.xlu1 %21733, %v14402_v43   ;;  %v23899_v56 = vpop.permute.xlu0 %6532 }
 0x52a   : > { %18642 = vmatprep.mubr.msk.f32.mxu1 %vm1529_vm2, %v23666_v16  ;;  %v18718_v7 = vpop.f32.mrb[218].mxu0  ;;  %v23906_v26 = vpop.permute.xlu1 %6537 }
 0x52b   : > { %v5569_v14 = vpop.f32.mrb[219].mxu0 }
 0x52c   : > { %14637 = vperm.xlu0 %21732, %v14403_v36  }
 0x52d   : > { %18643 = vmatmul.mubr.msk.f32.gmra.mrb[50].mxu1 %vm1529_vm2, %v23661_v17  ;;  %14642 = vperm.xlu1 %21733, %v14404_v34  }
 0x52e   : > { %18645 = vmatprep.mubr.msk.f32.mxu1 %vm1529_vm2, %v23682_v52  ;;  %v18721_v16 = vpop.f32.mrb[220].mxu0 }
 0x52f   : > { %v5579_v60 = vpop.f32.mrb[221].mxu0 }
 0x531   : > { %18646 = vmatmul.mubr.msk.f32.gmra.mrb[52].mxu1 %vm1529_vm2, %v23677_v42 }
 0x532   : > { %18648 = vmatprep.mubr.msk.f32.mxu1 %vm1529_vm2, %v23700_v24  ;;  %v18724_v17 = vpop.f32.mrb[222].mxu0 }
 0x533   : > { %v5589_v43 = vpop.f32.mrb[223].mxu0 }
 0x535   : > { %18649 = vmatmul.mubr.msk.f32.gmra.mrb[54].mxu1 %vm1529_vm2, %v23693_v29 }
 0x536   : > { %18651 = vmatprep.mubr.msk.f32.mxu1 %vm1529_vm2, %v23716_v63  ;;  %v18727_v52 = vpop.f32.mrb[224].mxu0 }
 0x537   : > { %v5599_v36 = vpop.f32.mrb[225].mxu0 }
 0x539   : > { %18652 = vmatmul.mubr.msk.f32.gmra.mrb[56].mxu1 %vm1529_vm2, %v23711_v21 }
 0x53a   : > { %18654 = vmatprep.mubr.msk.f32.mxu1 %vm1529_vm2, %v23732_v32  ;;  %v18730_v42 = vpop.f32.mrb[226].mxu0 }
 0x53b   : > { %v5609_v34 = vpop.f32.mrb[227].mxu0 }
 0x53d   : > { %18655 = vmatmul.mubr.msk.f32.gmra.mrb[58].mxu1 %vm1529_vm2, %v23727_v13 }
 0x53e   : > { %18657 = vmatprep.mubr.msk.f32.mxu1 %vm1529_vm2, %v23750_v6  ;;  %v18733_v29 = vpop.f32.mrb[228].mxu0 }
 0x53f   : > { %v5619_v24 = vpop.f32.mrb[229].mxu0 }
 0x541   : > { %18658 = vmatmul.mubr.msk.f32.gmra.mrb[60].mxu1 %vm1529_vm2, %v23743_v41 }
 0x542   : > { %18660 = vmatprep.mubr.msk.f32.mxu1 %vm1529_vm2, %v23766_v28  ;;  %v18736_v21 = vpop.f32.mrb[230].mxu0 }
 0x543   : > { %v5629_v63 = vpop.f32.mrb[231].mxu0 }
 0x545   : > { %18661 = vmatmul.mubr.msk.f32.gmra.mrb[62].mxu1 %vm1529_vm2, %v23761_v5 }
 0x546   : > { %18663 = vmatprep.mubr.msk.f32.mxu1 %vm1529_vm2, %v23782_v53  ;;  %v18739_v13 = vpop.f32.mrb[232].mxu0 }
 0x547   : > { %v5639_v32 = vpop.f32.mrb[233].mxu0 }
 0x549   : > { %18664 = vmatmul.mubr.msk.f32.gmra.mrb[64].mxu1 %vm1529_vm2, %v23777_v38 }
 0x54a   : > { %18666 = vmatprep.mubr.msk.f32.mxu1 %vm1529_vm2, %v23800_v51  ;;  %v18742_v41 = vpop.f32.mrb[234].mxu0  ;;  %v6235_v51 = vld [vmem:[%s25787_s18 + $0x58] sm:$0xff] }
 0x54b   : > { %v5649_v6 = vpop.f32.mrb[235].mxu0 }
 0x54d   : > { %18667 = vmatmul.mubr.msk.f32.gmra.mrb[66].mxu1 %vm1529_vm2, %v23793_v62  ;;  %v6225_v62 = vld [vmem:[%s25787_s18 + $0x8] sm:$0xff] }
 0x54e   : > { %18669 = vmatprep.mubr.msk.f32.mxu1 %vm1529_vm2, %v23816_v59  ;;  %v18745_v5 = vpop.f32.mrb[236].mxu0  ;;  %15745 = vmatprep.mubr.msk.f32.mxu0 %vm6256_vm3, %v6225_v62 }
 0x54f   : > { %v5659_v28 = vpop.f32.mrb[237].mxu0 }
 0x551   : > { %18670 = vmatmul.mubr.msk.f32.gmra.mrb[68].mxu1 %vm1529_vm2, %v23811_v8 }
 0x552   : > { %18672 = vmatprep.mubr.msk.f32.mxu1 %vm1529_vm2, %v23832_v47  ;;  %v18748_v53 = vpop.f32.mrb[238].mxu0 }
 0x553   : > { %v5669_v38 = vpop.f32.mrb[239].mxu0 }
 0x555   : > { %18673 = vmatmul.mubr.msk.f32.gmra.mrb[70].mxu1 %vm1529_vm2, %v23827_v11 }
 0x556   : > { %18757 = vmatprep.mubr.msk.f32.mxu1 %vm1529_vm2, %v23850_v31  ;;  %v25739_v31 = vmov 0.0|0.0  }
 0x557   : > { %20499 = vmatprep.subr.bf16.mxu0 %v25739_v31  ;;  %21191 = vmatprep.subr.bf16.mxu1 %v25739_v31 }
 0x559   : > { %18758 = vmatmul.mubr.msk.f32.vlgmr.msra.gmra.mrb[44].mxu1 %vm1529_vm2, %v23843_v9 }
 0x55a   : > { %18760 = vmatprep.mubr.msk.f32.mxu1 %vm1529_vm2, %v23867_v39 }
 0x55d   : > { %18761 = vmatmul.mubr.msk.f32.gmra.mrb[46].mxu1 %vm1529_vm2, %v23862_v35 }
 0x55e   : > { %18763 = vmatprep.mubr.msk.f32.mxu1 %vm1529_vm2, %v5559_v55 }
 0x561   : > { %18764 = vmatmul.mubr.msk.f32.gmra.mrb[48].mxu1 %vm1529_vm2, %v23878_v15 }
 0x562   : > { %18766 = vmatprep.mubr.msk.f32.mxu1 %vm1529_vm2, %v5569_v14 }
 0x565   : > { %18767 = vmatmul.mubr.msk.f32.gmra.mrb[50].mxu1 %vm1529_vm2, %v18718_v7 }
 0x566   : > { %18769 = vmatprep.mubr.msk.f32.mxu1 %vm1529_vm2, %v5579_v60 }
 0x569   : > { %18770 = vmatmul.mubr.msk.f32.gmra.mrb[52].mxu1 %vm1529_vm2, %v18721_v16 }
 0x56a   : > { %18772 = vmatprep.mubr.msk.f32.mxu1 %vm1529_vm2, %v5589_v43 }
 0x56d   : > { %18773 = vmatmul.mubr.msk.f32.gmra.mrb[54].mxu1 %vm1529_vm2, %v18724_v17 }
 0x56e   : > { %18775 = vmatprep.mubr.msk.f32.mxu1 %vm1529_vm2, %v5599_v36 }
 0x571   : > { %18776 = vmatmul.mubr.msk.f32.gmra.mrb[56].mxu1 %vm1529_vm2, %v18727_v52 }
 0x572   : > { %18778 = vmatprep.mubr.msk.f32.mxu1 %vm1529_vm2, %v5609_v34 }
 0x575   : > { %18779 = vmatmul.mubr.msk.f32.gmra.mrb[58].mxu1 %vm1529_vm2, %v18730_v42 }
 0x576   : > { %18781 = vmatprep.mubr.msk.f32.mxu1 %vm1529_vm2, %v5619_v24 }
 0x579   : > { %18782 = vmatmul.mubr.msk.f32.gmra.mrb[60].mxu1 %vm1529_vm2, %v18733_v29 }
 0x57a   : > { %18784 = vmatprep.mubr.msk.f32.mxu1 %vm1529_vm2, %v5629_v63 }
 0x57d   : > { %18785 = vmatmul.mubr.msk.f32.gmra.mrb[62].mxu1 %vm1529_vm2, %v18736_v21 }
 0x57e   : > { %18787 = vmatprep.mubr.msk.f32.mxu1 %vm1529_vm2, %v5639_v32 }
 0x581   : > { %18788 = vmatmul.mubr.msk.f32.gmra.mrb[64].mxu1 %vm1529_vm2, %v18739_v13 }
 0x582   : > { %18790 = vmatprep.mubr.msk.f32.mxu1 %vm1529_vm2, %v5649_v6 }
 0x585   : > { %18791 = vmatmul.mubr.msk.f32.gmra.mrb[66].mxu1 %vm1529_vm2, %v18742_v41 }
 0x586   : > { %18793 = vmatprep.mubr.msk.f32.mxu1 %vm1529_vm2, %v5659_v28 }
 0x589   : > { %18794 = vmatmul.mubr.msk.f32.gmra.mrb[68].mxu1 %vm1529_vm2, %v18745_v5 }
 0x58a   : > { %18796 = vmatprep.mubr.msk.f32.mxu1 %vm1529_vm2, %v5669_v38 }
 0x58d   : > { %18797 = vmatmul.mubr.msk.f32.gmra.mrb[70].mxu1 %vm1529_vm2, %v18748_v53 }
 0x58e   : > { %15750 = vmatprep.mubr.msk.f32.mxu1 %vm6256_vm3, %v6235_v51 }
 0x62c   : > { %v18759_v47 = vpop.f32.mrb[44].mxu1 }
 0x62d   : > { %v6169_v8 = vadd.f32 %v18759_v47, %v23430_v2  ;;  %v5833_v59 = vpop.f32.mrb[45].mxu1 }
 0x62e   : > { %v6168_v11 = vadd.f32 %v23399_v61, %v5833_v59 }
 0x62f   : > { %v6197_v9 = vmax.f32 %v6169_v8, 0.0 }
 0x630   : > { %v6196_v35 = vmax.f32 %v6168_v11, 0.0  ;;  %v18762_v39 = vpop.f32.mrb[46].mxu1 }
 0x631   : > { %v6171_v15 = vadd.f32 %v18762_v39, %v23441_v23  ;;  %v5843_v55 = vpop.f32.mrb[47].mxu1 }
 0x632   : > { %v20500_v14 = vpack.c.bf16 %v6197_v9, %v6196_v35  ;;  %v6170_v7 = vadd.f32 %v23414_v22, %v5843_v55 }
 0x633   : > { %v6199_v16 = vmax.f32 %v6171_v15, 0.0 }
 0x634   : > { %v6198_v60 = vmax.f32 %v6170_v7, 0.0  ;;  %v18765_v17 = vpop.f32.mrb[48].mxu1  ;;  %20501 = vmatpush1.bf16.msra.mxu0 %v20500_v14  ;;  %21205 = vmatpush1.bf16.msra.mxu1 %v20500_v14 }
 0x635   : > { %v6173_v43 = vadd.f32 %v18765_v17, %v23464_v40  ;;  %v5853_v2 = vpop.f32.mrb[49].mxu1  ;;  %20502 = vmatprep.subr.bf16.mxu0 %v25739_v31  ;;  %21192 = vmatprep.subr.bf16.mxu1 %v25739_v31 }
 0x636   : > { %v20503_v61 = vpack.c.bf16 %v6199_v16, %v6198_v60  ;;  %v6172_v52 = vadd.f32 %v23450_v27, %v5853_v2 }
 0x637   : > { %v6201_v23 = vmax.f32 %v6173_v43, 0.0 }
 0x638   : > { %v6200_v36 = vmax.f32 %v6172_v52, 0.0  ;;  %v18768_v42 = vpop.f32.mrb[50].mxu1  ;;  %20504 = vmatpush1.bf16.msra.mxu0 %v20503_v61  ;;  %21206 = vmatpush1.bf16.msra.mxu1 %v20503_v61 }
 0x639   : > { %v6175_v22 = vadd.f32 %v18768_v42, %v23491_v44  ;;  %v5863_v34 = vpop.f32.mrb[51].mxu1  ;;  %20505 = vmatprep.subr.bf16.mxu0 %v25739_v31  ;;  %21193 = vmatprep.subr.bf16.mxu1 %v25739_v31 }
 0x63a   : > { %v20506_v40 = vpack.c.bf16 %v6201_v23, %v6200_v36  ;;  %v6174_v29 = vadd.f32 %v23480_v4, %v5863_v34 }
 0x63b   : > { %v6203_v24 = vmax.f32 %v6175_v22, 0.0 }
 0x63c   : > { %v6202_v21 = vmax.f32 %v6174_v29, 0.0  ;;  %v18771_v63 = vpop.f32.mrb[52].mxu1  ;;  %20507 = vmatpush1.bf16.msra.mxu0 %v20506_v40  ;;  %21207 = vmatpush1.bf16.msra.mxu1 %v20506_v40 }
 0x63d   : > { %v6177_v27 = vadd.f32 %v18771_v63, %v23514_v3  ;;  %v5873_v13 = vpop.f32.mrb[53].mxu1  ;;  %20508 = vmatprep.subr.bf16.mxu0 %v25739_v31  ;;  %21194 = vmatprep.subr.bf16.mxu1 %v25739_v31 }
 0x63e   : > { %v20509_v44 = vpack.c.bf16 %v6203_v24, %v6202_v21  ;;  %v6176_v32 = vadd.f32 %v23500_v46, %v5873_v13 }
 0x63f   : > { %v6205_v41 = vmax.f32 %v6177_v27, 0.0 }
 0x640   : > { %v6204_v6 = vmax.f32 %v6176_v32, 0.0  ;;  %v18774_v5 = vpop.f32.mrb[54].mxu1  ;;  %20510 = vmatpush1.bf16.msra.mxu0 %v20509_v44  ;;  %21208 = vmatpush1.bf16.msra.mxu1 %v20509_v44  ;;  %v25788_v32 = vld [vmem:[#allocation21_spill] sm:$0xff] }
 0x641   : > { %v6179_v4 = vadd.f32 %v18774_v5, %v23541_v57  ;;  %v5883_v28 = vpop.f32.mrb[55].mxu1  ;;  %20511 = vmatprep.subr.bf16.mxu0 %v25739_v31  ;;  %21195 = vmatprep.subr.bf16.mxu1 %v25739_v31 }
 0x642   : > { %v20512_v3 = vpack.c.bf16 %v6205_v41, %v6204_v6  ;;  %v6178_v53 = vadd.f32 %v23530_v18, %v5883_v28 }
 0x643   : > { %v6207_v38 = vmax.f32 %v6179_v4, 0.0 }
 0x644   : > { %v6206_v62 = vmax.f32 %v6178_v53, 0.0  ;;  %v18777_v51 = vpop.f32.mrb[56].mxu1  ;;  %20513 = vmatpush1.bf16.msra.mxu0 %v20512_v3  ;;  %21209 = vmatpush1.bf16.msra.mxu1 %v20512_v3  ;;  %v25790_v53 = vld [vmem:[#allocation22_spill] sm:$0xff] }
 0x645   : > { %v6181_v46 = vadd.f32 %v18777_v51, %v23564_v30  ;;  %v5893_v47 = vpop.f32.mrb[57].mxu1  ;;  %20514 = vmatprep.subr.bf16.mxu0 %v25739_v31  ;;  %21196 = vmatprep.subr.bf16.mxu1 %v25739_v31  ;;  %v6451_v51 = vld [vmem:[%s25791_s28 + $0x8] sm:$0xff] }
 0x646   : > { %v20515_v57 = vpack.c.bf16 %v6207_v38, %v6206_v62  ;;  %v6180_v8 = vadd.f32 %v23550_v49, %v5893_v47  ;;  %v6450_v62 = vld [vmem:[%s25791_s28] sm:$0xff] }
 0x647   : > { %v6209_v59 = vmax.f32 %v6181_v46, 0.0 }
 0x648   : > { %v6208_v11 = vmax.f32 %v6180_v8, 0.0  ;;  %v18780_v9 = vpop.f32.mrb[58].mxu1  ;;  %20516 = vmatpush1.bf16.msra.mxu0 %v20515_v57  ;;  %21210 = vmatpush1.bf16.msra.mxu1 %v20515_v57  ;;  %v20541_v57 = vpack.c.bf16 %v6451_v51, %v6450_v62 }
 0x649   : > { %v6183_v18 = vadd.f32 %v18780_v9, %v23591_v20  ;;  %v5903_v35 = vpop.f32.mrb[59].mxu1  ;;  %20517 = vmatprep.subr.bf16.mxu0 %v25739_v31  ;;  %21197 = vmatprep.subr.bf16.mxu1 %v25739_v31  ;;  %v6227_v9 = vld [vmem:[%s25787_s18 + $0x18] sm:$0xff] }
 0x64a   : > { %v20518_v30 = vpack.c.bf16 %v6209_v59, %v6208_v11  ;;  %v6182_v39 = vadd.f32 %v23580_v19, %v5903_v35  ;;  %v6224_v59 = vld [vmem:[%s25787_s18] sm:$0xff]  ;;  %v6234_v11 = vld [vmem:[%s25787_s18 + $0x50] sm:$0xff] }
 0x64b   : > { %v6211_v15 = vmax.f32 %v6183_v18, 0.0  ;;  %v6237_v18 = vld [vmem:[%s25787_s18 + $0x68] sm:$0xff]  ;;  %v6226_v35 = vld [vmem:[%s25787_s18 + $0x10] sm:$0xff] }
 0x64c   : > { %v6210_v55 = vmax.f32 %v6182_v39, 0.0  ;;  %v18783_v14 = vpop.f32.mrb[60].mxu1  ;;  %20519 = vmatpush1.bf16.msra.mxu0 %v20518_v30  ;;  %21211 = vmatpush1.bf16.msra.mxu1 %v20518_v30  ;;  %v6236_v30 = vld [vmem:[%s25787_s18 + $0x60] sm:$0xff]  ;;  %v6229_v39 = vld [vmem:[%s25787_s18 + $0x28] sm:$0xff] }
 0x64d   : > { %v6185_v49 = vadd.f32 %v18783_v14, %v23614_v50  ;;  %v5913_v7 = vpop.f32.mrb[61].mxu1  ;;  %20520 = vmatprep.subr.bf16.mxu0 %v25739_v31  ;;  %21198 = vmatprep.subr.bf16.mxu1 %v25739_v31  ;;  %v6238_v14 = vld [vmem:[%s25787_s18 + $0x70] sm:$0xff] }
 0x64e   : > { %v20521_v20 = vpack.c.bf16 %v6211_v15, %v6210_v55  ;;  %v6184_v16 = vadd.f32 %v23600_v25, %v5913_v7  ;;  %v6239_v15 = vld [vmem:[%s25787_s18 + $0x78] sm:$0xff]  ;;  %v6228_v55 = vld [vmem:[%s25787_s18 + $0x20] sm:$0xff]  ;;  %v6241_v7 = vld [vmem:[%s25787_s18 + $0x88] sm:$0xff] }
 0x64f   : > { %v6213_v60 = vmax.f32 %v6185_v49, 0.0  ;;  %v6231_v49 = vld [vmem:[%s25787_s18 + $0x38] sm:$0xff] }
 0x650   : > { %v6212_v17 = vmax.f32 %v6184_v16, 0.0  ;;  %v18786_v43 = vpop.f32.mrb[62].mxu1  ;;  %20522 = vmatpush1.bf16.msra.mxu0 %v20521_v20  ;;  %21212 = vmatpush1.bf16.msra.mxu1 %v20521_v20  ;;  %v6230_v20 = vld [vmem:[%s25787_s18 + $0x30] sm:$0xff]  ;;  %v6240_v16 = vld [vmem:[%s25787_s18 + $0x80] sm:$0xff] }
 0x651   : > { %v6187_v19 = vadd.f32 %v18786_v43, %v23644_v0  ;;  %v5923_v2 = vpop.f32.mrb[63].mxu1  ;;  %20523 = vmatprep.subr.bf16.mxu0 %v25739_v31  ;;  %21199 = vmatprep.subr.bf16.mxu1 %v25739_v31  ;;  %v6232_v43 = vld [vmem:[%s25787_s18 + $0x40] sm:$0xff] }
 0x652   : > { %v20524_v50 = vpack.c.bf16 %v6213_v60, %v6212_v17  ;;  %v6186_v61 = vadd.f32 %v23631_v1, %v5923_v2  ;;  %v6233_v60 = vld [vmem:[%s25787_s18 + $0x48] sm:$0xff]  ;;  %v6243_v17 = vld [vmem:[%s25787_s18 + $0x98] sm:$0xff] }
 0x653   : > { %v6215_v52 = vmax.f32 %v6187_v19, 0.0  ;;  %v6242_v19 = vld [vmem:[%s25787_s18 + $0x90] sm:$0xff]  ;;  %v6245_v2 = vld [vmem:[%s25787_s18 + $0xa8] sm:$0xff] }
 0x654   : > { %v6214_v23 = vmax.f32 %v6186_v61, 0.0  ;;  %v18789_v36 = vpop.f32.mrb[64].mxu1  ;;  %20525 = vmatpush1.bf16.msra.mxu0 %v20524_v50  ;;  %21213 = vmatpush1.bf16.msra.mxu1 %v20524_v50  ;;  %v6244_v50 = vld [vmem:[%s25787_s18 + $0xa0] sm:$0xff]  ;;  %v6247_v61 = vld [vmem:[%s25787_s18 + $0xb8] sm:$0xff] }
 0x655   : > { %v6189_v25 = vadd.f32 %v18789_v36, %v23668_v54  ;;  %v5933_v42 = vpop.f32.mrb[65].mxu1  ;;  %20526 = vmatprep.subr.bf16.mxu0 %v25739_v31  ;;  %21200 = vmatprep.subr.bf16.mxu1 %v25739_v31  ;;  %v6248_v36 = vld [vmem:[%s25787_s18 + $0xc0] sm:$0xff] }
 0x656   : > { %v20527_v0 = vpack.c.bf16 %v6215_v52, %v6214_v23  ;;  %v6188_v22 = vadd.f32 %v23654_v45, %v5933_v42  ;;  %v6246_v52 = vld [vmem:[%s25787_s18 + $0xb0] sm:$0xff]  ;;  %v6249_v23 = vld [vmem:[%s25787_s18 + $0xc8] sm:$0xff] }
 0x657   : > { %v6217_v34 = vmax.f32 %v6189_v25, 0.0  ;;  %v6251_v25 = vld [vmem:[%s25787_s18 + $0xd8] sm:$0xff]  ;;  %v6250_v42 = vld [vmem:[%s25787_s18 + $0xd0] sm:$0xff] }
 0x658   : > { %v6216_v40 = vmax.f32 %v6188_v22, 0.0  ;;  %v18792_v29 = vpop.f32.mrb[66].mxu1  ;;  %20528 = vmatpush1.bf16.msra.mxu0 %v20527_v0  ;;  %21214 = vmatpush1.bf16.msra.mxu1 %v20527_v0  ;;  %v6253_v0 = vld [vmem:[%s25787_s18 + $0xe8] sm:$0xff]  ;;  %v6252_v22 = vld [vmem:[%s25787_s18 + $0xe0] sm:$0xff] }
 0x659   : > { %v6191_v1 = vadd.f32 %v18792_v29, %v23695_v12  ;;  %v5943_v24 = vpop.f32.mrb[67].mxu1  ;;  %20529 = vmatprep.subr.bf16.mxu0 %v25739_v31  ;;  %21201 = vmatprep.subr.bf16.mxu1 %v25739_v31  ;;  %v6452_v29 = vld [vmem:[%s25791_s28 + $0x10] sm:$0xff] }
 0x65a   : > { %v20530_v54 = vpack.c.bf16 %v6217_v34, %v6216_v40  ;;  %v6190_v21 = vadd.f32 %v23684_v48, %v5943_v24  ;;  %v25789_v48 = vld [vmem:[#allocation23_spill] sm:$0xff]  ;;  %v6255_v34 = vld [vmem:[%s25787_s18 + $0xf8] sm:$0xff]  ;;  %v6254_v40 = vld [vmem:[%s25787_s18 + $0xf0] sm:$0xff] }
 0x65b   : > { %v6219_v63 = vmax.f32 %v6191_v1, 0.0  ;;  %v6453_v1 = vld [vmem:[%s25791_s28 + $0x18] sm:$0xf] }
 0x65c   : > { %v6218_v27 = vmax.f32 %v6190_v21, 0.0  ;;  %v18795_v13 = vpop.f32.mrb[68].mxu1  ;;  %20531 = vmatpush1.bf16.msra.mxu0 %v20530_v54  ;;  %21215 = vmatpush1.bf16.msra.mxu1 %v20530_v54  ;;  %v20545_v24 = vpack.c.bf16 %v6453_v1, %v6452_v29 }
 0x65d   : > { %v6193_v45 = vadd.f32 %v18795_v13, %v23718_v33  ;;  %v5953_v44 = vpop.f32.mrb[69].mxu1  ;;  %20532 = vmatprep.subr.bf16.mxu0 %v25739_v31  ;;  %21202 = vmatprep.subr.bf16.mxu1 %v25739_v31 }
 0x65e   : > { %v20533_v12 = vpack.c.bf16 %v6219_v63, %v6218_v27  ;;  %v6192_v41 = vadd.f32 %v25788_v32, %v5953_v44 }
 0x65f   : > { %v6221_v6 = vmax.f32 %v6193_v45, 0.0 }
 0x660   : > { %v6220_v5 = vmax.f32 %v6192_v41, 0.0  ;;  %v18798_v4 = vpop.f32.mrb[70].mxu1  ;;  %20534 = vmatpush1.bf16.msra.mxu0 %v20533_v12  ;;  %21216 = vmatpush1.bf16.msra.mxu1 %v20533_v12 }
 0x661   : > { %v6195_v28 = vadd.f32 %v18798_v4, %v25789_v48  ;;  %v5963_v3 = vpop.f32.mrb[71].mxu1  ;;  %20535 = vmatprep.subr.bf16.mxu0 %v25739_v31  ;;  %21203 = vmatprep.subr.bf16.mxu1 %v25739_v31 }
 0x662   : > { %v20536_v33 = vpack.c.bf16 %v6221_v6, %v6220_v5  ;;  %v6194_v38 = vadd.f32 %v25790_v53, %v5963_v3 }
 0x663   : > { %v6223_v46 = vmax.f32 %v6195_v28, 0.0 }
 0x664   : > { %v6222_v47 = vmax.f32 %v6194_v38, 0.0  ;;  %20537 = vmatpush1.bf16.msra.mxu0 %v20536_v33  ;;  %21217 = vmatpush1.bf16.msra.mxu1 %v20536_v33 }
 0x665   : > { %20538 = vmatprep.subr.bf16.mxu0 %v25739_v31  ;;  %21204 = vmatprep.subr.bf16.mxu1 %v25739_v31 }
 0x666   : > { %v20539_v8 = vpack.c.bf16 %v6223_v46, %v6222_v47 }
 0x668   : > { %20540 = vmatpush1.bf16.msra.mxu0 %v20539_v8  ;;  %21218 = vmatpush1.bf16.msra.mxu1 %v20539_v8 }
 0x669   : > { %20542 = vmatprep.subr.bf16.mxu0 %v20541_v57 }
 0x66b   : > { %6370 = vmatmul.mubr.f32.vlgmr.msra.gmra.mrb[240].mxu0 %v6224_v59  ;;  %6395 = vmatmul.mubr.f32.vlgmr.msra.gmra.mrb[72].mxu1 %v6234_v11 }
 0x66c   : > { %15746 = vmatprep.mubr.msk.f32.mxu0 %vm6256_vm3, %v6227_v9  ;;  %15751 = vmatprep.mubr.msk.f32.mxu1 %vm6256_vm3, %v6237_v18 }
 0x66d   : > { %20544 = vmatpush3.bf16.msra.mxu0 %v20541_v57 }
 0x66e   : > { %20547 = vmatprep.subr.msk.bf16.mxu0 %vm20546_vm6, %v20545_v24 }
 0x66f   : > { %6375 = vmatmul.mubr.f32.gmra.mrb[242].mxu0 %v6226_v35  ;;  %6400 = vmatmul.mubr.f32.gmra.mrb[74].mxu1 %v6236_v30 }
 0x670   : > { %15747 = vmatprep.mubr.msk.f32.mxu0 %vm6256_vm3, %v6229_v39  ;;  %15752 = vmatprep.mubr.msk.f32.mxu1 %vm6256_vm3, %v6239_v15  ;;  %v6748_v15 = vld [vmem:[#allocation7] sm:$0xff] }
 0x671   : > { %20550 = vmatpush3.bf16.msk.msra.mxu0 %vm20546_vm6, %v20545_v24  ;;  %v25797_v24 = vld [vmem:[#allocation28_spill] sm:$0xff] }
 0x673   : > { %6380 = vmatmul.mubr.f32.gmra.mrb[244].mxu0 %v6228_v55  ;;  %6405 = vmatmul.mubr.f32.gmra.mrb[76].mxu1 %v6238_v14  ;;  %v25792_v14 = vld [vmem:[#allocation25_spill] sm:$0xff] }
 0x674   : > { %15748 = vmatprep.mubr.msk.f32.mxu0 %vm6256_vm3, %v6231_v49  ;;  %15753 = vmatprep.mubr.msk.f32.mxu1 %vm6256_vm3, %v6241_v7 }
 0x677   : > { %6385 = vmatmul.mubr.f32.gmra.mrb[246].mxu0 %v6230_v20  ;;  %6410 = vmatmul.mubr.f32.gmra.mrb[78].mxu1 %v6240_v16  ;;  %v25793_v20 = vld [vmem:[#allocation24_spill] sm:$0xff] }
 0x678   : > { %15749 = vmatprep.mubr.msk.f32.mxu0 %vm6256_vm3, %v6233_v60  ;;  %15754 = vmatprep.mubr.msk.f32.mxu1 %vm6256_vm3, %v6243_v17 }
 0x67b   : > { %6390 = vmatmul.mubr.f32.gmra.mrb[248].mxu0 %v6232_v43  ;;  %6415 = vmatmul.mubr.f32.gmra.mrb[80].mxu1 %v6242_v19  ;;  %v25794_v43 = vld [vmem:[#allocation27_spill] sm:$0xff] }
 0x67c   : > { %15755 = vmatprep.mubr.msk.f32.mxu1 %vm6256_vm3, %v6245_v2 }
 0x67f   : > { %6420 = vmatmul.mubr.f32.gmra.mrb[82].mxu1 %v6244_v50  ;;  %v25795_v50 = vld [vmem:[#allocation26_spill] sm:$0xff] }
 0x680   : > { %15756 = vmatprep.mubr.msk.f32.mxu1 %vm6256_vm3, %v6247_v61 }
 0x683   : > { %6425 = vmatmul.mubr.f32.gmra.mrb[84].mxu1 %v6246_v52  ;;  %v7101_v52 = vld [vmem:[#allocation9] sm:$0xff] }
 0x684   : > { %15757 = vmatprep.mubr.msk.f32.mxu1 %vm6256_vm3, %v6249_v23  ;;  %v7102_v23 = vld [vmem:[#allocation9 + $0x8] sm:$0xff] }
 0x687   : > { %6430 = vmatmul.mubr.f32.gmra.mrb[86].mxu1 %v6248_v36  ;;  %v7103_v36 = vld [vmem:[#allocation9 + $0x10] sm:$0xff] }
 0x688   : > { %15758 = vmatprep.mubr.msk.f32.mxu1 %vm6256_vm3, %v6251_v25  ;;  %v20583_v25 = vpack.c.bf16 %v7102_v23, %v7101_v52  ;;  %v6768_v52 = vld [vmem:[#allocation7 + $0xa0] sm:$0xff]  ;;  %v6769_v23 = vld [vmem:[#allocation7 + $0xa8] sm:$0xff] }
 0x68a   : > { %20584 = vmatprep.subr.bf16.mxu1 %v20583_v25 }
 0x68b   : > { %6435 = vmatmul.mubr.f32.gmra.mrb[88].mxu1 %v6250_v42  ;;  %v7104_v42 = vld [vmem:[#allocation9 + $0x18] sm:$0xff] }
 0x68c   : > { %15759 = vmatprep.mubr.msk.f32.mxu1 %vm6256_vm3, %v6253_v0  ;;  %20586 = vmatpush3.bf16.msra.mxu1 %v20583_v25  ;;  %v6771_v25 = vld [vmem:[#allocation7 + $0xb8] sm:$0xff] }
 0x68f   : > { %6440 = vmatmul.mubr.f32.gmra.mrb[90].mxu1 %v6252_v22  ;;  %v20587_v22 = vpack.c.bf16 %v7104_v42, %v7103_v36  ;;  %v6770_v36 = vld [vmem:[#allocation7 + $0xb0] sm:$0xff]  ;;  %v6772_v42 = vld [vmem:[#allocation7 + $0xc0] sm:$0xff] }
 0x690   : > { %15760 = vmatprep.mubr.msk.f32.mxu1 %vm6256_vm3, %v6255_v34 }
 0x691   : > { %20588 = vmatprep.subr.bf16.mxu1 %v20587_v22 }
 0x692   : > { %20590 = vmatpush3.bf16.msra.mxu1 %v20587_v22  ;;  %v6774_v22 = vld [vmem:[#allocation7 + $0xd0] sm:$0xff] }
 0x693   : > { %6445 = vmatmul.mubr.f32.gmra.mrb[92].mxu1 %v6254_v40  ;;  %v25796_v40 = vld [vmem:[#allocation29_spill] sm:$0xff] }
 0x73e   : > { %v6396_v54 = vpop.f32.mrb[72].mxu1  ;;  %v6371_v21 = vpop.f32.mrb[240].mxu0 }
 0x73f   : > { %v6398_v63 = vpop.f32.mrb[73].mxu1  ;;  %v6373_v27 = vpop.f32.mrb[241].mxu0  ;;  %18807 = vmatprep.mubr.msk.f32.mxu0 %vm6550_vm7, %v6371_v21 }
 0x742   : > { %v6376_v13 = vpop.f32.mrb[242].mxu0  ;;  %v6401_v45 = vpop.f32.mrb[74].mxu1 }
 0x743   : > { %v6403_v44 = vpop.f32.mrb[75].mxu1  ;;  %18808 = vmatmul.mubr.msk.f32.vlgmr.msra.gmra.mrb[250].mxu0 %vm6550_vm7, %v6376_v13  ;;  %v6378_v12 = vpop.f32.mrb[243].mxu0 }
 0x746   : > { %v6406_v32 = vpop.f32.mrb[76].mxu1  ;;  %v6381_v41 = vpop.f32.mrb[244].mxu0 }
 0x747   : > { %v6408_v6 = vpop.f32.mrb[77].mxu1  ;;  %v6383_v5 = vpop.f32.mrb[245].mxu0  ;;  %18810 = vmatprep.mubr.msk.f32.mxu0 %vm6550_vm7, %v6381_v41 }
 0x74a   : > { %v6386_v4 = vpop.f32.mrb[246].mxu0  ;;  %v6411_v48 = vpop.f32.mrb[78].mxu1 }
 0x74b   : > { %v6413_v28 = vpop.f32.mrb[79].mxu1  ;;  %18811 = vmatmul.mubr.msk.f32.gmra.mrb[252].mxu0 %vm6550_vm7, %v6386_v4  ;;  %v6388_v3 = vpop.f32.mrb[247].mxu0 }
 0x74c   : > { %v25799_v28 = vld [vmem:[#allocation32_spill] sm:$0xff] }
 0x74e   : > { %v6391_v33 = vpop.f32.mrb[248].mxu0  ;;  %v6416_v53 = vpop.f32.mrb[80].mxu1 }
 0x74f   : > { %v6418_v38 = vpop.f32.mrb[81].mxu1  ;;  %18813 = vmatprep.mubr.msk.f32.mxu0 %vm6550_vm7, %v6391_v33  ;;  %v6393_v62 = vpop.f32.mrb[249].mxu0  ;;  %v25800_v33 = vld [vmem:[#allocation31_spill] sm:$0xff] }
 0x750   : > { %18814 = vmatmul.mubr.msk.f32.gmra.mrb[254].mxu0 %vm6550_vm7, %v6396_v54 }
 0x751   : > { %18816 = vmatprep.mubr.msk.f32.mxu0 %vm6550_vm7, %v6401_v45  ;;  %v25798_v45 = vld [vmem:[#allocation30_spill] sm:$0xff] }
 0x752   : > { %v6421_v51 = vpop.f32.mrb[82].mxu1 }
 0x753   : > { %v6423_v46 = vpop.f32.mrb[83].mxu1 }
 0x754   : > { %18817 = vmatmul.mubr.msk.f32.gmra.mrb[0].mxu0 %vm6550_vm7, %v6406_v32 }
 0x755   : > { %18819 = vmatprep.mubr.msk.f32.mxu0 %vm6550_vm7, %v6411_v48 }
 0x756   : > { %v6426_v47 = vpop.f32.mrb[84].mxu1 }
 0x757   : > { %v6428_v57 = vpop.f32.mrb[85].mxu1 }
 0x758   : > { %18820 = vmatmul.mubr.msk.f32.gmra.mrb[2].mxu0 %vm6550_vm7, %v6416_v53 }
 0x759   : > { %18822 = vmatprep.mubr.msk.f32.mxu0 %vm6550_vm7, %v6421_v51 }
 0x75a   : > { %v6431_v8 = vpop.f32.mrb[86].mxu1 }
 0x75b   : > { %v6433_v59 = vpop.f32.mrb[87].mxu1 }
 0x75c   : > { %18823 = vmatmul.mubr.msk.f32.gmra.mrb[4].mxu0 %vm6550_vm7, %v6426_v47  ;;  %v6548_v47 = vpop.permute.xlu1 %6547 }
 0x75d   : > { %18825 = vmatprep.mubr.msk.f32.mxu0 %vm6550_vm7, %v6431_v8  ;;  %v6543_v8 = vpop.permute.xlu0 %6542 }
 0x75e   : > { %v6436_v11 = vpop.f32.mrb[88].mxu1 }
 0x75f   : > { %v6438_v9 = vpop.f32.mrb[89].mxu1 }
 0x760   : > { %18826 = vmatmul.mubr.msk.f32.gmra.mrb[6].mxu0 %vm6550_vm7, %v6436_v11 }
 0x762   : > { %v6441_v18 = vpop.f32.mrb[90].mxu1 }
 0x763   : > { %v6443_v35 = vpop.f32.mrb[91].mxu1  ;;  %18828 = vmatprep.mubr.msk.f32.mxu0 %vm6550_vm7, %v6441_v18 }
 0x764   : > { %v6749_v35 = vld [vmem:[#allocation7 + $0x8] sm:$0xff] }
 0x766   : > { %v6446_v30 = vpop.f32.mrb[92].mxu1 }
 0x767   : > { %v6448_v39 = vpop.f32.mrb[93].mxu1  ;;  %18829 = vmatmul.mubr.msk.f32.gmra.mrb[8].mxu0 %vm6550_vm7, %v6446_v30  ;;  %v6750_v30 = vld [vmem:[#allocation7 + $0x10] sm:$0xff] }
 0x768   : > { %18863 = vmatprep.mubr.f32.mxu0 %v6748_v15  ;;  %v6753_v39 = vld [vmem:[#allocation7 + $0x28] sm:$0xff]  ;;  %v6754_v15 = vld [vmem:[#allocation7 + $0x30] sm:$0xff] }
 0x816   : > { %v18809_v55 = vpop.f32.mrb[250].mxu0 }
 0x817   : > { %v6675_v49 = vadd.f32 %v18809_v55, %v25792_v14  ;;  %v6669_v7 = vpop.f32.mrb[251].mxu0  ;;  %v6755_v55 = vld [vmem:[#allocation7 + $0x38] sm:$0xff]  ;;  %v6756_v14 = vld [vmem:[#allocation7 + $0x40] sm:$0xff] }
 0x818   : > { %v6670_v16 = vadd.f32 %v6669_v7, %v25793_v20  ;;  %v6758_v7 = vld [vmem:[#allocation7 + $0x50] sm:$0xff]  ;;  %v6759_v20 = vld [vmem:[#allocation7 + $0x58] sm:$0xff] }
 0x81a   : > { %v20551_v60 = vpack.c.bf16 %v6675_v49, %v6670_v16  ;;  %v6757_v49 = vld [vmem:[#allocation7 + $0x48] sm:$0xff]  ;;  %v6760_v16 = vld [vmem:[#allocation7 + $0x60] sm:$0xff] }
 0x81c   : > { %20552 = vmatprep.subr.bf16.mxu0 %v20551_v60 }
 0x81d   : > { %20554 = vmatpush3.bf16.msra.mxu0 %v20551_v60  ;;  %v6761_v60 = vld [vmem:[#allocation7 + $0x68] sm:$0xff] }
 0x81e   : > { %v18812_v17 = vpop.f32.mrb[252].mxu0 }
 0x81f   : > { %v6685_v19 = vadd.f32 %v18812_v17, %v25794_v43  ;;  %v6679_v2 = vpop.f32.mrb[253].mxu0  ;;  %v6762_v17 = vld [vmem:[#allocation7 + $0x70] sm:$0xff]  ;;  %v6763_v43 = vld [vmem:[#allocation7 + $0x78] sm:$0xff] }
 0x820   : > { %v6680_v61 = vadd.f32 %v6679_v2, %v25795_v50  ;;  %v6765_v2 = vld [vmem:[#allocation7 + $0x88] sm:$0xff]  ;;  %v6766_v50 = vld [vmem:[#allocation7 + $0x90] sm:$0xff] }
 0x822   : > { %v20555_v0 = vpack.c.bf16 %v6685_v19, %v6680_v61  ;;  %v6764_v19 = vld [vmem:[#allocation7 + $0x80] sm:$0xff]  ;;  %v6767_v61 = vld [vmem:[#allocation7 + $0x98] sm:$0xff] }
 0x823   : > { %v18815_v34 = vpop.f32.mrb[254].mxu0 }
 0x824   : > { %v6695_v29 = vadd.f32 %v18815_v34, %v25796_v40  ;;  %v6689_v1 = vpop.f32.mrb[255].mxu0  ;;  %20556 = vmatprep.subr.bf16.mxu0 %v20555_v0  ;;  %v6775_v34 = vld [vmem:[#allocation7 + $0xd8] sm:$0xff]  ;;  %v6776_v40 = vld [vmem:[#allocation7 + $0xe0] sm:$0xff] }
 0x825   : > { %v6690_v54 = vadd.f32 %v6689_v1, %v25797_v24  ;;  %20558 = vmatpush3.bf16.msra.mxu0 %v20555_v0  ;;  %v6773_v0 = vld [vmem:[#allocation7 + $0xc8] sm:$0xff]  ;;  %v6778_v1 = vld [vmem:[#allocation7 + $0xf0] sm:$0xff]  ;;  %v6779_v24 = vld [vmem:[#allocation7 + $0xf8] sm:$0xff] }
 0x827   : > { %v18818_v21 = vpop.f32.mrb[0].mxu0  ;;  %v20559_v63 = vpack.c.bf16 %v6695_v29, %v6690_v54  ;;  %v6777_v29 = vld [vmem:[#allocation7 + $0xe8] sm:$0xff]  ;;  %v6780_v54 = vld [vmem:[#allocation7 + $0x100] sm:$0xff] }
 0x828   : > { %v6705_v27 = vadd.f32 %v18818_v21, %v23845_v10  ;;  %v6699_v13 = vpop.f32.mrb[1].mxu0  ;;  %v6781_v21 = vld [vmem:[#allocation7 + $0x108] sm:$0xff] }
 0x829   : > { %v6700_v44 = vadd.f32 %v6699_v13, %v25798_v45  ;;  %20560 = vmatprep.subr.bf16.mxu0 %v20559_v63  ;;  %v6784_v13 = vld [vmem:[#allocation7 + $0x120] sm:$0xff]  ;;  %v6785_v45 = vld [vmem:[#allocation7 + $0x128] sm:$0xff] }
 0x82a   : > { %20562 = vmatpush3.bf16.msra.mxu0 %v20559_v63  ;;  %v6782_v63 = vld [vmem:[#allocation7 + $0x110] sm:$0xff] }
 0x82b   : > { %v18821_v12 = vpop.f32.mrb[2].mxu0  ;;  %v20563_v32 = vpack.c.bf16 %v6705_v27, %v6700_v44  ;;  %v6783_v27 = vld [vmem:[#allocation7 + $0x118] sm:$0xff]  ;;  %v6786_v44 = vld [vmem:[#allocation7 + $0x130] sm:$0xff] }
 0x82c   : > { %v6715_v41 = vadd.f32 %v18821_v12, %v23869_v58  ;;  %v6709_v6 = vpop.f32.mrb[3].mxu0  ;;  %v6787_v12 = vld [vmem:[#allocation7 + $0x138] sm:$0xff] }
 0x82d   : > { %v6710_v5 = vadd.f32 %v6709_v6, %v23854_v37  ;;  %20564 = vmatprep.subr.bf16.mxu0 %v20563_v32  ;;  %v6790_v6 = vld [vmem:[#allocation7 + $0x150] sm:$0xff] }
 0x82e   : > { %20566 = vmatpush3.bf16.msra.mxu0 %v20563_v32  ;;  %v6788_v32 = vld [vmem:[#allocation7 + $0x140] sm:$0xff] }
 0x82f   : > { %v18824_v4 = vpop.f32.mrb[4].mxu0  ;;  %v20567_v48 = vpack.c.bf16 %v6715_v41, %v6710_v5  ;;  %v6789_v41 = vld [vmem:[#allocation7 + $0x148] sm:$0xff]  ;;  %v6791_v5 = vld [vmem:[#allocation7 + $0x158] sm:$0xff] }
 0x830   : > { %v6725_v3 = vadd.f32 %v18824_v4, %v25799_v28  ;;  %v6719_v10 = vpop.f32.mrb[5].mxu0  ;;  %v6792_v4 = vld [vmem:[#allocation7 + $0x160] sm:$0xff]  ;;  %v6794_v28 = vld [vmem:[#allocation7 + $0x170] sm:$0xff] }
 0x831   : > { %v6720_v53 = vadd.f32 %v6719_v10, %v25800_v33  ;;  %20568 = vmatprep.subr.bf16.mxu0 %v20567_v48 }
 0x832   : > { %20570 = vmatpush3.bf16.msra.mxu0 %v20567_v48  ;;  %v6793_v48 = vld [vmem:[#allocation7 + $0x168] sm:$0xff] }
 0x833   : > { %v18827_v38 = vpop.f32.mrb[6].mxu0  ;;  %v20571_v62 = vpack.c.bf16 %v6725_v3, %v6720_v53  ;;  %v6795_v3 = vld [vmem:[#allocation7 + $0x178] sm:$0xff] }
 0x834   : > { %v6735_v51 = vadd.f32 %v18827_v38, %v23906_v26  ;;  %v6729_v46 = vpop.f32.mrb[7].mxu0  ;;  %v6751_v26 = vld [vmem:[#allocation7 + $0x18] sm:$0xff] }
 0x835   : > { %v6730_v58 = vadd.f32 %v6729_v46, %v23899_v56  ;;  %20572 = vmatprep.subr.bf16.mxu0 %v20571_v62  ;;  %v6752_v56 = vld [vmem:[#allocation7 + $0x20] sm:$0xff] }
 0x836   : > { %20574 = vmatpush3.bf16.msra.mxu0 %v20571_v62 }
 0x837   : > { %v20575_v37 = vpack.c.bf16 %v6735_v51, %v6730_v58 }
 0x839   : > { %20576 = vmatprep.subr.bf16.mxu0 %v20575_v37 }
 0x83a   : > { %v18830_v57 = vpop.f32.mrb[8].mxu0  ;;  %20578 = vmatpush3.bf16.msra.mxu0 %v20575_v37 }
 0x83b   : > { %v6745_v59 = vadd.f32 %v18830_v57, %v6548_v47  ;;  %v6739_v11 = vpop.f32.mrb[9].mxu0 }
 0x83c   : > { %v6740_v9 = vadd.f32 %v6739_v11, %v6543_v8 }
 0x83e   : > { %v20579_v18 = vpack.c.bf16 %v6745_v59, %v6740_v9 }
 0x840   : > { %20580 = vmatprep.subr.bf16.mxu0 %v20579_v18 }
 0x841   : > { %20582 = vmatpush3.bf16.msra.mxu0 %v20579_v18 }
 0x842   : > { %20591 = vmatprep.subr.bf16.mxu0 %v25739_v31 }
 0x844   : > { %18864 = vmatmul.mubr.f32.vlgmr.msra.gmra.mrb[10].mxu0 %v6749_v35 }
 0x845   : > { %18866 = vmatprep.mubr.f32.mxu0 %v6750_v30 }
 0x848   : > { %18867 = vmatmul.mubr.f32.gmra.mrb[12].mxu0 %v6751_v26 }
 0x849   : > { %18869 = vmatprep.mubr.f32.mxu0 %v6752_v56 }
 0x84c   : > { %18870 = vmatmul.mubr.f32.gmra.mrb[14].mxu0 %v6753_v39 }
 0x84d   : > { %18872 = vmatprep.mubr.f32.mxu0 %v6754_v15 }
 0x850   : > { %18873 = vmatmul.mubr.f32.gmra.mrb[16].mxu0 %v6755_v55 }
 0x851   : > { %18875 = vmatprep.mubr.f32.mxu0 %v6756_v14 }
 0x854   : > { %18876 = vmatmul.mubr.f32.gmra.mrb[18].mxu0 %v6757_v49 }
 0x855   : > { %18878 = vmatprep.mubr.f32.mxu0 %v6758_v7 }
 0x858   : > { %18879 = vmatmul.mubr.f32.gmra.mrb[20].mxu0 %v6759_v20 }
 0x859   : > { %18881 = vmatprep.mubr.f32.mxu0 %v6760_v16 }
 0x85c   : > { %18882 = vmatmul.mubr.f32.gmra.mrb[22].mxu0 %v6761_v60 }
 0x85d   : > { %18884 = vmatprep.mubr.f32.mxu0 %v6762_v17 }
 0x860   : > { %18885 = vmatmul.mubr.f32.gmra.mrb[24].mxu0 %v6763_v43 }
 0x861   : > { %18887 = vmatprep.mubr.f32.mxu0 %v6764_v19 }
 0x864   : > { %18888 = vmatmul.mubr.f32.gmra.mrb[26].mxu0 %v6765_v2 }
 0x865   : > { %18890 = vmatprep.mubr.f32.mxu0 %v6766_v50 }
 0x868   : > { %18891 = vmatmul.mubr.f32.gmra.mrb[28].mxu0 %v6767_v61 }
 0x869   : > { %18893 = vmatprep.mubr.f32.mxu0 %v6768_v52 }
 0x86c   : > { %18894 = vmatmul.mubr.f32.gmra.mrb[30].mxu0 %v6769_v23 }
 0x86d   : > { %18896 = vmatprep.mubr.f32.mxu0 %v6770_v36 }
 0x870   : > { %18897 = vmatmul.mubr.f32.gmra.mrb[32].mxu0 %v6771_v25 }
 0x871   : > { %18899 = vmatprep.mubr.f32.mxu0 %v6772_v42 }
 0x874   : > { %18900 = vmatmul.mubr.f32.gmra.mrb[34].mxu0 %v6773_v0 }
 0x875   : > { %18902 = vmatprep.mubr.f32.mxu0 %v6774_v22 }
 0x878   : > { %18903 = vmatmul.mubr.f32.gmra.mrb[36].mxu0 %v6775_v34 }
 0x879   : > { %18905 = vmatprep.mubr.f32.mxu0 %v6776_v40 }
 0x87c   : > { %18906 = vmatmul.mubr.f32.gmra.mrb[38].mxu0 %v6777_v29 }
 0x87d   : > { %18908 = vmatprep.mubr.f32.mxu0 %v6778_v1 }
 0x880   : > { %18909 = vmatmul.mubr.f32.gmra.mrb[40].mxu0 %v6779_v24 }
 0x881   : > { %18911 = vmatprep.mubr.f32.mxu0 %v6780_v54 }
 0x884   : > { %18912 = vmatmul.mubr.f32.gmra.mrb[42].mxu0 %v6781_v21  ;;  %v7603_v21 = vld [vmem:[#allocation10 + $0x8] sm:$0xff] }
 0x885   : > { %18914 = vmatprep.mubr.f32.mxu0 %v6782_v63  ;;  %v7604_v63 = vld [vmem:[#allocation10 + $0x10] sm:$0xff] }
 0x888   : > { %18915 = vmatmul.mubr.f32.gmra.mrb[44].mxu0 %v6783_v27 }
 0x889   : > { %18917 = vmatprep.mubr.f32.mxu0 %v6784_v13 }
 0x88c   : > { %18918 = vmatmul.mubr.f32.gmra.mrb[46].mxu0 %v6785_v45 }
 0x88d   : > { %18920 = vmatprep.mubr.f32.mxu0 %v6786_v44 }
 0x890   : > { %18921 = vmatmul.mubr.f32.gmra.mrb[48].mxu0 %v6787_v12 }
 0x891   : > { %18923 = vmatprep.mubr.f32.mxu0 %v6788_v32 }
 0x894   : > { %18924 = vmatmul.mubr.f32.gmra.mrb[50].mxu0 %v6789_v41 }
 0x895   : > { %18926 = vmatprep.mubr.f32.mxu0 %v6790_v6 }
 0x898   : > { %18927 = vmatmul.mubr.f32.gmra.mrb[52].mxu0 %v6791_v5 }
 0x899   : > { %18929 = vmatprep.mubr.f32.mxu0 %v6792_v4 }
 0x89c   : > { %18930 = vmatmul.mubr.f32.gmra.mrb[54].mxu0 %v6793_v48 }
 0x89d   : > { %18932 = vmatprep.mubr.f32.mxu0 %v6794_v28 }
 0x8a0   : > { %18933 = vmatmul.mubr.f32.gmra.mrb[56].mxu0 %v6795_v3 }
 0x8a1   : > { %7810 = vmatprep.mubr.f32.mxu0 %v7603_v21 }
 0x917   : > { %v18865_v10 = vpop.f32.mrb[10].mxu0 }
 0x918   : > { %v6862_v33 = vpop.f32.mrb[11].mxu0 }
 0x919   : > { %18943 = vmatprep.mubr.msk.f32.mxu1 %vm1529_vm2, %v6862_v33 }
 0x91a   : > { %18944 = vmatmul.mubr.msk.f32.vlgmr.msra.gmra.mrb[94].mxu1 %vm1529_vm2, %v18865_v10 }
 0x91b   : > { %v18868_v53 = vpop.f32.mrb[12].mxu0 }
 0x91c   : > { %v6872_v38 = vpop.f32.mrb[13].mxu0 }
 0x91d   : > { %18946 = vmatprep.mubr.msk.f32.mxu1 %vm1529_vm2, %v6872_v38 }
 0x91e   : > { %18947 = vmatmul.mubr.msk.f32.gmra.mrb[96].mxu1 %vm1529_vm2, %v18868_v53 }
 0x91f   : > { %v18871_v62 = vpop.f32.mrb[14].mxu0 }
 0x920   : > { %v6882_v51 = vpop.f32.mrb[15].mxu0 }
 0x921   : > { %18949 = vmatprep.mubr.msk.f32.mxu1 %vm1529_vm2, %v6882_v51 }
 0x922   : > { %18950 = vmatmul.mubr.msk.f32.gmra.mrb[98].mxu1 %vm1529_vm2, %v18871_v62 }
 0x923   : > { %v18874_v46 = vpop.f32.mrb[16].mxu0 }
 0x924   : > { %v6892_v58 = vpop.f32.mrb[17].mxu0 }
 0x925   : > { %18952 = vmatprep.mubr.msk.f32.mxu1 %vm1529_vm2, %v6892_v58 }
 0x926   : > { %18953 = vmatmul.mubr.msk.f32.gmra.mrb[100].mxu1 %vm1529_vm2, %v18874_v46 }
 0x927   : > { %v18877_v37 = vpop.f32.mrb[18].mxu0 }
 0x928   : > { %v6902_v47 = vpop.f32.mrb[19].mxu0 }
 0x929   : > { %18955 = vmatprep.mubr.msk.f32.mxu1 %vm1529_vm2, %v6902_v47 }
 0x92a   : > { %18956 = vmatmul.mubr.msk.f32.gmra.mrb[102].mxu1 %vm1529_vm2, %v18877_v37 }
 0x92b   : > { %v18880_v57 = vpop.f32.mrb[20].mxu0 }
 0x92c   : > { %v6912_v8 = vpop.f32.mrb[21].mxu0 }
 0x92d   : > { %18958 = vmatprep.mubr.msk.f32.mxu1 %vm1529_vm2, %v6912_v8 }
 0x92e   : > { %18959 = vmatmul.mubr.msk.f32.gmra.mrb[104].mxu1 %vm1529_vm2, %v18880_v57 }
 0x92f   : > { %v18883_v59 = vpop.f32.mrb[22].mxu0 }
 0x930   : > { %v6922_v11 = vpop.f32.mrb[23].mxu0 }
 0x931   : > { %18961 = vmatprep.mubr.msk.f32.mxu1 %vm1529_vm2, %v6922_v11 }
 0x932   : > { %18962 = vmatmul.mubr.msk.f32.gmra.mrb[106].mxu1 %vm1529_vm2, %v18883_v59 }
 0x933   : > { %v18886_v9 = vpop.f32.mrb[24].mxu0 }
 0x934   : > { %v6932_v18 = vpop.f32.mrb[25].mxu0 }
 0x935   : > { %18964 = vmatprep.mubr.msk.f32.mxu1 %vm1529_vm2, %v6932_v18 }
 0x936   : > { %18965 = vmatmul.mubr.msk.f32.gmra.mrb[108].mxu1 %vm1529_vm2, %v18886_v9 }
 0x937   : > { %v18889_v35 = vpop.f32.mrb[26].mxu0 }
 0x938   : > { %v6942_v30 = vpop.f32.mrb[27].mxu0 }
 0x939   : > { %18967 = vmatprep.mubr.msk.f32.mxu1 %vm1529_vm2, %v6942_v30 }
 0x93a   : > { %18968 = vmatmul.mubr.msk.f32.gmra.mrb[110].mxu1 %vm1529_vm2, %v18889_v35 }
 0x93b   : > { %v18892_v26 = vpop.f32.mrb[28].mxu0 }
 0x93c   : > { %v6952_v56 = vpop.f32.mrb[29].mxu0 }
 0x93d   : > { %18970 = vmatprep.mubr.msk.f32.mxu1 %vm1529_vm2, %v6952_v56 }
 0x93e   : > { %18971 = vmatmul.mubr.msk.f32.gmra.mrb[112].mxu1 %vm1529_vm2, %v18892_v26 }
 0x93f   : > { %v18895_v39 = vpop.f32.mrb[30].mxu0 }
 0x940   : > { %v6962_v15 = vpop.f32.mrb[31].mxu0 }
 0x941   : > { %18973 = vmatprep.mubr.msk.f32.mxu1 %vm1529_vm2, %v6962_v15 }
 0x942   : > { %18974 = vmatmul.mubr.msk.f32.gmra.mrb[114].mxu1 %vm1529_vm2, %v18895_v39 }
 0x943   : > { %v18898_v55 = vpop.f32.mrb[32].mxu0 }
 0x944   : > { %v6972_v14 = vpop.f32.mrb[33].mxu0 }
 0x945   : > { %18976 = vmatprep.mubr.msk.f32.mxu1 %vm1529_vm2, %v6972_v14 }
 0x946   : > { %18977 = vmatmul.mubr.msk.f32.gmra.mrb[116].mxu1 %vm1529_vm2, %v18898_v55 }
 0x947   : > { %v18901_v49 = vpop.f32.mrb[34].mxu0 }
 0x948   : > { %v6982_v7 = vpop.f32.mrb[35].mxu0 }
 0x949   : > { %18979 = vmatprep.mubr.msk.f32.mxu1 %vm1529_vm2, %v6982_v7 }
 0x94a   : > { %18980 = vmatmul.mubr.msk.f32.gmra.mrb[118].mxu1 %vm1529_vm2, %v18901_v49 }
 0x94b   : > { %v18904_v20 = vpop.f32.mrb[36].mxu0 }
 0x94c   : > { %v6992_v16 = vpop.f32.mrb[37].mxu0 }
 0x94d   : > { %18982 = vmatprep.mubr.msk.f32.mxu1 %vm1529_vm2, %v6992_v16 }
 0x94e   : > { %18983 = vmatmul.mubr.msk.f32.gmra.mrb[120].mxu1 %vm1529_vm2, %v18904_v20 }
 0x94f   : > { %v18907_v60 = vpop.f32.mrb[38].mxu0 }
 0x950   : > { %v7002_v17 = vpop.f32.mrb[39].mxu0 }
 0x951   : > { %18985 = vmatprep.mubr.msk.f32.mxu1 %vm1529_vm2, %v7002_v17 }
 0x952   : > { %18986 = vmatmul.mubr.msk.f32.gmra.mrb[122].mxu1 %vm1529_vm2, %v18907_v60 }
 0x953   : > { %v18910_v43 = vpop.f32.mrb[40].mxu0 }
 0x954   : > { %v7012_v19 = vpop.f32.mrb[41].mxu0 }
 0x955   : > { %18988 = vmatprep.mubr.msk.f32.mxu1 %vm1529_vm2, %v7012_v19 }
 0x956   : > { %18989 = vmatmul.mubr.msk.f32.gmra.mrb[124].mxu1 %vm1529_vm2, %v18910_v43 }
 0x957   : > { %v18913_v2 = vpop.f32.mrb[42].mxu0 }
 0x958   : > { %v7022_v50 = vpop.f32.mrb[43].mxu0 }
 0x959   : > { %18991 = vmatprep.mubr.msk.f32.mxu1 %vm1529_vm2, %v7022_v50 }
 0x95a   : > { %18992 = vmatmul.mubr.msk.f32.gmra.mrb[126].mxu1 %vm1529_vm2, %v18913_v2 }
 0x95b   : > { %v18916_v61 = vpop.f32.mrb[44].mxu0 }
 0x95c   : > { %v7032_v52 = vpop.f32.mrb[45].mxu0 }
 0x95d   : > { %18994 = vmatprep.mubr.msk.f32.mxu1 %vm1529_vm2, %v7032_v52 }
 0x95e   : > { %18995 = vmatmul.mubr.msk.f32.gmra.mrb[128].mxu1 %vm1529_vm2, %v18916_v61 }
 0x95f   : > { %v18919_v23 = vpop.f32.mrb[46].mxu0 }
 0x960   : > { %v7042_v36 = vpop.f32.mrb[47].mxu0 }
 0x961   : > { %18997 = vmatprep.mubr.msk.f32.mxu1 %vm1529_vm2, %v7042_v36 }
 0x962   : > { %18998 = vmatmul.mubr.msk.f32.gmra.mrb[130].mxu1 %vm1529_vm2, %v18919_v23 }
 0x963   : > { %v18922_v25 = vpop.f32.mrb[48].mxu0 }
 0x964   : > { %v7052_v42 = vpop.f32.mrb[49].mxu0 }
 0x965   : > { %19000 = vmatprep.mubr.msk.f32.mxu1 %vm1529_vm2, %v7052_v42 }
 0x966   : > { %19001 = vmatmul.mubr.msk.f32.gmra.mrb[132].mxu1 %vm1529_vm2, %v18922_v25 }
 0x967   : > { %v18925_v0 = vpop.f32.mrb[50].mxu0 }
 0x968   : > { %v7062_v22 = vpop.f32.mrb[51].mxu0 }
 0x969   : > { %19003 = vmatprep.mubr.msk.f32.mxu1 %vm1529_vm2, %v7062_v22 }
 0x96a   : > { %19004 = vmatmul.mubr.msk.f32.gmra.mrb[134].mxu1 %vm1529_vm2, %v18925_v0 }
 0x96b   : > { %v18928_v34 = vpop.f32.mrb[52].mxu0 }
 0x96c   : > { %v7072_v40 = vpop.f32.mrb[53].mxu0 }
 0x96d   : > { %19006 = vmatprep.mubr.msk.f32.mxu1 %vm1529_vm2, %v7072_v40 }
 0x96e   : > { %19007 = vmatmul.mubr.msk.f32.gmra.mrb[136].mxu1 %vm1529_vm2, %v18928_v34 }
 0x96f   : > { %v18931_v29 = vpop.f32.mrb[54].mxu0 }
 0x970   : > { %v7082_v1 = vpop.f32.mrb[55].mxu0 }
 0x971   : > { %19009 = vmatprep.mubr.msk.f32.mxu1 %vm1529_vm2, %v7082_v1 }
 0x972   : > { %19010 = vmatmul.mubr.msk.f32.gmra.mrb[138].mxu1 %vm1529_vm2, %v18931_v29 }
 0x973   : > { %v18934_v24 = vpop.f32.mrb[56].mxu0 }
 0x974   : > { %v7092_v54 = vpop.f32.mrb[57].mxu0 }
 0x975   : > { %19012 = vmatprep.mubr.msk.f32.mxu1 %vm1529_vm2, %v7092_v54 }
 0x976   : > { %19013 = vmatmul.mubr.msk.f32.gmra.mrb[140].mxu1 %vm1529_vm2, %v18934_v24 }
 0x977   : > { %19047 = vmatprep.mubr.f32.mxu1 %v7604_v63 }
 0x9ed   : > { %v18945_v27 = vpop.f32.mrb[94].mxu1 }
 0x9ee   : > { %v7555_v13 = vmax.f32 %v18945_v27, 0.0  ;;  %v7315_v45 = vpop.f32.mrb[95].mxu1 }
 0x9ef   : > { %v7554_v44 = vmax.f32 %v7315_v45, 0.0 }
 0x9f1   : > { %v24238_v12 = vpack.c.bf16 %v7555_v13, %v7554_v44  ;;  %v18948_v32 = vpop.f32.mrb[96].mxu1 }
 0x9f2   : > { %v7557_v41 = vmax.f32 %v18948_v32, 0.0  ;;  %v7325_v6 = vpop.f32.mrb[97].mxu1 }
 0x9f3   : > { %v7556_v5 = vmax.f32 %v7325_v6, 0.0  ;;  %20593 = vmatpush1.bf16.msra.mxu0 %v24238_v12 }
 0x9f4   : > { %20594 = vmatprep.subr.bf16.mxu0 %v25739_v31 }
 0x9f5   : > { %v24242_v4 = vpack.c.bf16 %v7557_v41, %v7556_v5  ;;  %v18951_v48 = vpop.f32.mrb[98].mxu1 }
 0x9f6   : > { %v7559_v28 = vmax.f32 %v18951_v48, 0.0  ;;  %v7335_v3 = vpop.f32.mrb[99].mxu1 }
 0x9f7   : > { %v7558_v10 = vmax.f32 %v7335_v3, 0.0  ;;  %20596 = vmatpush1.bf16.msra.mxu0 %v24242_v4 }
 0x9f8   : > { %20597 = vmatprep.subr.bf16.mxu0 %v25739_v31 }
 0x9f9   : > { %v24246_v33 = vpack.c.bf16 %v7559_v28, %v7558_v10  ;;  %v18954_v53 = vpop.f32.mrb[100].mxu1 }
 0x9fa   : > { %v7561_v38 = vmax.f32 %v18954_v53, 0.0  ;;  %v7345_v62 = vpop.f32.mrb[101].mxu1 }
 0x9fb   : > { %v7560_v51 = vmax.f32 %v7345_v62, 0.0  ;;  %20599 = vmatpush1.bf16.msra.mxu0 %v24246_v33 }
 0x9fc   : > { %20600 = vmatprep.subr.bf16.mxu0 %v25739_v31 }
 0x9fd   : > { %v24250_v46 = vpack.c.bf16 %v7561_v38, %v7560_v51  ;;  %v18957_v58 = vpop.f32.mrb[102].mxu1 }
 0x9fe   : > { %v7563_v37 = vmax.f32 %v18957_v58, 0.0  ;;  %v7355_v47 = vpop.f32.mrb[103].mxu1 }
 0x9ff   : > { %v7562_v57 = vmax.f32 %v7355_v47, 0.0  ;;  %20602 = vmatpush1.bf16.msra.mxu0 %v24250_v46 }
 0xa00   : > { %20603 = vmatprep.subr.bf16.mxu0 %v25739_v31 }
 0xa01   : > { %v24254_v8 = vpack.c.bf16 %v7563_v37, %v7562_v57  ;;  %v18960_v59 = vpop.f32.mrb[104].mxu1 }
 0xa02   : > { %v7565_v11 = vmax.f32 %v18960_v59, 0.0  ;;  %v7365_v9 = vpop.f32.mrb[105].mxu1 }
 0xa03   : > { %v7564_v18 = vmax.f32 %v7365_v9, 0.0  ;;  %20605 = vmatpush1.bf16.msra.mxu0 %v24254_v8 }
 0xa04   : > { %20606 = vmatprep.subr.bf16.mxu0 %v25739_v31 }
 0xa05   : > { %v24258_v35 = vpack.c.bf16 %v7565_v11, %v7564_v18  ;;  %v18963_v30 = vpop.f32.mrb[106].mxu1  ;;  %v7602_v11 = vld [vmem:[#allocation10] sm:$0xff] }
 0xa06   : > { %v7567_v26 = vmax.f32 %v18963_v30, 0.0  ;;  %v7375_v56 = vpop.f32.mrb[107].mxu1 }
 0xa07   : > { %v7566_v39 = vmax.f32 %v7375_v56, 0.0  ;;  %20608 = vmatpush1.bf16.msra.mxu0 %v24258_v35  ;;  %v7606_v56 = vld [vmem:[#allocation10 + $0x20] sm:$0xff] }
 0xa08   : > { %20609 = vmatprep.subr.bf16.mxu0 %v25739_v31 }
 0xa09   : > { %v24262_v15 = vpack.c.bf16 %v7567_v26, %v7566_v39  ;;  %v18966_v55 = vpop.f32.mrb[108].mxu1 }
 0xa0a   : > { %v7569_v14 = vmax.f32 %v18966_v55, 0.0  ;;  %v7385_v49 = vpop.f32.mrb[109].mxu1  ;;  %v7605_v55 = vld [vmem:[#allocation10 + $0x18] sm:$0xff] }
 0xa0b   : > { %v7568_v7 = vmax.f32 %v7385_v49, 0.0  ;;  %20611 = vmatpush1.bf16.msra.mxu0 %v24262_v15 }
 0xa0c   : > { %20612 = vmatprep.subr.bf16.mxu0 %v25739_v31 }
 0xa0d   : > { %v24266_v20 = vpack.c.bf16 %v7569_v14, %v7568_v7  ;;  %v18969_v16 = vpop.f32.mrb[110].mxu1 }
 0xa0e   : > { %v7571_v60 = vmax.f32 %v18969_v16, 0.0  ;;  %v7395_v17 = vpop.f32.mrb[111].mxu1 }
 0xa0f   : > { %v7570_v43 = vmax.f32 %v7395_v17, 0.0  ;;  %20614 = vmatpush1.bf16.msra.mxu0 %v24266_v20 }
 0xa10   : > { %20615 = vmatprep.subr.bf16.mxu0 %v25739_v31 }
 0xa11   : > { %v24270_v19 = vpack.c.bf16 %v7571_v60, %v7570_v43  ;;  %v18972_v2 = vpop.f32.mrb[112].mxu1  ;;  %v7609_v60 = vld [vmem:[#allocation10 + $0x38] sm:$0xff]  ;;  %v7608_v43 = vld [vmem:[#allocation10 + $0x30] sm:$0xff] }
 0xa12   : > { %v7573_v50 = vmax.f32 %v18972_v2, 0.0  ;;  %v7405_v61 = vpop.f32.mrb[113].mxu1 }
 0xa13   : > { %v7572_v52 = vmax.f32 %v7405_v61, 0.0  ;;  %20617 = vmatpush1.bf16.msra.mxu0 %v24270_v19 }
 0xa14   : > { %20618 = vmatprep.subr.bf16.mxu0 %v25739_v31 }
 0xa15   : > { %v24274_v23 = vpack.c.bf16 %v7573_v50, %v7572_v52  ;;  %v18975_v36 = vpop.f32.mrb[114].mxu1 }
 0xa16   : > { %v7575_v25 = vmax.f32 %v18975_v36, 0.0  ;;  %v7415_v42 = vpop.f32.mrb[115].mxu1  ;;  %v7612_v36 = vld [vmem:[#allocation10 + $0x50] sm:$0xff] }
 0xa17   : > { %v7574_v0 = vmax.f32 %v7415_v42, 0.0  ;;  %20620 = vmatpush1.bf16.msra.mxu0 %v24274_v23  ;;  %v7611_v42 = vld [vmem:[#allocation10 + $0x48] sm:$0xff] }
 0xa18   : > { %20621 = vmatprep.subr.bf16.mxu0 %v25739_v31 }
 0xa19   : > { %v24278_v22 = vpack.c.bf16 %v7575_v25, %v7574_v0  ;;  %v18978_v34 = vpop.f32.mrb[116].mxu1 }
 0xa1a   : > { %v7577_v40 = vmax.f32 %v18978_v34, 0.0  ;;  %v7425_v29 = vpop.f32.mrb[117].mxu1 }
 0xa1b   : > { %v7576_v1 = vmax.f32 %v7425_v29, 0.0  ;;  %20623 = vmatpush1.bf16.msra.mxu0 %v24278_v22 }
 0xa1c   : > { %20624 = vmatprep.subr.bf16.mxu0 %v25739_v31 }
 0xa1d   : > { %v24282_v24 = vpack.c.bf16 %v7577_v40, %v7576_v1  ;;  %v18981_v54 = vpop.f32.mrb[118].mxu1  ;;  %v7615_v1 = vld [vmem:[#allocation10 + $0x68] sm:$0xff] }
 0xa1e   : > { %v7579_v21 = vmax.f32 %v18981_v54, 0.0  ;;  %v7435_v63 = vpop.f32.mrb[119].mxu1 }
 0xa1f   : > { %25801 = vst [vmem:[#allocation21_spill] sm:$0xff] %v24282_v24  ;;  %v7578_v27 = vmax.f32 %v7435_v63, 0.0  ;;  %20626 = vmatpush1.bf16.msra.mxu0 %v24282_v24 }
 0xa20   : > { %20627 = vmatprep.subr.bf16.mxu0 %v25739_v31 }
 0xa21   : > { %v24286_v13 = vpack.c.bf16 %v7579_v21, %v7578_v27  ;;  %v18984_v45 = vpop.f32.mrb[120].mxu1  ;;  %v7614_v21 = vld [vmem:[#allocation10 + $0x60] sm:$0xff] }
 0xa22   : > { %v7581_v44 = vmax.f32 %v18984_v45, 0.0  ;;  %v7445_v32 = vpop.f32.mrb[121].mxu1 }
 0xa23   : > { %25802 = vst [vmem:[#allocation23_spill] sm:$0xff] %v24286_v13  ;;  %v7580_v41 = vmax.f32 %v7445_v32, 0.0  ;;  %20629 = vmatpush1.bf16.msra.mxu0 %v24286_v13  ;;  %v7618_v32 = vld [vmem:[#allocation10 + $0x80] sm:$0xff] }
 0xa24   : > { %20630 = vmatprep.subr.bf16.mxu0 %v25739_v31 }
 0xa25   : > { %v24290_v6 = vpack.c.bf16 %v7581_v44, %v7580_v41  ;;  %v18987_v5 = vpop.f32.mrb[122].mxu1 }
 0xa26   : > { %v7583_v48 = vmax.f32 %v18987_v5, 0.0  ;;  %v7455_v28 = vpop.f32.mrb[123].mxu1  ;;  %v7617_v5 = vld [vmem:[#allocation10 + $0x78] sm:$0xff] }
 0xa27   : > { %25803 = vst [vmem:[#allocation22_spill] sm:$0xff] %v24290_v6  ;;  %v7582_v3 = vmax.f32 %v7455_v28, 0.0  ;;  %20632 = vmatpush1.bf16.msra.mxu0 %v24290_v6 }
 0xa28   : > { %20633 = vmatprep.subr.bf16.mxu0 %v25739_v31 }
 0xa29   : > { %v24294_v10 = vpack.c.bf16 %v7583_v48, %v7582_v3  ;;  %v18990_v53 = vpop.f32.mrb[124].mxu1 }
 0xa2a   : > { %v7585_v38 = vmax.f32 %v18990_v53, 0.0  ;;  %v7465_v62 = vpop.f32.mrb[125].mxu1 }
 0xa2b   : > { %25804 = vst [vmem:[#allocation25_spill] sm:$0xff] %v24294_v10  ;;  %v7584_v51 = vmax.f32 %v7465_v62, 0.0  ;;  %20635 = vmatpush1.bf16.msra.mxu0 %v24294_v10 }
 0xa2c   : > { %20636 = vmatprep.subr.bf16.mxu0 %v25739_v31 }
 0xa2d   : > { %v24298_v58 = vpack.c.bf16 %v7585_v38, %v7584_v51  ;;  %v18993_v37 = vpop.f32.mrb[126].mxu1  ;;  %v7621_v38 = vld [vmem:[#allocation10 + $0x98] sm:$0xff]  ;;  %v7620_v51 = vld [vmem:[#allocation10 + $0x90] sm:$0xff] }
 0xa2e   : > { %v7587_v47 = vmax.f32 %v18993_v37, 0.0  ;;  %v7475_v57 = vpop.f32.mrb[127].mxu1 }
 0xa2f   : > { %25805 = vst [vmem:[#allocation24_spill] sm:$0xff] %v24298_v58  ;;  %v7586_v59 = vmax.f32 %v7475_v57, 0.0  ;;  %20638 = vmatpush1.bf16.msra.mxu0 %v24298_v58 }
 0xa31   : > { %v24301_v9 = vpack.c.bf16 %v7587_v47, %v7586_v59  ;;  %v18996_v18 = vpop.f32.mrb[128].mxu1 }
 0xa32   : > { %v7589_v30 = vmax.f32 %v18996_v18, 0.0  ;;  %v7485_v26 = vpop.f32.mrb[129].mxu1  ;;  %7811 = vmatmul.mubr.f32.vlgmr.msra.gmra.mrb[58].mxu0 %v7602_v11  ;;  %v7624_v11 = vld [vmem:[#allocation10 + $0xb0] sm:$0xff] }
 0xa33   : > { %v7588_v39 = vmax.f32 %v7485_v26, 0.0  ;;  %20640 = vmatprep.subr.bf16.mxu1 %v24301_v9  ;;  %20720 = vmatprep.subr.bf16.mxu0 %v24301_v9 }
 0xa34   : > { %20642 = vmatpush3.bf16.msra.mxu1 %v24301_v9  ;;  %20722 = vmatpush3.bf16.msra.mxu0 %v24301_v9 }
 0xa35   : > { %v24307_v14 = vpack.c.bf16 %v7589_v30, %v7588_v39  ;;  %v18999_v49 = vpop.f32.mrb[130].mxu1  ;;  %7815 = vmatprep.mubr.f32.mxu0 %v7606_v56  ;;  %v7623_v30 = vld [vmem:[#allocation10 + $0xa8] sm:$0xff]  ;;  %v7626_v39 = vld [vmem:[#allocation10 + $0xc0] sm:$0xff] }
 0xa36   : > { %v7591_v7 = vmax.f32 %v18999_v49, 0.0  ;;  %v7495_v16 = vpop.f32.mrb[131].mxu1  ;;  %7816 = vmatmul.mubr.f32.gmra.mrb[60].mxu0 %v7605_v55  ;;  %v7627_v56 = vld [vmem:[#allocation10 + $0xc8] sm:$0xff]  ;;  %v7630_v49 = vld [vmem:[#allocation10 + $0xe0] sm:$0xff] }
 0xa37   : > { %v7590_v17 = vmax.f32 %v7495_v16, 0.0  ;;  %20644 = vmatprep.subr.bf16.mxu1 %v24307_v14  ;;  %20724 = vmatprep.subr.bf16.mxu0 %v24307_v14  ;;  %v7607_v55 = vld [vmem:[#allocation10 + $0x28] sm:$0xff]  ;;  %v7629_v16 = vld [vmem:[#allocation10 + $0xd8] sm:$0xff] }
 0xa38   : > { %20646 = vmatpush3.bf16.msra.mxu1 %v24307_v14  ;;  %20726 = vmatpush3.bf16.msra.mxu0 %v24307_v14 }
 0xa39   : > { %v24313_v2 = vpack.c.bf16 %v7591_v7, %v7590_v17  ;;  %v19002_v50 = vpop.f32.mrb[132].mxu1  ;;  %7820 = vmatprep.mubr.f32.mxu0 %v7609_v60  ;;  %v7610_v7 = vld [vmem:[#allocation10 + $0x40] sm:$0xff]  ;;  %v7613_v60 = vld [vmem:[#allocation10 + $0x58] sm:$0xff] }
 0xa3a   : > { %v7593_v61 = vmax.f32 %v19002_v50, 0.0  ;;  %v7505_v52 = vpop.f32.mrb[133].mxu1  ;;  %7821 = vmatmul.mubr.f32.gmra.mrb[62].mxu0 %v7608_v43  ;;  %v7633_v17 = vld [vmem:[#allocation10 + $0xf8] sm:$0xff]  ;;  %v7616_v43 = vld [vmem:[#allocation10 + $0x70] sm:$0xff] }
 0xa3b   : > { %v7592_v25 = vmax.f32 %v7505_v52, 0.0  ;;  %20648 = vmatprep.subr.bf16.mxu1 %v24313_v2  ;;  %20728 = vmatprep.subr.bf16.mxu0 %v24313_v2  ;;  %v7632_v50 = vld [vmem:[#allocation10 + $0xf0] sm:$0xff] }
 0xa3c   : > { %20650 = vmatpush3.bf16.msra.mxu1 %v24313_v2  ;;  %20730 = vmatpush3.bf16.msra.mxu0 %v24313_v2  ;;  %v7636_v52 = vld [vmem:[#allocation10 + $0x110] sm:$0xff] }
 0xa3d   : > { %v24319_v0 = vpack.c.bf16 %v7593_v61, %v7592_v25  ;;  %v19005_v34 = vpop.f32.mrb[134].mxu1  ;;  %7825 = vmatprep.mubr.f32.mxu0 %v7612_v36  ;;  %v7619_v61 = vld [vmem:[#allocation10 + $0x88] sm:$0xff]  ;;  %v7622_v36 = vld [vmem:[#allocation10 + $0xa0] sm:$0xff] }
 0xa3e   : > { %v7595_v40 = vmax.f32 %v19005_v34, 0.0  ;;  %v7515_v29 = vpop.f32.mrb[135].mxu1  ;;  %7826 = vmatmul.mubr.f32.gmra.mrb[64].mxu0 %v7611_v42  ;;  %v7635_v25 = vld [vmem:[#allocation10 + $0x108] sm:$0xff]  ;;  %v7625_v42 = vld [vmem:[#allocation10 + $0xb8] sm:$0xff] }
 0xa3f   : > { %v7594_v54 = vmax.f32 %v7515_v29, 0.0  ;;  %20652 = vmatprep.subr.bf16.mxu1 %v24319_v0  ;;  %20732 = vmatprep.subr.bf16.mxu0 %v24319_v0  ;;  %v7639_v34 = vld [vmem:[#allocation10 + $0x128] sm:$0xff]  ;;  %v7638_v29 = vld [vmem:[#allocation10 + $0x120] sm:$0xff] }
 0xa40   : > { %20654 = vmatpush3.bf16.msra.mxu1 %v24319_v0  ;;  %20734 = vmatpush3.bf16.msra.mxu0 %v24319_v0 }
 0xa41   : > { %v24325_v63 = vpack.c.bf16 %v7595_v40, %v7594_v54  ;;  %v19008_v27 = vpop.f32.mrb[136].mxu1  ;;  %7830 = vmatprep.mubr.f32.mxu0 %v7615_v1  ;;  %v7628_v40 = vld [vmem:[#allocation10 + $0xd0] sm:$0xff]  ;;  %v7631_v1 = vld [vmem:[#allocation10 + $0xe8] sm:$0xff]  ;;  %v7642_v54 = vld [vmem:[#allocation10 + $0x140] sm:$0xff] }
 0xa42   : > { %v7597_v45 = vmax.f32 %v19008_v27, 0.0  ;;  %v7525_v44 = vpop.f32.mrb[137].mxu1  ;;  %7831 = vmatmul.mubr.f32.gmra.mrb[66].mxu0 %v7614_v21  ;;  %v7634_v21 = vld [vmem:[#allocation10 + $0x100] sm:$0xff]  ;;  %v7641_v27 = vld [vmem:[#allocation10 + $0x138] sm:$0xff] }
 0xa43   : > { %v7596_v41 = vmax.f32 %v7525_v44, 0.0  ;;  %20656 = vmatprep.subr.bf16.mxu1 %v24325_v63  ;;  %20736 = vmatprep.subr.bf16.mxu0 %v24325_v63  ;;  %v7645_v44 = vld [vmem:[#allocation10 + $0x158] sm:$0xff] }
 0xa44   : > { %20658 = vmatpush3.bf16.msra.mxu1 %v24325_v63  ;;  %20738 = vmatpush3.bf16.msra.mxu0 %v24325_v63 }
 0xa45   : > { %v24331_v48 = vpack.c.bf16 %v7597_v45, %v7596_v41  ;;  %v19011_v28 = vpop.f32.mrb[138].mxu1  ;;  %7835 = vmatprep.mubr.f32.mxu0 %v7618_v32  ;;  %v7637_v45 = vld [vmem:[#allocation10 + $0x118] sm:$0xff]  ;;  %v7640_v32 = vld [vmem:[#allocation10 + $0x130] sm:$0xff] }
 0xa46   : > { %v7599_v3 = vmax.f32 %v19011_v28, 0.0  ;;  %v7535_v53 = vpop.f32.mrb[139].mxu1  ;;  %7836 = vmatmul.mubr.f32.gmra.mrb[68].mxu0 %v7617_v5  ;;  %v7644_v41 = vld [vmem:[#allocation10 + $0x150] sm:$0xff]  ;;  %v7643_v5 = vld [vmem:[#allocation10 + $0x148] sm:$0xff] }
 0xa47   : > { %v7598_v62 = vmax.f32 %v7535_v53, 0.0  ;;  %20660 = vmatprep.subr.bf16.mxu1 %v24331_v48  ;;  %20740 = vmatprep.subr.bf16.mxu0 %v24331_v48  ;;  %v7648_v28 = vld [vmem:[#allocation10 + $0x170] sm:$0xff]  ;;  %v7647_v53 = vld [vmem:[#allocation10 + $0x168] sm:$0xff] }
 0xa48   : > { %20662 = vmatpush3.bf16.msra.mxu1 %v24331_v48  ;;  %20742 = vmatpush3.bf16.msra.mxu0 %v24331_v48 }
 0xa49   : > { %v24337_v37 = vpack.c.bf16 %v7599_v3, %v7598_v62  ;;  %v19014_v47 = vpop.f32.mrb[140].mxu1  ;;  %7840 = vmatprep.mubr.f32.mxu0 %v7621_v38  ;;  %v7646_v3 = vld [vmem:[#allocation10 + $0x160] sm:$0xff]  ;;  %v7649_v38 = vld [vmem:[#allocation10 + $0x178] sm:$0xff]  ;;  %v7651_v62 = vld [vmem:[#allocation10 + $0x188] sm:$0xff] }
 0xa4a   : > { %v7601_v57 = vmax.f32 %v19014_v47, 0.0  ;;  %v7545_v59 = vpop.f32.mrb[141].mxu1  ;;  %7841 = vmatmul.mubr.f32.gmra.mrb[70].mxu0 %v7620_v51  ;;  %v7652_v51 = vld [vmem:[#allocation10 + $0x190] sm:$0xff]  ;;  %v7650_v47 = vld [vmem:[#allocation10 + $0x180] sm:$0xff] }
 0xa4b   : > { %25806 = vst [vmem:[#allocation27_spill] sm:$0xff] %v24337_v37  ;;  %v7600_v18 = vmax.f32 %v7545_v59, 0.0  ;;  %20664 = vmatprep.subr.bf16.mxu1 %v24337_v37  ;;  %20744 = vmatprep.subr.bf16.mxu0 %v24337_v37  ;;  %v7654_v59 = vld [vmem:[#allocation10 + $0x1a0] sm:$0xff] }
 0xa4c   : > { %20666 = vmatpush3.bf16.msra.mxu1 %v24337_v37  ;;  %20746 = vmatpush3.bf16.msra.mxu0 %v24337_v37 }
 0xa4d   : > { %v24343_v26 = vpack.c.bf16 %v7601_v57, %v7600_v18  ;;  %7845 = vmatprep.mubr.f32.mxu0 %v7624_v11  ;;  %v7655_v57 = vld [vmem:[#allocation10 + $0x1a8] sm:$0xff]  ;;  %v7658_v11 = vld [vmem:[#allocation10 + $0x1c0] sm:$0xff]  ;;  %v7653_v18 = vld [vmem:[#allocation10 + $0x198] sm:$0xff] }
 0xa4e   : > { %7846 = vmatmul.mubr.f32.gmra.mrb[72].mxu0 %v7623_v30  ;;  %v7661_v30 = vld [vmem:[#allocation10 + $0x1d8] sm:$0xff] }
 0xa4f   : > { %25807 = vst [vmem:[#allocation26_spill] sm:$0xff] %v24343_v26  ;;  %20668 = vmatprep.subr.bf16.mxu1 %v24343_v26  ;;  %20748 = vmatprep.subr.bf16.mxu0 %v24343_v26 }
 0xa50   : > { %20670 = vmatpush3.bf16.msra.mxu1 %v24343_v26  ;;  %20750 = vmatpush3.bf16.msra.mxu0 %v24343_v26 }
 0xa51   : > { %7850 = vmatprep.mubr.f32.mxu0 %v7627_v56  ;;  %20671 = vmatprep.subr.bf16.mxu1 %v25739_v31  ;;  %v7657_v56 = vld [vmem:[#allocation10 + $0x1b8] sm:$0xff] }
 0xa52   : > { %7851 = vmatmul.mubr.f32.gmra.mrb[74].mxu0 %v7626_v39  ;;  %v7664_v39 = vld [vmem:[#allocation10 + $0x1f0] sm:$0xff] }
 0xa53   : > { %19048 = vmatmul.mubr.f32.vlgmr.msra.gmra.mrb[142].mxu1 %v7607_v55  ;;  %7855 = vmatprep.mubr.f32.mxu0 %v7630_v49  ;;  %v7656_v55 = vld [vmem:[#allocation10 + $0x1b0] sm:$0xff]  ;;  %v7667_v49 = vld [vmem:[#allocation10 + $0x208] sm:$0xff] }
 0xa54   : > { %20673 = vmatpush1.bf16.msra.mxu1 %v24238_v12  ;;  %19050 = vmatprep.mubr.f32.mxu1 %v7610_v7  ;;  %v7660_v7 = vld [vmem:[#allocation10 + $0x1d0] sm:$0xff] }
 0xa55   : > { %20674 = vmatprep.subr.bf16.mxu1 %v25739_v31 }
 0xa56   : > { %7856 = vmatmul.mubr.f32.gmra.mrb[76].mxu0 %v7629_v16  ;;  %v7670_v16 = vld [vmem:[#allocation10 + $0x220] sm:$0xff] }
 0xa57   : > { %19051 = vmatmul.mubr.f32.gmra.mrb[144].mxu1 %v7613_v60  ;;  %7860 = vmatprep.mubr.f32.mxu0 %v7633_v17  ;;  %v7659_v60 = vld [vmem:[#allocation10 + $0x1c8] sm:$0xff]  ;;  %v7673_v17 = vld [vmem:[#allocation10 + $0x238] sm:$0xff] }
 0xa58   : > { %20676 = vmatpush1.bf16.msra.mxu1 %v24242_v4  ;;  %19053 = vmatprep.mubr.f32.mxu1 %v7616_v43  ;;  %v7663_v43 = vld [vmem:[#allocation10 + $0x1e8] sm:$0xff] }
 0xa59   : > { %20677 = vmatprep.subr.bf16.mxu1 %v25739_v31 }
 0xa5a   : > { %7861 = vmatmul.mubr.f32.gmra.mrb[78].mxu0 %v7632_v50  ;;  %v7676_v50 = vld [vmem:[#allocation10 + $0x250] sm:$0xff] }
 0xa5b   : > { %19054 = vmatmul.mubr.f32.gmra.mrb[146].mxu1 %v7619_v61  ;;  %7865 = vmatprep.mubr.f32.mxu0 %v7636_v52  ;;  %v7662_v61 = vld [vmem:[#allocation10 + $0x1e0] sm:$0xff]  ;;  %v7679_v52 = vld [vmem:[#allocation10 + $0x268] sm:$0xff] }
 0xa5c   : > { %20679 = vmatpush1.bf16.msra.mxu1 %v24246_v33  ;;  %19056 = vmatprep.mubr.f32.mxu1 %v7622_v36  ;;  %v7666_v36 = vld [vmem:[#allocation10 + $0x200] sm:$0xff] }
 0xa5d   : > { %20680 = vmatprep.subr.bf16.mxu1 %v25739_v31 }
 0xa5e   : > { %7866 = vmatmul.mubr.f32.gmra.mrb[80].mxu0 %v7635_v25  ;;  %v7682_v25 = vld [vmem:[#allocation10 + $0x280] sm:$0xff] }
 0xa5f   : > { %19057 = vmatmul.mubr.f32.gmra.mrb[148].mxu1 %v7625_v42  ;;  %7870 = vmatprep.mubr.f32.mxu0 %v7639_v34  ;;  %v7665_v42 = vld [vmem:[#allocation10 + $0x1f8] sm:$0xff] }
 0xa60   : > { %20682 = vmatpush1.bf16.msra.mxu1 %v24250_v46  ;;  %19059 = vmatprep.mubr.f32.mxu1 %v7628_v40  ;;  %v7685_v34 = vld [vmem:[#allocation10 + $0x298] sm:$0xff] }
 0xa61   : > { %20683 = vmatprep.subr.bf16.mxu1 %v25739_v31  ;;  %v7669_v40 = vld [vmem:[#allocation10 + $0x218] sm:$0xff] }
 0xa62   : > { %7871 = vmatmul.mubr.f32.gmra.mrb[82].mxu0 %v7638_v29  ;;  %v7688_v29 = vld [vmem:[#allocation10 + $0x2b0] sm:$0xff] }
 0xa63   : > { %19060 = vmatmul.mubr.f32.gmra.mrb[150].mxu1 %v7631_v1  ;;  %7875 = vmatprep.mubr.f32.mxu0 %v7642_v54  ;;  %v7668_v1 = vld [vmem:[#allocation10 + $0x210] sm:$0xff]  ;;  %v7691_v54 = vld [vmem:[#allocation10 + $0x2c8] sm:$0xff] }
 0xa64   : > { %20685 = vmatpush1.bf16.msra.mxu1 %v24254_v8  ;;  %19062 = vmatprep.mubr.f32.mxu1 %v7634_v21  ;;  %v7672_v21 = vld [vmem:[#allocation10 + $0x230] sm:$0xff] }
 0xa65   : > { %20686 = vmatprep.subr.bf16.mxu1 %v25739_v31 }
 0xa66   : > { %7876 = vmatmul.mubr.f32.gmra.mrb[84].mxu0 %v7641_v27  ;;  %v7694_v27 = vld [vmem:[#allocation10 + $0x2e0] sm:$0xff] }
 0xa67   : > { %19063 = vmatmul.mubr.f32.gmra.mrb[152].mxu1 %v7637_v45  ;;  %7880 = vmatprep.mubr.f32.mxu0 %v7645_v44  ;;  %v7671_v45 = vld [vmem:[#allocation10 + $0x228] sm:$0xff]  ;;  %v7697_v44 = vld [vmem:[#allocation10 + $0x2f8] sm:$0xff] }
 0xa68   : > { %20688 = vmatpush1.bf16.msra.mxu1 %v24258_v35  ;;  %19065 = vmatprep.mubr.f32.mxu1 %v7640_v32  ;;  %v7675_v32 = vld [vmem:[#allocation10 + $0x248] sm:$0xff] }
 0xa69   : > { %20689 = vmatprep.subr.bf16.mxu1 %v25739_v31 }
 0xa6a   : > { %7881 = vmatmul.mubr.f32.gmra.mrb[86].mxu0 %v7644_v41  ;;  %v7700_v41 = vld [vmem:[#allocation10 + $0x310] sm:$0xff] }
 0xa6b   : > { %19066 = vmatmul.mubr.f32.gmra.mrb[154].mxu1 %v7643_v5  ;;  %7885 = vmatprep.mubr.f32.mxu0 %v7648_v28  ;;  %v7674_v5 = vld [vmem:[#allocation10 + $0x240] sm:$0xff]  ;;  %v7703_v28 = vld [vmem:[#allocation10 + $0x328] sm:$0xff] }
 0xa6c   : > { %20691 = vmatpush1.bf16.msra.mxu1 %v24262_v15  ;;  %19068 = vmatprep.mubr.f32.mxu1 %v7646_v3  ;;  %v7678_v3 = vld [vmem:[#allocation10 + $0x260] sm:$0xff] }
 0xa6d   : > { %20692 = vmatprep.subr.bf16.mxu1 %v25739_v31 }
 0xa6e   : > { %7886 = vmatmul.mubr.f32.gmra.mrb[88].mxu0 %v7647_v53  ;;  %v7706_v53 = vld [vmem:[#allocation10 + $0x340] sm:$0xff] }
 0xa6f   : > { %19069 = vmatmul.mubr.f32.gmra.mrb[156].mxu1 %v7649_v38  ;;  %7890 = vmatprep.mubr.f32.mxu0 %v7651_v62  ;;  %v7677_v38 = vld [vmem:[#allocation10 + $0x258] sm:$0xff] }
 0xa70   : > { %20694 = vmatpush1.bf16.msra.mxu1 %v24266_v20  ;;  %19071 = vmatprep.mubr.f32.mxu1 %v7652_v51  ;;  %v7709_v62 = vld [vmem:[#allocation10 + $0x358] sm:$0xff] }
 0xa71   : > { %20695 = vmatprep.subr.bf16.mxu1 %v25739_v31  ;;  %v7681_v51 = vld [vmem:[#allocation10 + $0x278] sm:$0xff] }
 0xa72   : > { %7891 = vmatmul.mubr.f32.gmra.mrb[90].mxu0 %v7650_v47  ;;  %v7712_v47 = vld [vmem:[#allocation10 + $0x370] sm:$0xff] }
 0xa73   : > { %19072 = vmatmul.mubr.f32.gmra.mrb[158].mxu1 %v7655_v57  ;;  %7895 = vmatprep.mubr.f32.mxu0 %v7654_v59  ;;  %v7680_v57 = vld [vmem:[#allocation10 + $0x270] sm:$0xff]  ;;  %v7715_v59 = vld [vmem:[#allocation10 + $0x388] sm:$0xff] }
 0xa74   : > { %20697 = vmatpush1.bf16.msra.mxu1 %v24270_v19  ;;  %19074 = vmatprep.mubr.f32.mxu1 %v7658_v11  ;;  %v7684_v11 = vld [vmem:[#allocation10 + $0x290] sm:$0xff] }
 0xa75   : > { %20698 = vmatprep.subr.bf16.mxu1 %v25739_v31 }
 0xa76   : > { %7896 = vmatmul.mubr.f32.gmra.mrb[92].mxu0 %v7653_v18  ;;  %v7718_v18 = vld [vmem:[#allocation10 + $0x3a0] sm:$0xff] }
 0xa77   : > { %19075 = vmatmul.mubr.f32.gmra.mrb[160].mxu1 %v7661_v30  ;;  %7900 = vmatprep.mubr.f32.mxu0 %v7657_v56  ;;  %v7683_v30 = vld [vmem:[#allocation10 + $0x288] sm:$0xff]  ;;  %v7721_v56 = vld [vmem:[#allocation10 + $0x3b8] sm:$0xff] }
 0xa78   : > { %20700 = vmatpush1.bf16.msra.mxu1 %v24274_v23  ;;  %19077 = vmatprep.mubr.f32.mxu1 %v7664_v39  ;;  %v7687_v39 = vld [vmem:[#allocation10 + $0x2a8] sm:$0xff] }
 0xa79   : > { %20701 = vmatprep.subr.bf16.mxu1 %v25739_v31 }
 0xa7a   : > { %7901 = vmatmul.mubr.f32.gmra.mrb[94].mxu0 %v7656_v55  ;;  %v7724_v55 = vld [vmem:[#allocation10 + $0x3d0] sm:$0xff] }
 0xa7b   : > { %19078 = vmatmul.mubr.f32.gmra.mrb[162].mxu1 %v7667_v49  ;;  %7905 = vmatprep.mubr.f32.mxu0 %v7660_v7  ;;  %v7686_v49 = vld [vmem:[#allocation10 + $0x2a0] sm:$0xff]  ;;  %v7727_v7 = vld [vmem:[#allocation10 + $0x3e8] sm:$0xff] }
 0xa7c   : > { %20703 = vmatpush1.bf16.msra.mxu1 %v24278_v22  ;;  %19080 = vmatprep.mubr.f32.mxu1 %v7670_v16  ;;  %v7690_v16 = vld [vmem:[#allocation10 + $0x2c0] sm:$0xff] }
 0xa7d   : > { %20704 = vmatprep.subr.bf16.mxu1 %v25739_v31 }
 0xa7e   : > { %7906 = vmatmul.mubr.f32.gmra.mrb[96].mxu0 %v7659_v60  ;;  %v7730_v60 = vld [vmem:[#allocation10 + $0x400] sm:$0xff] }
 0xa7f   : > { %19081 = vmatmul.mubr.f32.gmra.mrb[164].mxu1 %v7673_v17  ;;  %7910 = vmatprep.mubr.f32.mxu0 %v7663_v43  ;;  %v7689_v17 = vld [vmem:[#allocation10 + $0x2b8] sm:$0xff] }
 0xa80   : > { %20706 = vmatpush1.bf16.msra.mxu1 %v24282_v24  ;;  %19083 = vmatprep.mubr.f32.mxu1 %v7676_v50  ;;  %v7733_v43 = vld [vmem:[#allocation10 + $0x418] sm:$0xff] }
 0xa81   : > { %20707 = vmatprep.subr.bf16.mxu1 %v25739_v31  ;;  %v7693_v50 = vld [vmem:[#allocation10 + $0x2d8] sm:$0xff] }
 0xa82   : > { %7911 = vmatmul.mubr.f32.gmra.mrb[98].mxu0 %v7662_v61  ;;  %v7736_v61 = vld [vmem:[#allocation10 + $0x430] sm:$0xff] }
 0xa83   : > { %19084 = vmatmul.mubr.f32.gmra.mrb[166].mxu1 %v7679_v52  ;;  %7915 = vmatprep.mubr.f32.mxu0 %v7666_v36  ;;  %v7692_v52 = vld [vmem:[#allocation10 + $0x2d0] sm:$0xff]  ;;  %v7739_v36 = vld [vmem:[#allocation10 + $0x448] sm:$0xff] }
 0xa84   : > { %20709 = vmatpush1.bf16.msra.mxu1 %v24286_v13  ;;  %19086 = vmatprep.mubr.f32.mxu1 %v7682_v25  ;;  %v7696_v25 = vld [vmem:[#allocation10 + $0x2f0] sm:$0xff] }
 0xa85   : > { %20710 = vmatprep.subr.bf16.mxu1 %v25739_v31 }
 0xa86   : > { %7916 = vmatmul.mubr.f32.gmra.mrb[100].mxu0 %v7665_v42  ;;  %v7742_v42 = vld [vmem:[#allocation10 + $0x460] sm:$0xff] }
 0xa87   : > { %19087 = vmatmul.mubr.f32.gmra.mrb[168].mxu1 %v7685_v34  ;;  %7920 = vmatprep.mubr.f32.mxu0 %v7669_v40  ;;  %v7695_v34 = vld [vmem:[#allocation10 + $0x2e8] sm:$0xff]  ;;  %v7745_v40 = vld [vmem:[#allocation10 + $0x478] sm:$0xff] }
 0xa88   : > { %20712 = vmatpush1.bf16.msra.mxu1 %v24290_v6  ;;  %19089 = vmatprep.mubr.f32.mxu1 %v7688_v29  ;;  %v7699_v29 = vld [vmem:[#allocation10 + $0x308] sm:$0xff] }
 0xa89   : > { %20713 = vmatprep.subr.bf16.mxu1 %v25739_v31 }
 0xa8a   : > { %7921 = vmatmul.mubr.f32.gmra.mrb[102].mxu0 %v7668_v1  ;;  %v8370_v1 = vld [vmem:[#allocation10 + $0x488] sm:$0xff] }
 0xa8b   : > { %19090 = vmatmul.mubr.f32.gmra.mrb[170].mxu1 %v7691_v54  ;;  %7925 = vmatprep.mubr.f32.mxu0 %v7672_v21  ;;  %v7698_v54 = vld [vmem:[#allocation10 + $0x300] sm:$0xff] }
 0xa8c   : > { %20715 = vmatpush1.bf16.msra.mxu1 %v24294_v10  ;;  %19092 = vmatprep.mubr.f32.mxu1 %v7694_v27  ;;  %v8369_v21 = vld [vmem:[#allocation10 + $0x480] sm:$0xff] }
 0xa8d   : > { %20716 = vmatprep.subr.bf16.mxu1 %v25739_v31  ;;  %v7702_v27 = vld [vmem:[#allocation10 + $0x320] sm:$0xff] }
 0xa8e   : > { %7926 = vmatmul.mubr.f32.gmra.mrb[104].mxu0 %v7671_v45  ;;  %v8373_v45 = vld [vmem:[#allocation10 + $0x4a0] sm:$0xff] }
 0xa8f   : > { %19093 = vmatmul.mubr.f32.gmra.mrb[172].mxu1 %v7697_v44  ;;  %7930 = vmatprep.mubr.f32.mxu0 %v7675_v32  ;;  %v7701_v44 = vld [vmem:[#allocation10 + $0x318] sm:$0xff] }
 0xa90   : > { %20718 = vmatpush1.bf16.msra.mxu1 %v24298_v58  ;;  %19095 = vmatprep.mubr.f32.mxu1 %v7700_v41  ;;  %v8372_v32 = vld [vmem:[#allocation10 + $0x498] sm:$0xff] }
 0xa91   : > { %20799 = vmatprep.subr.bf16.mxu1 %v25739_v31  ;;  %v7705_v41 = vld [vmem:[#allocation10 + $0x338] sm:$0xff] }
 0xa92   : > { %7931 = vmatmul.mubr.f32.gmra.mrb[106].mxu0 %v7674_v5  ;;  %v8376_v5 = vld [vmem:[#allocation10 + $0x4b8] sm:$0xff] }
 0xa93   : > { %19096 = vmatmul.mubr.f32.gmra.mrb[174].mxu1 %v7703_v28  ;;  %7935 = vmatprep.mubr.f32.mxu0 %v7678_v3  ;;  %v7704_v28 = vld [vmem:[#allocation10 + $0x330] sm:$0xff] }
 0xa94   : > { %19098 = vmatprep.mubr.f32.mxu1 %v7706_v53  ;;  %v8375_v3 = vld [vmem:[#allocation10 + $0x4b0] sm:$0xff] }
 0xa95   : > { %v7708_v53 = vld [vmem:[#allocation10 + $0x350] sm:$0xff] }
 0xa96   : > { %7936 = vmatmul.mubr.f32.gmra.mrb[108].mxu0 %v7677_v38  ;;  %v8379_v38 = vld [vmem:[#allocation10 + $0x4d0] sm:$0xff] }
 0xa97   : > { %19099 = vmatmul.mubr.f32.gmra.mrb[176].mxu1 %v7709_v62  ;;  %7940 = vmatprep.mubr.f32.mxu0 %v7681_v51  ;;  %v7707_v62 = vld [vmem:[#allocation10 + $0x348] sm:$0xff] }
 0xa98   : > { %19101 = vmatprep.mubr.f32.mxu1 %v7712_v47  ;;  %v8378_v51 = vld [vmem:[#allocation10 + $0x4c8] sm:$0xff] }
 0xa99   : > { %v7711_v47 = vld [vmem:[#allocation10 + $0x368] sm:$0xff] }
 0xa9a   : > { %7941 = vmatmul.mubr.f32.gmra.mrb[110].mxu0 %v7680_v57  ;;  %v8382_v57 = vld [vmem:[#allocation10 + $0x4e8] sm:$0xff] }
 0xa9b   : > { %19102 = vmatmul.mubr.f32.gmra.mrb[178].mxu1 %v7715_v59  ;;  %7945 = vmatprep.mubr.f32.mxu0 %v7684_v11  ;;  %v7710_v59 = vld [vmem:[#allocation10 + $0x360] sm:$0xff] }
 0xa9c   : > { %19104 = vmatprep.mubr.f32.mxu1 %v7718_v18  ;;  %v8381_v11 = vld [vmem:[#allocation10 + $0x4e0] sm:$0xff] }
 0xa9d   : > { %v7714_v18 = vld [vmem:[#allocation10 + $0x380] sm:$0xff] }
 0xa9e   : > { %7946 = vmatmul.mubr.f32.gmra.mrb[112].mxu0 %v7683_v30  ;;  %v8385_v30 = vld [vmem:[#allocation10 + $0x500] sm:$0xff] }
 0xa9f   : > { %19105 = vmatmul.mubr.f32.gmra.mrb[180].mxu1 %v7721_v56  ;;  %7950 = vmatprep.mubr.f32.mxu0 %v7687_v39  ;;  %v7713_v56 = vld [vmem:[#allocation10 + $0x378] sm:$0xff] }
 0xaa0   : > { %19107 = vmatprep.mubr.f32.mxu1 %v7724_v55  ;;  %v8384_v39 = vld [vmem:[#allocation10 + $0x4f8] sm:$0xff] }
 0xaa1   : > { %v7717_v55 = vld [vmem:[#allocation10 + $0x398] sm:$0xff] }
 0xaa2   : > { %7951 = vmatmul.mubr.f32.gmra.mrb[114].mxu0 %v7686_v49  ;;  %v8388_v49 = vld [vmem:[#allocation10 + $0x518] sm:$0xff] }
 0xaa3   : > { %19108 = vmatmul.mubr.f32.gmra.mrb[182].mxu1 %v7727_v7  ;;  %7955 = vmatprep.mubr.f32.mxu0 %v7690_v16  ;;  %v7716_v7 = vld [vmem:[#allocation10 + $0x390] sm:$0xff] }
 0xaa4   : > { %19110 = vmatprep.mubr.f32.mxu1 %v7730_v60  ;;  %v8387_v16 = vld [vmem:[#allocation10 + $0x510] sm:$0xff] }
 0xaa5   : > { %v7720_v60 = vld [vmem:[#allocation10 + $0x3b0] sm:$0xff] }
 0xaa6   : > { %7956 = vmatmul.mubr.f32.gmra.mrb[116].mxu0 %v7689_v17  ;;  %v8391_v17 = vld [vmem:[#allocation10 + $0x530] sm:$0xff] }
 0xaa7   : > { %19111 = vmatmul.mubr.f32.gmra.mrb[184].mxu1 %v7733_v43  ;;  %7960 = vmatprep.mubr.f32.mxu0 %v7693_v50  ;;  %v7719_v43 = vld [vmem:[#allocation10 + $0x3a8] sm:$0xff] }
 0xaa8   : > { %19113 = vmatprep.mubr.f32.mxu1 %v7736_v61  ;;  %v8390_v50 = vld [vmem:[#allocation10 + $0x528] sm:$0xff] }
 0xaa9   : > { %v7723_v61 = vld [vmem:[#allocation10 + $0x3c8] sm:$0xff] }
 0xaaa   : > { %7961 = vmatmul.mubr.f32.gmra.mrb[118].mxu0 %v7692_v52  ;;  %v8394_v52 = vld [vmem:[#allocation10 + $0x548] sm:$0xff] }
 0xaab   : > { %19114 = vmatmul.mubr.f32.gmra.mrb[186].mxu1 %v7739_v36  ;;  %7965 = vmatprep.mubr.f32.mxu0 %v7696_v25  ;;  %v7722_v36 = vld [vmem:[#allocation10 + $0x3c0] sm:$0xff] }
 0xaac   : > { %19116 = vmatprep.mubr.f32.mxu1 %v7742_v42  ;;  %v8393_v25 = vld [vmem:[#allocation10 + $0x540] sm:$0xff] }
 0xaad   : > { %v7726_v42 = vld [vmem:[#allocation10 + $0x3e0] sm:$0xff] }
 0xaae   : > { %7966 = vmatmul.mubr.f32.gmra.mrb[120].mxu0 %v7695_v34  ;;  %v8397_v34 = vld [vmem:[#allocation10 + $0x560] sm:$0xff] }
 0xaaf   : > { %19117 = vmatmul.mubr.f32.gmra.mrb[188].mxu1 %v7745_v40  ;;  %7970 = vmatprep.mubr.f32.mxu0 %v7699_v29  ;;  %v7725_v40 = vld [vmem:[#allocation10 + $0x3d8] sm:$0xff] }
 0xab0   : > { %8577 = vmatprep.mubr.f32.mxu1 %v8370_v1  ;;  %v8396_v29 = vld [vmem:[#allocation10 + $0x558] sm:$0xff] }
 0xab1   : > { %v7729_v1 = vld [vmem:[#allocation10 + $0x3f8] sm:$0xff] }
 0xab2   : > { %7971 = vmatmul.mubr.f32.gmra.mrb[122].mxu0 %v7698_v54  ;;  %v8400_v54 = vld [vmem:[#allocation10 + $0x578] sm:$0xff] }
 0xab3   : > { %8578 = vmatmul.mubr.f32.vlgmr.msra.gmra.mrb[190].mxu1 %v8369_v21  ;;  %7975 = vmatprep.mubr.f32.mxu0 %v7702_v27  ;;  %v7728_v21 = vld [vmem:[#allocation10 + $0x3f0] sm:$0xff] }
 0xab4   : > { %20801 = vmatpush1.bf16.msra.mxu1 %v24238_v12  ;;  %8582 = vmatprep.mubr.f32.mxu1 %v8373_v45  ;;  %v8399_v27 = vld [vmem:[#allocation10 + $0x570] sm:$0xff] }
 0xab5   : > { %20802 = vmatprep.subr.bf16.mxu1 %v25739_v31  ;;  %v7732_v45 = vld [vmem:[#allocation10 + $0x410] sm:$0xff] }
 0xab6   : > { %7976 = vmatmul.mubr.f32.gmra.mrb[124].mxu0 %v7701_v44  ;;  %v8403_v44 = vld [vmem:[#allocation10 + $0x590] sm:$0xff] }
 0xab7   : > { %8583 = vmatmul.mubr.f32.gmra.mrb[192].mxu1 %v8372_v32  ;;  %7980 = vmatprep.mubr.f32.mxu0 %v7705_v41  ;;  %v7731_v32 = vld [vmem:[#allocation10 + $0x408] sm:$0xff] }
 0xab8   : > { %20804 = vmatpush1.bf16.msra.mxu1 %v24242_v4  ;;  %8587 = vmatprep.mubr.f32.mxu1 %v8376_v5  ;;  %v8402_v41 = vld [vmem:[#allocation10 + $0x588] sm:$0xff] }
 0xab9   : > { %20805 = vmatprep.subr.bf16.mxu1 %v25739_v31  ;;  %v7735_v5 = vld [vmem:[#allocation10 + $0x428] sm:$0xff] }
 0xaba   : > { %7981 = vmatmul.mubr.f32.gmra.mrb[126].mxu0 %v7704_v28  ;;  %v8406_v28 = vld [vmem:[#allocation10 + $0x5a8] sm:$0xff] }
 0xabb   : > { %8588 = vmatmul.mubr.f32.gmra.mrb[194].mxu1 %v8375_v3  ;;  %7985 = vmatprep.mubr.f32.mxu0 %v7708_v53  ;;  %v7734_v3 = vld [vmem:[#allocation10 + $0x420] sm:$0xff] }
 0xabc   : > { %20807 = vmatpush1.bf16.msra.mxu1 %v24246_v33  ;;  %8592 = vmatprep.mubr.f32.mxu1 %v8379_v38  ;;  %v8405_v53 = vld [vmem:[#allocation10 + $0x5a0] sm:$0xff] }
 0xabd   : > { %20808 = vmatprep.subr.bf16.mxu1 %v25739_v31  ;;  %v7738_v38 = vld [vmem:[#allocation10 + $0x440] sm:$0xff] }
 0xabe   : > { %7986 = vmatmul.mubr.f32.gmra.mrb[128].mxu0 %v7707_v62  ;;  %v8409_v62 = vld [vmem:[#allocation10 + $0x5c0] sm:$0xff] }
 0xabf   : > { %8593 = vmatmul.mubr.f32.gmra.mrb[196].mxu1 %v8378_v51  ;;  %7990 = vmatprep.mubr.f32.mxu0 %v7711_v47  ;;  %v7737_v51 = vld [vmem:[#allocation10 + $0x438] sm:$0xff] }
 0xac0   : > { %20810 = vmatpush1.bf16.msra.mxu1 %v24250_v46  ;;  %8597 = vmatprep.mubr.f32.mxu1 %v8382_v57  ;;  %v8408_v47 = vld [vmem:[#allocation10 + $0x5b8] sm:$0xff] }
 0xac1   : > { %20811 = vmatprep.subr.bf16.mxu1 %v25739_v31  ;;  %v7741_v57 = vld [vmem:[#allocation10 + $0x458] sm:$0xff] }
 0xac2   : > { %7991 = vmatmul.mubr.f32.gmra.mrb[130].mxu0 %v7710_v59  ;;  %v8412_v59 = vld [vmem:[#allocation10 + $0x5d8] sm:$0xff] }
 0xac3   : > { %8598 = vmatmul.mubr.f32.gmra.mrb[198].mxu1 %v8381_v11  ;;  %7995 = vmatprep.mubr.f32.mxu0 %v7714_v18  ;;  %v7740_v11 = vld [vmem:[#allocation10 + $0x450] sm:$0xff] }
 0xac4   : > { %20813 = vmatpush1.bf16.msra.mxu1 %v24254_v8  ;;  %8602 = vmatprep.mubr.f32.mxu1 %v8385_v30  ;;  %v8411_v18 = vld [vmem:[#allocation10 + $0x5d0] sm:$0xff] }
 0xac5   : > { %20814 = vmatprep.subr.bf16.mxu1 %v25739_v31  ;;  %v7744_v30 = vld [vmem:[#allocation10 + $0x470] sm:$0xff] }
 0xac6   : > { %7996 = vmatmul.mubr.f32.gmra.mrb[132].mxu0 %v7713_v56  ;;  %v8415_v56 = vld [vmem:[#allocation10 + $0x5f0] sm:$0xff] }
 0xac7   : > { %8603 = vmatmul.mubr.f32.gmra.mrb[200].mxu1 %v8384_v39  ;;  %8000 = vmatprep.mubr.f32.mxu0 %v7717_v55  ;;  %v7743_v39 = vld [vmem:[#allocation10 + $0x468] sm:$0xff] }
 0xac8   : > { %20816 = vmatpush1.bf16.msra.mxu1 %v24258_v35  ;;  %8607 = vmatprep.mubr.f32.mxu1 %v8388_v49  ;;  %v8414_v55 = vld [vmem:[#allocation10 + $0x5e8] sm:$0xff]  ;;  %v8371_v49 = vld [vmem:[#allocation10 + $0x490] sm:$0xff] }
 0xac9   : > { %20817 = vmatprep.subr.bf16.mxu1 %v25739_v31 }
 0xaca   : > { %8001 = vmatmul.mubr.f32.gmra.mrb[134].mxu0 %v7716_v7  ;;  %v8418_v7 = vld [vmem:[#allocation10 + $0x608] sm:$0xff] }
 0xacb   : > { %8608 = vmatmul.mubr.f32.gmra.mrb[202].mxu1 %v8387_v16  ;;  %8005 = vmatprep.mubr.f32.mxu0 %v7720_v60  ;;  %v8374_v16 = vld [vmem:[#allocation10 + $0x4a8] sm:$0xff]  ;;  %v8417_v60 = vld [vmem:[#allocation10 + $0x600] sm:$0xff] }
 0xacc   : > { %20819 = vmatpush1.bf16.msra.mxu1 %v24262_v15  ;;  %8612 = vmatprep.mubr.f32.mxu1 %v8391_v17  ;;  %v8377_v17 = vld [vmem:[#allocation10 + $0x4c0] sm:$0xff] }
 0xacd   : > { %20820 = vmatprep.subr.bf16.mxu1 %v25739_v31 }
 0xace   : > { %8006 = vmatmul.mubr.f32.gmra.mrb[136].mxu0 %v7719_v43  ;;  %v8421_v43 = vld [vmem:[#allocation10 + $0x620] sm:$0xff] }
 0xacf   : > { %8613 = vmatmul.mubr.f32.gmra.mrb[204].mxu1 %v8390_v50  ;;  %8010 = vmatprep.mubr.f32.mxu0 %v7723_v61  ;;  %v8380_v50 = vld [vmem:[#allocation10 + $0x4d8] sm:$0xff] }
 0xad0   : > { %20822 = vmatpush1.bf16.msra.mxu1 %v24266_v20  ;;  %8617 = vmatprep.mubr.f32.mxu1 %v8394_v52  ;;  %v8420_v61 = vld [vmem:[#allocation10 + $0x618] sm:$0xff]  ;;  %v8383_v52 = vld [vmem:[#allocation10 + $0x4f0] sm:$0xff] }
 0xad1   : > { %20823 = vmatprep.subr.bf16.mxu1 %v25739_v31 }
 0xad2   : > { %8011 = vmatmul.mubr.f32.gmra.mrb[138].mxu0 %v7722_v36  ;;  %v8424_v36 = vld [vmem:[#allocation10 + $0x638] sm:$0xff] }
 0xad3   : > { %8618 = vmatmul.mubr.f32.gmra.mrb[206].mxu1 %v8393_v25  ;;  %8015 = vmatprep.mubr.f32.mxu0 %v7726_v42  ;;  %v8386_v25 = vld [vmem:[#allocation10 + $0x508] sm:$0xff]  ;;  %v8423_v42 = vld [vmem:[#allocation10 + $0x630] sm:$0xff] }
 0xad4   : > { %20825 = vmatpush1.bf16.msra.mxu1 %v24270_v19  ;;  %8622 = vmatprep.mubr.f32.mxu1 %v8397_v34  ;;  %v8389_v34 = vld [vmem:[#allocation10 + $0x520] sm:$0xff] }
 0xad5   : > { %20826 = vmatprep.subr.bf16.mxu1 %v25739_v31 }
 0xad6   : > { %8016 = vmatmul.mubr.f32.gmra.mrb[140].mxu0 %v7725_v40  ;;  %v8427_v40 = vld [vmem:[#allocation10 + $0x650] sm:$0xff] }
 0xad7   : > { %8623 = vmatmul.mubr.f32.gmra.mrb[208].mxu1 %v8396_v29  ;;  %8020 = vmatprep.mubr.f32.mxu0 %v7729_v1  ;;  %v8392_v29 = vld [vmem:[#allocation10 + $0x538] sm:$0xff]  ;;  %v8426_v1 = vld [vmem:[#allocation10 + $0x648] sm:$0xff] }
 0xad8   : > { %20828 = vmatpush1.bf16.msra.mxu1 %v24274_v23  ;;  %8627 = vmatprep.mubr.f32.mxu1 %v8400_v54  ;;  %v8395_v54 = vld [vmem:[#allocation10 + $0x550] sm:$0xff] }
 0xad9   : > { %20829 = vmatprep.subr.bf16.mxu1 %v25739_v31 }
 0xada   : > { %8021 = vmatmul.mubr.f32.gmra.mrb[142].mxu0 %v7728_v21  ;;  %v8430_v21 = vld [vmem:[#allocation10 + $0x668] sm:$0xff] }
 0xadb   : > { %8628 = vmatmul.mubr.f32.gmra.mrb[210].mxu1 %v8399_v27  ;;  %8025 = vmatprep.mubr.f32.mxu0 %v7732_v45  ;;  %v8398_v27 = vld [vmem:[#allocation10 + $0x568] sm:$0xff]  ;;  %v8429_v45 = vld [vmem:[#allocation10 + $0x660] sm:$0xff] }
 0xadc   : > { %20831 = vmatpush1.bf16.msra.mxu1 %v24278_v22  ;;  %8632 = vmatprep.mubr.f32.mxu1 %v8403_v44  ;;  %v8401_v44 = vld [vmem:[#allocation10 + $0x580] sm:$0xff] }
 0xadd   : > { %20832 = vmatprep.subr.bf16.mxu1 %v25739_v31 }
 0xade   : > { %8026 = vmatmul.mubr.f32.gmra.mrb[144].mxu0 %v7731_v32  ;;  %v8433_v32 = vld [vmem:[#allocation10 + $0x680] sm:$0xff] }
 0xadf   : > { %8633 = vmatmul.mubr.f32.gmra.mrb[212].mxu1 %v8402_v41  ;;  %8030 = vmatprep.mubr.f32.mxu0 %v7735_v5  ;;  %v8404_v41 = vld [vmem:[#allocation10 + $0x598] sm:$0xff] }
 0xae0   : > { %20834 = vmatpush1.bf16.msra.mxu1 %v24282_v24  ;;  %8637 = vmatprep.mubr.f32.mxu1 %v8406_v28  ;;  %v8432_v5 = vld [vmem:[#allocation10 + $0x678] sm:$0xff]  ;;  %v8407_v28 = vld [vmem:[#allocation10 + $0x5b0] sm:$0xff] }
 0xae1   : > { %20835 = vmatprep.subr.bf16.mxu1 %v25739_v31 }
 0xae2   : > { %8031 = vmatmul.mubr.f32.gmra.mrb[146].mxu0 %v7734_v3  ;;  %v8436_v3 = vld [vmem:[#allocation10 + $0x698] sm:$0xff] }
 0xae3   : > { %8638 = vmatmul.mubr.f32.gmra.mrb[214].mxu1 %v8405_v53  ;;  %8035 = vmatprep.mubr.f32.mxu0 %v7738_v38 }
 0xae4   : > { %20837 = vmatpush1.bf16.msra.mxu1 %v24286_v13  ;;  %8642 = vmatprep.mubr.f32.mxu1 %v8409_v62  ;;  %v8410_v62 = vld [vmem:[#allocation10 + $0x5c8] sm:$0xff] }
 0xae5   : > { %20838 = vmatprep.subr.bf16.mxu1 %v25739_v31 }
 0xae6   : > { %8036 = vmatmul.mubr.f32.gmra.mrb[148].mxu0 %v7737_v51  ;;  %v8435_v51 = vld [vmem:[#allocation10 + $0x690] sm:$0xff] }
 0xae7   : > { %8643 = vmatmul.mubr.f32.gmra.mrb[216].mxu1 %v8408_v47  ;;  %8040 = vmatprep.mubr.f32.mxu0 %v7741_v57  ;;  %v8413_v47 = vld [vmem:[#allocation10 + $0x5e0] sm:$0xff]  ;;  %v8439_v57 = vld [vmem:[#allocation10 + $0x6b0] sm:$0xff] }
 0xae8   : > { %20840 = vmatpush1.bf16.msra.mxu1 %v24290_v6  ;;  %8647 = vmatprep.mubr.f32.mxu1 %v8412_v59 }
 0xae9   : > { %20841 = vmatprep.subr.bf16.mxu1 %v25739_v31 }
 0xaea   : > { %8041 = vmatmul.mubr.f32.gmra.mrb[150].mxu0 %v7740_v11 }
 0xaeb   : > { %8648 = vmatmul.mubr.f32.gmra.mrb[218].mxu1 %v8411_v18  ;;  %8045 = vmatprep.mubr.f32.mxu0 %v7744_v30  ;;  %v8416_v18 = vld [vmem:[#allocation10 + $0x5f8] sm:$0xff]  ;;  %v8438_v30 = vld [vmem:[#allocation10 + $0x6a8] sm:$0xff] }
 0xaec   : > { %20843 = vmatpush1.bf16.msra.mxu1 %v24294_v10  ;;  %8652 = vmatprep.mubr.f32.mxu1 %v8415_v56  ;;  %v8419_v56 = vld [vmem:[#allocation10 + $0x610] sm:$0xff] }
 0xaed   : > { %20844 = vmatprep.subr.bf16.mxu1 %v25739_v31 }
 0xaee   : > { %8046 = vmatmul.mubr.f32.gmra.mrb[152].mxu0 %v7743_v39  ;;  %v8442_v39 = vld [vmem:[#allocation10 + $0x6c8] sm:$0xff] }
 0xaef   : > { %8653 = vmatmul.mubr.f32.gmra.mrb[220].mxu1 %v8414_v55  ;;  %19151 = vmatprep.mubr.f32.mxu0 %v8371_v49 }
 0xaf0   : > { %20846 = vmatpush1.bf16.msra.mxu1 %v24298_v58  ;;  %8657 = vmatprep.mubr.f32.mxu1 %v8418_v7  ;;  %v8422_v7 = vld [vmem:[#allocation10 + $0x628] sm:$0xff] }
 0xaf1   : > { %20903 = vmatprep.subr.bf16.mxu1 %v25739_v31  ;;  %v8499_v31 = vld [vmem:[#allocation10 + $0x890] sm:$0xff] }
 0xaf2   : > { %19152 = vmatmul.mubr.f32.vlgmr.msra.gmra.mrb[154].mxu0 %v8374_v16  ;;  %v8441_v16 = vld [vmem:[#allocation10 + $0x6c0] sm:$0xff] }
 0xaf3   : > { %8658 = vmatmul.mubr.f32.gmra.mrb[222].mxu1 %v8417_v60  ;;  %19154 = vmatprep.mubr.f32.mxu0 %v8377_v17  ;;  %v8425_v60 = vld [vmem:[#allocation10 + $0x640] sm:$0xff] }
 0xaf4   : > { %8662 = vmatprep.mubr.f32.mxu1 %v8421_v43  ;;  %v8445_v17 = vld [vmem:[#allocation10 + $0x6e0] sm:$0xff] }
 0xaf6   : > { %19155 = vmatmul.mubr.f32.gmra.mrb[156].mxu0 %v8380_v50 }
 0xaf7   : > { %8663 = vmatmul.mubr.f32.gmra.mrb[224].mxu1 %v8420_v61  ;;  %19157 = vmatprep.mubr.f32.mxu0 %v8383_v52  ;;  %v8428_v61 = vld [vmem:[#allocation10 + $0x658] sm:$0xff] }
 0xaf8   : > { %8667 = vmatprep.mubr.f32.mxu1 %v8424_v36  ;;  %v8444_v52 = vld [vmem:[#allocation10 + $0x6d8] sm:$0xff]  ;;  %v8431_v36 = vld [vmem:[#allocation10 + $0x670] sm:$0xff] }
 0xafa   : > { %19158 = vmatmul.mubr.f32.gmra.mrb[158].mxu0 %v8386_v25  ;;  %v8448_v25 = vld [vmem:[#allocation10 + $0x6f8] sm:$0xff] }
 0xafb   : > { %8668 = vmatmul.mubr.f32.gmra.mrb[226].mxu1 %v8423_v42  ;;  %19160 = vmatprep.mubr.f32.mxu0 %v8389_v34 }
 0xafc   : > { %8672 = vmatprep.mubr.f32.mxu1 %v8427_v40  ;;  %v8434_v40 = vld [vmem:[#allocation10 + $0x688] sm:$0xff] }
 0xafe   : > { %19161 = vmatmul.mubr.f32.gmra.mrb[160].mxu0 %v8392_v29  ;;  %v8447_v29 = vld [vmem:[#allocation10 + $0x6f0] sm:$0xff] }
 0xaff   : > { %8673 = vmatmul.mubr.f32.gmra.mrb[228].mxu1 %v8426_v1  ;;  %19163 = vmatprep.mubr.f32.mxu0 %v8395_v54  ;;  %v8437_v1 = vld [vmem:[#allocation10 + $0x6a0] sm:$0xff]  ;;  %v8451_v54 = vld [vmem:[#allocation10 + $0x710] sm:$0xff] }
 0xb00   : > { %8677 = vmatprep.mubr.f32.mxu1 %v8430_v21 }
 0xb02   : > { %19164 = vmatmul.mubr.f32.gmra.mrb[162].mxu0 %v8398_v27 }
 0xb03   : > { %8678 = vmatmul.mubr.f32.gmra.mrb[230].mxu1 %v8429_v45  ;;  %19166 = vmatprep.mubr.f32.mxu0 %v8401_v44  ;;  %v8440_v45 = vld [vmem:[#allocation10 + $0x6b8] sm:$0xff]  ;;  %v8450_v44 = vld [vmem:[#allocation10 + $0x708] sm:$0xff] }
 0xb04   : > { %8682 = vmatprep.mubr.f32.mxu1 %v8433_v32  ;;  %v8443_v32 = vld [vmem:[#allocation10 + $0x6d0] sm:$0xff] }
 0xb05   : > { %v24414_v53 = vpop.f32.mrb[58].mxu0 }
 0xb06   : > { %19167 = vmatmul.mubr.f32.gmra.mrb[164].mxu0 %v8404_v41  ;;  %v7814_v38 = vpop.f32.mrb[59].mxu0  ;;  %v8454_v41 = vld [vmem:[#allocation10 + $0x728] sm:$0xff] }
 0xb07   : > { %8683 = vmatmul.mubr.f32.gmra.mrb[232].mxu1 %v8432_v5  ;;  %19169 = vmatprep.mubr.f32.mxu0 %v8407_v28  ;;  %v8453_v38 = vld [vmem:[#allocation10 + $0x720] sm:$0xff] }
 0xb08   : > { %8687 = vmatprep.mubr.f32.mxu1 %v8436_v3  ;;  %v8446_v3 = vld [vmem:[#allocation10 + $0x6e8] sm:$0xff] }
 0xb09   : > { %v24416_v59 = vpop.f32.mrb[60].mxu0 }
 0xb0a   : > { %19170 = vmatmul.mubr.f32.gmra.mrb[166].mxu0 %v8410_v62  ;;  %v7819_v11 = vpop.f32.mrb[61].mxu0  ;;  %v8449_v62 = vld [vmem:[#allocation10 + $0x700] sm:$0xff] }
 0xb0b   : > { %8688 = vmatmul.mubr.f32.gmra.mrb[234].mxu1 %v8435_v51  ;;  %19172 = vmatprep.mubr.f32.mxu0 %v8413_v47  ;;  %v8457_v51 = vld [vmem:[#allocation10 + $0x740] sm:$0xff]  ;;  %v8452_v11 = vld [vmem:[#allocation10 + $0x718] sm:$0xff] }
 0xb0c   : > { %8692 = vmatprep.mubr.f32.mxu1 %v8439_v57 }
 0xb0d   : > { %v24418_v55 = vpop.f32.mrb[62].mxu0 }
 0xb0e   : > { %19173 = vmatmul.mubr.f32.gmra.mrb[168].mxu0 %v8416_v18  ;;  %v7824_v49 = vpop.f32.mrb[63].mxu0  ;;  %v8456_v18 = vld [vmem:[#allocation10 + $0x738] sm:$0xff] }
 0xb0f   : > { %8693 = vmatmul.mubr.f32.gmra.mrb[236].mxu1 %v8438_v30  ;;  %19175 = vmatprep.mubr.f32.mxu0 %v8419_v56  ;;  %v8455_v30 = vld [vmem:[#allocation10 + $0x730] sm:$0xff]  ;;  %v8460_v56 = vld [vmem:[#allocation10 + $0x758] sm:$0xff] }
 0xb10   : > { %8697 = vmatprep.mubr.f32.mxu1 %v8442_v39 }
 0xb11   : > { %v24420_v43 = vpop.f32.mrb[64].mxu0 }
 0xb12   : > { %19176 = vmatmul.mubr.f32.gmra.mrb[170].mxu0 %v8422_v7  ;;  %v7829_v50 = vpop.f32.mrb[65].mxu0 }
 0xb13   : > { %8698 = vmatmul.mubr.f32.gmra.mrb[238].mxu1 %v8441_v16  ;;  %19178 = vmatprep.mubr.f32.mxu0 %v8425_v60 }
 0xb14   : > { %8702 = vmatprep.mubr.f32.mxu1 %v8445_v17  ;;  %v8458_v17 = vld [vmem:[#allocation10 + $0x748] sm:$0xff] }
 0xb15   : > { %v24422_v42 = vpop.f32.mrb[66].mxu0 }
 0xb16   : > { %19179 = vmatmul.mubr.f32.gmra.mrb[172].mxu0 %v8428_v61  ;;  %v7834_v34 = vpop.f32.mrb[67].mxu0  ;;  %v8459_v61 = vld [vmem:[#allocation10 + $0x750] sm:$0xff] }
 0xb17   : > { %8703 = vmatmul.mubr.f32.gmra.mrb[240].mxu1 %v8444_v52  ;;  %19181 = vmatprep.mubr.f32.mxu0 %v8431_v36  ;;  %v8461_v52 = vld [vmem:[#allocation10 + $0x760] sm:$0xff]  ;;  %v8463_v36 = vld [vmem:[#allocation10 + $0x770] sm:$0xff] }
 0xb18   : > { %8707 = vmatprep.mubr.f32.mxu1 %v8448_v25 }
 0xb19   : > { %v7837_v21 = vpop.f32.mrb[68].mxu0 }
 0xb1a   : > { %19182 = vmatmul.mubr.f32.gmra.mrb[174].mxu0 %v8434_v40  ;;  %v7839_v27 = vpop.f32.mrb[69].mxu0 }
 0xb1b   : > { %8708 = vmatmul.mubr.f32.gmra.mrb[242].mxu1 %v8447_v29  ;;  %19184 = vmatprep.mubr.f32.mxu0 %v8437_v1  ;;  %v8464_v1 = vld [vmem:[#allocation10 + $0x778] sm:$0xff]  ;;  %v8467_v27 = vld [vmem:[#allocation10 + $0x790] sm:$0xff] }
 0xb1c   : > { %8712 = vmatprep.mubr.f32.mxu1 %v8451_v54 }
 0xb1d   : > { %v24424_v5 = vpop.f32.mrb[70].mxu0 }
 0xb1e   : > { %19185 = vmatmul.mubr.f32.gmra.mrb[176].mxu0 %v8440_v45  ;;  %v7844_v28 = vpop.f32.mrb[71].mxu0  ;;  %v8466_v45 = vld [vmem:[#allocation10 + $0x788] sm:$0xff] }
 0xb1f   : > { %8713 = vmatmul.mubr.f32.gmra.mrb[244].mxu1 %v8450_v44  ;;  %19187 = vmatprep.mubr.f32.mxu0 %v8443_v32 }
 0xb20   : > { %8717 = vmatprep.mubr.f32.mxu1 %v8454_v41 }
 0xb21   : > { %v7847_v47 = vpop.f32.mrb[72].mxu0 }
 0xb22   : > { %19188 = vmatmul.mubr.f32.gmra.mrb[178].mxu0 %v8446_v3  ;;  %v7849_v57 = vpop.f32.mrb[73].mxu0  ;;  %v8470_v3 = vld [vmem:[#allocation10 + $0x7a8] sm:$0xff] }
 0xb23   : > { %8718 = vmatmul.mubr.f32.gmra.mrb[246].mxu1 %v8453_v38  ;;  %19190 = vmatprep.mubr.f32.mxu0 %v8449_v62  ;;  %v9124_v38 = vld [vmem:[#allocation12 + $0x60] sm:$0xff]  ;;  %v9125_v62 = vld [vmem:[#allocation12 + $0x68] sm:$0xff] }
 0xb24   : > { %8722 = vmatprep.mubr.f32.mxu1 %v8457_v51  ;;  %v8465_v51 = vld [vmem:[#allocation10 + $0x780] sm:$0xff] }
 0xb25   : > { %v24426_v39 = vpop.f32.mrb[74].mxu0  ;;  %v8473_v57 = vld [vmem:[#allocation10 + $0x7c0] sm:$0xff] }
 0xb26   : > { %v19049_v49 = vpop.f32.mrb[142].mxu1  ;;  %19191 = vmatmul.mubr.f32.gmra.mrb[180].mxu0 %v8452_v11  ;;  %v7854_v7 = vpop.f32.mrb[75].mxu0  ;;  %v20751_v11 = vpack.c.bf16 %v9125_v62, %v9124_v38 }
 0xb27   : > { %v24429_v16 = vadd.f32 %v19049_v49, %v24416_v59  ;;  %v8117_v60 = vpop.f32.mrb[143].mxu1  ;;  %8723 = vmatmul.mubr.f32.gmra.mrb[248].mxu1 %v8456_v18  ;;  %19193 = vmatprep.mubr.f32.mxu0 %v8455_v30  ;;  %v8469_v18 = vld [vmem:[#allocation10 + $0x7a0] sm:$0xff] }
 0xb28   : > { %v24432_v50 = vadd.f32 %v8117_v60, %v24414_v53  ;;  %8727 = vmatprep.mubr.f32.mxu1 %v8460_v56  ;;  %v8462_v53 = vld [vmem:[#allocation10 + $0x768] sm:$0xff]  ;;  %20752 = vmatprep.subr.bf16.mxu0 %v20751_v11  ;;  %v8476_v60 = vld [vmem:[#allocation10 + $0x7d8] sm:$0xff] }
 0xb29   : > { %v7857_v25 = vpop.f32.mrb[76].mxu0  ;;  %20754 = vmatpush3.bf16.msra.mxu0 %v20751_v11 }
 0xb2a   : > { %v19052_v34 = vpop.f32.mrb[144].mxu1  ;;  %19194 = vmatmul.mubr.f32.gmra.mrb[182].mxu0 %v8458_v17  ;;  %v7859_v40 = vpop.f32.mrb[77].mxu0  ;;  %v9126_v17 = vld [vmem:[#allocation12 + $0x70] sm:$0xff] }
 0xb2b   : > { %v24435_v29 = vadd.f32 %v19052_v34, %v24420_v43  ;;  %v8127_v59 = vpop.f32.mrb[145].mxu1  ;;  %8728 = vmatmul.mubr.f32.gmra.mrb[250].mxu1 %v8459_v61  ;;  %19196 = vmatprep.mubr.f32.mxu0 %v8461_v52  ;;  %v9127_v61 = vld [vmem:[#allocation12 + $0x78] sm:$0xff] }
 0xb2c   : > { %v24438_v54 = vadd.f32 %v8127_v59, %v24418_v55  ;;  %8732 = vmatprep.mubr.f32.mxu1 %v8463_v36  ;;  %v8468_v52 = vld [vmem:[#allocation10 + $0x798] sm:$0xff]  ;;  %v8479_v36 = vld [vmem:[#allocation10 + $0x7f0] sm:$0xff]  ;;  %v20755_v34 = vpack.c.bf16 %v9127_v61, %v9126_v17 }
 0xb2d   : > { %v24440_v44 = vpop.f32.mrb[78].mxu0  ;;  %v8472_v40 = vld [vmem:[#allocation10 + $0x7b8] sm:$0xff]  ;;  %v8491_v17 = vld [vmem:[#allocation10 + $0x850] sm:$0xff] }
 0xb2e   : > { %v19055_v32 = vpop.f32.mrb[146].mxu1  ;;  %19197 = vmatmul.mubr.f32.gmra.mrb[184].mxu0 %v8464_v1  ;;  %v7864_v41 = vpop.f32.mrb[79].mxu0  ;;  %20756 = vmatprep.subr.bf16.mxu0 %v20755_v34 }
 0xb2f   : > { %v24442_v28 = vadd.f32 %v19055_v32, %v7837_v21  ;;  %v8137_v43 = vpop.f32.mrb[147].mxu1  ;;  %8733 = vmatmul.mubr.f32.gmra.mrb[252].mxu1 %v8462_v53  ;;  %19199 = vmatprep.mubr.f32.mxu0 %v8467_v27  ;;  %v9128_v32 = vld [vmem:[#allocation12 + $0x80] sm:$0xff] }
 0xb30   : > { %v24445_v55 = vadd.f32 %v8137_v43, %v24422_v42  ;;  %8737 = vmatprep.mubr.f32.mxu1 %v8466_v45  ;;  %v8482_v45 = vld [vmem:[#allocation10 + $0x808] sm:$0xff]  ;;  %v8471_v43 = vld [vmem:[#allocation10 + $0x7b0] sm:$0xff]  ;;  %20758 = vmatpush3.bf16.msra.mxu0 %v20755_v34 }
 0xb31   : > { %v7867_v30 = vpop.f32.mrb[80].mxu0 }
 0xb32   : > { %v19058_v56 = vpop.f32.mrb[148].mxu1  ;;  %19200 = vmatmul.mubr.f32.gmra.mrb[186].mxu0 %v8470_v3  ;;  %v7869_v49 = vpop.f32.mrb[81].mxu0  ;;  %v8485_v3 = vld [vmem:[#allocation10 + $0x820] sm:$0xff] }
 0xb33   : > { %v24447_v21 = vadd.f32 %v19058_v56, %v7847_v47  ;;  %v8147_v7 = vpop.f32.mrb[149].mxu1  ;;  %8738 = vmatmul.mubr.f32.gmra.mrb[254].mxu1 %v8465_v51  ;;  %19202 = vmatprep.mubr.f32.mxu0 %v8473_v57  ;;  %v8475_v51 = vld [vmem:[#allocation10 + $0x7d0] sm:$0xff]  ;;  %v8488_v56 = vld [vmem:[#allocation10 + $0x838] sm:$0xff] }
 0xb34   : > { %v24450_v42 = vadd.f32 %v8147_v7, %v24424_v5  ;;  %8742 = vmatprep.mubr.f32.mxu1 %v8469_v18  ;;  %v9129_v5 = vld [vmem:[#allocation12 + $0x88] sm:$0xff]  ;;  %v9130_v49 = vld [vmem:[#allocation12 + $0x90] sm:$0xff] }
 0xb35   : > { %v7872_v59 = vpop.f32.mrb[82].mxu0  ;;  %v20759_v38 = vpack.c.bf16 %v9129_v5, %v9128_v32  ;;  %v8477_v32 = vld [vmem:[#allocation10 + $0x7e0] sm:$0xff] }
 0xb36   : > { %v19061_v1 = vpop.f32.mrb[150].mxu1  ;;  %19203 = vmatmul.mubr.f32.gmra.mrb[188].mxu0 %v8476_v60  ;;  %v7874_v47 = vpop.f32.mrb[83].mxu0  ;;  %v8474_v60 = vld [vmem:[#allocation10 + $0x7c8] sm:$0xff]  ;;  %v8497_v5 = vld [vmem:[#allocation10 + $0x880] sm:$0xff] }
 0xb37   : > { %v24452_v53 = vadd.f32 %v19061_v1, %v7857_v25  ;;  %v8157_v27 = vpop.f32.mrb[151].mxu1  ;;  %8743 = vmatmul.mubr.f32.gmra.mrb[0].mxu1 %v8468_v52  ;;  %19205 = vmatprep.mubr.f32.mxu0 %v8479_v36  ;;  %v8478_v36 = vld [vmem:[#allocation10 + $0x7e8] sm:$0xff] }
 0xb38   : > { %v24455_v41 = vadd.f32 %v8157_v27, %v24426_v39  ;;  %8747 = vmatprep.mubr.f32.mxu1 %v8472_v40  ;;  %20760 = vmatprep.subr.bf16.mxu0 %v20759_v38  ;;  %v9131_v39 = vld [vmem:[#allocation12 + $0x98] sm:$0xff]  ;;  %v8494_v47 = vld [vmem:[#allocation10 + $0x868] sm:$0xff]  ;;  %v9132_v27 = vld [vmem:[#allocation12 + $0xa0] sm:$0xff] }
 0xb39   : > { %v7877_v62 = vpop.f32.mrb[84].mxu0  ;;  %20762 = vmatpush3.bf16.msra.mxu0 %v20759_v38  ;;  %v20763_v61 = vpack.c.bf16 %v9131_v39, %v9130_v49  ;;  %v8481_v38 = vld [vmem:[#allocation10 + $0x800] sm:$0xff]  ;;  %v8480_v39 = vld [vmem:[#allocation10 + $0x7f8] sm:$0xff] }
 0xb3a   : > { %v19064_v57 = vpop.f32.mrb[152].mxu1  ;;  %v7879_v11 = vpop.f32.mrb[85].mxu0  ;;  %19206 = vmatmul.mubr.f32.gmra.mrb[190].mxu0 %v8482_v45 }
 0xb3b   : > { %v24457_v25 = vadd.f32 %v19064_v57, %v7867_v30  ;;  %v8167_v18 = vpop.f32.mrb[153].mxu1  ;;  %8748 = vmatmul.mubr.f32.gmra.mrb[2].mxu1 %v8471_v43  ;;  %19208 = vmatprep.mubr.f32.mxu0 %v8485_v3 }
 0xb3c   : > { %v24460_v7 = vadd.f32 %v8167_v18, %v24440_v44  ;;  %8752 = vmatprep.mubr.f32.mxu1 %v8475_v51  ;;  %20764 = vmatprep.subr.bf16.mxu0 %v20763_v61  ;;  %v9133_v44 = vld [vmem:[#allocation12 + $0xa8] sm:$0xff]  ;;  %v8500_v18 = vld [vmem:[#allocation10 + $0x898] sm:$0xff] }
 0xb3d   : > { %25808 = vst [vmem:[#allocation29_spill] sm:$0xff] %v24457_v25  ;;  %v7882_v52 = vpop.f32.mrb[86].mxu0  ;;  %20766 = vmatpush3.bf16.msra.mxu0 %v20763_v61  ;;  %v20767_v43 = vpack.c.bf16 %v9133_v44, %v9132_v27  ;;  %v8356_v27 = vld [vmem:[#allocation12] sm:$0xff]  ;;  %v8357_v44 = vld [vmem:[#allocation12 + $0x8] sm:$0xff] }
 0xb3e   : > { %v19067_v34 = vpop.f32.mrb[154].mxu1  ;;  %v7884_v40 = vpop.f32.mrb[87].mxu0  ;;  %19209 = vmatmul.mubr.f32.gmra.mrb[192].mxu0 %v8488_v56  ;;  %v9134_v56 = vld [vmem:[#allocation12 + $0xb0] sm:$0xff] }
 0xb3f   : > { %v24462_v30 = vadd.f32 %v19067_v34, %v7877_v62  ;;  %v8177_v1 = vpop.f32.mrb[155].mxu1  ;;  %8753 = vmatmul.mubr.f32.gmra.mrb[4].mxu1 %v8474_v60  ;;  %19211 = vmatprep.mubr.f32.mxu0 %v8491_v17  ;;  %v8503_v60 = vld [vmem:[#allocation10 + $0x8b0] sm:$0xff] }
 0xb40   : > { %v24464_v45 = vadd.f32 %v8177_v1, %v7872_v59  ;;  %8757 = vmatprep.mubr.f32.mxu1 %v8478_v36  ;;  %20768 = vmatprep.subr.bf16.mxu0 %v20767_v43  ;;  %v9135_v59 = vld [vmem:[#allocation12 + $0xb8] sm:$0xff] }
 0xb41   : > { %25809 = vst [vmem:[#allocation28_spill] sm:$0xff] %v24462_v30  ;;  %v7887_v3 = vpop.f32.mrb[88].mxu0  ;;  %20770 = vmatpush3.bf16.msra.mxu0 %v20767_v43  ;;  %v20771_v17 = vpack.c.bf16 %v9135_v59, %v9134_v56  ;;  %v8484_v36 = vld [vmem:[#allocation10 + $0x818] sm:$0xff]  ;;  %v24472_v43 = vpack.c.bf16 %v8357_v44, %v8356_v27  ;;  %v8486_v59 = vld [vmem:[#allocation10 + $0x828] sm:$0xff] }
 0xb42   : > { %25810 = vst [vmem:[#allocation30_spill] sm:$0xff] %v24464_v45  ;;  %v19070_v51 = vpop.f32.mrb[156].mxu1  ;;  %v7889_v57 = vpop.f32.mrb[89].mxu0  ;;  %19212 = vmatmul.mubr.f32.gmra.mrb[194].mxu0 %v8494_v47  ;;  %v8506_v47 = vld [vmem:[#allocation10 + $0x8c8] sm:$0xff]  ;;  %v8512_v56 = vld [vmem:[#allocation10 + $0x8f8] sm:$0xff] }
 0xb43   : > { %v24466_v62 = vadd.f32 %v19070_v51, %v7887_v3  ;;  %v8187_v11 = vpop.f32.mrb[157].mxu1  ;;  %8758 = vmatmul.mubr.f32.gmra.mrb[6].mxu1 %v8477_v32  ;;  %19214 = vmatprep.mubr.f32.mxu0 %v8497_v5  ;;  %v8509_v5 = vld [vmem:[#allocation10 + $0x8e0] sm:$0xff] }
 0xb44   : > { %v24468_v49 = vadd.f32 %v8187_v11, %v7882_v52  ;;  %8762 = vmatprep.mubr.f32.mxu1 %v8481_v38  ;;  %20772 = vmatprep.subr.bf16.mxu0 %v20771_v17  ;;  %v8483_v52 = vld [vmem:[#allocation10 + $0x810] sm:$0xff] }
 0xb45   : > { %25811 = vst [vmem:[#allocation32_spill] sm:$0xff] %v24466_v62  ;;  %v7892_v61 = vpop.f32.mrb[90].mxu0  ;;  %20774 = vmatpush3.bf16.msra.mxu0 %v20771_v17  ;;  %v8487_v38 = vld [vmem:[#allocation10 + $0x830] sm:$0xff] }
 0xb46   : > { %25812 = vst [vmem:[#allocation31_spill] sm:$0xff] %v24468_v49  ;;  %v19073_v34 = vpop.f32.mrb[158].mxu1  ;;  %v7894_v40 = vpop.f32.mrb[91].mxu0  ;;  %19215 = vmatmul.mubr.f32.gmra.mrb[196].mxu0 %v8500_v18  ;;  %20776 = vmatprep.subr.bf16.mxu0 %v24472_v43 }
 0xb47   : > { %v8197_v1 = vpop.f32.mrb[159].mxu1  ;;  %8763 = vmatmul.mubr.f32.gmra.mrb[8].mxu1 %v8480_v39  ;;  %19217 = vmatprep.mubr.f32.mxu0 %v8503_v60  ;;  %v8490_v60 = vld [vmem:[#allocation10 + $0x848] sm:$0xff]  ;;  %v8489_v40 = vld [vmem:[#allocation10 + $0x840] sm:$0xff] }
 0xb48   : > { %v24470_v32 = vadd.f32 %v8197_v1, %v7892_v61  ;;  %8767 = vmatprep.mubr.f32.mxu1 %v8484_v36 }
 0xb49   : > { %v7897_v3 = vpop.f32.mrb[92].mxu0 }
 0xb4a   : > { %25813 = vst [vmem:[#allocation33_spill] sm:$0xff] %v24470_v32  ;;  %v24474_v51 = vadd.f32 %v19073_v34, %v7897_v3  ;;  %v19076_v57 = vpop.f32.mrb[160].mxu1  ;;  %v7899_v11 = vpop.f32.mrb[93].mxu0  ;;  %19218 = vmatmul.mubr.f32.gmra.mrb[198].mxu0 %v8506_v47  ;;  %v8493_v47 = vld [vmem:[#allocation10 + $0x860] sm:$0xff]  ;;  %v8492_v3 = vld [vmem:[#allocation10 + $0x858] sm:$0xff] }
 0xb4b   : > { %v8207_v18 = vpop.f32.mrb[161].mxu1  ;;  %8768 = vmatmul.mubr.f32.gmra.mrb[10].mxu1 %v8483_v52  ;;  %19220 = vmatprep.mubr.f32.mxu0 %v8509_v5  ;;  %v8496_v11 = vld [vmem:[#allocation10 + $0x878] sm:$0xff] }
 0xb4c   : > { %25814 = vst [vmem:[#allocation34_spill] sm:$0xff] %v24474_v51  ;;  %8772 = vmatprep.mubr.f32.mxu1 %v8487_v38 }
 0xb4d   : > { %v7902_v39 = vpop.f32.mrb[94].mxu0 }
 0xb4e   : > { %v24477_v17 = vadd.f32 %v8207_v18, %v7902_v39  ;;  %v19079_v61 = vpop.f32.mrb[162].mxu1  ;;  %v7904_v36 = vpop.f32.mrb[95].mxu0  ;;  %19221 = vmatmul.mubr.f32.gmra.mrb[200].mxu0 %v8512_v56 }
 0xb4f   : > { %v8217_v34 = vpop.f32.mrb[163].mxu1  ;;  %8773 = vmatmul.mubr.f32.gmra.mrb[12].mxu1 %v8486_v59  ;;  %v8495_v59 = vld [vmem:[#allocation10 + $0x870] sm:$0xff] }
 0xb50   : > { %25815 = vst [vmem:[#allocation35_spill] sm:$0xff] %v24477_v17  ;;  %8777 = vmatprep.mubr.f32.mxu1 %v8490_v60  ;;  %v8502_v17 = vld [vmem:[#allocation10 + $0x8a8] sm:$0xff] }
 0xb51   : > { %v7907_v1 = vpop.f32.mrb[96].mxu0 }
 0xb52   : > { %v24479_v27 = vadd.f32 %v19076_v57, %v7907_v1  ;;  %v19082_v44 = vpop.f32.mrb[164].mxu1  ;;  %v7909_v52 = vpop.f32.mrb[97].mxu0 }
 0xb53   : > { %v8227_v5 = vpop.f32.mrb[165].mxu1  ;;  %8778 = vmatmul.mubr.f32.gmra.mrb[14].mxu1 %v8489_v40  ;;  %v8498_v40 = vld [vmem:[#allocation10 + $0x888] sm:$0xff] }
 0xb54   : > { %25816 = vst [vmem:[#allocation36_spill] sm:$0xff] %v24479_v27  ;;  %8782 = vmatprep.mubr.f32.mxu1 %v8493_v47 }
 0xb55   : > { %v7912_v38 = vpop.f32.mrb[98].mxu0 }
 0xb56   : > { %v24481_v18 = vadd.f32 %v8217_v34, %v7912_v38  ;;  %v19085_v39 = vpop.f32.mrb[166].mxu1  ;;  %v7914_v56 = vpop.f32.mrb[99].mxu0 }
 0xb57   : > { %v8237_v36 = vpop.f32.mrb[167].mxu1  ;;  %8783 = vmatmul.mubr.f32.gmra.mrb[16].mxu1 %v8492_v3 }
 0xb58   : > { %25817 = vst [vmem:[#allocation37_spill] sm:$0xff] %v24481_v18  ;;  %8787 = vmatprep.mubr.f32.mxu1 %v8496_v11  ;;  %v8501_v11 = vld [vmem:[#allocation10 + $0x8a0] sm:$0xff] }
 0xb59   : > { %v7917_v60 = vpop.f32.mrb[100].mxu0 }
 0xb5a   : > { %v24483_v57 = vadd.f32 %v19079_v61, %v7917_v60  ;;  %v19088_v1 = vpop.f32.mrb[168].mxu1  ;;  %v7919_v52 = vpop.f32.mrb[101].mxu0  ;;  %v8505_v61 = vld [vmem:[#allocation10 + $0x8c0] sm:$0xff] }
 0xb5b   : > { %v8247_v27 = vpop.f32.mrb[169].mxu1  ;;  %8788 = vmatmul.mubr.f32.gmra.mrb[18].mxu1 %v8495_v59 }
 0xb5c   : > { %25818 = vst [vmem:[#allocation38_spill] sm:$0xff] %v24483_v57  ;;  %8792 = vmatprep.mubr.f32.mxu1 %v8499_v31 }
 0xb5d   : > { %v7922_v47 = vpop.f32.mrb[102].mxu0 }
 0xb5e   : > { %v24485_v34 = vadd.f32 %v8227_v5, %v7922_v47  ;;  %v24487_v38 = vpop.f32.mrb[170].mxu1  ;;  %v7924_v56 = vpop.f32.mrb[103].mxu0  ;;  %v8504_v5 = vld [vmem:[#allocation10 + $0x8b8] sm:$0xff] }
 0xb5f   : > { %v8257_v3 = vpop.f32.mrb[171].mxu1  ;;  %8793 = vmatmul.mubr.f32.gmra.mrb[20].mxu1 %v8498_v40 }
 0xb60   : > { %25819 = vst [vmem:[#allocation39_spill] sm:$0xff] %v24485_v34  ;;  %8797 = vmatprep.mubr.f32.mxu1 %v8502_v17  ;;  %v8508_v34 = vld [vmem:[#allocation10 + $0x8d8] sm:$0xff] }
 0xb61   : > { %v7927_v18 = vpop.f32.mrb[104].mxu0 }
 0xb62   : > { %v24489_v60 = vadd.f32 %v19082_v44, %v7927_v18  ;;  %v24491_v52 = vpop.f32.mrb[172].mxu1  ;;  %v7929_v59 = vpop.f32.mrb[105].mxu0  ;;  %v8507_v44 = vld [vmem:[#allocation10 + $0x8d0] sm:$0xff] }
 0xb63   : > { %v24493_v31 = vpop.f32.mrb[173].mxu1  ;;  %8798 = vmatmul.mubr.f32.gmra.mrb[22].mxu1 %v8501_v11 }
 0xb64   : > { %25820 = vst [vmem:[#allocation40_spill] sm:$0xff] %v24489_v60  ;;  %8802 = vmatprep.mubr.f32.mxu1 %v8505_v61  ;;  %v8511_v60 = vld [vmem:[#allocation10 + $0x8f0] sm:$0xff] }
 0xb65   : > { %v7932_v47 = vpop.f32.mrb[106].mxu0 }
 0xb66   : > { %v24495_v57 = vadd.f32 %v8237_v36, %v7932_v47  ;;  %v24497_v56 = vpop.f32.mrb[174].mxu1  ;;  %v7934_v17 = vpop.f32.mrb[107].mxu0  ;;  %v8510_v36 = vld [vmem:[#allocation10 + $0x8e8] sm:$0xff] }
 0xb67   : > { %v24499_v40 = vpop.f32.mrb[175].mxu1  ;;  %8803 = vmatmul.mubr.f32.gmra.mrb[24].mxu1 %v8504_v5 }
 0xb68   : > { %25821 = vst [vmem:[#allocation41_spill] sm:$0xff] %v24495_v57  ;;  %8807 = vmatprep.mubr.f32.mxu1 %v8508_v34  ;;  %v10036_v57 = vld [vmem:[#allocation10 + $0x908] sm:$0xff] }
 0xb69   : > { %v7937_v18 = vpop.f32.mrb[108].mxu0 }
 0xb6a   : > { %v24501_v59 = vadd.f32 %v19085_v39, %v7937_v18  ;;  %v24503_v51 = vpop.f32.mrb[176].mxu1  ;;  %v7939_v11 = vpop.f32.mrb[109].mxu0  ;;  %v10035_v39 = vld [vmem:[#allocation10 + $0x900] sm:$0xff] }
 0xb6b   : > { %v24505_v61 = vpop.f32.mrb[177].mxu1  ;;  %8808 = vmatmul.mubr.f32.gmra.mrb[26].mxu1 %v8507_v44 }
 0xb6c   : > { %25822 = vst [vmem:[#allocation42_spill] sm:$0xff] %v24501_v59  ;;  %8812 = vmatprep.mubr.f32.mxu1 %v8511_v60  ;;  %v10039_v59 = vld [vmem:[#allocation10 + $0x920] sm:$0xff] }
 0xb6d   : > { %v7942_v47 = vpop.f32.mrb[110].mxu0 }
 0xb6e   : > { %v24507_v17 = vadd.f32 %v8247_v27, %v7942_v47  ;;  %v24509_v32 = vpop.f32.mrb[178].mxu1  ;;  %v7944_v34 = vpop.f32.mrb[111].mxu0  ;;  %v10038_v27 = vld [vmem:[#allocation10 + $0x918] sm:$0xff] }
 0xb6f   : > { %v24511_v5 = vpop.f32.mrb[179].mxu1  ;;  %8813 = vmatmul.mubr.f32.gmra.mrb[28].mxu1 %v8510_v36  ;;  %v25825_v34 = vmov 0.0|0.0   ;;  %v10042_v36 = vld [vmem:[#allocation10 + $0x938] sm:$0xff] }
 0xb70   : > { %25823 = vst [vmem:[#allocation43_spill] sm:$0xff] %v24507_v17  ;;  %10243 = vmatprep.mubr.f32.mxu1 %v10036_v57 }
 0xb71   : > { %v7947_v18 = vpop.f32.mrb[112].mxu0 }
 0xb72   : > { %v24513_v11 = vadd.f32 %v19088_v1, %v7947_v18  ;;  %v24515_v62 = vpop.f32.mrb[180].mxu1  ;;  %v7949_v60 = vpop.f32.mrb[113].mxu0 }
 0xb73   : > { %v24517_v44 = vpop.f32.mrb[181].mxu1  ;;  %10244 = vmatmul.mubr.f32.vlgmr.msra.gmra.mrb[30].mxu1 %v10035_v39  ;;  %v10041_v39 = vld [vmem:[#allocation10 + $0x930] sm:$0xff] }
 0xb74   : > { %25824 = vst [vmem:[#allocation44_spill] sm:$0xff] %v24513_v11  ;;  %20905 = vmatpush1.bf16.msra.mxu1 %v24238_v12  ;;  %10248 = vmatprep.mubr.f32.mxu1 %v10039_v59  ;;  %v10045_v59 = vld [vmem:[#allocation10 + $0x950] sm:$0xff] }
 0xb75   : > { %v7952_v47 = vpop.f32.mrb[114].mxu0  ;;  %20906 = vmatprep.subr.bf16.mxu1 %v25825_v34 }
 0xb76   : > { %v24521_v57 = vadd.f32 %v8257_v3, %v7952_v47  ;;  %v24523_v17 = vpop.f32.mrb[182].mxu1  ;;  %v7954_v1 = vpop.f32.mrb[115].mxu0 }
 0xb77   : > { %v24525_v18 = vpop.f32.mrb[183].mxu1  ;;  %10249 = vmatmul.mubr.f32.gmra.mrb[32].mxu1 %v10038_v27  ;;  %v10044_v27 = vld [vmem:[#allocation10 + $0x948] sm:$0xff] }
 0xb78   : > { %25826 = vst [vmem:[#allocation45_spill] sm:$0xff] %v24521_v57  ;;  %20908 = vmatpush1.bf16.msra.mxu1 %v24242_v4  ;;  %10253 = vmatprep.mubr.f32.mxu1 %v10042_v36  ;;  %v10048_v36 = vld [vmem:[#allocation10 + $0x968] sm:$0xff] }
 0xb79   : > { %v7957_v60 = vpop.f32.mrb[116].mxu0  ;;  %20909 = vmatprep.subr.bf16.mxu1 %v25825_v34 }
 0xb7a   : > { %v24530_v11 = vadd.f32 %v24487_v38, %v7957_v60  ;;  %v24532_v26 = vpop.f32.mrb[184].mxu1  ;;  %v7959_v3 = vpop.f32.mrb[117].mxu0 }
 0xb7b   : > { %v24534_v47 = vpop.f32.mrb[185].mxu1  ;;  %10254 = vmatmul.mubr.f32.gmra.mrb[34].mxu1 %v10041_v39  ;;  %v10047_v39 = vld [vmem:[#allocation10 + $0x960] sm:$0xff] }
 0xb7c   : > { %25827 = vst [vmem:[#allocation46_spill] sm:$0xff] %v24530_v11  ;;  %20911 = vmatpush1.bf16.msra.mxu1 %v24246_v33  ;;  %10258 = vmatprep.mubr.f32.mxu1 %v10045_v59  ;;  %v10051_v59 = vld [vmem:[#allocation10 + $0x980] sm:$0xff] }
 0xb7d   : > { %v7962_v1 = vpop.f32.mrb[118].mxu0  ;;  %20912 = vmatprep.subr.bf16.mxu1 %v25825_v34 }
 0xb7e   : > { %v24539_v57 = vadd.f32 %v24493_v31, %v7962_v1  ;;  %v24541_v49 = vpop.f32.mrb[186].mxu1  ;;  %v7964_v38 = vpop.f32.mrb[119].mxu0 }
 0xb7f   : > { %v24543_v60 = vpop.f32.mrb[187].mxu1  ;;  %10259 = vmatmul.mubr.f32.gmra.mrb[36].mxu1 %v10044_v27  ;;  %v10050_v27 = vld [vmem:[#allocation10 + $0x978] sm:$0xff] }
 0xb80   : > { %25828 = vst [vmem:[#allocation47_spill] sm:$0xff] %v24539_v57  ;;  %20914 = vmatpush1.bf16.msra.mxu1 %v24250_v46  ;;  %10263 = vmatprep.mubr.f32.mxu1 %v10048_v36  ;;  %v10054_v36 = vld [vmem:[#allocation10 + $0x998] sm:$0xff] }
 0xb81   : > { %v7967_v3 = vpop.f32.mrb[120].mxu0  ;;  %20915 = vmatprep.subr.bf16.mxu1 %v25825_v34 }
 0xb82   : > { %v24548_v11 = vadd.f32 %v24491_v52, %v7967_v3  ;;  %v24550_v30 = vpop.f32.mrb[188].mxu1  ;;  %v7969_v31 = vpop.f32.mrb[121].mxu0 }
 0xb83   : > { %v24552_v1 = vpop.f32.mrb[189].mxu1  ;;  %10264 = vmatmul.mubr.f32.gmra.mrb[38].mxu1 %v10047_v39  ;;  %v10053_v39 = vld [vmem:[#allocation10 + $0x990] sm:$0xff] }
 0xb84   : > { %25829 = vst [vmem:[#allocation48_spill] sm:$0xff] %v24548_v11  ;;  %20917 = vmatpush1.bf16.msra.mxu1 %v24254_v8  ;;  %10268 = vmatprep.mubr.f32.mxu1 %v10051_v59  ;;  %v10057_v59 = vld [vmem:[#allocation10 + $0x9b0] sm:$0xff] }
 0xb85   : > { %v7972_v38 = vpop.f32.mrb[122].mxu0  ;;  %20918 = vmatprep.subr.bf16.mxu1 %v25825_v34 }
 0xb86   : > { %v24557_v57 = vadd.f32 %v24499_v40, %v7972_v38  ;;  %v24559_v37 = vpop.f32.mrb[190].mxu1  ;;  %v7974_v52 = vpop.f32.mrb[123].mxu0 }
 0xb87   : > { %v8581_v3 = vpop.f32.mrb[191].mxu1  ;;  %10269 = vmatmul.mubr.f32.gmra.mrb[40].mxu1 %v10050_v27  ;;  %v10056_v27 = vld [vmem:[#allocation10 + $0x9a8] sm:$0xff] }
 0xb88   : > { %25830 = vst [vmem:[#allocation49_spill] sm:$0xff] %v24557_v57  ;;  %20920 = vmatpush1.bf16.msra.mxu1 %v24258_v35  ;;  %10273 = vmatprep.mubr.f32.mxu1 %v10054_v36  ;;  %v10060_v36 = vld [vmem:[#allocation10 + $0x9c8] sm:$0xff] }
 0xb89   : > { %v7977_v31 = vpop.f32.mrb[124].mxu0  ;;  %20921 = vmatprep.subr.bf16.mxu1 %v25825_v34 }
 0xb8a   : > { %v24564_v11 = vadd.f32 %v24497_v56, %v7977_v31  ;;  %v24566_v45 = vpop.f32.mrb[192].mxu1  ;;  %v7979_v40 = vpop.f32.mrb[125].mxu0 }
 0xb8b   : > { %v8586_v38 = vpop.f32.mrb[193].mxu1  ;;  %10274 = vmatmul.mubr.f32.gmra.mrb[42].mxu1 %v10053_v39  ;;  %v10059_v39 = vld [vmem:[#allocation10 + $0x9c0] sm:$0xff] }
 0xb8c   : > { %25831 = vst [vmem:[#allocation50_spill] sm:$0xff] %v24564_v11  ;;  %20923 = vmatpush1.bf16.msra.mxu1 %v24262_v15  ;;  %10278 = vmatprep.mubr.f32.mxu1 %v10057_v59  ;;  %v10063_v59 = vld [vmem:[#allocation10 + $0x9e0] sm:$0xff] }
 0xb8d   : > { %v7982_v52 = vpop.f32.mrb[126].mxu0  ;;  %20924 = vmatprep.subr.bf16.mxu1 %v25825_v34 }
 0xb8e   : > { %v24571_v3 = vadd.f32 %v24505_v61, %v7982_v52  ;;  %v24573_v57 = vpop.f32.mrb[194].mxu1  ;;  %v7984_v56 = vpop.f32.mrb[127].mxu0 }
 0xb8f   : > { %v8591_v31 = vpop.f32.mrb[195].mxu1  ;;  %10279 = vmatmul.mubr.f32.gmra.mrb[44].mxu1 %v10056_v27  ;;  %v10062_v27 = vld [vmem:[#allocation10 + $0x9d8] sm:$0xff] }
 0xb90   : > { %25832 = vst [vmem:[#allocation51_spill] sm:$0xff] %v24571_v3  ;;  %20926 = vmatpush1.bf16.msra.mxu1 %v24266_v20  ;;  %10283 = vmatprep.mubr.f32.mxu1 %v10060_v36  ;;  %v10066_v36 = vld [vmem:[#allocation10 + $0x9f8] sm:$0xff] }
 0xb91   : > { %v7987_v40 = vpop.f32.mrb[128].mxu0  ;;  %20927 = vmatprep.subr.bf16.mxu1 %v25825_v34 }
 0xb92   : > { %v24578_v38 = vadd.f32 %v24503_v51, %v7987_v40  ;;  %v24580_v11 = vpop.f32.mrb[196].mxu1  ;;  %v7989_v61 = vpop.f32.mrb[129].mxu0 }
 0xb93   : > { %v8596_v52 = vpop.f32.mrb[197].mxu1  ;;  %10284 = vmatmul.mubr.f32.gmra.mrb[46].mxu1 %v10059_v39  ;;  %v10065_v39 = vld [vmem:[#allocation10 + $0x9f0] sm:$0xff] }
 0xb94   : > { %25833 = vst [vmem:[#allocation52_spill] sm:$0xff] %v24578_v38  ;;  %20929 = vmatpush1.bf16.msra.mxu1 %v24270_v19  ;;  %10288 = vmatprep.mubr.f32.mxu1 %v10063_v59  ;;  %v10069_v59 = vld [vmem:[#allocation10 + $0xa10] sm:$0xff] }
 0xb95   : > { %v7992_v56 = vpop.f32.mrb[130].mxu0  ;;  %20930 = vmatprep.subr.bf16.mxu1 %v25825_v34 }
 0xb96   : > { %v24585_v31 = vadd.f32 %v24511_v5, %v7992_v56  ;;  %v24587_v3 = vpop.f32.mrb[198].mxu1  ;;  %v7994_v51 = vpop.f32.mrb[131].mxu0 }
 0xb97   : > { %v8601_v40 = vpop.f32.mrb[199].mxu1  ;;  %10289 = vmatmul.mubr.f32.gmra.mrb[48].mxu1 %v10062_v27  ;;  %v10068_v27 = vld [vmem:[#allocation10 + $0xa08] sm:$0xff] }
 0xb98   : > { %25834 = vst [vmem:[#allocation53_spill] sm:$0xff] %v24585_v31  ;;  %20932 = vmatpush1.bf16.msra.mxu1 %v24274_v23  ;;  %10293 = vmatprep.mubr.f32.mxu1 %v10066_v36  ;;  %v10072_v36 = vld [vmem:[#allocation10 + $0xa28] sm:$0xff] }
 0xb99   : > { %v7997_v61 = vpop.f32.mrb[132].mxu0  ;;  %20933 = vmatprep.subr.bf16.mxu1 %v25825_v34 }
 0xb9a   : > { %v24592_v52 = vadd.f32 %v24509_v32, %v7997_v61  ;;  %v24594_v38 = vpop.f32.mrb[200].mxu1  ;;  %v7999_v5 = vpop.f32.mrb[133].mxu0 }
 0xb9b   : > { %v8606_v56 = vpop.f32.mrb[201].mxu1  ;;  %10294 = vmatmul.mubr.f32.gmra.mrb[50].mxu1 %v10065_v39  ;;  %v10071_v39 = vld [vmem:[#allocation10 + $0xa20] sm:$0xff] }
 0xb9c   : > { %25835 = vst [vmem:[#allocation54_spill] sm:$0xff] %v24592_v52  ;;  %20935 = vmatpush1.bf16.msra.mxu1 %v24278_v22  ;;  %10298 = vmatprep.mubr.f32.mxu1 %v10069_v59  ;;  %v10075_v59 = vld [vmem:[#allocation10 + $0xa40] sm:$0xff] }
 0xb9d   : > { %v8002_v51 = vpop.f32.mrb[134].mxu0  ;;  %20936 = vmatprep.subr.bf16.mxu1 %v25825_v34 }
 0xb9e   : > { %v24599_v40 = vadd.f32 %v24517_v44, %v8002_v51  ;;  %v24601_v31 = vpop.f32.mrb[202].mxu1  ;;  %v8004_v32 = vpop.f32.mrb[135].mxu0 }
 0xb9f   : > { %v8611_v61 = vpop.f32.mrb[203].mxu1  ;;  %10299 = vmatmul.mubr.f32.gmra.mrb[52].mxu1 %v10068_v27  ;;  %v10074_v27 = vld [vmem:[#allocation10 + $0xa38] sm:$0xff] }
 0xba0   : > { %25836 = vst [vmem:[#allocation55_spill] sm:$0xff] %v24599_v40  ;;  %20938 = vmatpush1.bf16.msra.mxu1 %v24282_v24  ;;  %10303 = vmatprep.mubr.f32.mxu1 %v10072_v36  ;;  %v10078_v36 = vld [vmem:[#allocation10 + $0xa58] sm:$0xff] }
 0xba1   : > { %v8007_v5 = vpop.f32.mrb[136].mxu0  ;;  %20939 = vmatprep.subr.bf16.mxu1 %v25825_v34 }
 0xba2   : > { %v24606_v56 = vadd.f32 %v24515_v62, %v8007_v5  ;;  %v24608_v52 = vpop.f32.mrb[204].mxu1  ;;  %v8009_v44 = vpop.f32.mrb[137].mxu0 }
 0xba3   : > { %v8616_v51 = vpop.f32.mrb[205].mxu1  ;;  %10304 = vmatmul.mubr.f32.gmra.mrb[54].mxu1 %v10071_v39  ;;  %v10077_v39 = vld [vmem:[#allocation10 + $0xa50] sm:$0xff] }
 0xba4   : > { %25837 = vst [vmem:[#allocation56_spill] sm:$0xff] %v24606_v56  ;;  %20941 = vmatpush1.bf16.msra.mxu1 %v24286_v13  ;;  %10308 = vmatprep.mubr.f32.mxu1 %v10075_v59  ;;  %v10081_v59 = vld [vmem:[#allocation10 + $0xa70] sm:$0xff] }
 0xba5   : > { %v8012_v32 = vpop.f32.mrb[138].mxu0  ;;  %20942 = vmatprep.subr.bf16.mxu1 %v25825_v34 }
 0xba6   : > { %v24613_v61 = vadd.f32 %v24525_v18, %v8012_v32  ;;  %v24615_v40 = vpop.f32.mrb[206].mxu1  ;;  %v8014_v62 = vpop.f32.mrb[139].mxu0 }
 0xba7   : > { %v8621_v5 = vpop.f32.mrb[207].mxu1  ;;  %10309 = vmatmul.mubr.f32.gmra.mrb[56].mxu1 %v10074_v27  ;;  %v10080_v27 = vld [vmem:[#allocation10 + $0xa68] sm:$0xff] }
 0xba8   : > { %25838 = vst [vmem:[#allocation57_spill] sm:$0xff] %v24613_v61  ;;  %20944 = vmatpush1.bf16.msra.mxu1 %v24290_v6  ;;  %10313 = vmatprep.mubr.f32.mxu1 %v10078_v36  ;;  %v10084_v36 = vld [vmem:[#allocation10 + $0xa88] sm:$0xff]  ;;  %v8358_v6 = vld [vmem:[#allocation12 + $0x10] sm:$0xff] }
 0xba9   : > { %v8017_v44 = vpop.f32.mrb[140].mxu0  ;;  %20945 = vmatprep.subr.bf16.mxu1 %v25825_v34 }
 0xbaa   : > { %v24620_v51 = vadd.f32 %v24523_v17, %v8017_v44  ;;  %v24622_v56 = vpop.f32.mrb[208].mxu1  ;;  %v8019_v18 = vpop.f32.mrb[141].mxu0 }
 0xbab   : > { %v8626_v32 = vpop.f32.mrb[209].mxu1  ;;  %10314 = vmatmul.mubr.f32.gmra.mrb[58].mxu1 %v10077_v39  ;;  %v10083_v39 = vld [vmem:[#allocation10 + $0xa80] sm:$0xff] }
 0xbac   : > { %25839 = vst [vmem:[#allocation58_spill] sm:$0xff] %v24620_v51  ;;  %20947 = vmatpush1.bf16.msra.mxu1 %v24294_v10  ;;  %10318 = vmatprep.mubr.f32.mxu1 %v10081_v59  ;;  %v10087_v32 = vld [vmem:[#allocation10 + $0xaa0] sm:$0xff] }
 0xbad   : > { %v8022_v62 = vpop.f32.mrb[142].mxu0  ;;  %20948 = vmatprep.subr.bf16.mxu1 %v25825_v34 }
 0xbae   : > { %v24627_v5 = vadd.f32 %v24534_v47, %v8022_v62  ;;  %v24629_v61 = vpop.f32.mrb[210].mxu1  ;;  %v8024_v17 = vpop.f32.mrb[143].mxu0 }
 0xbaf   : > { %v8631_v44 = vpop.f32.mrb[211].mxu1  ;;  %10319 = vmatmul.mubr.f32.gmra.mrb[60].mxu1 %v10080_v27  ;;  %v10086_v17 = vld [vmem:[#allocation10 + $0xa98] sm:$0xff] }
 0xbb0   : > { %25840 = vst [vmem:[#allocation59_spill] sm:$0xff] %v24627_v5  ;;  %20950 = vmatpush1.bf16.msra.mxu1 %v24298_v58  ;;  %10323 = vmatprep.mubr.f32.mxu1 %v10084_v36  ;;  %v10090_v27 = vld [vmem:[#allocation10 + $0xab8] sm:$0xff] }
 0xbb1   : > { %v8027_v18 = vpop.f32.mrb[144].mxu0  ;;  %21007 = vmatprep.subr.bf16.mxu1 %v25825_v34 }
 0xbb2   : > { %v24634_v59 = vadd.f32 %v24532_v26, %v8027_v18  ;;  %v24636_v51 = vpop.f32.mrb[212].mxu1  ;;  %v8029_v47 = vpop.f32.mrb[145].mxu0  ;;  %v10089_v26 = vld [vmem:[#allocation10 + $0xab0] sm:$0xff] }
 0xbb3   : > { %v8636_v62 = vpop.f32.mrb[213].mxu1  ;;  %10324 = vmatmul.mubr.f32.gmra.mrb[62].mxu1 %v10083_v39 }
 0xbb4   : > { %25841 = vst [vmem:[#allocation60_spill] sm:$0xff] %v24634_v59  ;;  %10328 = vmatprep.mubr.f32.mxu1 %v10087_v32  ;;  %v10093_v59 = vld [vmem:[#allocation10 + $0xad0] sm:$0xff] }
 0xbb5   : > { %v8032_v44 = vpop.f32.mrb[146].mxu0 }
 0xbb6   : > { %v24639_v5 = vadd.f32 %v24543_v60, %v8032_v44  ;;  %v24641_v36 = vpop.f32.mrb[214].mxu1  ;;  %v8034_v58 = vpop.f32.mrb[147].mxu0  ;;  %v10092_v60 = vld [vmem:[#allocation10 + $0xac8] sm:$0xff] }
 0xbb7   : > { %v8641_v10 = vpop.f32.mrb[215].mxu1  ;;  %10329 = vmatmul.mubr.f32.gmra.mrb[64].mxu1 %v10086_v17 }
 0xbb8   : > { %25842 = vst [vmem:[#allocation61_spill] sm:$0xff] %v24639_v5  ;;  %10333 = vmatprep.mubr.f32.mxu1 %v10090_v27  ;;  %v10096_v5 = vld [vmem:[#allocation10 + $0xae8] sm:$0xff] }
 0xbb9   : > { %v8037_v18 = vpop.f32.mrb[148].mxu0 }
 0xbba   : > { %v24644_v47 = vadd.f32 %v24541_v49, %v8037_v18  ;;  %v24646_v39 = vpop.f32.mrb[216].mxu1  ;;  %v8039_v32 = vpop.f32.mrb[149].mxu0  ;;  %v10095_v49 = vld [vmem:[#allocation10 + $0xae0] sm:$0xff] }
 0xbbb   : > { %v8646_v62 = vpop.f32.mrb[217].mxu1  ;;  %10334 = vmatmul.mubr.f32.gmra.mrb[66].mxu1 %v10089_v26 }
 0xbbc   : > { %25843 = vst [vmem:[#allocation62_spill] sm:$0xff] %v24644_v47  ;;  %10338 = vmatprep.mubr.f32.mxu1 %v10093_v59  ;;  %v10099_v47 = vld [vmem:[#allocation10 + $0xb00] sm:$0xff] }
 0xbbd   : > { %v8042_v44 = vpop.f32.mrb[150].mxu0 }
 0xbbe   : > { %v24649_v58 = vadd.f32 %v24552_v1, %v8042_v44  ;;  %v24651_v10 = vpop.f32.mrb[218].mxu1  ;;  %v8044_v17 = vpop.f32.mrb[151].mxu0  ;;  %v10098_v1 = vld [vmem:[#allocation10 + $0xaf8] sm:$0xff] }
 0xbbf   : > { %v8651_v27 = vpop.f32.mrb[219].mxu1  ;;  %10339 = vmatmul.mubr.f32.gmra.mrb[68].mxu1 %v10092_v60  ;;  %v8359_v17 = vld [vmem:[#allocation12 + $0x18] sm:$0xff] }
 0xbc0   : > { %25844 = vst [vmem:[#allocation63_spill] sm:$0xff] %v24649_v58  ;;  %10343 = vmatprep.mubr.f32.mxu1 %v10096_v5  ;;  %v10102_v58 = vld [vmem:[#allocation10 + $0xb18] sm:$0xff] }
 0xbc1   : > { %v8047_v18 = vpop.f32.mrb[152].mxu0 }
 0xbc2   : > { %v24654_v32 = vadd.f32 %v24550_v30, %v8047_v18  ;;  %v24656_v26 = vpop.f32.mrb[220].mxu1  ;;  %v8049_v59 = vpop.f32.mrb[153].mxu0  ;;  %v10101_v18 = vld [vmem:[#allocation10 + $0xb10] sm:$0xff] }
 0xbc3   : > { %v8656_v62 = vpop.f32.mrb[221].mxu1  ;;  %10344 = vmatmul.mubr.f32.gmra.mrb[70].mxu1 %v10095_v49  ;;  %v20779_v59 = vpack.c.bf16 %v8359_v17, %v8358_v6  ;;  %v8360_v49 = vld [vmem:[#allocation12 + $0x20] sm:$0xff]  ;;  %v10104_v6 = vld [vmem:[#allocation10 + $0xb28] sm:$0xff]  ;;  %v8363_v17 = vld [vmem:[#allocation12 + $0x38] sm:$0xff] }
 0xbc4   : > { %25845 = vst [vmem:[#allocation64_spill] sm:$0xff] %v24654_v32  ;;  %10348 = vmatprep.mubr.f32.mxu1 %v10099_v47  ;;  %v10105_v47 = vld [vmem:[#allocation10 + $0xb30] sm:$0xff]  ;;  %v8361_v32 = vld [vmem:[#allocation12 + $0x28] sm:$0xff] }
 0xbc5   : > { %v19153_v44 = vpop.f32.mrb[154].mxu0 }
 0xbc6   : > { %v8890_v60 = vadd.f32 %v19153_v44, %v24566_v45  ;;  %v24659_v5 = vpop.f32.mrb[222].mxu1  ;;  %v8884_v27 = vpop.f32.mrb[155].mxu0  ;;  %v10108_v44 = vld [vmem:[#allocation10 + $0xb48] sm:$0xff] }
 0xbc7   : > { %v8885_v13 = vadd.f32 %v8884_v27, %v24559_v37  ;;  %v8661_v30 = vpop.f32.mrb[223].mxu1  ;;  %10349 = vmatmul.mubr.f32.gmra.mrb[72].mxu1 %v10098_v1 }
 0xbc8   : > { %10353 = vmatprep.mubr.f32.mxu1 %v10102_v58 }
 0xbc9   : > { %v19156_v62 = vpop.f32.mrb[156].mxu0  ;;  %19247 = vmatprep.mubr.msk.f32.mxu0 %vm6256_vm3, %v8885_v13  ;;  %v20783_v13 = vpack.c.bf16 %v8361_v32, %v8360_v49  ;;  %v10107_v32 = vld [vmem:[#allocation10 + $0xb40] sm:$0xff] }
 0xbca   : > { %v8900_v24 = vadd.f32 %v19156_v62, %v24580_v11  ;;  %v24664_v25 = vpop.f32.mrb[224].mxu1  ;;  %v8894_v45 = vpop.f32.mrb[157].mxu0  ;;  %19248 = vmatmul.mubr.msk.f32.vlgmr.msra.gmra.mrb[202].mxu0 %vm6256_vm3, %v8890_v60  ;;  %v8362_v11 = vld [vmem:[#allocation12 + $0x30] sm:$0xff]  ;;  %v8364_v49 = vld [vmem:[#allocation12 + $0x40] sm:$0xff] }
 0xbcb   : > { %v8895_v37 = vadd.f32 %v8894_v45, %v24573_v57  ;;  %20778 = vmatpush3.bf16.msra.mxu0 %v24472_v43  ;;  %v8666_v58 = vpop.f32.mrb[225].mxu1  ;;  %10354 = vmatmul.mubr.f32.gmra.mrb[74].mxu1 %v10101_v18  ;;  %v20787_v18 = vpack.c.bf16 %v8363_v17, %v8362_v11  ;;  %v8366_v11 = vld [vmem:[#allocation12 + $0x50] sm:$0xff] }
 0xbcc   : > { %20780 = vmatprep.subr.bf16.mxu0 %v20779_v59  ;;  %10358 = vmatprep.mubr.f32.mxu1 %v10105_v47  ;;  %v10111_v47 = vld [vmem:[#allocation10 + $0xb60] sm:$0xff]  ;;  %v10110_v58 = vld [vmem:[#allocation10 + $0xb58] sm:$0xff] }
 0xbcd   : > { %v19159_v1 = vpop.f32.mrb[158].mxu0  ;;  %19250 = vmatprep.mubr.msk.f32.mxu0 %vm6256_vm3, %v8895_v37 }
 0xbce   : > { %v8910_v27 = vadd.f32 %v19159_v1, %v24594_v38  ;;  %v24671_v30 = vpop.f32.mrb[226].mxu1  ;;  %v8904_v60 = vpop.f32.mrb[159].mxu0  ;;  %19251 = vmatmul.mubr.msk.f32.gmra.mrb[204].mxu0 %vm6256_vm3, %v8900_v24  ;;  %v8365_v38 = vld [vmem:[#allocation12 + $0x48] sm:$0xff] }
 0xbcf   : > { %v8905_v43 = vadd.f32 %v8904_v60, %v24587_v3  ;;  %20782 = vmatpush3.bf16.msra.mxu0 %v20779_v59  ;;  %v8671_v57 = vpop.f32.mrb[227].mxu1  ;;  %10359 = vmatmul.mubr.f32.gmra.mrb[76].mxu1 %v10104_v6  ;;  %v20791_v6 = vpack.c.bf16 %v8365_v38, %v8364_v49  ;;  %v10116_v38 = vld [vmem:[#allocation10 + $0xb88] sm:$0xff] }
 0xbd0   : > { %20784 = vmatprep.subr.bf16.mxu0 %v20783_v13  ;;  %10363 = vmatprep.mubr.f32.mxu1 %v10108_v44  ;;  %v10114_v44 = vld [vmem:[#allocation10 + $0xb78] sm:$0xff] }
 0xbd1   : > { %v19162_v62 = vpop.f32.mrb[160].mxu0  ;;  %19253 = vmatprep.mubr.msk.f32.mxu0 %vm6256_vm3, %v8905_v43  ;;  %v10113_v43 = vld [vmem:[#allocation10 + $0xb70] sm:$0xff] }
 0xbd2   : > { %v8920_v45 = vadd.f32 %v19162_v62, %v24608_v52  ;;  %v24677_v37 = vpop.f32.mrb[228].mxu1  ;;  %v8914_v24 = vpop.f32.mrb[161].mxu0  ;;  %19254 = vmatmul.mubr.msk.f32.gmra.mrb[206].mxu0 %vm6256_vm3, %v8910_v27  ;;  %v8367_v52 = vld [vmem:[#allocation12 + $0x58] sm:$0xff]  ;;  %v10117_v62 = vld [vmem:[#allocation10 + $0xb90] sm:$0xff] }
 0xbd3   : > { %v8915_v3 = vadd.f32 %v8914_v24, %v24601_v31  ;;  %20786 = vmatpush3.bf16.msra.mxu0 %v20783_v13  ;;  %v8676_v59 = vpop.f32.mrb[229].mxu1  ;;  %10364 = vmatmul.mubr.f32.gmra.mrb[78].mxu1 %v10107_v32  ;;  %v20795_v57 = vpack.c.bf16 %v8367_v52, %v8366_v11  ;;  %v10120_v24 = vld [vmem:[#allocation10 + $0xba8] sm:$0xff] }
 0xbd4   : > { %20788 = vmatprep.subr.bf16.mxu0 %v20787_v18  ;;  %10368 = vmatprep.mubr.f32.mxu1 %v10111_v47 }
 0xbd5   : > { %v19165_v1 = vpop.f32.mrb[162].mxu0  ;;  %19256 = vmatprep.mubr.msk.f32.mxu0 %vm6256_vm3, %v8915_v3 }
 0xbd6   : > { %v8930_v17 = vadd.f32 %v19165_v1, %v24622_v56  ;;  %v24683_v60 = vpop.f32.mrb[230].mxu1  ;;  %v8924_v27 = vpop.f32.mrb[163].mxu0  ;;  %19257 = vmatmul.mubr.msk.f32.gmra.mrb[208].mxu0 %vm6256_vm3, %v8920_v45 }
 0xbd7   : > { %v8925_v31 = vadd.f32 %v8924_v27, %v24615_v40  ;;  %20790 = vmatpush3.bf16.msra.mxu0 %v20787_v18  ;;  %v8681_v13 = vpop.f32.mrb[231].mxu1  ;;  %10369 = vmatmul.mubr.f32.gmra.mrb[80].mxu1 %v10110_v58  ;;  %v10122_v27 = vld [vmem:[#allocation10 + $0xbb8] sm:$0xff] }
 0xbd8   : > { %20792 = vmatprep.subr.bf16.mxu0 %v20791_v6  ;;  %10373 = vmatprep.mubr.f32.mxu1 %v10114_v44  ;;  %v10123_v44 = vld [vmem:[#allocation10 + $0xbc0] sm:$0xff]  ;;  %v10126_v13 = vld [vmem:[#allocation10 + $0xbd8] sm:$0xff] }
 0xbd9   : > { %v19168_v32 = vpop.f32.mrb[164].mxu0  ;;  %19259 = vmatprep.mubr.msk.f32.mxu0 %vm6256_vm3, %v8925_v31 }
 0xbda   : > { %v8940_v56 = vadd.f32 %v19168_v32, %v24636_v51  ;;  %v24689_v47 = vpop.f32.mrb[232].mxu1  ;;  %v8934_v49 = vpop.f32.mrb[165].mxu0  ;;  %19260 = vmatmul.mubr.msk.f32.gmra.mrb[210].mxu0 %vm6256_vm3, %v8930_v17 }
 0xbdb   : > { %v8935_v40 = vadd.f32 %v8934_v49, %v24629_v61  ;;  %20794 = vmatpush3.bf16.msra.mxu0 %v20791_v6  ;;  %v8686_v18 = vpop.f32.mrb[233].mxu1  ;;  %10374 = vmatmul.mubr.f32.gmra.mrb[82].mxu1 %v10113_v43  ;;  %v10119_v6 = vld [vmem:[#allocation10 + $0xba0] sm:$0xff]  ;;  %v10129_v49 = vld [vmem:[#allocation10 + $0xbf0] sm:$0xff] }
 0xbdc   : > { %20796 = vmatprep.subr.bf16.mxu0 %v20795_v57  ;;  %10378 = vmatprep.mubr.f32.mxu1 %v10117_v62 }
 0xbdd   : > { %v19171_v45 = vpop.f32.mrb[166].mxu0  ;;  %19262 = vmatprep.mubr.msk.f32.mxu0 %vm6256_vm3, %v8935_v40 }
 0xbde   : > { %v8950_v3 = vadd.f32 %v19171_v45, %v24646_v39  ;;  %v24695_v51 = vpop.f32.mrb[234].mxu1  ;;  %v8944_v59 = vpop.f32.mrb[167].mxu0  ;;  %19263 = vmatmul.mubr.msk.f32.gmra.mrb[212].mxu0 %vm6256_vm3, %v8940_v56 }
 0xbdf   : > { %v8945_v58 = vadd.f32 %v8944_v59, %v24641_v36  ;;  %20798 = vmatpush3.bf16.msra.mxu0 %v20795_v57  ;;  %v8691_v61 = vpop.f32.mrb[235].mxu1  ;;  %10379 = vmatmul.mubr.f32.gmra.mrb[84].mxu1 %v10116_v38 }
 0xbe0   : > { %20848 = vmatprep.subr.bf16.mxu0 %v24301_v9  ;;  %10383 = vmatprep.mubr.f32.mxu1 %v10120_v24 }
 0xbe1   : > { %v19174_v1 = vpop.f32.mrb[168].mxu0  ;;  %19265 = vmatprep.mubr.msk.f32.mxu0 %vm6256_vm3, %v8945_v58 }
 0xbe2   : > { %v8960_v39 = vadd.f32 %v19174_v1, %v24656_v26  ;;  %v8694_v11 = vpop.f32.mrb[236].mxu1  ;;  %v8954_v52 = vpop.f32.mrb[169].mxu0  ;;  %19266 = vmatmul.mubr.msk.f32.gmra.mrb[214].mxu0 %vm6256_vm3, %v8950_v3  ;;  %v10132_v3 = vld [vmem:[#allocation10 + $0xc08] sm:$0xff] }
 0xbe3   : > { %v8955_v17 = vadd.f32 %v8954_v52, %v24651_v10  ;;  %v8696_v36 = vpop.f32.mrb[237].mxu1  ;;  %10384 = vmatmul.mubr.f32.gmra.mrb[86].mxu1 %v10119_v6  ;;  %v10125_v10 = vld [vmem:[#allocation10 + $0xbd0] sm:$0xff] }
 0xbe4   : > { %10388 = vmatprep.mubr.f32.mxu1 %v10123_v44  ;;  %v10135_v44 = vld [vmem:[#allocation10 + $0xc20] sm:$0xff] }
 0xbe5   : > { %v19177_v31 = vpop.f32.mrb[170].mxu0  ;;  %19268 = vmatprep.mubr.msk.f32.mxu0 %vm6256_vm3, %v8955_v17 }
 0xbe6   : > { %v8970_v43 = vadd.f32 %v19177_v31, %v24664_v25  ;;  %v8699_v57 = vpop.f32.mrb[238].mxu1  ;;  %v8964_v32 = vpop.f32.mrb[171].mxu0  ;;  %19269 = vmatmul.mubr.msk.f32.gmra.mrb[216].mxu0 %vm6256_vm3, %v8960_v39  ;;  %v10138_v31 = vld [vmem:[#allocation10 + $0xc38] sm:$0xff] }
 0xbe7   : > { %v8965_v26 = vadd.f32 %v8964_v32, %v24659_v5  ;;  %v8701_v62 = vpop.f32.mrb[239].mxu1  ;;  %10389 = vmatmul.mubr.f32.gmra.mrb[88].mxu1 %v10122_v27  ;;  %v10128_v5 = vld [vmem:[#allocation10 + $0xbe8] sm:$0xff]  ;;  %v10134_v27 = vld [vmem:[#allocation10 + $0xc18] sm:$0xff] }
 0xbe8   : > { %10393 = vmatprep.mubr.f32.mxu1 %v10126_v13  ;;  %v10137_v62 = vld [vmem:[#allocation10 + $0xc30] sm:$0xff] }
 0xbe9   : > { %v19180_v56 = vpop.f32.mrb[172].mxu0  ;;  %19271 = vmatprep.mubr.msk.f32.mxu0 %vm6256_vm3, %v8965_v26 }
 0xbea   : > { %v8980_v40 = vadd.f32 %v19180_v56, %v24677_v37  ;;  %v8704_v18 = vpop.f32.mrb[240].mxu1  ;;  %v8974_v38 = vpop.f32.mrb[173].mxu0  ;;  %19272 = vmatmul.mubr.msk.f32.gmra.mrb[218].mxu0 %vm6256_vm3, %v8970_v43 }
 0xbeb   : > { %v8975_v25 = vadd.f32 %v8974_v38, %v24671_v30  ;;  %v8706_v45 = vpop.f32.mrb[241].mxu1  ;;  %10394 = vmatmul.mubr.f32.gmra.mrb[90].mxu1 %v10125_v10  ;;  %v10131_v30 = vld [vmem:[#allocation10 + $0xc00] sm:$0xff] }
 0xbec   : > { %10398 = vmatprep.mubr.f32.mxu1 %v10129_v49 }
 0xbed   : > { %v19183_v24 = vpop.f32.mrb[174].mxu0  ;;  %19274 = vmatprep.mubr.msk.f32.mxu0 %vm6256_vm3, %v8975_v25  ;;  %v10140_v25 = vld [vmem:[#allocation10 + $0xc48] sm:$0xff] }
 0xbee   : > { %v8990_v59 = vadd.f32 %v19183_v24, %v24689_v47  ;;  %v8709_v58 = vpop.f32.mrb[242].mxu1  ;;  %v8984_v61 = vpop.f32.mrb[175].mxu0  ;;  %19275 = vmatmul.mubr.msk.f32.gmra.mrb[220].mxu0 %vm6256_vm3, %v8980_v40 }
 0xbef   : > { %v8985_v37 = vadd.f32 %v8984_v61, %v24683_v60  ;;  %v8711_v6 = vpop.f32.mrb[243].mxu1  ;;  %10399 = vmatmul.mubr.f32.gmra.mrb[92].mxu1 %v10128_v5 }
 0xbf0   : > { %10403 = vmatprep.mubr.f32.mxu1 %v10132_v3 }
 0xbf1   : > { %v19186_v1 = vpop.f32.mrb[176].mxu0  ;;  %19277 = vmatprep.mubr.msk.f32.mxu0 %vm6256_vm3, %v8985_v37  ;;  %v10143_v37 = vld [vmem:[#allocation10 + $0xc60] sm:$0xff] }
 0xbf2   : > { %v9000_v39 = vadd.f32 %v19186_v1, %v8694_v11  ;;  %v8714_v52 = vpop.f32.mrb[244].mxu1  ;;  %v8994_v17 = vpop.f32.mrb[177].mxu0  ;;  %19278 = vmatmul.mubr.msk.f32.gmra.mrb[222].mxu0 %vm6256_vm3, %v8990_v59 }
 0xbf3   : > { %v8995_v47 = vadd.f32 %v8994_v17, %v24695_v51  ;;  %v8716_v36 = vpop.f32.mrb[245].mxu1  ;;  %10404 = vmatmul.mubr.f32.gmra.mrb[94].mxu1 %v10131_v30  ;;  %v10141_v51 = vld [vmem:[#allocation10 + $0xc50] sm:$0xff]  ;;  %v10146_v17 = vld [vmem:[#allocation10 + $0xc78] sm:$0xff] }
 0xbf4   : > { %10408 = vmatprep.mubr.f32.mxu1 %v10135_v44  ;;  %v10150_v36 = vld [vmem:[#allocation10 + $0xc98] sm:$0xff] }
 0xbf5   : > { %v19189_v60 = vpop.f32.mrb[178].mxu0  ;;  %19280 = vmatprep.mubr.msk.f32.mxu0 %vm6256_vm3, %v8995_v47 }
 0xbf6   : > { %v9010_v13 = vadd.f32 %v19189_v60, %v8704_v18  ;;  %v8719_v43 = vpop.f32.mrb[246].mxu1  ;;  %v9004_v32 = vpop.f32.mrb[179].mxu0  ;;  %19281 = vmatmul.mubr.msk.f32.gmra.mrb[224].mxu0 %vm6256_vm3, %v9000_v39 }
 0xbf7   : > { %v9005_v11 = vadd.f32 %v9004_v32, %v8699_v57  ;;  %v8721_v26 = vpop.f32.mrb[247].mxu1  ;;  %10409 = vmatmul.mubr.f32.gmra.mrb[96].mxu1 %v10134_v27  ;;  %v10144_v57 = vld [vmem:[#allocation10 + $0xc68] sm:$0xff] }
 0xbf8   : > { %10413 = vmatprep.mubr.f32.mxu1 %v10138_v31 }
 0xbf9   : > { %v19192_v10 = vpop.f32.mrb[180].mxu0  ;;  %19283 = vmatprep.mubr.msk.f32.mxu0 %vm6256_vm3, %v9005_v11  ;;  %v10153_v11 = vld [vmem:[#allocation10 + $0xcb0] sm:$0xff] }
 0xbfa   : > { %v9020_v56 = vadd.f32 %v19192_v10, %v8714_v52  ;;  %v8724_v49 = vpop.f32.mrb[248].mxu1  ;;  %v9014_v40 = vpop.f32.mrb[181].mxu0  ;;  %19284 = vmatmul.mubr.msk.f32.gmra.mrb[226].mxu0 %vm6256_vm3, %v9010_v13 }
 0xbfb   : > { %v9015_v38 = vadd.f32 %v9014_v40, %v8709_v58  ;;  %v8726_v18 = vpop.f32.mrb[249].mxu1  ;;  %10414 = vmatmul.mubr.f32.gmra.mrb[98].mxu1 %v10137_v62  ;;  %v10147_v58 = vld [vmem:[#allocation10 + $0xc80] sm:$0xff] }
 0xbfc   : > { %10418 = vmatprep.mubr.f32.mxu1 %v10141_v51 }
 0xbfd   : > { %v19195_v45 = vpop.f32.mrb[182].mxu0  ;;  %19286 = vmatprep.mubr.msk.f32.mxu0 %vm6256_vm3, %v9015_v38 }
 0xbfe   : > { %v9030_v5 = vadd.f32 %v19195_v45, %v8724_v49  ;;  %v8729_v24 = vpop.f32.mrb[250].mxu1  ;;  %v9024_v3 = vpop.f32.mrb[183].mxu0  ;;  %19287 = vmatmul.mubr.msk.f32.gmra.mrb[228].mxu0 %vm6256_vm3, %v9020_v56  ;;  %v10152_v56 = vld [vmem:[#allocation10 + $0xca8] sm:$0xff] }
 0xbff   : > { %v9025_v59 = vadd.f32 %v9024_v3, %v8719_v43  ;;  %v8731_v61 = vpop.f32.mrb[251].mxu1  ;;  %10419 = vmatmul.mubr.f32.gmra.mrb[100].mxu1 %v10140_v25  ;;  %v10149_v43 = vld [vmem:[#allocation10 + $0xc90] sm:$0xff]  ;;  %v10156_v49 = vld [vmem:[#allocation10 + $0xcc8] sm:$0xff] }
 0xc00   : > { %10423 = vmatprep.mubr.f32.mxu1 %v10144_v57  ;;  %v10155_v57 = vld [vmem:[#allocation10 + $0xcc0] sm:$0xff] }
 0xc01   : > { %v19198_v6 = vpop.f32.mrb[184].mxu0  ;;  %19289 = vmatprep.mubr.msk.f32.mxu0 %vm6256_vm3, %v9025_v59 }
 0xc02   : > { %v8734_v30 = vpop.f32.mrb[252].mxu1  ;;  %v9034_v1 = vpop.f32.mrb[185].mxu0  ;;  %19290 = vmatmul.mubr.msk.f32.gmra.mrb[230].mxu0 %vm6256_vm3, %v9030_v5  ;;  %v10159_v5 = vld [vmem:[#allocation10 + $0xce0] sm:$0xff] }
 0xc03   : > { %v9040_v44 = vadd.f32 %v19198_v6, %v8734_v30  ;;  %v9035_v39 = vadd.f32 %v9034_v1, %v8729_v24  ;;  %v8736_v52 = vpop.f32.mrb[253].mxu1  ;;  %10424 = vmatmul.mubr.f32.gmra.mrb[102].mxu1 %v10143_v37  ;;  %v10158_v6 = vld [vmem:[#allocation10 + $0xcd8] sm:$0xff] }
 0xc04   : > { %10428 = vmatprep.mubr.f32.mxu1 %v10147_v58  ;;  %v10162_v58 = vld [vmem:[#allocation10 + $0xcf8] sm:$0xff] }
 0xc05   : > { %v19201_v47 = vpop.f32.mrb[186].mxu0  ;;  %19292 = vmatprep.mubr.msk.f32.mxu0 %vm6256_vm3, %v9035_v39 }
 0xc06   : > { %v8739_v27 = vpop.f32.mrb[254].mxu1  ;;  %v9044_v60 = vpop.f32.mrb[187].mxu0  ;;  %19293 = vmatmul.mubr.msk.f32.gmra.mrb[232].mxu0 %vm6256_vm3, %v9040_v44 }
 0xc07   : > { %v9045_v31 = vadd.f32 %v9044_v60, %v8739_v27  ;;  %v8741_v13 = vpop.f32.mrb[255].mxu1  ;;  %10429 = vmatmul.mubr.f32.gmra.mrb[104].mxu1 %v10146_v17  ;;  %v10161_v17 = vld [vmem:[#allocation10 + $0xcf0] sm:$0xff] }
 0xc08   : > { %10433 = vmatprep.mubr.f32.mxu1 %v10150_v36 }
 0xc09   : > { %19295 = vmatprep.mubr.msk.f32.mxu0 %vm6256_vm3, %v9045_v31  ;;  %v19204_v32 = vpop.f32.mrb[188].mxu0 }
 0xc0a   : > { %v8744_v26 = vpop.f32.mrb[0].mxu1  ;;  %v9054_v62 = vpop.f32.mrb[189].mxu0 }
 0xc0b   : > { %v9050_v10 = vadd.f32 %v19201_v47, %v8744_v26  ;;  %v8746_v51 = vpop.f32.mrb[1].mxu1  ;;  %10434 = vmatmul.mubr.f32.gmra.mrb[106].mxu1 %v10149_v43  ;;  %v10165_v47 = vld [vmem:[#allocation10 + $0xd10] sm:$0xff]  ;;  %v10164_v43 = vld [vmem:[#allocation10 + $0xd08] sm:$0xff] }
 0xc0c   : > { %10438 = vmatprep.mubr.f32.mxu1 %v10153_v11 }
 0xc0d   : > { %19296 = vmatmul.mubr.msk.f32.gmra.mrb[234].mxu0 %vm6256_vm3, %v9050_v10  ;;  %v19207_v40 = vpop.f32.mrb[190].mxu0 }
 0xc0e   : > { %v8749_v38 = vpop.f32.mrb[2].mxu1  ;;  %v9064_v18 = vpop.f32.mrb[191].mxu0 }
 0xc0f   : > { %v9055_v25 = vadd.f32 %v9054_v62, %v8749_v38  ;;  %v8751_v45 = vpop.f32.mrb[3].mxu1  ;;  %10439 = vmatmul.mubr.f32.gmra.mrb[108].mxu1 %v10152_v56  ;;  %v10167_v56 = vld [vmem:[#allocation10 + $0xd20] sm:$0xff] }
 0xc10   : > { %10443 = vmatprep.mubr.f32.mxu1 %v10156_v49  ;;  %v10171_v49 = vld [vmem:[#allocation10 + $0xd40] sm:$0xff] }
 0xc11   : > { %19298 = vmatprep.mubr.msk.f32.mxu0 %vm6256_vm3, %v9055_v25  ;;  %v19210_v24 = vpop.f32.mrb[192].mxu0 }
 0xc12   : > { %v8754_v3 = vpop.f32.mrb[4].mxu1  ;;  %v9074_v59 = vpop.f32.mrb[193].mxu0 }
 0xc13   : > { %v9060_v61 = vadd.f32 %v19204_v32, %v8754_v3  ;;  %v8756_v37 = vpop.f32.mrb[5].mxu1  ;;  %10444 = vmatmul.mubr.f32.gmra.mrb[110].mxu1 %v10155_v57  ;;  %v10168_v32 = vld [vmem:[#allocation10 + $0xd28] sm:$0xff]  ;;  %v10170_v57 = vld [vmem:[#allocation10 + $0xd38] sm:$0xff] }
 0xc14   : > { %10448 = vmatprep.mubr.f32.mxu1 %v10159_v5  ;;  %v10174_v5 = vld [vmem:[#allocation10 + $0xd58] sm:$0xff]  ;;  %v10173_v37 = vld [vmem:[#allocation10 + $0xd50] sm:$0xff] }
 0xc15   : > { %19299 = vmatmul.mubr.msk.f32.gmra.mrb[236].mxu0 %vm6256_vm3, %v9060_v61  ;;  %v19213_v30 = vpop.f32.mrb[194].mxu0 }
 0xc16   : > { %v8759_v1 = vpop.f32.mrb[6].mxu1  ;;  %v9084_v44 = vpop.f32.mrb[195].mxu0 }
 0xc17   : > { %v9065_v39 = vadd.f32 %v9064_v18, %v8759_v1  ;;  %v8761_v52 = vpop.f32.mrb[7].mxu1  ;;  %10449 = vmatmul.mubr.f32.gmra.mrb[112].mxu1 %v10158_v6  ;;  %v10177_v6 = vld [vmem:[#allocation10 + $0xd70] sm:$0xff] }
 0xc18   : > { %10453 = vmatprep.mubr.f32.mxu1 %v10162_v58  ;;  %v11301_v52 = vld [vmem:[#allocation10 + $0xd88] sm:$0xff] }
 0xc19   : > { %19301 = vmatprep.mubr.msk.f32.mxu0 %vm6256_vm3, %v9065_v39  ;;  %v19216_v36 = vpop.f32.mrb[196].mxu0 }
 0xc1a   : > { %v8764_v27 = vpop.f32.mrb[8].mxu1  ;;  %v9094_v60 = vpop.f32.mrb[197].mxu0 }
 0xc1b   : > { %v9070_v31 = vadd.f32 %v19207_v40, %v8764_v27  ;;  %v8766_v13 = vpop.f32.mrb[9].mxu1  ;;  %10454 = vmatmul.mubr.f32.gmra.mrb[114].mxu1 %v10161_v17 }
 0xc1c   : > { %10458 = vmatprep.mubr.f32.mxu1 %v10165_v47 }
 0xc1d   : > { %19302 = vmatmul.mubr.msk.f32.gmra.mrb[238].mxu0 %vm6256_vm3, %v9070_v31  ;;  %v19219_v11 = vpop.f32.mrb[198].mxu0 }
 0xc1e   : > { %v8769_v26 = vpop.f32.mrb[10].mxu1  ;;  %v9104_v62 = vpop.f32.mrb[199].mxu0 }
 0xc1f   : > { %v9075_v10 = vadd.f32 %v9074_v59, %v8769_v26  ;;  %v8771_v51 = vpop.f32.mrb[11].mxu1  ;;  %10459 = vmatmul.mubr.f32.gmra.mrb[116].mxu1 %v10164_v43 }
 0xc20   : > { %10463 = vmatprep.mubr.f32.mxu1 %v10168_v32 }
 0xc21   : > { %19304 = vmatprep.mubr.msk.f32.mxu0 %vm6256_vm3, %v9075_v10  ;;  %v19222_v38 = vpop.f32.mrb[200].mxu0 }
 0xc22   : > { %v8774_v40 = vpop.f32.mrb[12].mxu1  ;;  %v9114_v18 = vpop.f32.mrb[201].mxu0 }
 0xc23   : > { %v9080_v25 = vadd.f32 %v19210_v24, %v8774_v40  ;;  %v8776_v45 = vpop.f32.mrb[13].mxu1  ;;  %10464 = vmatmul.mubr.f32.gmra.mrb[118].mxu1 %v10167_v56  ;;  %v10176_v24 = vld [vmem:[#allocation10 + $0xd68] sm:$0xff]  ;;  %v25865_v40 = vld [vmem:[#allocation40_spill] sm:$0xff] }
 0xc24   : > { %10468 = vmatprep.mubr.f32.mxu1 %v10171_v49  ;;  %v25868_v45 = vld [vmem:[#allocation43_spill] sm:$0xff] }
 0xc25   : > { %19305 = vmatmul.mubr.msk.f32.gmra.mrb[240].mxu0 %vm6256_vm3, %v9080_v25  ;;  %v25867_v25 = vld [vmem:[#allocation42_spill] sm:$0xff] }
 0xc26   : > { %v8779_v3 = vpop.f32.mrb[14].mxu1 }
 0xc27   : > { %v9085_v59 = vadd.f32 %v9084_v44, %v8779_v3  ;;  %v8781_v61 = vpop.f32.mrb[15].mxu1  ;;  %10469 = vmatmul.mubr.f32.gmra.mrb[120].mxu1 %v10170_v57  ;;  %v11300_v44 = vld [vmem:[#allocation10 + $0xd80] sm:$0xff]  ;;  %v25869_v57 = vld [vmem:[#allocation44_spill] sm:$0xff]  ;;  %v25871_v3 = vld [vmem:[#allocation46_spill] sm:$0xff] }
 0xc28   : > { %10473 = vmatprep.mubr.f32.mxu1 %v10174_v5  ;;  %v25870_v5 = vld [vmem:[#allocation45_spill] sm:$0xff]  ;;  %v25873_v61 = vld [vmem:[#allocation48_spill] sm:$0xff] }
 0xc29   : > { %19307 = vmatprep.mubr.msk.f32.mxu0 %vm6256_vm3, %v9085_v59  ;;  %v25872_v59 = vld [vmem:[#allocation47_spill] sm:$0xff] }
 0xc2a   : > { %v8784_v58 = vpop.f32.mrb[16].mxu1 }
 0xc2b   : > { %v9090_v1 = vadd.f32 %v19213_v30, %v8784_v58  ;;  %v8786_v39 = vpop.f32.mrb[17].mxu1  ;;  %10474 = vmatmul.mubr.f32.gmra.mrb[122].mxu1 %v10173_v37 }
 0xc2c   : > { %10478 = vmatprep.mubr.f32.mxu1 %v10177_v6  ;;  %v25874_v6 = vld [vmem:[#allocation49_spill] sm:$0xff] }
 0xc2d   : > { %19308 = vmatmul.mubr.msk.f32.gmra.mrb[242].mxu0 %vm6256_vm3, %v9090_v1 }
 0xc2e   : > { %v8789_v17 = vpop.f32.mrb[18].mxu1 }
 0xc2f   : > { %v9095_v47 = vadd.f32 %v9094_v60, %v8789_v17  ;;  %v8791_v27 = vpop.f32.mrb[19].mxu1  ;;  %10479 = vmatmul.mubr.f32.gmra.mrb[124].mxu1 %v10176_v24  ;;  %v25875_v24 = vld [vmem:[#allocation50_spill] sm:$0xff]  ;;  %v25876_v17 = vld [vmem:[#allocation51_spill] sm:$0xff] }
 0xc30   : > { %11508 = vmatprep.mubr.f32.mxu1 %v11301_v52 }
 0xc31   : > { %19310 = vmatprep.mubr.msk.f32.mxu0 %vm6256_vm3, %v9095_v47 }
 0xc32   : > { %v8794_v31 = vpop.f32.mrb[20].mxu1 }
 0xc33   : > { %v9100_v13 = vadd.f32 %v19216_v36, %v8794_v31  ;;  %v8796_v43 = vpop.f32.mrb[21].mxu1  ;;  %11509 = vmatmul.mubr.f32.vlgmr.msra.gmra.mrb[126].mxu1 %v11300_v44  ;;  %v25877_v31 = vld [vmem:[#allocation52_spill] sm:$0xff] }
 0xc34   : > { %21009 = vmatpush1.bf16.msra.mxu1 %v24238_v12  ;;  %v25878_v43 = vld [vmem:[#allocation53_spill] sm:$0xff] }
 0xc35   : > { %19311 = vmatmul.mubr.msk.f32.gmra.mrb[244].mxu0 %vm6256_vm3, %v9100_v13  ;;  %21010 = vmatprep.subr.bf16.mxu1 %v25825_v34 }
 0xc36   : > { %v8799_v30 = vpop.f32.mrb[22].mxu1 }
 0xc37   : > { %v9105_v32 = vadd.f32 %v9104_v62, %v8799_v30  ;;  %v8801_v26 = vpop.f32.mrb[23].mxu1 }
 0xc38   : > { %21012 = vmatpush1.bf16.msra.mxu1 %v24242_v4 }
 0xc39   : > { %19313 = vmatprep.mubr.msk.f32.mxu0 %vm6256_vm3, %v9105_v32  ;;  %21013 = vmatprep.subr.bf16.mxu1 %v25825_v34 }
 0xc3a   : > { %v8804_v60 = vpop.f32.mrb[24].mxu1 }
 0xc3b   : > { %v9110_v10 = vadd.f32 %v19219_v11, %v8804_v60  ;;  %v8806_v36 = vpop.f32.mrb[25].mxu1  ;;  %v25863_v11 = vld [vmem:[#allocation38_spill] sm:$0xff] }
 0xc3c   : > { %21015 = vmatpush1.bf16.msra.mxu1 %v24246_v33  ;;  %v25846_v33 = vld [vmem:[#allocation29_spill] sm:$0xff]  ;;  %v25879_v60 = vld [vmem:[#allocation54_spill] sm:$0xff]  ;;  %v25880_v36 = vld [vmem:[#allocation55_spill] sm:$0xff] }
 0xc3d   : > { %19314 = vmatmul.mubr.msk.f32.gmra.mrb[246].mxu0 %vm6256_vm3, %v9110_v10  ;;  %21016 = vmatprep.subr.bf16.mxu1 %v25825_v34 }
 0xc3e   : > { %v8809_v12 = vpop.f32.mrb[26].mxu1 }
 0xc3f   : > { %v9115_v51 = vadd.f32 %v9114_v18, %v8809_v12  ;;  %v8811_v56 = vpop.f32.mrb[27].mxu1  ;;  %v25866_v18 = vld [vmem:[#allocation41_spill] sm:$0xff] }
 0xc40   : > { %21018 = vmatpush1.bf16.msra.mxu1 %v24250_v46  ;;  %v25847_v46 = vld [vmem:[#allocation30_spill] sm:$0xff] }
 0xc41   : > { %19316 = vmatprep.mubr.msk.f32.mxu0 %vm6256_vm3, %v9115_v51  ;;  %21019 = vmatprep.subr.bf16.mxu1 %v25825_v34 }
 0xc42   : > { %v8814_v4 = vpop.f32.mrb[28].mxu1 }
 0xc43   : > { %v9120_v62 = vadd.f32 %v19222_v38, %v8814_v4  ;;  %v8816_v49 = vpop.f32.mrb[29].mxu1  ;;  %v25864_v38 = vld [vmem:[#allocation39_spill] sm:$0xff]  ;;  %v25881_v4 = vld [vmem:[#allocation56_spill] sm:$0xff] }
 0xc44   : > { %21021 = vmatpush1.bf16.msra.mxu1 %v24254_v8  ;;  %v25848_v8 = vld [vmem:[#allocation27_spill] sm:$0xff]  ;;  %v25882_v49 = vld [vmem:[#allocation57_spill] sm:$0xff] }
 0xc45   : > { %19317 = vmatmul.mubr.msk.f32.gmra.mrb[248].mxu0 %vm6256_vm3, %v9120_v62  ;;  %21022 = vmatprep.subr.bf16.mxu1 %v25825_v34 }
 0xc46   : > { %19343 = vmatprep.mubr.msk.f32.mxu0 %vm6256_vm3, %v24432_v50  ;;  %v25853_v50 = vld [vmem:[#allocation23_spill] sm:$0xff]  ;;  %v24859_v37 = vpop.f32.mrb[30].mxu1 }
 0xc47   : > { %v10247_v58 = vpop.f32.mrb[31].mxu1 }
 0xc48   : > { %21024 = vmatpush1.bf16.msra.mxu1 %v24258_v35  ;;  %v25849_v35 = vld [vmem:[#allocation21_spill] sm:$0xff] }
 0xc49   : > { %19344 = vmatmul.mubr.msk.f32.vlgmr.msra.gmra.mrb[202].mxu0 %vm6256_vm3, %v24429_v16  ;;  %21025 = vmatprep.subr.bf16.mxu1 %v25825_v34 }
 0xc4a   : > { %20850 = vmatpush3.bf16.msra.mxu0 %v24301_v9  ;;  %19346 = vmatprep.mubr.msk.f32.mxu0 %vm6256_vm3, %v24438_v54  ;;  %v25855_v54 = vld [vmem:[#allocation33_spill] sm:$0xff]  ;;  %v24863_v1 = vpop.f32.mrb[32].mxu1 }
 0xc4b   : > { %20852 = vmatprep.subr.bf16.mxu0 %v24307_v14  ;;  %v10252_v39 = vpop.f32.mrb[33].mxu1 }
 0xc4c   : > { %21027 = vmatpush1.bf16.msra.mxu1 %v24262_v15  ;;  %v10790_v15 = vld [vmem:[#allocation12 + $0xc0] sm:$0xff] }
 0xc4d   : > { %19347 = vmatmul.mubr.msk.f32.gmra.mrb[204].mxu0 %vm6256_vm3, %v24435_v29  ;;  %21028 = vmatprep.subr.bf16.mxu1 %v25825_v34  ;;  %v25854_v29 = vld [vmem:[#allocation32_spill] sm:$0xff] }
 0xc4e   : > { %20854 = vmatpush3.bf16.msra.mxu0 %v24307_v14  ;;  %19349 = vmatprep.mubr.msk.f32.mxu0 %vm6256_vm3, %v24445_v55  ;;  %v25857_v55 = vld [vmem:[#allocation34_spill] sm:$0xff]  ;;  %v24867_v52 = vpop.f32.mrb[34].mxu1 }
 0xc4f   : > { %20856 = vmatprep.subr.bf16.mxu0 %v24313_v2  ;;  %v10257_v47 = vpop.f32.mrb[35].mxu1 }
 0xc50   : > { %21030 = vmatpush1.bf16.msra.mxu1 %v24266_v20  ;;  %v10791_v20 = vld [vmem:[#allocation12 + $0xc8] sm:$0xff] }
 0xc51   : > { %19350 = vmatmul.mubr.msk.f32.gmra.mrb[206].mxu0 %vm6256_vm3, %v24442_v28  ;;  %21031 = vmatprep.subr.bf16.mxu1 %v25825_v34  ;;  %v24813_v16 = vpack.c.bf16 %v10791_v20, %v10790_v15  ;;  %v25856_v28 = vld [vmem:[#allocation22_spill] sm:$0xff] }
 0xc52   : > { %20858 = vmatpush3.bf16.msra.mxu0 %v24313_v2  ;;  %19352 = vmatprep.mubr.msk.f32.mxu0 %vm6256_vm3, %v24450_v42  ;;  %v25859_v42 = vld [vmem:[#allocation25_spill] sm:$0xff]  ;;  %v24871_v27 = vpop.f32.mrb[36].mxu1  ;;  %v25883_v15 = vld [vmem:[#allocation58_spill] sm:$0xff] }
 0xc53   : > { %20860 = vmatprep.subr.bf16.mxu0 %v24319_v0  ;;  %v10262_v44 = vpop.f32.mrb[37].mxu1 }
 0xc54   : > { %21033 = vmatpush1.bf16.msra.mxu1 %v24270_v19  ;;  %v25850_v19 = vld [vmem:[#allocation28_spill] sm:$0xff] }
 0xc55   : > { %19353 = vmatmul.mubr.msk.f32.gmra.mrb[208].mxu0 %vm6256_vm3, %v24447_v21  ;;  %21034 = vmatprep.subr.bf16.mxu1 %v25825_v34  ;;  %v25858_v21 = vld [vmem:[#allocation35_spill] sm:$0xff] }
 0xc56   : > { %20862 = vmatpush3.bf16.msra.mxu0 %v24319_v0  ;;  %19355 = vmatprep.mubr.msk.f32.mxu0 %vm6256_vm3, %v24455_v41  ;;  %v25861_v41 = vld [vmem:[#allocation37_spill] sm:$0xff]  ;;  %v24875_v13 = vpop.f32.mrb[38].mxu1 }
 0xc57   : > { %20864 = vmatprep.subr.bf16.mxu0 %v24325_v63  ;;  %v10267_v30 = vpop.f32.mrb[39].mxu1 }
 0xc58   : > { %21036 = vmatpush1.bf16.msra.mxu1 %v24274_v23  ;;  %v25851_v23 = vld [vmem:[#allocation31_spill] sm:$0xff] }
 0xc59   : > { %19356 = vmatmul.mubr.msk.f32.gmra.mrb[210].mxu0 %vm6256_vm3, %v24452_v53  ;;  %21037 = vmatprep.subr.bf16.mxu1 %v25825_v34  ;;  %v25860_v53 = vld [vmem:[#allocation36_spill] sm:$0xff]  ;;  %v10049_v30 = vld [vmem:[#allocation10 + $0x970] sm:$0xff] }
 0xc5a   : > { %20866 = vmatpush3.bf16.msra.mxu0 %v24325_v63  ;;  %19358 = vmatprep.mubr.msk.f32.mxu0 %vm6256_vm3, %v24460_v7  ;;  %v25862_v7 = vld [vmem:[#allocation24_spill] sm:$0xff]  ;;  %v24879_v32 = vpop.f32.mrb[40].mxu1 }
 0xc5b   : > { %20868 = vmatprep.subr.bf16.mxu0 %v24331_v48  ;;  %v10272_v26 = vpop.f32.mrb[41].mxu1 }
 0xc5c   : > { %21039 = vmatpush1.bf16.msra.mxu1 %v24278_v22  ;;  %v25852_v22 = vld [vmem:[#allocation26_spill] sm:$0xff] }
 0xc5d   : > { %19359 = vmatmul.mubr.msk.f32.gmra.mrb[212].mxu0 %vm6256_vm3, %v25846_v33  ;;  %21040 = vmatprep.subr.bf16.mxu1 %v25825_v34 }
 0xc5e   : > { %20870 = vmatpush3.bf16.msra.mxu0 %v24331_v48  ;;  %19361 = vmatprep.mubr.msk.f32.mxu0 %vm6256_vm3, %v25847_v46  ;;  %v24883_v10 = vpop.f32.mrb[42].mxu1 }
 0xc5f   : > { %20872 = vmatprep.subr.bf16.mxu0 %v25848_v8  ;;  %v10277_v12 = vpop.f32.mrb[43].mxu1 }
 0xc60   : > { %21042 = vmatpush1.bf16.msra.mxu1 %v25849_v35  ;;  %v10797_v12 = vld [vmem:[#allocation12 + $0xf8] sm:$0xff] }
 0xc61   : > { %19362 = vmatmul.mubr.msk.f32.gmra.mrb[214].mxu0 %vm6256_vm3, %v25850_v19  ;;  %21043 = vmatprep.subr.bf16.mxu1 %v25825_v34  ;;  %v25884_v19 = vld [vmem:[#allocation59_spill] sm:$0xff] }
 0xc62   : > { %20874 = vmatpush3.bf16.msra.mxu0 %v25848_v8  ;;  %19364 = vmatprep.mubr.msk.f32.mxu0 %vm6256_vm3, %v25851_v23  ;;  %v24887_v51 = vpop.f32.mrb[44].mxu1 }
 0xc63   : > { %20876 = vmatprep.subr.bf16.mxu0 %v25852_v22  ;;  %v10282_v56 = vpop.f32.mrb[45].mxu1 }
 0xc64   : > { %21045 = vmatpush1.bf16.msra.mxu1 %v25853_v50 }
 0xc65   : > { %19365 = vmatmul.mubr.msk.f32.gmra.mrb[216].mxu0 %vm6256_vm3, %v25854_v29  ;;  %21046 = vmatprep.subr.bf16.mxu1 %v25825_v34 }
 0xc66   : > { %20878 = vmatpush3.bf16.msra.mxu0 %v25852_v22  ;;  %19367 = vmatprep.mubr.msk.f32.mxu0 %vm6256_vm3, %v25855_v54  ;;  %v24891_v62 = vpop.f32.mrb[46].mxu1  ;;  %v25885_v54 = vld [vmem:[#allocation60_spill] sm:$0xff] }
 0xc67   : > { %20880 = vmatprep.subr.bf16.mxu0 %v24813_v16  ;;  %v10287_v33 = vpop.f32.mrb[47].mxu1 }
 0xc68   : > { %21048 = vmatpush1.bf16.msra.mxu1 %v25856_v28 }
 0xc69   : > { %19368 = vmatmul.mubr.msk.f32.gmra.mrb[218].mxu0 %vm6256_vm3, %v25857_v55  ;;  %21049 = vmatprep.subr.bf16.mxu1 %v25825_v34  ;;  %v25886_v55 = vld [vmem:[#allocation61_spill] sm:$0xff] }
 0xc6a   : > { %19370 = vmatprep.mubr.msk.f32.mxu0 %vm6256_vm3, %v25858_v21  ;;  %v24895_v46 = vpop.f32.mrb[48].mxu1 }
 0xc6b   : > { %v10292_v35 = vpop.f32.mrb[49].mxu1 }
 0xc6c   : > { %21051 = vmatpush1.bf16.msra.mxu1 %v25859_v42 }
 0xc6d   : > { %19371 = vmatmul.mubr.msk.f32.gmra.mrb[220].mxu0 %vm6256_vm3, %v25860_v53  ;;  %21052 = vmatprep.subr.bf16.mxu1 %v25825_v34 }
 0xc6e   : > { %19373 = vmatprep.mubr.msk.f32.mxu0 %vm6256_vm3, %v25861_v41  ;;  %v24899_v20 = vpop.f32.mrb[50].mxu1  ;;  %v25887_v41 = vld [vmem:[#allocation62_spill] sm:$0xff] }
 0xc6f   : > { %v10297_v23 = vpop.f32.mrb[51].mxu1 }
 0xc70   : > { %21054 = vmatpush1.bf16.msra.mxu1 %v25862_v7  ;;  %v10799_v23 = vld [vmem:[#allocation12 + $0x108] sm:$0xff] }
 0xc71   : > { %19374 = vmatmul.mubr.msk.f32.gmra.mrb[222].mxu0 %vm6256_vm3, %v25863_v11  ;;  %21111 = vmatprep.subr.bf16.mxu1 %v25825_v34  ;;  %v25888_v11 = vld [vmem:[#allocation63_spill] sm:$0xff] }
 0xc72   : > { %19376 = vmatprep.mubr.msk.f32.mxu0 %vm6256_vm3, %v25864_v38  ;;  %v24903_v50 = vpop.f32.mrb[52].mxu1 }
 0xc73   : > { %v10302_v29 = vpop.f32.mrb[53].mxu1 }
 0xc75   : > { %19377 = vmatmul.mubr.msk.f32.gmra.mrb[224].mxu0 %vm6256_vm3, %v25865_v40  ;;  %v10037_v40 = vld [vmem:[#allocation10 + $0x910] sm:$0xff] }
 0xc76   : > { %19379 = vmatprep.mubr.msk.f32.mxu0 %vm6256_vm3, %v25866_v18  ;;  %v24907_v28 = vpop.f32.mrb[54].mxu1 }
 0xc77   : > { %v10307_v21 = vpop.f32.mrb[55].mxu1 }
 0xc79   : > { %19380 = vmatmul.mubr.msk.f32.gmra.mrb[226].mxu0 %vm6256_vm3, %v25867_v25  ;;  %v10792_v25 = vld [vmem:[#allocation12 + $0xd0] sm:$0xff] }
 0xc7a   : > { %19382 = vmatprep.mubr.msk.f32.mxu0 %vm6256_vm3, %v25868_v45  ;;  %v24911_v42 = vpop.f32.mrb[56].mxu1  ;;  %v10793_v45 = vld [vmem:[#allocation12 + $0xd8] sm:$0xff] }
 0xc7b   : > { %v10312_v53 = vpop.f32.mrb[57].mxu1  ;;  %v20883_v58 = vpack.c.bf16 %v10793_v45, %v10792_v25  ;;  %v10064_v45 = vld [vmem:[#allocation10 + $0x9e8] sm:$0xff] }
 0xc7c   : > { %v10061_v53 = vld [vmem:[#allocation10 + $0x9d0] sm:$0xff] }
 0xc7d   : > { %19383 = vmatmul.mubr.msk.f32.gmra.mrb[228].mxu0 %vm6256_vm3, %v25869_v57 }
 0xc7e   : > { %19385 = vmatprep.mubr.msk.f32.mxu0 %vm6256_vm3, %v25870_v5  ;;  %v24915_v7 = vpop.f32.mrb[58].mxu1  ;;  %v25889_v5 = vld [vmem:[#allocation64_spill] sm:$0xff] }
 0xc7f   : > { %v10317_v38 = vpop.f32.mrb[59].mxu1 }
 0xc80   : > { %v10800_v38 = vld [vmem:[#allocation12 + $0x110] sm:$0xff] }
 0xc81   : > { %19386 = vmatmul.mubr.msk.f32.gmra.mrb[230].mxu0 %vm6256_vm3, %v25871_v3 }
 0xc82   : > { %19388 = vmatprep.mubr.msk.f32.mxu0 %vm6256_vm3, %v25872_v59  ;;  %v24919_v18 = vpop.f32.mrb[60].mxu1  ;;  %v10040_v59 = vld [vmem:[#allocation10 + $0x928] sm:$0xff] }
 0xc83   : > { %v10322_v57 = vpop.f32.mrb[61].mxu1 }
 0xc84   : > { %v10067_v57 = vld [vmem:[#allocation10 + $0xa00] sm:$0xff] }
 0xc85   : > { %19389 = vmatmul.mubr.msk.f32.gmra.mrb[232].mxu0 %vm6256_vm3, %v25873_v61 }
 0xc86   : > { %19391 = vmatprep.mubr.msk.f32.mxu0 %vm6256_vm3, %v25874_v6  ;;  %v24923_v3 = vpop.f32.mrb[62].mxu1  ;;  %v10043_v6 = vld [vmem:[#allocation10 + $0x940] sm:$0xff] }
 0xc87   : > { %v10327_v61 = vpop.f32.mrb[63].mxu1 }
 0xc88   : > { %v10073_v61 = vld [vmem:[#allocation10 + $0xa30] sm:$0xff] }
 0xc89   : > { %19392 = vmatmul.mubr.msk.f32.gmra.mrb[234].mxu0 %vm6256_vm3, %v25875_v24  ;;  %v10794_v24 = vld [vmem:[#allocation12 + $0xe0] sm:$0xff] }
 0xc8a   : > { %19394 = vmatprep.mubr.msk.f32.mxu0 %vm6256_vm3, %v25876_v17  ;;  %v24925_v39 = vpop.f32.mrb[64].mxu1  ;;  %v10795_v17 = vld [vmem:[#allocation12 + $0xe8] sm:$0xff] }
 0xc8b   : > { %v10332_v47 = vpop.f32.mrb[65].mxu1  ;;  %v20887_v26 = vpack.c.bf16 %v10795_v17, %v10794_v24  ;;  %v10082_v24 = vld [vmem:[#allocation10 + $0xa78] sm:$0xff]  ;;  %v10085_v17 = vld [vmem:[#allocation10 + $0xa90] sm:$0xff] }
 0xc8c   : > { %v10088_v47 = vld [vmem:[#allocation10 + $0xaa8] sm:$0xff] }
 0xc8d   : > { %19395 = vmatmul.mubr.msk.f32.gmra.mrb[236].mxu0 %vm6256_vm3, %v25877_v31  ;;  %v10046_v31 = vld [vmem:[#allocation10 + $0x958] sm:$0xff] }
 0xc8e   : > { %19397 = vmatprep.mubr.msk.f32.mxu0 %vm6256_vm3, %v25878_v43  ;;  %v24927_v44 = vpop.f32.mrb[66].mxu1 }
 0xc8f   : > { %v10337_v43 = vpop.f32.mrb[67].mxu1 }
 0xc90   : > { %v10094_v43 = vld [vmem:[#allocation10 + $0xad8] sm:$0xff] }
 0xc91   : > { %19398 = vmatmul.mubr.msk.f32.gmra.mrb[238].mxu0 %vm6256_vm3, %v25879_v60 }
 0xc92   : > { %19400 = vmatprep.mubr.msk.f32.mxu0 %vm6256_vm3, %v25880_v36  ;;  %v24930_v60 = vpop.f32.mrb[68].mxu1  ;;  %v10796_v36 = vld [vmem:[#allocation12 + $0xf0] sm:$0xff] }
 0xc93   : > { %v10342_v56 = vpop.f32.mrb[69].mxu1  ;;  %v20891_v35 = vpack.c.bf16 %v10797_v12, %v10796_v36  ;;  %v10103_v36 = vld [vmem:[#allocation10 + $0xb20] sm:$0xff]  ;;  %v10106_v12 = vld [vmem:[#allocation10 + $0xb38] sm:$0xff] }
 0xc94   : > { %v10109_v56 = vld [vmem:[#allocation10 + $0xb50] sm:$0xff] }
 0xc95   : > { %19401 = vmatmul.mubr.msk.f32.gmra.mrb[240].mxu0 %vm6256_vm3, %v25881_v4 }
 0xc96   : > { %19403 = vmatprep.mubr.msk.f32.mxu0 %vm6256_vm3, %v25882_v49  ;;  %v24932_v4 = vpop.f32.mrb[70].mxu1  ;;  %v10052_v49 = vld [vmem:[#allocation10 + $0x988] sm:$0xff] }
 0xc97   : > { %v10347_v33 = vpop.f32.mrb[71].mxu1 }
 0xc98   : > { %v10115_v33 = vld [vmem:[#allocation10 + $0xb80] sm:$0xff] }
 0xc99   : > { %19404 = vmatmul.mubr.msk.f32.gmra.mrb[242].mxu0 %vm6256_vm3, %v25883_v15 }
 0xc9a   : > { %19406 = vmatprep.mubr.msk.f32.mxu0 %vm6256_vm3, %v25884_v19  ;;  %v24934_v15 = vpop.f32.mrb[72].mxu1  ;;  %v10798_v19 = vld [vmem:[#allocation12 + $0x100] sm:$0xff] }
 0xc9b   : > { %v10352_v29 = vpop.f32.mrb[73].mxu1 }
 0xc9c   : > { %v10130_v29 = vld [vmem:[#allocation10 + $0xbf8] sm:$0xff] }
 0xc9d   : > { %19407 = vmatmul.mubr.msk.f32.gmra.mrb[244].mxu0 %vm6256_vm3, %v25885_v54 }
 0xc9e   : > { %19409 = vmatprep.mubr.msk.f32.mxu0 %vm6256_vm3, %v25886_v55  ;;  %v24936_v54 = vpop.f32.mrb[74].mxu1  ;;  %v10058_v55 = vld [vmem:[#allocation10 + $0x9b8] sm:$0xff] }
 0xc9f   : > { %v10357_v21 = vpop.f32.mrb[75].mxu1 }
 0xca0   : > { %v10136_v21 = vld [vmem:[#allocation10 + $0xc28] sm:$0xff] }
 0xca1   : > { %19410 = vmatmul.mubr.msk.f32.gmra.mrb[246].mxu0 %vm6256_vm3, %v25887_v41  ;;  %v20895_v41 = vpack.c.bf16 %v10799_v23, %v10798_v19  ;;  %v10124_v19 = vld [vmem:[#allocation10 + $0xbc8] sm:$0xff]  ;;  %v10127_v23 = vld [vmem:[#allocation10 + $0xbe0] sm:$0xff] }
 0xca2   : > { %19412 = vmatprep.mubr.msk.f32.mxu0 %vm6256_vm3, %v25888_v11  ;;  %v24938_v11 = vpop.f32.mrb[76].mxu1 }
 0xca3   : > { %v10362_v25 = vpop.f32.mrb[77].mxu1 }
 0xca4   : > { %v10151_v25 = vld [vmem:[#allocation10 + $0xca0] sm:$0xff] }
 0xca5   : > { %19413 = vmatmul.mubr.msk.f32.gmra.mrb[248].mxu0 %vm6256_vm3, %v25889_v5 }
 0xca6   : > { %19447 = vmatprep.mubr.f32.mxu0 %v10037_v40  ;;  %v10801_v40 = vld [vmem:[#allocation12 + $0x118] sm:$0xff] }
 0xca7   : > { %v20899_v5 = vpack.c.bf16 %v10801_v40, %v10800_v38  ;;  %v10145_v38 = vld [vmem:[#allocation10 + $0xc70] sm:$0xff]  ;;  %v10148_v40 = vld [vmem:[#allocation10 + $0xc88] sm:$0xff] }
 0xca9   : > { %19448 = vmatmul.mubr.f32.vlgmr.msra.gmra.mrb[250].mxu0 %v10040_v59  ;;  %v10070_v59 = vld [vmem:[#allocation10 + $0xa18] sm:$0xff] }
 0xcaa   : > { %20882 = vmatpush3.bf16.msra.mxu0 %v24813_v16  ;;  %19450 = vmatprep.mubr.f32.mxu0 %v10043_v6  ;;  %v10055_v16 = vld [vmem:[#allocation10 + $0x9a0] sm:$0xff]  ;;  %v10076_v6 = vld [vmem:[#allocation10 + $0xa48] sm:$0xff] }
 0xcab   : > { %20884 = vmatprep.subr.bf16.mxu0 %v20883_v58 }
 0xcad   : > { %19451 = vmatmul.mubr.f32.gmra.mrb[252].mxu0 %v10046_v31  ;;  %v10091_v31 = vld [vmem:[#allocation10 + $0xac0] sm:$0xff] }
 0xcae   : > { %20886 = vmatpush3.bf16.msra.mxu0 %v20883_v58  ;;  %19453 = vmatprep.mubr.f32.mxu0 %v10049_v30  ;;  %v10079_v58 = vld [vmem:[#allocation10 + $0xa60] sm:$0xff]  ;;  %v10097_v30 = vld [vmem:[#allocation10 + $0xaf0] sm:$0xff] }
 0xcaf   : > { %20888 = vmatprep.subr.bf16.mxu0 %v20887_v26 }
 0xcb1   : > { %19454 = vmatmul.mubr.f32.gmra.mrb[254].mxu0 %v10052_v49  ;;  %v10112_v49 = vld [vmem:[#allocation10 + $0xb68] sm:$0xff] }
 0xcb2   : > { %20890 = vmatpush3.bf16.msra.mxu0 %v20887_v26  ;;  %19456 = vmatprep.mubr.f32.mxu0 %v10055_v16  ;;  %v10100_v26 = vld [vmem:[#allocation10 + $0xb08] sm:$0xff]  ;;  %v10118_v16 = vld [vmem:[#allocation10 + $0xb98] sm:$0xff] }
 0xcb3   : > { %20892 = vmatprep.subr.bf16.mxu0 %v20891_v35 }
 0xcb5   : > { %19457 = vmatmul.mubr.f32.gmra.mrb[0].mxu0 %v10058_v55  ;;  %v10133_v55 = vld [vmem:[#allocation10 + $0xc10] sm:$0xff] }
 0xcb6   : > { %20894 = vmatpush3.bf16.msra.mxu0 %v20891_v35  ;;  %19459 = vmatprep.mubr.f32.mxu0 %v10061_v53  ;;  %v10121_v35 = vld [vmem:[#allocation10 + $0xbb0] sm:$0xff]  ;;  %v10139_v53 = vld [vmem:[#allocation10 + $0xc40] sm:$0xff] }
 0xcb7   : > { %20896 = vmatprep.subr.bf16.mxu0 %v20895_v41 }
 0xcb9   : > { %19460 = vmatmul.mubr.f32.gmra.mrb[2].mxu0 %v10064_v45  ;;  %v10154_v45 = vld [vmem:[#allocation10 + $0xcb8] sm:$0xff] }
 0xcba   : > { %20898 = vmatpush3.bf16.msra.mxu0 %v20895_v41  ;;  %19462 = vmatprep.mubr.f32.mxu0 %v10067_v57  ;;  %v10142_v41 = vld [vmem:[#allocation10 + $0xc58] sm:$0xff]  ;;  %v10157_v57 = vld [vmem:[#allocation10 + $0xcd0] sm:$0xff] }
 0xcbb   : > { %20900 = vmatprep.subr.bf16.mxu0 %v20899_v5 }
 0xcbd   : > { %19463 = vmatmul.mubr.f32.gmra.mrb[4].mxu0 %v10070_v59  ;;  %v10163_v59 = vld [vmem:[#allocation10 + $0xd00] sm:$0xff] }
 0xcbe   : > { %20902 = vmatpush3.bf16.msra.mxu0 %v20899_v5  ;;  %19465 = vmatprep.mubr.f32.mxu0 %v10073_v61  ;;  %v10160_v5 = vld [vmem:[#allocation10 + $0xce8] sm:$0xff]  ;;  %v10166_v61 = vld [vmem:[#allocation10 + $0xd18] sm:$0xff] }
 0xcbf   : > { %20952 = vmatprep.subr.bf16.mxu0 %v24301_v9 }
 0xcc1   : > { %19466 = vmatmul.mubr.f32.gmra.mrb[6].mxu0 %v10076_v6  ;;  %v10169_v6 = vld [vmem:[#allocation10 + $0xd30] sm:$0xff] }
 0xcc2   : > { %19468 = vmatprep.mubr.f32.mxu0 %v10079_v58  ;;  %v24941_v58 = vpop.f32.mrb[78].mxu1 }
 0xcc5   : > { %19469 = vmatmul.mubr.f32.gmra.mrb[8].mxu0 %v10082_v24  ;;  %v10172_v24 = vld [vmem:[#allocation10 + $0xd48] sm:$0xff] }
 0xcc6   : > { %19471 = vmatprep.mubr.f32.mxu0 %v10085_v17  ;;  %v10367_v17 = vpop.f32.mrb[79].mxu1 }
 0xcc9   : > { %19472 = vmatmul.mubr.f32.gmra.mrb[10].mxu0 %v10088_v47  ;;  %v10175_v47 = vld [vmem:[#allocation10 + $0xd60] sm:$0xff] }
 0xcca   : > { %19474 = vmatprep.mubr.f32.mxu0 %v10091_v31  ;;  %v24943_v31 = vpop.f32.mrb[80].mxu1 }
 0xccd   : > { %19475 = vmatmul.mubr.f32.gmra.mrb[12].mxu0 %v10094_v43  ;;  %v10178_v43 = vld [vmem:[#allocation10 + $0xd78] sm:$0xff] }
 0xcce   : > { %19477 = vmatprep.mubr.f32.mxu0 %v10097_v30  ;;  %v10372_v30 = vpop.f32.mrb[81].mxu1 }
 0xccf   : > { %v11325_v30 = vld [vmem:[#allocation10 + $0xe48] sm:$0xff] }
 0xcd1   : > { %19478 = vmatmul.mubr.f32.gmra.mrb[14].mxu0 %v10100_v26  ;;  %v11304_v26 = vld [vmem:[#allocation10 + $0xda0] sm:$0xff] }
 0xcd2   : > { %19480 = vmatprep.mubr.f32.mxu0 %v10103_v36  ;;  %11513 = vmatprep.mubr.f32.mxu1 %v11304_v26  ;;  %v24945_v36 = vpop.f32.mrb[82].mxu1 }
 0xcd5   : > { %19481 = vmatmul.mubr.f32.gmra.mrb[16].mxu0 %v10106_v12  ;;  %v11303_v12 = vld [vmem:[#allocation10 + $0xd98] sm:$0xff] }
 0xcd6   : > { %19483 = vmatprep.mubr.f32.mxu0 %v10109_v56  ;;  %11514 = vmatmul.mubr.f32.gmra.mrb[128].mxu1 %v11303_v12  ;;  %v10377_v56 = vpop.f32.mrb[83].mxu1  ;;  %v11324_v12 = vld [vmem:[#allocation10 + $0xe40] sm:$0xff] }
 0xcd9   : > { %19484 = vmatmul.mubr.f32.gmra.mrb[18].mxu0 %v10112_v49  ;;  %v11307_v49 = vld [vmem:[#allocation10 + $0xdb8] sm:$0xff] }
 0xcda   : > { %19486 = vmatprep.mubr.f32.mxu0 %v10115_v33  ;;  %11518 = vmatprep.mubr.f32.mxu1 %v11307_v49  ;;  %v24947_v33 = vpop.f32.mrb[84].mxu1  ;;  %v11328_v49 = vld [vmem:[#allocation10 + $0xe60] sm:$0xff] }
 0xcdd   : > { %19487 = vmatmul.mubr.f32.gmra.mrb[20].mxu0 %v10118_v16  ;;  %v11306_v16 = vld [vmem:[#allocation10 + $0xdb0] sm:$0xff] }
 0xcde   : > { %19489 = vmatprep.mubr.f32.mxu0 %v10121_v35  ;;  %11519 = vmatmul.mubr.f32.gmra.mrb[130].mxu1 %v11306_v16  ;;  %v10382_v35 = vpop.f32.mrb[85].mxu1 }
 0xcdf   : > { %v11327_v35 = vld [vmem:[#allocation10 + $0xe58] sm:$0xff] }
 0xce1   : > { %19490 = vmatmul.mubr.f32.gmra.mrb[22].mxu0 %v10124_v19  ;;  %v11310_v19 = vld [vmem:[#allocation10 + $0xdd0] sm:$0xff] }
 0xce2   : > { %19492 = vmatprep.mubr.f32.mxu0 %v10127_v23  ;;  %11523 = vmatprep.mubr.f32.mxu1 %v11310_v19  ;;  %v24949_v23 = vpop.f32.mrb[86].mxu1 }
 0xce5   : > { %19493 = vmatmul.mubr.f32.gmra.mrb[24].mxu0 %v10130_v29  ;;  %v11309_v29 = vld [vmem:[#allocation10 + $0xdc8] sm:$0xff] }
 0xce6   : > { %19495 = vmatprep.mubr.f32.mxu0 %v10133_v55  ;;  %11524 = vmatmul.mubr.f32.gmra.mrb[132].mxu1 %v11309_v29  ;;  %v10387_v55 = vpop.f32.mrb[87].mxu1  ;;  %v11331_v29 = vld [vmem:[#allocation10 + $0xe78] sm:$0xff] }
 0xce9   : > { %19496 = vmatmul.mubr.f32.gmra.mrb[26].mxu0 %v10136_v21  ;;  %v11313_v21 = vld [vmem:[#allocation10 + $0xde8] sm:$0xff] }
 0xcea   : > { %19498 = vmatprep.mubr.f32.mxu0 %v10139_v53  ;;  %11528 = vmatprep.mubr.f32.mxu1 %v11313_v21  ;;  %v24951_v53 = vpop.f32.mrb[88].mxu1  ;;  %v11330_v21 = vld [vmem:[#allocation10 + $0xe70] sm:$0xff] }
 0xced   : > { %19499 = vmatmul.mubr.f32.gmra.mrb[28].mxu0 %v10142_v41  ;;  %v11312_v41 = vld [vmem:[#allocation10 + $0xde0] sm:$0xff] }
 0xcee   : > { %19501 = vmatprep.mubr.f32.mxu0 %v10145_v38  ;;  %11529 = vmatmul.mubr.f32.gmra.mrb[134].mxu1 %v11312_v41  ;;  %v10392_v38 = vpop.f32.mrb[89].mxu1 }
 0xcef   : > { %v11334_v38 = vld [vmem:[#allocation10 + $0xe90] sm:$0xff] }
 0xcf1   : > { %19502 = vmatmul.mubr.f32.gmra.mrb[30].mxu0 %v10148_v40  ;;  %v11316_v40 = vld [vmem:[#allocation10 + $0xe00] sm:$0xff] }
 0xcf2   : > { %19504 = vmatprep.mubr.f32.mxu0 %v10151_v25  ;;  %11533 = vmatprep.mubr.f32.mxu1 %v11316_v40  ;;  %v24953_v25 = vpop.f32.mrb[90].mxu1 }
 0xcf5   : > { %19505 = vmatmul.mubr.f32.gmra.mrb[32].mxu0 %v10154_v45  ;;  %v11315_v45 = vld [vmem:[#allocation10 + $0xdf8] sm:$0xff] }
 0xcf6   : > { %19507 = vmatprep.mubr.f32.mxu0 %v10157_v57  ;;  %11534 = vmatmul.mubr.f32.gmra.mrb[136].mxu1 %v11315_v45  ;;  %v10397_v57 = vpop.f32.mrb[91].mxu1  ;;  %v11333_v45 = vld [vmem:[#allocation10 + $0xe88] sm:$0xff] }
 0xcf9   : > { %19508 = vmatmul.mubr.f32.gmra.mrb[34].mxu0 %v10160_v5  ;;  %v11319_v5 = vld [vmem:[#allocation10 + $0xe18] sm:$0xff] }
 0xcfa   : > { %19510 = vmatprep.mubr.f32.mxu0 %v10163_v59  ;;  %11538 = vmatprep.mubr.f32.mxu1 %v11319_v5  ;;  %v24955_v59 = vpop.f32.mrb[92].mxu1  ;;  %v11337_v5 = vld [vmem:[#allocation10 + $0xea8] sm:$0xff] }
 0xcfd   : > { %19511 = vmatmul.mubr.f32.gmra.mrb[36].mxu0 %v10166_v61  ;;  %v11318_v61 = vld [vmem:[#allocation10 + $0xe10] sm:$0xff] }
 0xcfe   : > { %19513 = vmatprep.mubr.f32.mxu0 %v10169_v6  ;;  %11539 = vmatmul.mubr.f32.gmra.mrb[138].mxu1 %v11318_v61  ;;  %v10402_v6 = vpop.f32.mrb[93].mxu1 }
 0xcff   : > { %v24957_v17 = vpop.f32.mrb[94].mxu1  ;;  %v11336_v6 = vld [vmem:[#allocation10 + $0xea0] sm:$0xff] }
 0xd01   : > { %19514 = vmatmul.mubr.f32.gmra.mrb[38].mxu0 %v10172_v24  ;;  %v11322_v24 = vld [vmem:[#allocation10 + $0xe30] sm:$0xff] }
 0xd02   : > { %19516 = vmatprep.mubr.f32.mxu0 %v10175_v47  ;;  %11543 = vmatprep.mubr.f32.mxu1 %v11322_v24  ;;  %v11321_v47 = vld [vmem:[#allocation10 + $0xe28] sm:$0xff] }
 0xd03   : > { %11544 = vmatmul.mubr.f32.gmra.mrb[140].mxu1 %v11321_v47  ;;  %v11340_v47 = vld [vmem:[#allocation10 + $0xec0] sm:$0xff] }
 0xd04   : > { %11548 = vmatprep.mubr.f32.mxu1 %v11325_v30  ;;  %v11339_v30 = vld [vmem:[#allocation10 + $0xeb8] sm:$0xff] }
 0xd05   : > { %19517 = vmatmul.mubr.f32.gmra.mrb[40].mxu0 %v10178_v43  ;;  %v10407_v43 = vpop.f32.mrb[95].mxu1 }
 0xd06   : > { %v24959_v26 = vpop.f32.mrb[96].mxu1 }
 0xd07   : > { %11549 = vmatmul.mubr.f32.gmra.mrb[142].mxu1 %v11324_v12  ;;  %v10412_v56 = vpop.f32.mrb[97].mxu1 }
 0xd08   : > { %11553 = vmatprep.mubr.f32.mxu1 %v11328_v49  ;;  %v24961_v16 = vpop.f32.mrb[98].mxu1  ;;  %v11343_v56 = vld [vmem:[#allocation10 + $0xed8] sm:$0xff] }
 0xd09   : > { %v10417_v19 = vpop.f32.mrb[99].mxu1 }
 0xd0a   : > { %v24963_v55 = vpop.f32.mrb[100].mxu1 }
 0xd0b   : > { %11554 = vmatmul.mubr.f32.gmra.mrb[144].mxu1 %v11327_v35  ;;  %v10422_v41 = vpop.f32.mrb[101].mxu1  ;;  %v11342_v35 = vld [vmem:[#allocation10 + $0xed0] sm:$0xff] }
 0xd0c   : > { %11558 = vmatprep.mubr.f32.mxu1 %v11331_v29  ;;  %v24965_v40 = vpop.f32.mrb[102].mxu1  ;;  %v11346_v29 = vld [vmem:[#allocation10 + $0xef0] sm:$0xff]  ;;  %v11345_v41 = vld [vmem:[#allocation10 + $0xee8] sm:$0xff] }
 0xd0d   : > { %v10427_v57 = vpop.f32.mrb[103].mxu1 }
 0xd0e   : > { %v24967_v61 = vpop.f32.mrb[104].mxu1 }
 0xd0f   : > { %11559 = vmatmul.mubr.f32.gmra.mrb[146].mxu1 %v11330_v21  ;;  %v10432_v24 = vpop.f32.mrb[105].mxu1 }
 0xd10   : > { %11563 = vmatprep.mubr.f32.mxu1 %v11334_v38  ;;  %v24969_v43 = vpop.f32.mrb[106].mxu1  ;;  %v11352_v24 = vld [vmem:[#allocation10 + $0xf20] sm:$0xff] }
 0xd11   : > { %v10437_v12 = vpop.f32.mrb[107].mxu1 }
 0xd12   : > { %v24971_v49 = vpop.f32.mrb[108].mxu1 }
 0xd13   : > { %11564 = vmatmul.mubr.f32.gmra.mrb[148].mxu1 %v11333_v45  ;;  %v10442_v19 = vpop.f32.mrb[109].mxu1  ;;  %v11349_v45 = vld [vmem:[#allocation10 + $0xf08] sm:$0xff] }
 0xd14   : > { %11568 = vmatprep.mubr.f32.mxu1 %v11337_v5  ;;  %v24973_v21 = vpop.f32.mrb[110].mxu1  ;;  %v11348_v5 = vld [vmem:[#allocation10 + $0xf00] sm:$0xff]  ;;  %v11354_v19 = vld [vmem:[#allocation10 + $0xf30] sm:$0xff] }
 0xd15   : > { %v10447_v38 = vpop.f32.mrb[111].mxu1 }
 0xd16   : > { %v24975_v57 = vpop.f32.mrb[112].mxu1 }
 0xd17   : > { %11569 = vmatmul.mubr.f32.gmra.mrb[150].mxu1 %v11336_v6  ;;  %v10452_v6 = vpop.f32.mrb[113].mxu1 }
 0xd18   : > { %11573 = vmatprep.mubr.f32.mxu1 %v11340_v47  ;;  %v24977_v47 = vpop.f32.mrb[114].mxu1  ;;  %v11361_v6 = vld [vmem:[#allocation10 + $0xf68] sm:$0xff] }
 0xd19   : > { %25890 = vst [vmem:[#allocation29_spill] sm:$0xff] %v24977_v47  ;;  %v10457_v12 = vpop.f32.mrb[115].mxu1 }
 0xd1b   : > { %11574 = vmatmul.mubr.f32.gmra.mrb[152].mxu1 %v11339_v30  ;;  %v11351_v30 = vld [vmem:[#allocation10 + $0xf18] sm:$0xff] }
 0xd1c   : > { %11578 = vmatprep.mubr.f32.mxu1 %v11343_v56  ;;  %v11355_v56 = vld [vmem:[#allocation10 + $0xf38] sm:$0xff] }
 0xd1f   : > { %11579 = vmatmul.mubr.f32.gmra.mrb[154].mxu1 %v11342_v35  ;;  %v24979_v35 = vpop.f32.mrb[116].mxu1 }
 0xd20   : > { %11583 = vmatprep.mubr.f32.mxu1 %v11346_v29  ;;  %v10462_v29 = vpop.f32.mrb[117].mxu1 }
 0xd21   : > { %v24981_v38 = vpop.f32.mrb[118].mxu1 }
 0xd22   : > { %25891 = vst [vmem:[#allocation30_spill] sm:$0xff] %v24981_v38  ;;  %v11367_v38 = vld [vmem:[#allocation10 + $0xf98] sm:$0xff] }
 0xd23   : > { %11584 = vmatmul.mubr.f32.gmra.mrb[156].mxu1 %v11345_v41  ;;  %v11358_v41 = vld [vmem:[#allocation10 + $0xf50] sm:$0xff] }
 0xd24   : > { %11588 = vmatprep.mubr.f32.mxu1 %v11349_v45  ;;  %v11357_v45 = vld [vmem:[#allocation10 + $0xf48] sm:$0xff] }
 0xd27   : > { %11589 = vmatmul.mubr.f32.gmra.mrb[158].mxu1 %v11348_v5  ;;  %v10467_v5 = vpop.f32.mrb[119].mxu1 }
 0xd28   : > { %11593 = vmatprep.mubr.f32.mxu1 %v11352_v24  ;;  %v24983_v24 = vpop.f32.mrb[120].mxu1  ;;  %v11370_v5 = vld [vmem:[#allocation10 + $0xfb0] sm:$0xff] }
 0xd29   : > { %25892 = vst [vmem:[#allocation27_spill] sm:$0xff] %v24983_v24  ;;  %v10472_v12 = vpop.f32.mrb[121].mxu1  ;;  %v11373_v24 = vld [vmem:[#allocation10 + $0xfc8] sm:$0xff] }
 0xd2a   : > { %v24985_v34 = vpop.f32.mrb[122].mxu1  ;;  %v11376_v12 = vld [vmem:[#allocation10 + $0xfe0] sm:$0xff] }
 0xd2b   : > { %11594 = vmatmul.mubr.f32.gmra.mrb[160].mxu1 %v11351_v30  ;;  %v11360_v30 = vld [vmem:[#allocation10 + $0xf60] sm:$0xff]  ;;  %25893 = vst [vmem:[#allocation21_spill] sm:$0xff] %v24985_v34  ;;  %v10477_v29 = vpop.f32.mrb[123].mxu1 }
 0xd2c   : > { %11598 = vmatprep.mubr.f32.mxu1 %v11355_v56  ;;  %v11364_v56 = vld [vmem:[#allocation10 + $0xf80] sm:$0xff]  ;;  %v11378_v29 = vld [vmem:[#allocation10 + $0xff0] sm:$0xff] }
 0xd2f   : > { %11599 = vmatmul.mubr.f32.gmra.mrb[162].mxu1 %v11354_v19  ;;  %v11363_v19 = vld [vmem:[#allocation10 + $0xf78] sm:$0xff] }
 0xd30   : > { %11603 = vmatprep.mubr.f32.mxu1 %v11358_v41  ;;  %v24987_v41 = vpop.f32.mrb[124].mxu1 }
 0xd31   : > { %v10482_v47 = vpop.f32.mrb[125].mxu1 }
 0xd32   : > { %v11382_v47 = vld [vmem:[#allocation10 + $0x1010] sm:$0xff] }
 0xd33   : > { %11604 = vmatmul.mubr.f32.gmra.mrb[164].mxu1 %v11357_v45  ;;  %v11366_v45 = vld [vmem:[#allocation10 + $0xf90] sm:$0xff] }
 0xd34   : > { %11608 = vmatprep.mubr.f32.mxu1 %v11361_v6  ;;  %v11369_v6 = vld [vmem:[#allocation10 + $0xfa8] sm:$0xff] }
 0xd37   : > { %11609 = vmatmul.mubr.f32.gmra.mrb[166].mxu1 %v11360_v30  ;;  %v11372_v30 = vld [vmem:[#allocation10 + $0xfc0] sm:$0xff] }
 0xd38   : > { %11613 = vmatprep.mubr.f32.mxu1 %v11364_v56  ;;  %v11375_v56 = vld [vmem:[#allocation10 + $0xfd8] sm:$0xff] }
 0xd3b   : > { %11614 = vmatmul.mubr.f32.gmra.mrb[168].mxu1 %v11363_v19  ;;  %v11379_v19 = vld [vmem:[#allocation10 + $0xff8] sm:$0xff] }
 0xd3c   : > { %11618 = vmatprep.mubr.f32.mxu1 %v11367_v38  ;;  %v11381_v38 = vld [vmem:[#allocation10 + $0x1008] sm:$0xff] }
 0xd3f   : > { %11619 = vmatmul.mubr.f32.gmra.mrb[170].mxu1 %v11366_v45  ;;  %v11385_v45 = vld [vmem:[#allocation10 + $0x1028] sm:$0xff] }
 0xd40   : > { %11623 = vmatprep.mubr.f32.mxu1 %v11370_v5  ;;  %v11384_v5 = vld [vmem:[#allocation10 + $0x1020] sm:$0xff] }
 0xd43   : > { %11624 = vmatmul.mubr.f32.gmra.mrb[172].mxu1 %v11369_v6  ;;  %v11388_v6 = vld [vmem:[#allocation10 + $0x1040] sm:$0xff] }
 0xd44   : > { %11628 = vmatprep.mubr.f32.mxu1 %v11373_v24  ;;  %v11387_v24 = vld [vmem:[#allocation10 + $0x1038] sm:$0xff] }
 0xd47   : > { %11629 = vmatmul.mubr.f32.gmra.mrb[174].mxu1 %v11372_v30  ;;  %v11391_v30 = vld [vmem:[#allocation10 + $0x1058] sm:$0xff] }
 0xd48   : > { %11633 = vmatprep.mubr.f32.mxu1 %v11376_v12  ;;  %v11390_v12 = vld [vmem:[#allocation10 + $0x1050] sm:$0xff] }
 0xd4b   : > { %11634 = vmatmul.mubr.f32.gmra.mrb[176].mxu1 %v11375_v56  ;;  %v11394_v56 = vld [vmem:[#allocation10 + $0x1070] sm:$0xff] }
 0xd4c   : > { %11638 = vmatprep.mubr.f32.mxu1 %v11379_v19  ;;  %v11393_v19 = vld [vmem:[#allocation10 + $0x1068] sm:$0xff] }
 0xd4f   : > { %11639 = vmatmul.mubr.f32.gmra.mrb[178].mxu1 %v11378_v29 }
 0xd50   : > { %11643 = vmatprep.mubr.f32.mxu1 %v11382_v47 }
 0xd53   : > { %11644 = vmatmul.mubr.f32.gmra.mrb[180].mxu1 %v11381_v38  ;;  %v11397_v38 = vld [vmem:[#allocation10 + $0x1088] sm:$0xff] }
 0xd54   : > { %11648 = vmatprep.mubr.f32.mxu1 %v11385_v45 }
 0xd57   : > { %11649 = vmatmul.mubr.f32.gmra.mrb[182].mxu1 %v11384_v5  ;;  %v11396_v5 = vld [vmem:[#allocation10 + $0x1080] sm:$0xff] }
 0xd58   : > { %11653 = vmatprep.mubr.f32.mxu1 %v11388_v6 }
 0xd5b   : > { %11654 = vmatmul.mubr.f32.gmra.mrb[184].mxu1 %v11387_v24 }
 0xd5c   : > { %11658 = vmatprep.mubr.f32.mxu1 %v11391_v30 }
 0xd5f   : > { %11659 = vmatmul.mubr.f32.gmra.mrb[186].mxu1 %v11390_v12  ;;  %v11400_v12 = vld [vmem:[#allocation10 + $0x10a0] sm:$0xff] }
 0xd60   : > { %11663 = vmatprep.mubr.f32.mxu1 %v11394_v56 }
 0xd63   : > { %11664 = vmatmul.mubr.f32.gmra.mrb[188].mxu1 %v11393_v19 }
 0xd64   : > { %11668 = vmatprep.mubr.f32.mxu1 %v11397_v38 }
 0xd67   : > { %11669 = vmatmul.mubr.f32.gmra.mrb[190].mxu1 %v11396_v5 }
 0xd68   : > { %11673 = vmatprep.mubr.f32.mxu1 %v11400_v12 }
 0xd7c   : > { %v19449_v29 = vpop.f32.mrb[250].mxu0 }
 0xd7d   : > { %v10556_v47 = vadd.f32 %v19449_v29, %v24863_v1  ;;  %v10550_v34 = vpop.f32.mrb[251].mxu0 }
 0xd7e   : > { %v10551_v45 = vadd.f32 %v10550_v34, %v24859_v37  ;;  %v11399_v34 = vld [vmem:[#allocation10 + $0x1098] sm:$0xff] }
 0xd7f   : > { %11674 = vmatmul.mubr.f32.gmra.mrb[192].mxu1 %v11399_v34 }
 0xd80   : > { %v19452_v6 = vpop.f32.mrb[252].mxu0  ;;  %19543 = vmatprep.mubr.msk.f32.mxu0 %vm6256_vm3, %v10551_v45 }
 0xd81   : > { %v10566_v24 = vadd.f32 %v19452_v6, %v24871_v27  ;;  %v10560_v30 = vpop.f32.mrb[253].mxu0  ;;  %19544 = vmatmul.mubr.msk.f32.vlgmr.msra.gmra.mrb[202].mxu0 %vm6256_vm3, %v10556_v47  ;;  %v11403_v27 = vld [vmem:[#allocation10 + $0x10b8] sm:$0xff] }
 0xd82   : > { %v10561_v56 = vadd.f32 %v10560_v30, %v24867_v52  ;;  %20954 = vmatpush3.bf16.msra.mxu0 %v24301_v9  ;;  %11678 = vmatprep.mubr.f32.mxu1 %v11403_v27  ;;  %v11402_v52 = vld [vmem:[#allocation10 + $0x10b0] sm:$0xff] }
 0xd83   : > { %20956 = vmatprep.subr.bf16.mxu0 %v24307_v14  ;;  %11679 = vmatmul.mubr.f32.gmra.mrb[194].mxu1 %v11402_v52 }
 0xd84   : > { %v19455_v37 = vpop.f32.mrb[254].mxu0  ;;  %19546 = vmatprep.mubr.msk.f32.mxu0 %vm6256_vm3, %v10561_v56 }
 0xd85   : > { %v10576_v1 = vadd.f32 %v19455_v37, %v24879_v32  ;;  %v10570_v19 = vpop.f32.mrb[255].mxu0  ;;  %19547 = vmatmul.mubr.msk.f32.gmra.mrb[204].mxu0 %vm6256_vm3, %v10566_v24  ;;  %v11406_v32 = vld [vmem:[#allocation10 + $0x10d0] sm:$0xff] }
 0xd86   : > { %v10571_v29 = vadd.f32 %v10570_v19, %v24875_v13  ;;  %20958 = vmatpush3.bf16.msra.mxu0 %v24307_v14  ;;  %11683 = vmatprep.mubr.f32.mxu1 %v11406_v32  ;;  %v11405_v13 = vld [vmem:[#allocation10 + $0x10c8] sm:$0xff] }
 0xd87   : > { %20960 = vmatprep.subr.bf16.mxu0 %v24313_v2  ;;  %11684 = vmatmul.mubr.f32.gmra.mrb[196].mxu1 %v11405_v13 }
 0xd88   : > { %v19458_v47 = vpop.f32.mrb[0].mxu0  ;;  %19549 = vmatprep.mubr.msk.f32.mxu0 %vm6256_vm3, %v10571_v29 }
 0xd89   : > { %v10586_v38 = vadd.f32 %v19458_v47, %v24887_v51  ;;  %v10580_v45 = vpop.f32.mrb[1].mxu0  ;;  %19550 = vmatmul.mubr.msk.f32.gmra.mrb[206].mxu0 %vm6256_vm3, %v10576_v1  ;;  %v11409_v51 = vld [vmem:[#allocation10 + $0x10e8] sm:$0xff] }
 0xd8a   : > { %v10581_v5 = vadd.f32 %v10580_v45, %v24883_v10  ;;  %20962 = vmatpush3.bf16.msra.mxu0 %v24313_v2  ;;  %11688 = vmatprep.mubr.f32.mxu1 %v11409_v51  ;;  %v11408_v10 = vld [vmem:[#allocation10 + $0x10e0] sm:$0xff]  ;;  %v12056_v45 = vld [vmem:[#allocation12 + $0x128] sm:$0xff] }
 0xd8b   : > { %20964 = vmatprep.subr.bf16.mxu0 %v24319_v0  ;;  %11689 = vmatmul.mubr.f32.gmra.mrb[198].mxu1 %v11408_v10  ;;  %v11421_v51 = vld [vmem:[#allocation10 + $0x1148] sm:$0xff] }
 0xd8c   : > { %v19461_v6 = vpop.f32.mrb[2].mxu0  ;;  %19552 = vmatprep.mubr.msk.f32.mxu0 %vm6256_vm3, %v10581_v5  ;;  %v11418_v5 = vld [vmem:[#allocation10 + $0x1130] sm:$0xff] }
 0xd8d   : > { %v10596_v24 = vadd.f32 %v19461_v6, %v24895_v46  ;;  %v10590_v30 = vpop.f32.mrb[3].mxu0  ;;  %19553 = vmatmul.mubr.msk.f32.gmra.mrb[208].mxu0 %vm6256_vm3, %v10586_v38  ;;  %v11412_v46 = vld [vmem:[#allocation10 + $0x1100] sm:$0xff]  ;;  %v11417_v6 = vld [vmem:[#allocation10 + $0x1128] sm:$0xff] }
 0xd8e   : > { %v10591_v12 = vadd.f32 %v10590_v30, %v24891_v62  ;;  %20966 = vmatpush3.bf16.msra.mxu0 %v24319_v0  ;;  %11693 = vmatprep.mubr.f32.mxu1 %v11412_v46  ;;  %v11411_v62 = vld [vmem:[#allocation10 + $0x10f8] sm:$0xff]  ;;  %v12055_v38 = vld [vmem:[#allocation12 + $0x120] sm:$0xff] }
 0xd8f   : > { %20968 = vmatprep.subr.bf16.mxu0 %v24325_v63  ;;  %11694 = vmatmul.mubr.f32.gmra.mrb[200].mxu1 %v11411_v62  ;;  %v25033_v13 = vpack.c.bf16 %v12056_v45, %v12055_v38  ;;  %v11433_v45 = vld [vmem:[#allocation10 + $0x11a8] sm:$0xff] }
 0xd90   : > { %v19464_v56 = vpop.f32.mrb[4].mxu0  ;;  %19555 = vmatprep.mubr.msk.f32.mxu0 %vm6256_vm3, %v10591_v12  ;;  %v11420_v12 = vld [vmem:[#allocation10 + $0x1140] sm:$0xff] }
 0xd91   : > { %v10606_v34 = vadd.f32 %v19464_v56, %v24903_v50  ;;  %v10600_v37 = vpop.f32.mrb[5].mxu0  ;;  %19556 = vmatmul.mubr.msk.f32.gmra.mrb[210].mxu0 %vm6256_vm3, %v10596_v24  ;;  %v11415_v50 = vld [vmem:[#allocation10 + $0x1118] sm:$0xff] }
 0xd92   : > { %v10601_v1 = vadd.f32 %v10600_v37, %v24899_v20  ;;  %20970 = vmatpush3.bf16.msra.mxu0 %v24325_v63  ;;  %11698 = vmatprep.mubr.f32.mxu1 %v11415_v50  ;;  %v11414_v20 = vld [vmem:[#allocation10 + $0x1110] sm:$0xff] }
 0xd93   : > { %20972 = vmatprep.subr.bf16.mxu0 %v24331_v48  ;;  %11699 = vmatmul.mubr.f32.gmra.mrb[202].mxu1 %v11414_v20  ;;  %v11429_v20 = vld [vmem:[#allocation10 + $0x1188] sm:$0xff] }
 0xd94   : > { %v19467_v19 = vpop.f32.mrb[6].mxu0  ;;  %19558 = vmatprep.mubr.msk.f32.mxu0 %vm6256_vm3, %v10601_v1  ;;  %11703 = vmatprep.mubr.f32.mxu1 %v11418_v5 }
 0xd95   : > { %v10616_v27 = vadd.f32 %v19467_v19, %v24911_v42  ;;  %v10610_v29 = vpop.f32.mrb[7].mxu0  ;;  %19559 = vmatmul.mubr.msk.f32.gmra.mrb[212].mxu0 %vm6256_vm3, %v10606_v34  ;;  %v11427_v19 = vld [vmem:[#allocation10 + $0x1178] sm:$0xff] }
 0xd96   : > { %v10611_v52 = vadd.f32 %v10610_v29, %v24907_v28  ;;  %20974 = vmatpush3.bf16.msra.mxu0 %v24331_v48 }
 0xd97   : > { %20976 = vmatprep.subr.bf16.mxu0 %v25848_v8  ;;  %11704 = vmatmul.mubr.f32.gmra.mrb[204].mxu1 %v11417_v6  ;;  %v11435_v6 = vld [vmem:[#allocation10 + $0x11b8] sm:$0xff] }
 0xd98   : > { %v19470_v47 = vpop.f32.mrb[8].mxu0  ;;  %19561 = vmatprep.mubr.msk.f32.mxu0 %vm6256_vm3, %v10611_v52  ;;  %11708 = vmatprep.mubr.f32.mxu1 %v11421_v51  ;;  %v11430_v52 = vld [vmem:[#allocation10 + $0x1190] sm:$0xff] }
 0xd99   : > { %v10626_v42 = vadd.f32 %v19470_v47, %v24919_v18  ;;  %v10620_v32 = vpop.f32.mrb[9].mxu0  ;;  %19562 = vmatmul.mubr.msk.f32.gmra.mrb[214].mxu0 %vm6256_vm3, %v10616_v27  ;;  %v11426_v27 = vld [vmem:[#allocation10 + $0x1170] sm:$0xff] }
 0xd9a   : > { %v10621_v28 = vadd.f32 %v10620_v32, %v24915_v7  ;;  %20978 = vmatpush3.bf16.msra.mxu0 %v25848_v8  ;;  %v11438_v51 = vld [vmem:[#allocation10 + $0x11d0] sm:$0xff] }
 0xd9b   : > { %20980 = vmatprep.subr.bf16.mxu0 %v25852_v22  ;;  %11709 = vmatmul.mubr.f32.gmra.mrb[206].mxu1 %v11420_v12 }
 0xd9c   : > { %v19473_v24 = vpop.f32.mrb[10].mxu0  ;;  %19564 = vmatprep.mubr.msk.f32.mxu0 %vm6256_vm3, %v10621_v28  ;;  %v11436_v28 = vld [vmem:[#allocation10 + $0x11c0] sm:$0xff] }
 0xd9d   : > { %v10636_v18 = vadd.f32 %v19473_v24, %v24925_v39  ;;  %v10630_v30 = vpop.f32.mrb[11].mxu0  ;;  %19565 = vmatmul.mubr.msk.f32.gmra.mrb[216].mxu0 %vm6256_vm3, %v10626_v42  ;;  %v11424_v39 = vld [vmem:[#allocation10 + $0x1160] sm:$0xff] }
 0xd9e   : > { %v10631_v7 = vadd.f32 %v10630_v30, %v24923_v3  ;;  %20982 = vmatpush3.bf16.msra.mxu0 %v25852_v22  ;;  %11713 = vmatprep.mubr.f32.mxu1 %v11424_v39  ;;  %v11423_v3 = vld [vmem:[#allocation10 + $0x1158] sm:$0xff]  ;;  %v11432_v42 = vld [vmem:[#allocation10 + $0x11a0] sm:$0xff] }
 0xd9f   : > { %20984 = vmatprep.subr.bf16.mxu0 %v25033_v13  ;;  %11714 = vmatmul.mubr.f32.gmra.mrb[208].mxu1 %v11423_v3  ;;  %v11439_v30 = vld [vmem:[#allocation10 + $0x11d8] sm:$0xff] }
 0xda0   : > { %v19476_v10 = vpop.f32.mrb[12].mxu0  ;;  %19567 = vmatprep.mubr.msk.f32.mxu0 %vm6256_vm3, %v10631_v7  ;;  %11718 = vmatprep.mubr.f32.mxu1 %v11427_v19 }
 0xda1   : > { %v10646_v56 = vadd.f32 %v19476_v10, %v24930_v60  ;;  %v10640_v34 = vpop.f32.mrb[13].mxu0  ;;  %19568 = vmatmul.mubr.msk.f32.gmra.mrb[218].mxu0 %vm6256_vm3, %v10636_v18  ;;  %v11442_v10 = vld [vmem:[#allocation10 + $0x11f0] sm:$0xff] }
 0xda2   : > { %v10641_v37 = vadd.f32 %v10640_v34, %v24927_v44 }
 0xda3   : > { %11719 = vmatmul.mubr.f32.gmra.mrb[210].mxu1 %v11426_v27 }
 0xda4   : > { %v19479_v46 = vpop.f32.mrb[14].mxu0  ;;  %19570 = vmatprep.mubr.msk.f32.mxu0 %vm6256_vm3, %v10641_v37  ;;  %11723 = vmatprep.mubr.f32.mxu1 %v11430_v52  ;;  %v25072_v37 = vpop.f32.mrb[126].mxu1 }
 0xda5   : > { %v10656_v1 = vadd.f32 %v19479_v46, %v24934_v15  ;;  %v10650_v62 = vpop.f32.mrb[15].mxu0  ;;  %19571 = vmatmul.mubr.msk.f32.gmra.mrb[220].mxu0 %vm6256_vm3, %v10646_v56  ;;  %v11441_v56 = vld [vmem:[#allocation10 + $0x11e8] sm:$0xff]  ;;  %v11512_v3 = vpop.f32.mrb[127].mxu1 }
 0xda6   : > { %v10651_v60 = vadd.f32 %v10650_v62, %v24932_v4 }
 0xda7   : > { %11724 = vmatmul.mubr.f32.gmra.mrb[212].mxu1 %v11429_v20  ;;  %v25894_v20 = vld [vmem:[#allocation29_spill] sm:$0xff] }
 0xda8   : > { %v19482_v29 = vpop.f32.mrb[16].mxu0  ;;  %19573 = vmatprep.mubr.msk.f32.mxu0 %vm6256_vm3, %v10651_v60  ;;  %11728 = vmatprep.mubr.f32.mxu1 %v11433_v45  ;;  %v25896_v45 = vld [vmem:[#allocation30_spill] sm:$0xff] }
 0xda9   : > { %v10666_v44 = vadd.f32 %v19482_v29, %v24938_v11  ;;  %v10660_v50 = vpop.f32.mrb[17].mxu0  ;;  %19574 = vmatmul.mubr.msk.f32.gmra.mrb[222].mxu0 %vm6256_vm3, %v10656_v1 }
 0xdaa   : > { %v10661_v15 = vadd.f32 %v10660_v50, %v24936_v54 }
 0xdab   : > { %11729 = vmatmul.mubr.f32.gmra.mrb[214].mxu1 %v11432_v42 }
 0xdac   : > { %v19485_v47 = vpop.f32.mrb[18].mxu0  ;;  %19576 = vmatprep.mubr.msk.f32.mxu0 %vm6256_vm3, %v10661_v15  ;;  %11733 = vmatprep.mubr.f32.mxu1 %v11436_v28 }
 0xdad   : > { %v10676_v4 = vadd.f32 %v19485_v47, %v24943_v31  ;;  %v10670_v38 = vpop.f32.mrb[19].mxu0  ;;  %19577 = vmatmul.mubr.msk.f32.gmra.mrb[224].mxu0 %vm6256_vm3, %v10666_v44 }
 0xdae   : > { %v10671_v11 = vadd.f32 %v10670_v38, %v24941_v58 }
 0xdaf   : > { %11734 = vmatmul.mubr.f32.gmra.mrb[216].mxu1 %v11435_v6  ;;  %v12057_v6 = vld [vmem:[#allocation12 + $0x130] sm:$0xff] }
 0xdb0   : > { %v19488_v32 = vpop.f32.mrb[20].mxu0  ;;  %19579 = vmatprep.mubr.msk.f32.mxu0 %vm6256_vm3, %v10671_v11  ;;  %11738 = vmatprep.mubr.f32.mxu1 %v11439_v30  ;;  %v11308_v30 = vld [vmem:[#allocation10 + $0xdc0] sm:$0xff] }
 0xdb1   : > { %v10686_v54 = vadd.f32 %v19488_v32, %v24947_v33  ;;  %v10680_v5 = vpop.f32.mrb[21].mxu0  ;;  %19580 = vmatmul.mubr.msk.f32.gmra.mrb[226].mxu0 %vm6256_vm3, %v10676_v4  ;;  %v25895_v4 = vld [vmem:[#allocation27_spill] sm:$0xff]  ;;  %v25102_v32 = vpop.f32.mrb[128].mxu1 }
 0xdb2   : > { %v10681_v31 = vadd.f32 %v10680_v5, %v24945_v36  ;;  %v11517_v28 = vpop.f32.mrb[129].mxu1 }
 0xdb3   : > { %11739 = vmatmul.mubr.f32.gmra.mrb[218].mxu1 %v11438_v51  ;;  %v12059_v51 = vld [vmem:[#allocation12 + $0x140] sm:$0xff]  ;;  %v11359_v28 = vld [vmem:[#allocation10 + $0xf58] sm:$0xff] }
 0xdb4   : > { %v19491_v24 = vpop.f32.mrb[22].mxu0  ;;  %19582 = vmatprep.mubr.msk.f32.mxu0 %vm6256_vm3, %v10681_v31  ;;  %11743 = vmatprep.mubr.f32.mxu1 %v11442_v10  ;;  %v11302_v31 = vld [vmem:[#allocation10 + $0xd90] sm:$0xff] }
 0xdb5   : > { %v10696_v58 = vadd.f32 %v19491_v24, %v24951_v53  ;;  %v10690_v18 = vpop.f32.mrb[23].mxu0  ;;  %19583 = vmatmul.mubr.msk.f32.gmra.mrb[228].mxu0 %vm6256_vm3, %v10686_v54  ;;  %v25897_v54 = vld [vmem:[#allocation21_spill] sm:$0xff]  ;;  %v12058_v24 = vld [vmem:[#allocation12 + $0x138] sm:$0xff] }
 0xdb6   : > { %v10691_v33 = vadd.f32 %v10690_v18, %v24949_v23  ;;  %v11305_v18 = vld [vmem:[#allocation10 + $0xda8] sm:$0xff] }
 0xdb7   : > { %11744 = vmatmul.mubr.f32.gmra.mrb[220].mxu1 %v11441_v56 }
 0xdb8   : > { %v19494_v7 = vpop.f32.mrb[24].mxu0  ;;  %19585 = vmatprep.mubr.msk.f32.mxu0 %vm6256_vm3, %v10691_v33  ;;  %v20987_v33 = vpack.c.bf16 %v12058_v24, %v12057_v6  ;;  %v11362_v6 = vld [vmem:[#allocation10 + $0xf70] sm:$0xff] }
 0xdb9   : > { %v10706_v36 = vadd.f32 %v19494_v7, %v24955_v59  ;;  %v10700_v12 = vpop.f32.mrb[25].mxu0  ;;  %19586 = vmatmul.mubr.msk.f32.gmra.mrb[230].mxu0 %vm6256_vm3, %v10696_v58  ;;  %v25107_v58 = vpop.f32.mrb[130].mxu1  ;;  %v12060_v7 = vld [vmem:[#allocation12 + $0x148] sm:$0xff] }
 0xdba   : > { %v10701_v53 = vadd.f32 %v10700_v12, %v24953_v25  ;;  %v11311_v12 = vld [vmem:[#allocation10 + $0xdd8] sm:$0xff]  ;;  %v20991_v56 = vpack.c.bf16 %v12060_v7, %v12059_v51 }
 0xdbb   : > { %v11371_v51 = vld [vmem:[#allocation10 + $0xfb8] sm:$0xff] }
 0xdbc   : > { %v19497_v34 = vpop.f32.mrb[26].mxu0  ;;  %19588 = vmatprep.mubr.msk.f32.mxu0 %vm6256_vm3, %v10701_v53  ;;  %v11314_v53 = vld [vmem:[#allocation10 + $0xdf0] sm:$0xff] }
 0xdbd   : > { %v10716_v23 = vadd.f32 %v19497_v34, %v24959_v26  ;;  %v10710_v39 = vpop.f32.mrb[27].mxu0  ;;  %19589 = vmatmul.mubr.msk.f32.gmra.mrb[232].mxu0 %vm6256_vm3, %v10706_v36  ;;  %v12061_v34 = vld [vmem:[#allocation12 + $0x150] sm:$0xff] }
 0xdbe   : > { %v10711_v59 = vadd.f32 %v10710_v39, %v24957_v17 }
 0xdc0   : > { %v19500_v46 = vpop.f32.mrb[28].mxu0  ;;  %19591 = vmatprep.mubr.msk.f32.mxu0 %vm6256_vm3, %v10711_v59  ;;  %v11317_v59 = vld [vmem:[#allocation10 + $0xe08] sm:$0xff] }
 0xdc1   : > { %v10726_v25 = vadd.f32 %v19500_v46, %v24963_v55  ;;  %v10720_v1 = vpop.f32.mrb[29].mxu0  ;;  %19592 = vmatmul.mubr.msk.f32.gmra.mrb[234].mxu0 %vm6256_vm3, %v10716_v23  ;;  %v12062_v23 = vld [vmem:[#allocation12 + $0x158] sm:$0xff]  ;;  %v11320_v46 = vld [vmem:[#allocation10 + $0xe20] sm:$0xff] }
 0xdc2   : > { %v10721_v62 = vadd.f32 %v10720_v1, %v24961_v16  ;;  %v12063_v1 = vld [vmem:[#allocation12 + $0x160] sm:$0xff] }
 0xdc4   : > { %v19503_v26 = vpop.f32.mrb[30].mxu0  ;;  %19594 = vmatprep.mubr.msk.f32.mxu0 %vm6256_vm3, %v10721_v62 }
 0xdc5   : > { %v10736_v19 = vadd.f32 %v19503_v26, %v24967_v61  ;;  %v10730_v60 = vpop.f32.mrb[31].mxu0  ;;  %19595 = vmatmul.mubr.msk.f32.gmra.mrb[236].mxu0 %vm6256_vm3, %v10726_v25  ;;  %v20995_v25 = vpack.c.bf16 %v12062_v23, %v12061_v34  ;;  %v11323_v26 = vld [vmem:[#allocation10 + $0xe38] sm:$0xff]  ;;  %v11380_v34 = vld [vmem:[#allocation10 + $0x1000] sm:$0xff] }
 0xdc6   : > { %v10731_v17 = vadd.f32 %v10730_v60, %v24965_v40  ;;  %v11326_v60 = vld [vmem:[#allocation10 + $0xe50] sm:$0xff] }
 0xdc8   : > { %v19506_v27 = vpop.f32.mrb[32].mxu0  ;;  %19597 = vmatprep.mubr.msk.f32.mxu0 %vm6256_vm3, %v10731_v17 }
 0xdc9   : > { %v10746_v55 = vadd.f32 %v19506_v27, %v24971_v49  ;;  %v10740_v29 = vpop.f32.mrb[33].mxu0  ;;  %19598 = vmatmul.mubr.msk.f32.gmra.mrb[238].mxu0 %vm6256_vm3, %v10736_v19  ;;  %v12065_v27 = vld [vmem:[#allocation12 + $0x170] sm:$0xff] }
 0xdca   : > { %v10741_v16 = vadd.f32 %v10740_v29, %v24969_v43 }
 0xdcc   : > { %v19509_v44 = vpop.f32.mrb[34].mxu0  ;;  %19600 = vmatprep.mubr.msk.f32.mxu0 %vm6256_vm3, %v10741_v16  ;;  %v11329_v16 = vld [vmem:[#allocation10 + $0xe68] sm:$0xff] }
 0xdcd   : > { %v10756_v61 = vadd.f32 %v19509_v44, %v24975_v57  ;;  %v10750_v50 = vpop.f32.mrb[35].mxu0  ;;  %19601 = vmatmul.mubr.msk.f32.gmra.mrb[240].mxu0 %vm6256_vm3, %v10746_v55  ;;  %v12066_v55 = vld [vmem:[#allocation12 + $0x178] sm:$0xff] }
 0xdce   : > { %v10751_v40 = vadd.f32 %v10750_v50, %v24973_v21  ;;  %v21003_v50 = vpack.c.bf16 %v12066_v55, %v12065_v27  ;;  %v11398_v27 = vld [vmem:[#allocation10 + $0x1090] sm:$0xff] }
 0xdd0   : > { %v19512_v52 = vpop.f32.mrb[36].mxu0  ;;  %19603 = vmatprep.mubr.msk.f32.mxu0 %vm6256_vm3, %v10751_v40 }
 0xdd1   : > { %v10766_v49 = vadd.f32 %v19512_v52, %v24979_v35  ;;  %v10760_v15 = vpop.f32.mrb[37].mxu0  ;;  %19604 = vmatmul.mubr.msk.f32.gmra.mrb[242].mxu0 %vm6256_vm3, %v10756_v61  ;;  %v11332_v61 = vld [vmem:[#allocation10 + $0xe80] sm:$0xff]  ;;  %v11335_v52 = vld [vmem:[#allocation10 + $0xe98] sm:$0xff] }
 0xdd2   : > { %v10761_v43 = vadd.f32 %v10760_v15, %v25894_v20  ;;  %v11338_v15 = vld [vmem:[#allocation10 + $0xeb0] sm:$0xff] }
 0xdd4   : > { %v19515_v47 = vpop.f32.mrb[38].mxu0  ;;  %19606 = vmatprep.mubr.msk.f32.mxu0 %vm6256_vm3, %v10761_v43  ;;  %v11341_v43 = vld [vmem:[#allocation10 + $0xec8] sm:$0xff] }
 0xdd5   : > { %v10776_v57 = vadd.f32 %v19515_v47, %v25895_v4  ;;  %v10770_v38 = vpop.f32.mrb[39].mxu0  ;;  %19607 = vmatmul.mubr.msk.f32.gmra.mrb[244].mxu0 %vm6256_vm3, %v10766_v49  ;;  %v11344_v4 = vld [vmem:[#allocation10 + $0xee0] sm:$0xff] }
 0xdd6   : > { %v10771_v21 = vadd.f32 %v10770_v38, %v25896_v45  ;;  %v11347_v38 = vld [vmem:[#allocation10 + $0xef8] sm:$0xff] }
 0xdd8   : > { %v19518_v11 = vpop.f32.mrb[40].mxu0  ;;  %19609 = vmatprep.mubr.msk.f32.mxu0 %vm6256_vm3, %v10771_v21  ;;  %v11350_v21 = vld [vmem:[#allocation10 + $0xf10] sm:$0xff] }
 0xdd9   : > { %v10786_v35 = vadd.f32 %v19518_v11, %v24987_v41  ;;  %v10780_v42 = vpop.f32.mrb[41].mxu0  ;;  %19610 = vmatmul.mubr.msk.f32.gmra.mrb[246].mxu0 %vm6256_vm3, %v10776_v57  ;;  %v11522_v41 = vpop.f32.mrb[131].mxu1 }
 0xdda   : > { %v10781_v5 = vadd.f32 %v10780_v42, %v25897_v54  ;;  %v25109_v36 = vpop.f32.mrb[132].mxu1  ;;  %v11356_v54 = vld [vmem:[#allocation10 + $0xf40] sm:$0xff] }
 0xddb   : > { %v11527_v10 = vpop.f32.mrb[133].mxu1 }
 0xddc   : > { %19612 = vmatprep.mubr.msk.f32.mxu0 %vm6256_vm3, %v10781_v5  ;;  %v25112_v39 = vpop.f32.mrb[134].mxu1 }
 0xddd   : > { %19613 = vmatmul.mubr.msk.f32.gmra.mrb[248].mxu0 %vm6256_vm3, %v10786_v35  ;;  %v11532_v3 = vpop.f32.mrb[135].mxu1  ;;  %v11353_v35 = vld [vmem:[#allocation10 + $0xf28] sm:$0xff] }
 0xdde   : > { %19647 = vmatprep.mubr.f32.mxu0 %v11302_v31  ;;  %v25114_v62 = vpop.f32.mrb[136].mxu1 }
 0xddf   : > { %v11537_v19 = vpop.f32.mrb[137].mxu1 }
 0xde0   : > { %v25116_v29 = vpop.f32.mrb[138].mxu1 }
 0xde1   : > { %19648 = vmatmul.mubr.f32.vlgmr.msra.gmra.mrb[42].mxu0 %v11305_v18  ;;  %v11542_v44 = vpop.f32.mrb[139].mxu1  ;;  %v11365_v18 = vld [vmem:[#allocation10 + $0xf88] sm:$0xff] }
 0xde2   : > { %20986 = vmatpush3.bf16.msra.mxu0 %v25033_v13  ;;  %19650 = vmatprep.mubr.f32.mxu0 %v11308_v30  ;;  %v12064_v13 = vld [vmem:[#allocation12 + $0x168] sm:$0xff]  ;;  %v25118_v40 = vpop.f32.mrb[140].mxu1  ;;  %v11368_v30 = vld [vmem:[#allocation10 + $0xfa0] sm:$0xff] }
 0xde3   : > { %20988 = vmatprep.subr.bf16.mxu0 %v20987_v33  ;;  %v20999_v17 = vpack.c.bf16 %v12064_v13, %v12063_v1  ;;  %v11547_v49 = vpop.f32.mrb[141].mxu1  ;;  %v11389_v1 = vld [vmem:[#allocation10 + $0x1048] sm:$0xff] }
 0xde4   : > { %v25120_v20 = vpop.f32.mrb[142].mxu1 }
 0xde5   : > { %19651 = vmatmul.mubr.f32.gmra.mrb[44].mxu0 %v11311_v12  ;;  %v11552_v47 = vpop.f32.mrb[143].mxu1  ;;  %v11374_v12 = vld [vmem:[#allocation10 + $0xfd0] sm:$0xff] }
 0xde6   : > { %20990 = vmatpush3.bf16.msra.mxu0 %v20987_v33  ;;  %19653 = vmatprep.mubr.f32.mxu0 %v11314_v53  ;;  %v25123_v57 = vpop.f32.mrb[144].mxu1  ;;  %v11377_v53 = vld [vmem:[#allocation10 + $0xfe8] sm:$0xff] }
 0xde7   : > { %20992 = vmatprep.subr.bf16.mxu0 %v20991_v56  ;;  %v11557_v45 = vpop.f32.mrb[145].mxu1  ;;  %v11413_v47 = vld [vmem:[#allocation10 + $0x1108] sm:$0xff] }
 0xde8   : > { %v25125_v11 = vpop.f32.mrb[146].mxu1 }
 0xde9   : > { %19654 = vmatmul.mubr.f32.gmra.mrb[46].mxu0 %v11317_v59  ;;  %v11562_v42 = vpop.f32.mrb[147].mxu1  ;;  %v11383_v59 = vld [vmem:[#allocation10 + $0x1018] sm:$0xff] }
 0xdea   : > { %20994 = vmatpush3.bf16.msra.mxu0 %v20991_v56  ;;  %19656 = vmatprep.mubr.f32.mxu0 %v11320_v46  ;;  %v25127_v5 = vpop.f32.mrb[148].mxu1  ;;  %v11386_v46 = vld [vmem:[#allocation10 + $0x1030] sm:$0xff] }
 0xdeb   : > { %20996 = vmatprep.subr.bf16.mxu0 %v20995_v25  ;;  %v11567_v31 = vpop.f32.mrb[149].mxu1  ;;  %v11422_v42 = vld [vmem:[#allocation10 + $0x1150] sm:$0xff] }
 0xdec   : > { %v25129_v24 = vpop.f32.mrb[150].mxu1 }
 0xded   : > { %19657 = vmatmul.mubr.f32.gmra.mrb[48].mxu0 %v11323_v26  ;;  %v11572_v41 = vpop.f32.mrb[151].mxu1  ;;  %v11392_v26 = vld [vmem:[#allocation10 + $0x1060] sm:$0xff] }
 0xdee   : > { %20998 = vmatpush3.bf16.msra.mxu0 %v20995_v25  ;;  %19659 = vmatprep.mubr.f32.mxu0 %v11326_v60  ;;  %v25131_v33 = vpop.f32.mrb[152].mxu1  ;;  %v11395_v60 = vld [vmem:[#allocation10 + $0x1078] sm:$0xff] }
 0xdef   : > { %21000 = vmatprep.subr.bf16.mxu0 %v20999_v17  ;;  %v11577_v7 = vpop.f32.mrb[153].mxu1  ;;  %v11431_v41 = vld [vmem:[#allocation10 + $0x1198] sm:$0xff] }
 0xdf1   : > { %19660 = vmatmul.mubr.f32.gmra.mrb[50].mxu0 %v11329_v16  ;;  %v11401_v16 = vld [vmem:[#allocation10 + $0x10a8] sm:$0xff] }
 0xdf2   : > { %21002 = vmatpush3.bf16.msra.mxu0 %v20999_v17  ;;  %19662 = vmatprep.mubr.f32.mxu0 %v11332_v61  ;;  %v25133_v10 = vpop.f32.mrb[154].mxu1  ;;  %v11404_v61 = vld [vmem:[#allocation10 + $0x10c0] sm:$0xff] }
 0xdf3   : > { %21004 = vmatprep.subr.bf16.mxu0 %v21003_v50  ;;  %v11582_v56 = vpop.f32.mrb[155].mxu1 }
 0xdf4   : > { %v11440_v56 = vld [vmem:[#allocation10 + $0x11e0] sm:$0xff] }
 0xdf5   : > { %19663 = vmatmul.mubr.f32.gmra.mrb[52].mxu0 %v11335_v52  ;;  %v11407_v52 = vld [vmem:[#allocation10 + $0x10d8] sm:$0xff] }
 0xdf6   : > { %21006 = vmatpush3.bf16.msra.mxu0 %v21003_v50  ;;  %19665 = vmatprep.mubr.f32.mxu0 %v11338_v15  ;;  %v25135_v23 = vpop.f32.mrb[156].mxu1  ;;  %v11410_v15 = vld [vmem:[#allocation10 + $0x10f0] sm:$0xff] }
 0xdf7   : > { %21056 = vmatprep.subr.bf16.mxu0 %v24301_v9  ;;  %v11587_v3 = vpop.f32.mrb[157].mxu1 }
 0xdf9   : > { %19666 = vmatmul.mubr.f32.gmra.mrb[54].mxu0 %v11341_v43 }
 0xdfa   : > { %19668 = vmatprep.mubr.f32.mxu0 %v11344_v4  ;;  %v25137_v25 = vpop.f32.mrb[158].mxu1 }
 0xdfb   : > { %v11592_v13 = vpop.f32.mrb[159].mxu1 }
 0xdfd   : > { %19669 = vmatmul.mubr.f32.gmra.mrb[56].mxu0 %v11347_v38  ;;  %v11416_v38 = vld [vmem:[#allocation10 + $0x1120] sm:$0xff] }
 0xdfe   : > { %19671 = vmatprep.mubr.f32.mxu0 %v11350_v21  ;;  %v25139_v19 = vpop.f32.mrb[160].mxu1  ;;  %v11419_v21 = vld [vmem:[#allocation10 + $0x1138] sm:$0xff] }
 0xdff   : > { %v11597_v17 = vpop.f32.mrb[161].mxu1 }
 0xe00   : > { %v12568_v17 = vld [vmem:[#allocation10 + $0x1218] sm:$0xff] }
 0xe01   : > { %19672 = vmatmul.mubr.f32.gmra.mrb[58].mxu0 %v11353_v35 }
 0xe02   : > { %19674 = vmatprep.mubr.f32.mxu0 %v11356_v54  ;;  %v25141_v55 = vpop.f32.mrb[162].mxu1 }
 0xe03   : > { %v11602_v44 = vpop.f32.mrb[163].mxu1 }
 0xe04   : > { %v12572_v44 = vld [vmem:[#allocation10 + $0x1238] sm:$0xff] }
 0xe05   : > { %19675 = vmatmul.mubr.f32.gmra.mrb[60].mxu0 %v11359_v28  ;;  %v11425_v28 = vld [vmem:[#allocation10 + $0x1168] sm:$0xff] }
 0xe06   : > { %19677 = vmatprep.mubr.f32.mxu0 %v11362_v6  ;;  %v25143_v50 = vpop.f32.mrb[164].mxu1  ;;  %v11428_v6 = vld [vmem:[#allocation10 + $0x1180] sm:$0xff] }
 0xe07   : > { %v11607_v49 = vpop.f32.mrb[165].mxu1 }
 0xe09   : > { %19678 = vmatmul.mubr.f32.gmra.mrb[62].mxu0 %v11365_v18 }
 0xe0a   : > { %19680 = vmatprep.mubr.f32.mxu0 %v11368_v30  ;;  %v25145_v43 = vpop.f32.mrb[166].mxu1 }
 0xe0b   : > { %v11612_v4 = vpop.f32.mrb[167].mxu1 }
 0xe0d   : > { %19681 = vmatmul.mubr.f32.gmra.mrb[64].mxu0 %v11371_v51  ;;  %v11434_v51 = vld [vmem:[#allocation10 + $0x11b0] sm:$0xff] }
 0xe0e   : > { %19683 = vmatprep.mubr.f32.mxu0 %v11374_v12  ;;  %v25147_v45 = vpop.f32.mrb[168].mxu1  ;;  %v11437_v12 = vld [vmem:[#allocation10 + $0x11c8] sm:$0xff] }
 0xe0f   : > { %v11617_v35 = vpop.f32.mrb[169].mxu1 }
 0xe10   : > { %v12577_v35 = vld [vmem:[#allocation10 + $0x1260] sm:$0xff] }
 0xe11   : > { %19684 = vmatmul.mubr.f32.gmra.mrb[66].mxu0 %v11377_v53 }
 0xe12   : > { %19686 = vmatprep.mubr.f32.mxu0 %v11380_v34  ;;  %v25149_v54 = vpop.f32.mrb[170].mxu1 }
 0xe13   : > { %v11622_v31 = vpop.f32.mrb[171].mxu1 }
 0xe14   : > { %v12581_v31 = vld [vmem:[#allocation10 + $0x1280] sm:$0xff] }
 0xe15   : > { %19687 = vmatmul.mubr.f32.gmra.mrb[68].mxu0 %v11383_v59  ;;  %v11443_v59 = vld [vmem:[#allocation10 + $0x11f8] sm:$0xff] }
 0xe16   : > { %19689 = vmatprep.mubr.f32.mxu0 %v11386_v46  ;;  %v25151_v18 = vpop.f32.mrb[172].mxu1  ;;  %v12566_v46 = vld [vmem:[#allocation10 + $0x1208] sm:$0xff] }
 0xe17   : > { %v11627_v30 = vpop.f32.mrb[173].mxu1  ;;  %12773 = vmatprep.mubr.f32.mxu1 %v12566_v46 }
 0xe19   : > { %19690 = vmatmul.mubr.f32.gmra.mrb[70].mxu0 %v11389_v1  ;;  %v12565_v1 = vld [vmem:[#allocation10 + $0x1200] sm:$0xff] }
 0xe1a   : > { %19692 = vmatprep.mubr.f32.mxu0 %v11392_v26  ;;  %v25153_v7 = vpop.f32.mrb[174].mxu1  ;;  %12774 = vmatmul.mubr.f32.vlgmr.msra.gmra.mrb[222].mxu1 %v12565_v1 }
 0xe1b   : > { %v11632_v53 = vpop.f32.mrb[175].mxu1 }
 0xe1d   : > { %19693 = vmatmul.mubr.f32.gmra.mrb[72].mxu0 %v11395_v60  ;;  %v12569_v60 = vld [vmem:[#allocation10 + $0x1220] sm:$0xff] }
 0xe1e   : > { %19695 = vmatprep.mubr.f32.mxu0 %v11398_v27  ;;  %v25155_v34 = vpop.f32.mrb[176].mxu1  ;;  %12778 = vmatprep.mubr.f32.mxu1 %v12569_v60  ;;  %v12589_v60 = vld [vmem:[#allocation10 + $0x12c0] sm:$0xff] }
 0xe1f   : > { %v11637_v3 = vpop.f32.mrb[177].mxu1  ;;  %12779 = vmatmul.mubr.f32.gmra.mrb[224].mxu1 %v12568_v17 }
 0xe20   : > { %12783 = vmatprep.mubr.f32.mxu1 %v12572_v44  ;;  %v12586_v3 = vld [vmem:[#allocation10 + $0x12a8] sm:$0xff]  ;;  %v12593_v44 = vld [vmem:[#allocation10 + $0x12e0] sm:$0xff] }
 0xe21   : > { %19696 = vmatmul.mubr.f32.gmra.mrb[74].mxu0 %v11401_v16 }
 0xe22   : > { %19698 = vmatprep.mubr.f32.mxu0 %v11404_v61  ;;  %v25157_v13 = vpop.f32.mrb[178].mxu1  ;;  %v12571_v61 = vld [vmem:[#allocation10 + $0x1230] sm:$0xff] }
 0xe23   : > { %v11642_v26 = vpop.f32.mrb[179].mxu1  ;;  %12784 = vmatmul.mubr.f32.gmra.mrb[226].mxu1 %v12571_v61  ;;  %v12592_v61 = vld [vmem:[#allocation10 + $0x12d8] sm:$0xff] }
 0xe24   : > { %v12590_v26 = vld [vmem:[#allocation10 + $0x12c8] sm:$0xff] }
 0xe25   : > { %19699 = vmatmul.mubr.f32.gmra.mrb[76].mxu0 %v11407_v52 }
 0xe26   : > { %19701 = vmatprep.mubr.f32.mxu0 %v11410_v15  ;;  %v25159_v27 = vpop.f32.mrb[180].mxu1  ;;  %v12575_v15 = vld [vmem:[#allocation10 + $0x1250] sm:$0xff] }
 0xe27   : > { %v11647_v16 = vpop.f32.mrb[181].mxu1  ;;  %12788 = vmatprep.mubr.f32.mxu1 %v12575_v15 }
 0xe29   : > { %19702 = vmatmul.mubr.f32.gmra.mrb[78].mxu0 %v11413_v47  ;;  %v12574_v47 = vld [vmem:[#allocation10 + $0x1248] sm:$0xff] }
 0xe2a   : > { %19704 = vmatprep.mubr.f32.mxu0 %v11416_v38  ;;  %v25161_v52 = vpop.f32.mrb[182].mxu1  ;;  %12789 = vmatmul.mubr.f32.gmra.mrb[228].mxu1 %v12574_v47  ;;  %v12596_v47 = vld [vmem:[#allocation10 + $0x12f8] sm:$0xff] }
 0xe2b   : > { %v11652_v49 = vpop.f32.mrb[183].mxu1 }
 0xe2d   : > { %19705 = vmatmul.mubr.f32.gmra.mrb[80].mxu0 %v11419_v21  ;;  %v12578_v21 = vld [vmem:[#allocation10 + $0x1268] sm:$0xff] }
 0xe2e   : > { %19707 = vmatprep.mubr.f32.mxu0 %v11422_v42  ;;  %v25163_v4 = vpop.f32.mrb[184].mxu1  ;;  %12793 = vmatprep.mubr.f32.mxu1 %v12578_v21 }
 0xe2f   : > { %v11657_v38 = vpop.f32.mrb[185].mxu1  ;;  %12794 = vmatmul.mubr.f32.gmra.mrb[230].mxu1 %v12577_v35 }
 0xe30   : > { %12798 = vmatprep.mubr.f32.mxu1 %v12581_v31  ;;  %v12595_v38 = vld [vmem:[#allocation10 + $0x12f0] sm:$0xff]  ;;  %v12598_v31 = vld [vmem:[#allocation10 + $0x1308] sm:$0xff] }
 0xe31   : > { %19708 = vmatmul.mubr.f32.gmra.mrb[82].mxu0 %v11425_v28 }
 0xe32   : > { %19710 = vmatprep.mubr.f32.mxu0 %v11428_v6  ;;  %v25165_v42 = vpop.f32.mrb[186].mxu1  ;;  %v12580_v6 = vld [vmem:[#allocation10 + $0x1278] sm:$0xff] }
 0xe33   : > { %v11662_v28 = vpop.f32.mrb[187].mxu1  ;;  %12799 = vmatmul.mubr.f32.gmra.mrb[232].mxu1 %v12580_v6 }
 0xe34   : > { %v12599_v28 = vld [vmem:[#allocation10 + $0x1310] sm:$0xff] }
 0xe35   : > { %19711 = vmatmul.mubr.f32.gmra.mrb[84].mxu0 %v11431_v41 }
 0xe36   : > { %19713 = vmatprep.mubr.f32.mxu0 %v11434_v51  ;;  %v25167_v41 = vpop.f32.mrb[188].mxu1  ;;  %v12584_v51 = vld [vmem:[#allocation10 + $0x1298] sm:$0xff] }
 0xe37   : > { %v11667_v30 = vpop.f32.mrb[189].mxu1  ;;  %12803 = vmatprep.mubr.f32.mxu1 %v12584_v51  ;;  %v12602_v51 = vld [vmem:[#allocation10 + $0x1328] sm:$0xff] }
 0xe39   : > { %19714 = vmatmul.mubr.f32.gmra.mrb[86].mxu0 %v11437_v12  ;;  %v12583_v12 = vld [vmem:[#allocation10 + $0x1290] sm:$0xff] }
 0xe3a   : > { %19716 = vmatprep.mubr.f32.mxu0 %v11440_v56  ;;  %12804 = vmatmul.mubr.f32.gmra.mrb[234].mxu1 %v12583_v12  ;;  %v25169_v53 = vpop.f32.mrb[190].mxu1  ;;  %v12601_v12 = vld [vmem:[#allocation10 + $0x1320] sm:$0xff] }
 0xe3b   : > { %v11672_v56 = vpop.f32.mrb[191].mxu1 }
 0xe3d   : > { %19717 = vmatmul.mubr.f32.gmra.mrb[88].mxu0 %v11443_v59  ;;  %v12587_v59 = vld [vmem:[#allocation10 + $0x12b0] sm:$0xff] }
 0xe3e   : > { %12808 = vmatprep.mubr.f32.mxu1 %v12587_v59 }
 0xe3f   : > { %12809 = vmatmul.mubr.f32.gmra.mrb[236].mxu1 %v12586_v3  ;;  %v12605_v3 = vld [vmem:[#allocation10 + $0x1340] sm:$0xff] }
 0xe40   : > { %12813 = vmatprep.mubr.f32.mxu1 %v12590_v26 }
 0xe43   : > { %12814 = vmatmul.mubr.f32.gmra.mrb[238].mxu1 %v12589_v60 }
 0xe44   : > { %12818 = vmatprep.mubr.f32.mxu1 %v12593_v44  ;;  %v12607_v44 = vld [vmem:[#allocation10 + $0x1350] sm:$0xff] }
 0xe47   : > { %12819 = vmatmul.mubr.f32.gmra.mrb[240].mxu1 %v12592_v61 }
 0xe48   : > { %12823 = vmatprep.mubr.f32.mxu1 %v12596_v47  ;;  %v12611_v47 = vld [vmem:[#allocation10 + $0x1370] sm:$0xff] }
 0xe4b   : > { %12824 = vmatmul.mubr.f32.gmra.mrb[242].mxu1 %v12595_v38  ;;  %v12610_v38 = vld [vmem:[#allocation10 + $0x1368] sm:$0xff] }
 0xe4c   : > { %12828 = vmatprep.mubr.f32.mxu1 %v12599_v28 }
 0xe4f   : > { %12829 = vmatmul.mubr.f32.gmra.mrb[244].mxu1 %v12598_v31  ;;  %v12614_v31 = vld [vmem:[#allocation10 + $0x1388] sm:$0xff] }
 0xe50   : > { %12833 = vmatprep.mubr.f32.mxu1 %v12602_v51 }
 0xe52   : > { %v25171_v46 = vpop.f32.mrb[192].mxu1 }
 0xe53   : > { %v11677_v1 = vpop.f32.mrb[193].mxu1  ;;  %12834 = vmatmul.mubr.f32.gmra.mrb[246].mxu1 %v12601_v12 }
 0xe54   : > { %v12604_v1 = vld [vmem:[#allocation10 + $0x1338] sm:$0xff]  ;;  %12838 = vmatprep.mubr.f32.mxu1 %v12605_v3 }
 0xe55   : > { %v12616_v3 = vld [vmem:[#allocation10 + $0x1398] sm:$0xff] }
 0xe56   : > { %v25173_v17 = vpop.f32.mrb[194].mxu1 }
 0xe57   : > { %v11682_v16 = vpop.f32.mrb[195].mxu1  ;;  %12839 = vmatmul.mubr.f32.gmra.mrb[248].mxu1 %v12604_v1 }
 0xe58   : > { %v12608_v16 = vld [vmem:[#allocation10 + $0x1358] sm:$0xff] }
 0xe59   : > { %12843 = vmatprep.mubr.f32.mxu1 %v12608_v16  ;;  %v12620_v16 = vld [vmem:[#allocation10 + $0x13b8] sm:$0xff] }
 0xe5a   : > { %v25175_v49 = vpop.f32.mrb[196].mxu1 }
 0xe5b   : > { %v11687_v15 = vpop.f32.mrb[197].mxu1  ;;  %12844 = vmatmul.mubr.f32.gmra.mrb[250].mxu1 %v12607_v44  ;;  %v12619_v44 = vld [vmem:[#allocation10 + $0x13b0] sm:$0xff] }
 0xe5c   : > { %12848 = vmatprep.mubr.f32.mxu1 %v12611_v47 }
 0xe5e   : > { %v25177_v21 = vpop.f32.mrb[198].mxu1 }
 0xe5f   : > { %v11692_v35 = vpop.f32.mrb[199].mxu1  ;;  %12849 = vmatmul.mubr.f32.gmra.mrb[252].mxu1 %v12610_v38  ;;  %v12623_v38 = vld [vmem:[#allocation10 + $0x13d0] sm:$0xff] }
 0xe60   : > { %12853 = vmatprep.mubr.f32.mxu1 %v12614_v31 }
 0xe62   : > { %v25179_v6 = vpop.f32.mrb[200].mxu1 }
 0xe63   : > { %v11697_v30 = vpop.f32.mrb[201].mxu1 }
 0xe64   : > { %v12613_v30 = vld [vmem:[#allocation10 + $0x1380] sm:$0xff] }
 0xe65   : > { %12854 = vmatmul.mubr.f32.gmra.mrb[254].mxu1 %v12613_v30 }
 0xe66   : > { %v25181_v56 = vpop.f32.mrb[202].mxu1 }
 0xe67   : > { %v11702_v59 = vpop.f32.mrb[203].mxu1 }
 0xe68   : > { %v12617_v59 = vld [vmem:[#allocation10 + $0x13a0] sm:$0xff] }
 0xe69   : > { %12858 = vmatprep.mubr.f32.mxu1 %v12617_v59  ;;  %v12625_v59 = vld [vmem:[#allocation10 + $0x13e0] sm:$0xff] }
 0xe6a   : > { %v25183_v26 = vpop.f32.mrb[204].mxu1  ;;  %12859 = vmatmul.mubr.f32.gmra.mrb[0].mxu1 %v12616_v3 }
 0xe6b   : > { %v11707_v60 = vpop.f32.mrb[205].mxu1  ;;  %12863 = vmatprep.mubr.f32.mxu1 %v12620_v16  ;;  %v12628_v16 = vld [vmem:[#allocation10 + $0x13f8] sm:$0xff] }
 0xe6e   : > { %v25185_v61 = vpop.f32.mrb[206].mxu1  ;;  %12864 = vmatmul.mubr.f32.gmra.mrb[2].mxu1 %v12619_v44 }
 0xe6f   : > { %v11712_v15 = vpop.f32.mrb[207].mxu1  ;;  %12868 = vmatprep.mubr.f32.mxu1 %v12623_v38  ;;  %v12631_v38 = vld [vmem:[#allocation10 + $0x1410] sm:$0xff] }
 0xe72   : > { %v25187_v35 = vpop.f32.mrb[208].mxu1 }
 0xe73   : > { %v11717_v28 = vpop.f32.mrb[209].mxu1 }
 0xe74   : > { %v12622_v28 = vld [vmem:[#allocation10 + $0x13c8] sm:$0xff] }
 0xe75   : > { %12869 = vmatmul.mubr.f32.gmra.mrb[4].mxu1 %v12622_v28  ;;  %v12635_v28 = vld [vmem:[#allocation10 + $0x1430] sm:$0xff] }
 0xe76   : > { %v25189_v51 = vpop.f32.mrb[210].mxu1 }
 0xe77   : > { %25898 = vst [vmem:[#allocation28_spill] sm:$0xff] %v25189_v51  ;;  %v11722_v12 = vpop.f32.mrb[211].mxu1  ;;  %v12629_v51 = vld [vmem:[#allocation10 + $0x1400] sm:$0xff] }
 0xe78   : > { %v12626_v12 = vld [vmem:[#allocation10 + $0x13e8] sm:$0xff] }
 0xe79   : > { %12873 = vmatprep.mubr.f32.mxu1 %v12626_v12  ;;  %v12638_v12 = vld [vmem:[#allocation10 + $0x1448] sm:$0xff] }
 0xe7a   : > { %v25191_v1 = vpop.f32.mrb[212].mxu1  ;;  %12874 = vmatmul.mubr.f32.gmra.mrb[6].mxu1 %v12625_v59  ;;  %v12637_v59 = vld [vmem:[#allocation10 + $0x1440] sm:$0xff] }
 0xe7b   : > { %v11727_v60 = vpop.f32.mrb[213].mxu1  ;;  %12878 = vmatprep.mubr.f32.mxu1 %v12629_v51  ;;  %v12644_v51 = vld [vmem:[#allocation10 + $0x1478] sm:$0xff] }
 0xe7e   : > { %v25193_v15 = vpop.f32.mrb[214].mxu1  ;;  %12879 = vmatmul.mubr.f32.gmra.mrb[8].mxu1 %v12628_v16  ;;  %v12643_v16 = vld [vmem:[#allocation10 + $0x1470] sm:$0xff] }
 0xe7f   : > { %25899 = vst [vmem:[#allocation31_spill] sm:$0xff] %v25193_v15  ;;  %v11732_v47 = vpop.f32.mrb[215].mxu1  ;;  %v12632_v15 = vld [vmem:[#allocation10 + $0x1418] sm:$0xff] }
 0xe80   : > { %12883 = vmatprep.mubr.f32.mxu1 %v12632_v15  ;;  %v12650_v15 = vld [vmem:[#allocation10 + $0x14a8] sm:$0xff] }
 0xe82   : > { %v25195_v31 = vpop.f32.mrb[216].mxu1  ;;  %12884 = vmatmul.mubr.f32.gmra.mrb[10].mxu1 %v12631_v38  ;;  %v12649_v38 = vld [vmem:[#allocation10 + $0x14a0] sm:$0xff] }
 0xe83   : > { %25900 = vst [vmem:[#allocation26_spill] sm:$0xff] %v25195_v31  ;;  %v11737_v30 = vpop.f32.mrb[217].mxu1  ;;  %12888 = vmatprep.mubr.f32.mxu1 %v12635_v28  ;;  %v12653_v28 = vld [vmem:[#allocation10 + $0x14c0] sm:$0xff]  ;;  %v12658_v31 = vld [vmem:[#allocation10 + $0x14e8] sm:$0xff] }
 0xe84   : > { %v12634_v30 = vld [vmem:[#allocation10 + $0x1428] sm:$0xff] }
 0xe86   : > { %v25197_v3 = vpop.f32.mrb[218].mxu1  ;;  %12889 = vmatmul.mubr.f32.gmra.mrb[12].mxu1 %v12634_v30  ;;  %v12652_v30 = vld [vmem:[#allocation10 + $0x14b8] sm:$0xff] }
 0xe87   : > { %25901 = vst [vmem:[#allocation23_spill] sm:$0xff] %v25197_v3  ;;  %v11742_v60 = vpop.f32.mrb[219].mxu1  ;;  %12893 = vmatprep.mubr.f32.mxu1 %v12638_v12  ;;  %v12640_v3 = vld [vmem:[#allocation10 + $0x1458] sm:$0xff] }
 0xe88   : > { %v12641_v60 = vld [vmem:[#allocation10 + $0x1460] sm:$0xff]  ;;  %v12656_v12 = vld [vmem:[#allocation10 + $0x14d8] sm:$0xff] }
 0xe8a   : > { %v25199_v44 = vpop.f32.mrb[220].mxu1  ;;  %12894 = vmatmul.mubr.f32.gmra.mrb[14].mxu1 %v12637_v59  ;;  %v12655_v59 = vld [vmem:[#allocation10 + $0x14d0] sm:$0xff] }
 0xe8b   : > { %25902 = vst [vmem:[#allocation32_spill] sm:$0xff] %v25199_v44  ;;  %v11747_v47 = vpop.f32.mrb[221].mxu1  ;;  %12898 = vmatprep.mubr.f32.mxu1 %v12641_v60  ;;  %v12646_v44 = vld [vmem:[#allocation10 + $0x1488] sm:$0xff] }
 0xe8c   : > { %v12647_v47 = vld [vmem:[#allocation10 + $0x1490] sm:$0xff] }
 0xe8e   : > { %12899 = vmatmul.mubr.f32.gmra.mrb[16].mxu1 %v12640_v3 }
 0xe8f   : > { %12903 = vmatprep.mubr.f32.mxu1 %v12644_v51 }
 0xe92   : > { %12904 = vmatmul.mubr.f32.gmra.mrb[18].mxu1 %v12643_v16  ;;  %v12659_v16 = vld [vmem:[#allocation10 + $0x14f0] sm:$0xff] }
 0xe93   : > { %12908 = vmatprep.mubr.f32.mxu1 %v12647_v47 }
 0xe96   : > { %12909 = vmatmul.mubr.f32.gmra.mrb[20].mxu1 %v12646_v44 }
 0xe97   : > { %12913 = vmatprep.mubr.f32.mxu1 %v12650_v15 }
 0xe9a   : > { %12914 = vmatmul.mubr.f32.gmra.mrb[22].mxu1 %v12649_v38 }
 0xe9b   : > { %12918 = vmatprep.mubr.f32.mxu1 %v12653_v28  ;;  %v12662_v28 = vld [vmem:[#allocation10 + $0x1508] sm:$0xff] }
 0xe9e   : > { %12919 = vmatmul.mubr.f32.gmra.mrb[24].mxu1 %v12652_v30  ;;  %v12661_v30 = vld [vmem:[#allocation10 + $0x1500] sm:$0xff] }
 0xe9f   : > { %12923 = vmatprep.mubr.f32.mxu1 %v12656_v12 }
 0xea2   : > { %12924 = vmatmul.mubr.f32.gmra.mrb[26].mxu1 %v12655_v59  ;;  %v12664_v59 = vld [vmem:[#allocation10 + $0x1518] sm:$0xff] }
 0xea3   : > { %12928 = vmatprep.mubr.f32.mxu1 %v12659_v16 }
 0xea6   : > { %12929 = vmatmul.mubr.f32.gmra.mrb[28].mxu1 %v12658_v31 }
 0xea7   : > { %12933 = vmatprep.mubr.f32.mxu1 %v12662_v28  ;;  %v12673_v28 = vld [vmem:[#allocation10 + $0x1560] sm:$0xff] }
 0xeaa   : > { %12934 = vmatmul.mubr.f32.gmra.mrb[30].mxu1 %v12661_v30 }
 0xeb4   : > { %v19649_v3 = vpop.f32.mrb[42].mxu0 }
 0xeb5   : > { %v11821_v60 = vadd.f32 %v19649_v3, %v25102_v32  ;;  %v11815_v51 = vpop.f32.mrb[43].mxu0 }
 0xeb6   : > { %v11816_v44 = vadd.f32 %v11815_v51, %v25072_v37  ;;  %v12667_v51 = vld [vmem:[#allocation10 + $0x1530] sm:$0xff] }
 0xeb8   : > { %v19652_v47 = vpop.f32.mrb[44].mxu0  ;;  %19743 = vmatprep.mubr.msk.f32.mxu0 %vm6256_vm3, %v11816_v44 }
 0xeb9   : > { %v11831_v15 = vadd.f32 %v19652_v47, %v25109_v36  ;;  %v11825_v38 = vpop.f32.mrb[45].mxu0  ;;  %19744 = vmatmul.mubr.msk.f32.vlgmr.msra.gmra.mrb[202].mxu0 %vm6256_vm3, %v11821_v60  ;;  %v12665_v36 = vld [vmem:[#allocation10 + $0x1520] sm:$0xff]  ;;  %v12670_v47 = vld [vmem:[#allocation10 + $0x1548] sm:$0xff] }
 0xeba   : > { %v11826_v12 = vadd.f32 %v11825_v38, %v25107_v58  ;;  %21058 = vmatpush3.bf16.msra.mxu0 %v24301_v9  ;;  %12938 = vmatprep.mubr.f32.mxu1 %v12665_v36  ;;  %v12679_v36 = vld [vmem:[#allocation10 + $0x1590] sm:$0xff] }
 0xebb   : > { %21060 = vmatprep.subr.bf16.mxu0 %v24307_v14  ;;  %12939 = vmatmul.mubr.f32.gmra.mrb[32].mxu1 %v12664_v59 }
 0xebc   : > { %v19655_v37 = vpop.f32.mrb[46].mxu0  ;;  %19746 = vmatprep.mubr.msk.f32.mxu0 %vm6256_vm3, %v11826_v12 }
 0xebd   : > { %v11841_v32 = vadd.f32 %v19655_v37, %v25114_v62  ;;  %v11835_v31 = vpop.f32.mrb[47].mxu0  ;;  %19747 = vmatmul.mubr.msk.f32.gmra.mrb[204].mxu0 %vm6256_vm3, %v11831_v15  ;;  %v12668_v62 = vld [vmem:[#allocation10 + $0x1538] sm:$0xff] }
 0xebe   : > { %v11836_v3 = vadd.f32 %v11835_v31, %v25112_v39  ;;  %21062 = vmatpush3.bf16.msra.mxu0 %v24307_v14  ;;  %12943 = vmatprep.mubr.f32.mxu1 %v12668_v62  ;;  %v12676_v37 = vld [vmem:[#allocation10 + $0x1578] sm:$0xff]  ;;  %v12685_v62 = vld [vmem:[#allocation10 + $0x15c0] sm:$0xff] }
 0xebf   : > { %21064 = vmatprep.subr.bf16.mxu0 %v24313_v2  ;;  %12944 = vmatmul.mubr.f32.gmra.mrb[34].mxu1 %v12667_v51 }
 0xec0   : > { %v19658_v9 = vpop.f32.mrb[48].mxu0  ;;  %19749 = vmatprep.mubr.msk.f32.mxu0 %vm6256_vm3, %v11836_v3 }
 0xec1   : > { %v11851_v58 = vadd.f32 %v19658_v9, %v25118_v40  ;;  %v11845_v60 = vpop.f32.mrb[49].mxu0  ;;  %19750 = vmatmul.mubr.msk.f32.gmra.mrb[206].mxu0 %vm6256_vm3, %v11841_v32  ;;  %v12671_v40 = vld [vmem:[#allocation10 + $0x1550] sm:$0xff]  ;;  %v12682_v9 = vld [vmem:[#allocation10 + $0x15a8] sm:$0xff] }
 0xec2   : > { %v11846_v16 = vadd.f32 %v11845_v60, %v25116_v29  ;;  %21066 = vmatpush3.bf16.msra.mxu0 %v24313_v2  ;;  %12948 = vmatprep.mubr.f32.mxu1 %v12671_v40 }
 0xec3   : > { %21068 = vmatprep.subr.bf16.mxu0 %v24319_v0  ;;  %12949 = vmatmul.mubr.f32.gmra.mrb[36].mxu1 %v12670_v47  ;;  %v12692_v47 = vld [vmem:[#allocation10 + $0x15f8] sm:$0xff] }
 0xec4   : > { %v19661_v14 = vpop.f32.mrb[50].mxu0  ;;  %19752 = vmatprep.mubr.msk.f32.mxu0 %vm6256_vm3, %v11846_v16 }
 0xec5   : > { %v11861_v39 = vadd.f32 %v19661_v14, %v25123_v57  ;;  %v11855_v44 = vpop.f32.mrb[51].mxu0  ;;  %19753 = vmatmul.mubr.msk.f32.gmra.mrb[208].mxu0 %vm6256_vm3, %v11851_v58  ;;  %v12674_v57 = vld [vmem:[#allocation10 + $0x1568] sm:$0xff]  ;;  %v12689_v14 = vld [vmem:[#allocation10 + $0x15e0] sm:$0xff] }
 0xec6   : > { %v11856_v15 = vadd.f32 %v11855_v44, %v25120_v20  ;;  %21070 = vmatpush3.bf16.msra.mxu0 %v24319_v0  ;;  %12953 = vmatprep.mubr.f32.mxu1 %v12674_v57  ;;  %v12694_v57 = vld [vmem:[#allocation10 + $0x1608] sm:$0xff] }
 0xec7   : > { %21072 = vmatprep.subr.bf16.mxu0 %v24325_v63  ;;  %12954 = vmatmul.mubr.f32.gmra.mrb[38].mxu1 %v12673_v28 }
 0xec8   : > { %v19664_v2 = vpop.f32.mrb[52].mxu0  ;;  %19755 = vmatprep.mubr.msk.f32.mxu0 %vm6256_vm3, %v11856_v15  ;;  %v12691_v15 = vld [vmem:[#allocation10 + $0x15f0] sm:$0xff] }
 0xec9   : > { %v11871_v29 = vadd.f32 %v19664_v2, %v25127_v5  ;;  %v11865_v38 = vpop.f32.mrb[53].mxu0  ;;  %19756 = vmatmul.mubr.msk.f32.gmra.mrb[210].mxu0 %vm6256_vm3, %v11861_v39  ;;  %v12677_v5 = vld [vmem:[#allocation10 + $0x1580] sm:$0xff]  ;;  %v12688_v39 = vld [vmem:[#allocation10 + $0x15d8] sm:$0xff] }
 0xeca   : > { %v11866_v30 = vadd.f32 %v11865_v38, %v25125_v11  ;;  %21074 = vmatpush3.bf16.msra.mxu0 %v24325_v63  ;;  %12958 = vmatprep.mubr.f32.mxu1 %v12677_v5  ;;  %v12695_v38 = vld [vmem:[#allocation10 + $0x1610] sm:$0xff] }
 0xecb   : > { %21076 = vmatprep.subr.bf16.mxu0 %v24331_v48  ;;  %12959 = vmatmul.mubr.f32.gmra.mrb[40].mxu1 %v12676_v37  ;;  %v12701_v37 = vld [vmem:[#allocation10 + $0x1640] sm:$0xff] }
 0xecc   : > { %v19667_v0 = vpop.f32.mrb[54].mxu0  ;;  %19758 = vmatprep.mubr.msk.f32.mxu0 %vm6256_vm3, %v11866_v30 }
 0xecd   : > { %v11881_v20 = vadd.f32 %v19667_v0, %v25131_v33  ;;  %v11875_v12 = vpop.f32.mrb[55].mxu0  ;;  %19759 = vmatmul.mubr.msk.f32.gmra.mrb[212].mxu0 %vm6256_vm3, %v11871_v29  ;;  %v12680_v33 = vld [vmem:[#allocation10 + $0x1598] sm:$0xff]  ;;  %v12698_v0 = vld [vmem:[#allocation10 + $0x1628] sm:$0xff] }
 0xece   : > { %v11876_v32 = vadd.f32 %v11875_v12, %v25129_v24  ;;  %21078 = vmatpush3.bf16.msra.mxu0 %v24331_v48  ;;  %12963 = vmatprep.mubr.f32.mxu1 %v12680_v33  ;;  %v12703_v33 = vld [vmem:[#allocation10 + $0x1650] sm:$0xff] }
 0xecf   : > { %21080 = vmatprep.subr.bf16.mxu0 %v25848_v8  ;;  %12964 = vmatmul.mubr.f32.gmra.mrb[42].mxu1 %v12679_v36 }
 0xed0   : > { %v19670_v63 = vpop.f32.mrb[56].mxu0  ;;  %19761 = vmatprep.mubr.msk.f32.mxu0 %vm6256_vm3, %v11876_v32  ;;  %v12700_v32 = vld [vmem:[#allocation10 + $0x1638] sm:$0xff] }
 0xed1   : > { %v11891_v11 = vadd.f32 %v19670_v63, %v25135_v23  ;;  %v11885_v31 = vpop.f32.mrb[57].mxu0  ;;  %19762 = vmatmul.mubr.msk.f32.gmra.mrb[214].mxu0 %vm6256_vm3, %v11881_v20  ;;  %v12683_v23 = vld [vmem:[#allocation10 + $0x15b0] sm:$0xff]  ;;  %v12697_v20 = vld [vmem:[#allocation10 + $0x1620] sm:$0xff] }
 0xed2   : > { %v11886_v59 = vadd.f32 %v11885_v31, %v25133_v10  ;;  %21082 = vmatpush3.bf16.msra.mxu0 %v25848_v8  ;;  %12968 = vmatprep.mubr.f32.mxu1 %v12683_v23  ;;  %v12704_v31 = vld [vmem:[#allocation10 + $0x1658] sm:$0xff]  ;;  %v13321_v23 = vld [vmem:[#allocation12 + $0x188] sm:$0xff] }
 0xed3   : > { %21084 = vmatprep.subr.bf16.mxu0 %v25852_v22  ;;  %12969 = vmatmul.mubr.f32.gmra.mrb[44].mxu1 %v12682_v9 }
 0xed4   : > { %v19673_v48 = vpop.f32.mrb[58].mxu0  ;;  %19764 = vmatprep.mubr.msk.f32.mxu0 %vm6256_vm3, %v11886_v59 }
 0xed5   : > { %v11901_v24 = vadd.f32 %v19673_v48, %v25139_v19  ;;  %v11895_v3 = vpop.f32.mrb[59].mxu0  ;;  %19765 = vmatmul.mubr.msk.f32.gmra.mrb[216].mxu0 %vm6256_vm3, %v11891_v11  ;;  %v12686_v19 = vld [vmem:[#allocation10 + $0x15c8] sm:$0xff]  ;;  %v12707_v48 = vld [vmem:[#allocation10 + $0x1670] sm:$0xff] }
 0xed6   : > { %v11896_v58 = vadd.f32 %v11895_v3, %v25137_v25  ;;  %21086 = vmatpush3.bf16.msra.mxu0 %v25852_v22  ;;  %12973 = vmatprep.mubr.f32.mxu1 %v12686_v19 }
 0xed7   : > { %12974 = vmatmul.mubr.f32.gmra.mrb[46].mxu1 %v12685_v62 }
 0xed8   : > { %v19676_v8 = vpop.f32.mrb[60].mxu0  ;;  %19767 = vmatprep.mubr.msk.f32.mxu0 %vm6256_vm3, %v11896_v58  ;;  %12978 = vmatprep.mubr.f32.mxu1 %v12689_v14 }
 0xed9   : > { %v11911_v10 = vadd.f32 %v19676_v8, %v25143_v50  ;;  %v11905_v60 = vpop.f32.mrb[61].mxu0  ;;  %19768 = vmatmul.mubr.msk.f32.gmra.mrb[218].mxu0 %vm6256_vm3, %v11901_v24  ;;  %v12706_v24 = vld [vmem:[#allocation10 + $0x1668] sm:$0xff] }
 0xeda   : > { %v11906_v51 = vadd.f32 %v11905_v60, %v25141_v55 }
 0xedb   : > { %12979 = vmatmul.mubr.f32.gmra.mrb[48].mxu1 %v12688_v39  ;;  %v25903_v39 = vld [vmem:[#allocation28_spill] sm:$0xff] }
 0xedc   : > { %v19679_v16 = vpop.f32.mrb[62].mxu0  ;;  %19770 = vmatprep.mubr.msk.f32.mxu0 %vm6256_vm3, %v11906_v51  ;;  %12983 = vmatprep.mubr.f32.mxu1 %v12692_v47 }
 0xedd   : > { %v11921_v22 = vadd.f32 %v19679_v16, %v25147_v45  ;;  %v11915_v25 = vpop.f32.mrb[63].mxu0  ;;  %19771 = vmatmul.mubr.msk.f32.gmra.mrb[220].mxu0 %vm6256_vm3, %v11911_v10 }
 0xede   : > { %v11916_v50 = vadd.f32 %v11915_v25, %v25145_v43 }
 0xedf   : > { %12984 = vmatmul.mubr.f32.gmra.mrb[50].mxu1 %v12691_v15 }
 0xee0   : > { %v19682_v44 = vpop.f32.mrb[64].mxu0  ;;  %19773 = vmatprep.mubr.msk.f32.mxu0 %vm6256_vm3, %v11916_v50  ;;  %12988 = vmatprep.mubr.f32.mxu1 %v12695_v38 }
 0xee1   : > { %v11931_v55 = vadd.f32 %v19682_v44, %v25151_v18  ;;  %v11925_v40 = vpop.f32.mrb[65].mxu0  ;;  %19774 = vmatmul.mubr.msk.f32.gmra.mrb[222].mxu0 %vm6256_vm3, %v11921_v22  ;;  %v25904_v44 = vld [vmem:[#allocation26_spill] sm:$0xff] }
 0xee2   : > { %v11926_v45 = vadd.f32 %v11925_v40, %v25149_v54  ;;  %v25905_v40 = vld [vmem:[#allocation31_spill] sm:$0xff] }
 0xee3   : > { %12989 = vmatmul.mubr.f32.gmra.mrb[52].mxu1 %v12694_v57  ;;  %v12567_v57 = vld [vmem:[#allocation10 + $0x1210] sm:$0xff] }
 0xee4   : > { %v19685_v2 = vpop.f32.mrb[66].mxu0  ;;  %19776 = vmatprep.mubr.msk.f32.mxu0 %vm6256_vm3, %v11926_v45  ;;  %12993 = vmatprep.mubr.f32.mxu1 %v12698_v0  ;;  %v25906_v45 = vld [vmem:[#allocation32_spill] sm:$0xff]  ;;  %v12570_v0 = vld [vmem:[#allocation10 + $0x1228] sm:$0xff] }
 0xee5   : > { %v11941_v43 = vadd.f32 %v19685_v2, %v25155_v34  ;;  %v11935_v29 = vpop.f32.mrb[67].mxu0  ;;  %19777 = vmatmul.mubr.msk.f32.gmra.mrb[224].mxu0 %vm6256_vm3, %v11931_v55 }
 0xee6   : > { %v11936_v18 = vadd.f32 %v11935_v29, %v25153_v7  ;;  %v25907_v29 = vld [vmem:[#allocation23_spill] sm:$0xff] }
 0xee7   : > { %12994 = vmatmul.mubr.f32.gmra.mrb[54].mxu1 %v12697_v20  ;;  %v12573_v20 = vld [vmem:[#allocation10 + $0x1240] sm:$0xff] }
 0xee8   : > { %v19688_v28 = vpop.f32.mrb[68].mxu0  ;;  %19779 = vmatprep.mubr.msk.f32.mxu0 %vm6256_vm3, %v11936_v18  ;;  %12998 = vmatprep.mubr.f32.mxu1 %v12701_v37  ;;  %v12579_v37 = vld [vmem:[#allocation10 + $0x1270] sm:$0xff] }
 0xee9   : > { %v11951_v54 = vadd.f32 %v19688_v28, %v25159_v27  ;;  %v11945_v30 = vpop.f32.mrb[69].mxu0  ;;  %19780 = vmatmul.mubr.msk.f32.gmra.mrb[226].mxu0 %vm6256_vm3, %v11941_v43  ;;  %v13322_v28 = vld [vmem:[#allocation12 + $0x190] sm:$0xff] }
 0xeea   : > { %v11946_v34 = vadd.f32 %v11945_v30, %v25157_v13 }
 0xeeb   : > { %12999 = vmatmul.mubr.f32.gmra.mrb[56].mxu1 %v12700_v32 }
 0xeec   : > { %v19691_v12 = vpop.f32.mrb[70].mxu0  ;;  %19782 = vmatprep.mubr.msk.f32.mxu0 %vm6256_vm3, %v11946_v34  ;;  %13003 = vmatprep.mubr.f32.mxu1 %v12704_v31 }
 0xeed   : > { %v11961_v7 = vadd.f32 %v19691_v12, %v25163_v4  ;;  %v11955_v5 = vpop.f32.mrb[71].mxu0  ;;  %19783 = vmatmul.mubr.msk.f32.gmra.mrb[228].mxu0 %vm6256_vm3, %v11951_v54  ;;  %v25306_v47 = vpop.f32.mrb[222].mxu1  ;;  %v13323_v54 = vld [vmem:[#allocation12 + $0x198] sm:$0xff]  ;;  %v13324_v12 = vld [vmem:[#allocation12 + $0x1a0] sm:$0xff] }
 0xeee   : > { %v11956_v27 = vadd.f32 %v11955_v5, %v25161_v52  ;;  %v21091_v34 = vpack.c.bf16 %v13323_v54, %v13322_v28  ;;  %v12576_v5 = vld [vmem:[#allocation10 + $0x1258] sm:$0xff]  ;;  %v12669_v54 = vld [vmem:[#allocation10 + $0x1540] sm:$0xff] }
 0xeef   : > { %13004 = vmatmul.mubr.f32.gmra.mrb[58].mxu1 %v12703_v33  ;;  %v13328_v33 = vld [vmem:[#allocation12 + $0x1c0] sm:$0xff] }
 0xef0   : > { %v19694_v63 = vpop.f32.mrb[72].mxu0  ;;  %19785 = vmatprep.mubr.msk.f32.mxu0 %vm6256_vm3, %v11956_v27  ;;  %13008 = vmatprep.mubr.f32.mxu1 %v12707_v48  ;;  %v13326_v27 = vld [vmem:[#allocation12 + $0x1b0] sm:$0xff]  ;;  %v12594_v48 = vld [vmem:[#allocation10 + $0x12e8] sm:$0xff] }
 0xef1   : > { %v11971_v13 = vadd.f32 %v19694_v63, %v25167_v41  ;;  %v11965_v11 = vpop.f32.mrb[73].mxu0  ;;  %19786 = vmatmul.mubr.msk.f32.gmra.mrb[230].mxu0 %vm6256_vm3, %v11961_v7  ;;  %v13320_v41 = vld [vmem:[#allocation12 + $0x180] sm:$0xff]  ;;  %v13325_v7 = vld [vmem:[#allocation12 + $0x1a8] sm:$0xff]  ;;  %v13327_v63 = vld [vmem:[#allocation12 + $0x1b8] sm:$0xff] }
 0xef2   : > { %v11966_v4 = vadd.f32 %v11965_v11, %v25165_v42  ;;  %v21087_v9 = vpack.c.bf16 %v13321_v23, %v13320_v41  ;;  %v21095_v32 = vpack.c.bf16 %v13325_v7, %v13324_v12  ;;  %v12585_v11 = vld [vmem:[#allocation10 + $0x12a0] sm:$0xff]  ;;  %v21099_v31 = vpack.c.bf16 %v13327_v63, %v13326_v27  ;;  %v12600_v41 = vld [vmem:[#allocation10 + $0x1318] sm:$0xff]  ;;  %v12606_v23 = vld [vmem:[#allocation10 + $0x1348] sm:$0xff] }
 0xef3   : > { %13009 = vmatmul.mubr.f32.gmra.mrb[60].mxu1 %v12706_v24  ;;  %v12597_v24 = vld [vmem:[#allocation10 + $0x1300] sm:$0xff]  ;;  %v12678_v7 = vld [vmem:[#allocation10 + $0x1588] sm:$0xff]  ;;  %v12684_v27 = vld [vmem:[#allocation10 + $0x15b8] sm:$0xff] }
 0xef4   : > { %v19697_v36 = vpop.f32.mrb[74].mxu0  ;;  %19788 = vmatprep.mubr.msk.f32.mxu0 %vm6256_vm3, %v11966_v4  ;;  %21088 = vmatprep.subr.bf16.mxu0 %v21087_v9  ;;  %v13329_v4 = vld [vmem:[#allocation12 + $0x1c8] sm:$0xff] }
 0xef5   : > { %v11981_v52 = vadd.f32 %v19697_v36, %v25171_v46  ;;  %v11975_v59 = vpop.f32.mrb[75].mxu0  ;;  %19789 = vmatmul.mubr.msk.f32.gmra.mrb[232].mxu0 %vm6256_vm3, %v11971_v13  ;;  %v12582_v13 = vld [vmem:[#allocation10 + $0x1288] sm:$0xff]  ;;  %v12588_v36 = vld [vmem:[#allocation10 + $0x12b8] sm:$0xff] }
 0xef6   : > { %v11976_v3 = vadd.f32 %v11975_v59, %v25169_v53  ;;  %v21103_v59 = vpack.c.bf16 %v13329_v4, %v13328_v33  ;;  %v12693_v4 = vld [vmem:[#allocation10 + $0x1600] sm:$0xff] }
 0xef8   : > { %v19700_v58 = vpop.f32.mrb[76].mxu0  ;;  %19791 = vmatprep.mubr.msk.f32.mxu0 %vm6256_vm3, %v11976_v3  ;;  %v12603_v3 = vld [vmem:[#allocation10 + $0x1330] sm:$0xff] }
 0xef9   : > { %v11991_v42 = vadd.f32 %v19700_v58, %v25175_v49  ;;  %v11985_v8 = vpop.f32.mrb[77].mxu0  ;;  %19792 = vmatmul.mubr.msk.f32.gmra.mrb[234].mxu0 %vm6256_vm3, %v11981_v52  ;;  %v12591_v52 = vld [vmem:[#allocation10 + $0x12d0] sm:$0xff]  ;;  %v12612_v58 = vld [vmem:[#allocation10 + $0x1378] sm:$0xff] }
 0xefa   : > { %v11986_v46 = vadd.f32 %v11985_v8, %v25173_v17  ;;  %v12618_v8 = vld [vmem:[#allocation10 + $0x13a8] sm:$0xff] }
 0xefc   : > { %v19703_v10 = vpop.f32.mrb[78].mxu0  ;;  %19794 = vmatprep.mubr.msk.f32.mxu0 %vm6256_vm3, %v11986_v46 }
 0xefd   : > { %v12001_v53 = vadd.f32 %v19703_v10, %v25179_v6  ;;  %v11995_v60 = vpop.f32.mrb[79].mxu0  ;;  %19795 = vmatmul.mubr.msk.f32.gmra.mrb[236].mxu0 %vm6256_vm3, %v11991_v42  ;;  %v12615_v42 = vld [vmem:[#allocation10 + $0x1390] sm:$0xff]  ;;  %v12621_v10 = vld [vmem:[#allocation10 + $0x13c0] sm:$0xff] }
 0xefe   : > { %v11996_v19 = vadd.f32 %v11995_v60, %v25177_v21  ;;  %v12624_v60 = vld [vmem:[#allocation10 + $0x13d8] sm:$0xff] }
 0xf00   : > { %v19706_v62 = vpop.f32.mrb[80].mxu0  ;;  %19797 = vmatprep.mubr.msk.f32.mxu0 %vm6256_vm3, %v11996_v19 }
 0xf01   : > { %v12011_v49 = vadd.f32 %v19706_v62, %v25183_v26  ;;  %v12005_v51 = vpop.f32.mrb[81].mxu0  ;;  %19798 = vmatmul.mubr.msk.f32.gmra.mrb[238].mxu0 %vm6256_vm3, %v12001_v53  ;;  %v12627_v62 = vld [vmem:[#allocation10 + $0x13f0] sm:$0xff] }
 0xf02   : > { %v12006_v17 = vadd.f32 %v12005_v51, %v25181_v56  ;;  %v12630_v51 = vld [vmem:[#allocation10 + $0x1408] sm:$0xff] }
 0xf04   : > { %v19709_v16 = vpop.f32.mrb[82].mxu0  ;;  %19800 = vmatprep.mubr.msk.f32.mxu0 %vm6256_vm3, %v12006_v17 }
 0xf05   : > { %v12021_v6 = vadd.f32 %v19709_v16, %v25187_v35  ;;  %v12015_v22 = vpop.f32.mrb[83].mxu0  ;;  %19801 = vmatmul.mubr.msk.f32.gmra.mrb[240].mxu0 %vm6256_vm3, %v12011_v49  ;;  %v12633_v16 = vld [vmem:[#allocation10 + $0x1420] sm:$0xff] }
 0xf06   : > { %v12016_v21 = vadd.f32 %v12015_v22, %v25185_v61  ;;  %v12636_v22 = vld [vmem:[#allocation10 + $0x1438] sm:$0xff] }
 0xf08   : > { %v19712_v25 = vpop.f32.mrb[84].mxu0  ;;  %19803 = vmatprep.mubr.msk.f32.mxu0 %vm6256_vm3, %v12016_v21 }
 0xf09   : > { %v12031_v26 = vadd.f32 %v19712_v25, %v25191_v1  ;;  %v12025_v14 = vpop.f32.mrb[85].mxu0  ;;  %19804 = vmatmul.mubr.msk.f32.gmra.mrb[242].mxu0 %vm6256_vm3, %v12021_v6  ;;  %v12777_v1 = vpop.f32.mrb[223].mxu1  ;;  %v12639_v25 = vld [vmem:[#allocation10 + $0x1450] sm:$0xff] }
 0xf0a   : > { %v12026_v56 = vadd.f32 %v12025_v14, %v25903_v39  ;;  %v25312_v18 = vpop.f32.mrb[224].mxu1  ;;  %v12642_v14 = vld [vmem:[#allocation10 + $0x1468] sm:$0xff]  ;;  %v12657_v1 = vld [vmem:[#allocation10 + $0x14e0] sm:$0xff] }
 0xf0b   : > { %v12782_v30 = vpop.f32.mrb[225].mxu1 }
 0xf0c   : > { %v19715_v50 = vpop.f32.mrb[86].mxu0  ;;  %19806 = vmatprep.mubr.msk.f32.mxu0 %vm6256_vm3, %v12026_v56  ;;  %v25316_v46 = vpop.f32.mrb[226].mxu1  ;;  %v12645_v56 = vld [vmem:[#allocation10 + $0x1480] sm:$0xff] }
 0xf0d   : > { %v12041_v35 = vadd.f32 %v19715_v50, %v25904_v44  ;;  %v12035_v55 = vpop.f32.mrb[87].mxu0  ;;  %19807 = vmatmul.mubr.msk.f32.gmra.mrb[244].mxu0 %vm6256_vm3, %v12031_v26  ;;  %v12787_v53 = vpop.f32.mrb[227].mxu1  ;;  %v12648_v44 = vld [vmem:[#allocation10 + $0x1498] sm:$0xff] }
 0xf0e   : > { %v12036_v61 = vadd.f32 %v12035_v55, %v25905_v40  ;;  %v25318_v19 = vpop.f32.mrb[228].mxu1  ;;  %v12651_v55 = vld [vmem:[#allocation10 + $0x14b0] sm:$0xff] }
 0xf0f   : > { %v12792_v49 = vpop.f32.mrb[229].mxu1 }
 0xf10   : > { %v19718_v15 = vpop.f32.mrb[88].mxu0  ;;  %19809 = vmatprep.mubr.msk.f32.mxu0 %vm6256_vm3, %v12036_v61  ;;  %v25320_v17 = vpop.f32.mrb[230].mxu1  ;;  %v12654_v61 = vld [vmem:[#allocation10 + $0x14c8] sm:$0xff] }
 0xf11   : > { %v12051_v2 = vadd.f32 %v19718_v15, %v25906_v45  ;;  %v12045_v43 = vpop.f32.mrb[89].mxu0  ;;  %19810 = vmatmul.mubr.msk.f32.gmra.mrb[246].mxu0 %vm6256_vm3, %v12041_v35  ;;  %v12797_v6 = vpop.f32.mrb[231].mxu1 }
 0xf12   : > { %v12046_v38 = vadd.f32 %v12045_v43, %v25907_v29  ;;  %v25322_v21 = vpop.f32.mrb[232].mxu1  ;;  %v12663_v29 = vld [vmem:[#allocation10 + $0x1510] sm:$0xff] }
 0xf13   : > { %v12802_v26 = vpop.f32.mrb[233].mxu1 }
 0xf14   : > { %19812 = vmatprep.mubr.msk.f32.mxu0 %vm6256_vm3, %v12046_v38  ;;  %v25324_v39 = vpop.f32.mrb[234].mxu1 }
 0xf15   : > { %19813 = vmatmul.mubr.msk.f32.gmra.mrb[248].mxu0 %vm6256_vm3, %v12051_v2  ;;  %v12807_v50 = vpop.f32.mrb[235].mxu1  ;;  %v12660_v2 = vld [vmem:[#allocation10 + $0x14f8] sm:$0xff] }
 0xf16   : > { %19847 = vmatprep.mubr.f32.mxu0 %v12567_v57  ;;  %v25326_v35 = vpop.f32.mrb[236].mxu1  ;;  %v12666_v57 = vld [vmem:[#allocation10 + $0x1528] sm:$0xff] }
 0xf17   : > { %v12812_v40 = vpop.f32.mrb[237].mxu1 }
 0xf18   : > { %v25328_v15 = vpop.f32.mrb[238].mxu1 }
 0xf19   : > { %19848 = vmatmul.mubr.f32.vlgmr.msra.gmra.mrb[90].mxu0 %v12570_v0  ;;  %v12817_v45 = vpop.f32.mrb[239].mxu1  ;;  %v12672_v0 = vld [vmem:[#allocation10 + $0x1558] sm:$0xff] }
 0xf1a   : > { %19850 = vmatprep.mubr.f32.mxu0 %v12573_v20  ;;  %21090 = vmatpush3.bf16.msra.mxu0 %v21087_v9  ;;  %v12609_v9 = vld [vmem:[#allocation10 + $0x1360] sm:$0xff]  ;;  %v25330_v43 = vpop.f32.mrb[240].mxu1 }
 0xf1b   : > { %21092 = vmatprep.subr.bf16.mxu0 %v21091_v34  ;;  %v12822_v38 = vpop.f32.mrb[241].mxu1 }
 0xf1d   : > { %19851 = vmatmul.mubr.f32.gmra.mrb[92].mxu0 %v12576_v5 }
 0xf1e   : > { %19853 = vmatprep.mubr.f32.mxu0 %v12579_v37  ;;  %21094 = vmatpush3.bf16.msra.mxu0 %v21091_v34  ;;  %v25332_v28 = vpop.f32.mrb[242].mxu1  ;;  %v12675_v34 = vld [vmem:[#allocation10 + $0x1570] sm:$0xff]  ;;  %v12681_v37 = vld [vmem:[#allocation10 + $0x15a0] sm:$0xff] }
 0xf1f   : > { %21096 = vmatprep.subr.bf16.mxu0 %v21095_v32  ;;  %v12827_v30 = vpop.f32.mrb[243].mxu1 }
 0xf21   : > { %19854 = vmatmul.mubr.f32.gmra.mrb[94].mxu0 %v12582_v13  ;;  %v12687_v13 = vld [vmem:[#allocation10 + $0x15d0] sm:$0xff] }
 0xf22   : > { %19856 = vmatprep.mubr.f32.mxu0 %v12585_v11  ;;  %21098 = vmatpush3.bf16.msra.mxu0 %v21095_v32  ;;  %v25334_v20 = vpop.f32.mrb[244].mxu1 }
 0xf23   : > { %21100 = vmatprep.subr.bf16.mxu0 %v21099_v31  ;;  %v12832_v12 = vpop.f32.mrb[245].mxu1 }
 0xf25   : > { %19857 = vmatmul.mubr.f32.gmra.mrb[96].mxu0 %v12588_v36 }
 0xf26   : > { %19859 = vmatprep.mubr.f32.mxu0 %v12591_v52  ;;  %21102 = vmatpush3.bf16.msra.mxu0 %v21099_v31  ;;  %v25336_v5 = vpop.f32.mrb[246].mxu1  ;;  %v12690_v31 = vld [vmem:[#allocation10 + $0x15e8] sm:$0xff]  ;;  %v12696_v52 = vld [vmem:[#allocation10 + $0x1618] sm:$0xff] }
 0xf27   : > { %21104 = vmatprep.subr.bf16.mxu0 %v21103_v59  ;;  %v12837_v32 = vpop.f32.mrb[247].mxu1 }
 0xf29   : > { %19860 = vmatmul.mubr.f32.gmra.mrb[98].mxu0 %v12594_v48  ;;  %v12699_v48 = vld [vmem:[#allocation10 + $0x1630] sm:$0xff] }
 0xf2a   : > { %19862 = vmatprep.mubr.f32.mxu0 %v12597_v24  ;;  %21106 = vmatpush3.bf16.msra.mxu0 %v21103_v59  ;;  %v25338_v63 = vpop.f32.mrb[248].mxu1  ;;  %v13330_v24 = vld [vmem:[#allocation12 + $0x1d0] sm:$0xff] }
 0xf2b   : > { %v12842_v11 = vpop.f32.mrb[249].mxu1 }
 0xf2d   : > { %19863 = vmatmul.mubr.f32.gmra.mrb[100].mxu0 %v12600_v41  ;;  %v13331_v41 = vld [vmem:[#allocation12 + $0x1d8] sm:$0xff] }
 0xf2e   : > { %19865 = vmatprep.mubr.f32.mxu0 %v12603_v3  ;;  %v25340_v33 = vpop.f32.mrb[250].mxu1 }
 0xf2f   : > { %v12847_v36 = vpop.f32.mrb[251].mxu1 }
 0xf31   : > { %19866 = vmatmul.mubr.f32.gmra.mrb[102].mxu0 %v12606_v23  ;;  %v21107_v23 = vpack.c.bf16 %v13331_v41, %v13330_v24 }
 0xf32   : > { %19868 = vmatprep.mubr.f32.mxu0 %v12609_v9  ;;  %v25342_v59 = vpop.f32.mrb[252].mxu1  ;;  %v12702_v9 = vld [vmem:[#allocation10 + $0x1648] sm:$0xff] }
 0xf33   : > { %v12852_v3 = vpop.f32.mrb[253].mxu1  ;;  %21108 = vmatprep.subr.bf16.mxu0 %v21107_v23 }
 0xf34   : > { %21110 = vmatpush3.bf16.msra.mxu0 %v21107_v23 }
 0xf35   : > { %19869 = vmatmul.mubr.f32.gmra.mrb[104].mxu0 %v12612_v58 }
 0xf36   : > { %19871 = vmatprep.mubr.f32.mxu0 %v12615_v42  ;;  %v12705_v42 = vld [vmem:[#allocation10 + $0x1660] sm:$0xff] }
 0xf38   : > { %v25344_v58 = vpop.f32.mrb[254].mxu1 }
 0xf39   : > { %19872 = vmatmul.mubr.f32.gmra.mrb[106].mxu0 %v12618_v8  ;;  %v12857_v8 = vpop.f32.mrb[255].mxu1 }
 0xf3a   : > { %19874 = vmatprep.mubr.f32.mxu0 %v12621_v10  ;;  %v12708_v10 = vld [vmem:[#allocation10 + $0x1678] sm:$0xff] }
 0xf3d   : > { %19875 = vmatmul.mubr.f32.gmra.mrb[108].mxu0 %v12624_v60  ;;  %v25346_v53 = vpop.f32.mrb[0].mxu1 }
 0xf3e   : > { %19877 = vmatprep.mubr.f32.mxu0 %v12627_v62  ;;  %v12862_v60 = vpop.f32.mrb[1].mxu1 }
 0xf41   : > { %19878 = vmatmul.mubr.f32.gmra.mrb[110].mxu0 %v12630_v51  ;;  %v25348_v62 = vpop.f32.mrb[2].mxu1 }
 0xf42   : > { %19880 = vmatprep.mubr.f32.mxu0 %v12633_v16  ;;  %v12867_v49 = vpop.f32.mrb[3].mxu1 }
 0xf45   : > { %19881 = vmatmul.mubr.f32.gmra.mrb[112].mxu0 %v12636_v22 }
 0xf46   : > { %19883 = vmatprep.mubr.f32.mxu0 %v12639_v25 }
 0xf48   : > { %v25350_v51 = vpop.f32.mrb[4].mxu1 }
 0xf49   : > { %19884 = vmatmul.mubr.f32.gmra.mrb[114].mxu0 %v12642_v14  ;;  %v12872_v16 = vpop.f32.mrb[5].mxu1 }
 0xf4a   : > { %19886 = vmatprep.mubr.f32.mxu0 %v12645_v56 }
 0xf4d   : > { %19887 = vmatmul.mubr.f32.gmra.mrb[116].mxu0 %v12648_v44  ;;  %v25352_v6 = vpop.f32.mrb[6].mxu1 }
 0xf4e   : > { %19889 = vmatprep.mubr.f32.mxu0 %v12651_v55  ;;  %v12877_v22 = vpop.f32.mrb[7].mxu1 }
 0xf51   : > { %19890 = vmatmul.mubr.f32.gmra.mrb[118].mxu0 %v12654_v61  ;;  %v25354_v25 = vpop.f32.mrb[8].mxu1 }
 0xf52   : > { %19892 = vmatprep.mubr.f32.mxu0 %v12657_v1  ;;  %v12882_v26 = vpop.f32.mrb[9].mxu1 }
 0xf55   : > { %19893 = vmatmul.mubr.f32.gmra.mrb[120].mxu0 %v12660_v2  ;;  %v25356_v14 = vpop.f32.mrb[10].mxu1 }
 0xf56   : > { %19895 = vmatprep.mubr.f32.mxu0 %v12663_v29  ;;  %v12887_v56 = vpop.f32.mrb[11].mxu1 }
 0xf59   : > { %19896 = vmatmul.mubr.f32.gmra.mrb[122].mxu0 %v12666_v57  ;;  %v25358_v50 = vpop.f32.mrb[12].mxu1 }
 0xf5a   : > { %19898 = vmatprep.mubr.f32.mxu0 %v12669_v54  ;;  %v12892_v44 = vpop.f32.mrb[13].mxu1 }
 0xf5d   : > { %19899 = vmatmul.mubr.f32.gmra.mrb[124].mxu0 %v12672_v0  ;;  %v25360_v55 = vpop.f32.mrb[14].mxu1 }
 0xf5e   : > { %19901 = vmatprep.mubr.f32.mxu0 %v12675_v34  ;;  %v12897_v40 = vpop.f32.mrb[15].mxu1 }
 0xf61   : > { %19902 = vmatmul.mubr.f32.gmra.mrb[126].mxu0 %v12678_v7  ;;  %v25362_v61 = vpop.f32.mrb[16].mxu1 }
 0xf62   : > { %19904 = vmatprep.mubr.f32.mxu0 %v12681_v37  ;;  %v12902_v1 = vpop.f32.mrb[17].mxu1 }
 0xf65   : > { %19905 = vmatmul.mubr.f32.gmra.mrb[128].mxu0 %v12684_v27  ;;  %v25364_v45 = vpop.f32.mrb[18].mxu1 }
 0xf66   : > { %19907 = vmatprep.mubr.f32.mxu0 %v12687_v13  ;;  %v12907_v2 = vpop.f32.mrb[19].mxu1 }
 0xf69   : > { %19908 = vmatmul.mubr.f32.gmra.mrb[130].mxu0 %v12690_v31  ;;  %v25366_v29 = vpop.f32.mrb[20].mxu1 }
 0xf6a   : > { %19910 = vmatprep.mubr.f32.mxu0 %v12693_v4  ;;  %v12912_v38 = vpop.f32.mrb[21].mxu1 }
 0xf6d   : > { %19911 = vmatmul.mubr.f32.gmra.mrb[132].mxu0 %v12696_v52  ;;  %v25368_v57 = vpop.f32.mrb[22].mxu1 }
 0xf6e   : > { %19913 = vmatprep.mubr.f32.mxu0 %v12699_v48  ;;  %v12917_v54 = vpop.f32.mrb[23].mxu1 }
 0xf71   : > { %19914 = vmatmul.mubr.f32.gmra.mrb[134].mxu0 %v12702_v9  ;;  %v25370_v30 = vpop.f32.mrb[24].mxu1 }
 0xf72   : > { %19916 = vmatprep.mubr.f32.mxu0 %v12705_v42  ;;  %v12922_v0 = vpop.f32.mrb[25].mxu1 }
 0xf75   : > { %19917 = vmatmul.mubr.f32.gmra.mrb[136].mxu0 %v12708_v10  ;;  %v25372_v34 = vpop.f32.mrb[26].mxu1 }
 0xf76   : > { %v12927_v12 = vpop.f32.mrb[27].mxu1 }
 0xf79   : > { %v25374_v7 = vpop.f32.mrb[28].mxu1 }
 0xf7a   : > { %v12932_v37 = vpop.f32.mrb[29].mxu1 }
 0xf7d   : > { %v25376_v32 = vpop.f32.mrb[30].mxu1 }
 0xf7e   : > { %v12937_v27 = vpop.f32.mrb[31].mxu1 }
 0xf8e   : > { %v25378_v13 = vpop.f32.mrb[32].mxu1 }
 0xf8f   : > { %v12942_v11 = vpop.f32.mrb[33].mxu1 }
 0xf92   : > { %v25380_v31 = vpop.f32.mrb[34].mxu1 }
 0xf93   : > { %v12947_v4 = vpop.f32.mrb[35].mxu1 }
 0xf96   : > { %v25382_v36 = vpop.f32.mrb[36].mxu1 }
 0xf97   : > { %v12952_v52 = vpop.f32.mrb[37].mxu1 }
 0xf9a   : > { %v25384_v48 = vpop.f32.mrb[38].mxu1 }
 0xf9b   : > { %v12957_v24 = vpop.f32.mrb[39].mxu1 }
 0xf9e   : > { %v25386_v41 = vpop.f32.mrb[40].mxu1 }
 0xf9f   : > { %v12962_v3 = vpop.f32.mrb[41].mxu1 }
 0xfa2   : > { %v25388_v23 = vpop.f32.mrb[42].mxu1 }
 0xfa3   : > { %v12967_v9 = vpop.f32.mrb[43].mxu1 }
 0xfa6   : > { %v25390_v42 = vpop.f32.mrb[44].mxu1 }
 0xfa7   : > { %v12972_v8 = vpop.f32.mrb[45].mxu1 }
 0xfaa   : > { %v25392_v10 = vpop.f32.mrb[46].mxu1 }
 0xfab   : > { %v12977_v60 = vpop.f32.mrb[47].mxu1 }
 0xfae   : > { %v25394_v49 = vpop.f32.mrb[48].mxu1 }
 0xfaf   : > { %v12982_v16 = vpop.f32.mrb[49].mxu1 }
 0xfb2   : > { %v25396_v22 = vpop.f32.mrb[50].mxu1 }
 0xfb3   : > { %v12987_v26 = vpop.f32.mrb[51].mxu1 }
 0xfb6   : > { %v25398_v56 = vpop.f32.mrb[52].mxu1 }
 0xfb7   : > { %v12992_v44 = vpop.f32.mrb[53].mxu1 }
 0xfba   : > { %v25400_v40 = vpop.f32.mrb[54].mxu1 }
 0xfbb   : > { %v12997_v1 = vpop.f32.mrb[55].mxu1 }
 0xfbe   : > { %v25402_v2 = vpop.f32.mrb[56].mxu1 }
 0xfbf   : > { %v13002_v38 = vpop.f32.mrb[57].mxu1 }
 0xfc2   : > { %v25404_v54 = vpop.f32.mrb[58].mxu1 }
 0xfc3   : > { %v13007_v0 = vpop.f32.mrb[59].mxu1 }
 0xfc6   : > { %v25406_v12 = vpop.f32.mrb[60].mxu1 }
 0xfc7   : > { %v13012_v37 = vpop.f32.mrb[61].mxu1 }
 0xfec   : > { %v19849_v27 = vpop.f32.mrb[90].mxu0 }
 0xfed   : > { %v13086_v11 = vadd.f32 %v19849_v27, %v25312_v18  ;;  %v13080_v4 = vpop.f32.mrb[91].mxu0 }
 0xfee   : > { %v13081_v52 = vadd.f32 %v13080_v4, %v25306_v47 }
 0xff0   : > { %v19852_v24 = vpop.f32.mrb[92].mxu0  ;;  %19943 = vmatprep.mubr.msk.f32.mxu0 %vm6256_vm3, %v13081_v52 }
 0xff1   : > { %v13090_v3 = vpop.f32.mrb[93].mxu0  ;;  %19944 = vmatmul.mubr.msk.f32.vlgmr.msra.gmra.mrb[202].mxu0 %vm6256_vm3, %v13086_v11  ;;  %v13096_v9 = vadd.f32 %v19852_v24, %v25318_v19 }
 0xff2   : > { %v13091_v8 = vadd.f32 %v13090_v3, %v25316_v46 }
 0xff4   : > { %v19855_v60 = vpop.f32.mrb[94].mxu0  ;;  %19946 = vmatprep.mubr.msk.f32.mxu0 %vm6256_vm3, %v13091_v8 }
 0xff5   : > { %v13100_v16 = vpop.f32.mrb[95].mxu0  ;;  %19947 = vmatmul.mubr.msk.f32.gmra.mrb[204].mxu0 %vm6256_vm3, %v13096_v9  ;;  %v13106_v18 = vadd.f32 %v19855_v60, %v25322_v21 }
 0xff6   : > { %v13101_v47 = vadd.f32 %v13100_v16, %v25320_v17 }
 0xff8   : > { %v19858_v26 = vpop.f32.mrb[96].mxu0  ;;  %19949 = vmatprep.mubr.msk.f32.mxu0 %vm6256_vm3, %v13101_v47 }
 0xff9   : > { %v13110_v44 = vpop.f32.mrb[97].mxu0  ;;  %19950 = vmatmul.mubr.msk.f32.gmra.mrb[206].mxu0 %vm6256_vm3, %v13106_v18  ;;  %v13116_v19 = vadd.f32 %v19858_v26, %v25326_v35 }
 0xffa   : > { %v13111_v46 = vadd.f32 %v13110_v44, %v25324_v39 }
 0xffc   : > { %v19861_v1 = vpop.f32.mrb[98].mxu0  ;;  %19952 = vmatprep.mubr.msk.f32.mxu0 %vm6256_vm3, %v13111_v46 }
 0xffd   : > { %v13120_v38 = vpop.f32.mrb[99].mxu0  ;;  %19953 = vmatmul.mubr.msk.f32.gmra.mrb[208].mxu0 %vm6256_vm3, %v13116_v19  ;;  %v13126_v21 = vadd.f32 %v19861_v1, %v25330_v43 }
 0xffe   : > { %v13121_v17 = vadd.f32 %v13120_v38, %v25328_v15 }
0x1000   : > { %v19864_v0 = vpop.f32.mrb[100].mxu0  ;;  %19955 = vmatprep.mubr.msk.f32.mxu0 %vm6256_vm3, %v13121_v17 }
0x1001   : > { %v13130_v37 = vpop.f32.mrb[101].mxu0  ;;  %19956 = vmatmul.mubr.msk.f32.gmra.mrb[210].mxu0 %vm6256_vm3, %v13126_v21  ;;  %v13136_v35 = vadd.f32 %v19864_v0, %v25334_v20 }
0x1002   : > { %v13131_v39 = vadd.f32 %v13130_v37, %v25332_v28 }
0x1004   : > { %v19867_v27 = vpop.f32.mrb[102].mxu0  ;;  %19958 = vmatprep.mubr.msk.f32.mxu0 %vm6256_vm3, %v13131_v39 }
0x1005   : > { %v13140_v11 = vpop.f32.mrb[103].mxu0  ;;  %19959 = vmatmul.mubr.msk.f32.gmra.mrb[212].mxu0 %vm6256_vm3, %v13136_v35  ;;  %v13146_v43 = vadd.f32 %v19867_v27, %v25338_v63 }
0x1006   : > { %v13141_v15 = vadd.f32 %v13140_v11, %v25336_v5 }
0x1008   : > { %v19870_v4 = vpop.f32.mrb[104].mxu0  ;;  %19961 = vmatprep.mubr.msk.f32.mxu0 %vm6256_vm3, %v13141_v15 }
0x1009   : > { %v13150_v52 = vpop.f32.mrb[105].mxu0  ;;  %19962 = vmatmul.mubr.msk.f32.gmra.mrb[214].mxu0 %vm6256_vm3, %v13146_v43  ;;  %v13156_v20 = vadd.f32 %v19870_v4, %v25342_v59 }
0x100a   : > { %v13151_v28 = vadd.f32 %v13150_v52, %v25340_v33 }
0x100c   : > { %v19873_v24 = vpop.f32.mrb[106].mxu0  ;;  %19964 = vmatprep.mubr.msk.f32.mxu0 %vm6256_vm3, %v13151_v28 }
0x100d   : > { %v13160_v3 = vpop.f32.mrb[107].mxu0  ;;  %19965 = vmatmul.mubr.msk.f32.gmra.mrb[216].mxu0 %vm6256_vm3, %v13156_v20  ;;  %v13166_v63 = vadd.f32 %v19873_v24, %v25346_v53 }
0x100e   : > { %v13161_v5 = vadd.f32 %v13160_v3, %v25344_v58 }
0x1010   : > { %v19876_v9 = vpop.f32.mrb[108].mxu0  ;;  %19967 = vmatprep.mubr.msk.f32.mxu0 %vm6256_vm3, %v13161_v5 }
0x1011   : > { %v13170_v8 = vpop.f32.mrb[109].mxu0  ;;  %19968 = vmatmul.mubr.msk.f32.gmra.mrb[218].mxu0 %vm6256_vm3, %v13166_v63  ;;  %v13176_v59 = vadd.f32 %v19876_v9, %v25350_v51  ;;  %v14214_v9 = vld [vmem:[#allocation13 + $0x8] sm:$0xff] }
0x1012   : > { %v13171_v33 = vadd.f32 %v13170_v8, %v25348_v62  ;;  %14709 = vmatprep.mubr.f32.mxu1 %v14214_v9  ;;  %v13885_v8 = vpop.permute.xlu1 %13884 }
0x1014   : > { %v19879_v60 = vpop.f32.mrb[110].mxu0  ;;  %19970 = vmatprep.mubr.msk.f32.mxu0 %vm6256_vm3, %v13171_v33 }
0x1015   : > { %v13180_v16 = vpop.f32.mrb[111].mxu0  ;;  %19971 = vmatmul.mubr.msk.f32.gmra.mrb[220].mxu0 %vm6256_vm3, %v13176_v59  ;;  %v13186_v53 = vadd.f32 %v19879_v60, %v25354_v25 }
0x1016   : > { %v13181_v58 = vadd.f32 %v13180_v16, %v25352_v6  ;;  %v13895_v59 = vpop.permute.xlu1 %13894 }
0x1018   : > { %v19882_v18 = vpop.f32.mrb[112].mxu0  ;;  %19973 = vmatprep.mubr.msk.f32.mxu0 %vm6256_vm3, %v13181_v58  ;;  %v14215_v58 = vld [vmem:[#allocation13 + $0x10] sm:$0xff] }
0x1019   : > { %v13190_v47 = vpop.f32.mrb[113].mxu0  ;;  %19974 = vmatmul.mubr.msk.f32.gmra.mrb[222].mxu0 %vm6256_vm3, %v13186_v53  ;;  %v13196_v51 = vadd.f32 %v19882_v18, %v25358_v50 }
0x101a   : > { %v13191_v62 = vadd.f32 %v13190_v47, %v25356_v14  ;;  %v13905_v33 = vpop.permute.xlu1 %13904 }
0x101c   : > { %v19885_v26 = vpop.f32.mrb[114].mxu0  ;;  %19976 = vmatprep.mubr.msk.f32.mxu0 %vm6256_vm3, %v13191_v62 }
0x101d   : > { %v13200_v44 = vpop.f32.mrb[115].mxu0  ;;  %19977 = vmatmul.mubr.msk.f32.gmra.mrb[224].mxu0 %vm6256_vm3, %v13196_v51  ;;  %v13206_v25 = vadd.f32 %v19885_v26, %v25362_v61 }
0x101e   : > { %v13201_v6 = vadd.f32 %v13200_v44, %v25360_v55  ;;  %v13915_v16 = vpop.permute.xlu1 %13914 }
0x1020   : > { %v19888_v19 = vpop.f32.mrb[116].mxu0  ;;  %19979 = vmatprep.mubr.msk.f32.mxu0 %vm6256_vm3, %v13201_v6 }
0x1021   : > { %v13210_v46 = vpop.f32.mrb[117].mxu0  ;;  %19980 = vmatmul.mubr.msk.f32.gmra.mrb[226].mxu0 %vm6256_vm3, %v13206_v25  ;;  %v13216_v50 = vadd.f32 %v19888_v19, %v25366_v29 }
0x1022   : > { %v13211_v14 = vadd.f32 %v13210_v46, %v25364_v45  ;;  %v13925_v18 = vpop.permute.xlu1 %13924 }
0x1024   : > { %v19891_v1 = vpop.f32.mrb[118].mxu0  ;;  %19982 = vmatprep.mubr.msk.f32.mxu0 %vm6256_vm3, %v13211_v14 }
0x1025   : > { %v13220_v38 = vpop.f32.mrb[119].mxu0  ;;  %19983 = vmatmul.mubr.msk.f32.gmra.mrb[228].mxu0 %vm6256_vm3, %v13216_v50  ;;  %v13226_v61 = vadd.f32 %v19891_v1, %v25370_v30 }
0x1026   : > { %v13221_v55 = vadd.f32 %v13220_v38, %v25368_v57  ;;  %v13935_v47 = vpop.permute.xlu1 %13934 }
0x1028   : > { %v19894_v21 = vpop.f32.mrb[120].mxu0  ;;  %19985 = vmatprep.mubr.msk.f32.mxu0 %vm6256_vm3, %v13221_v55 }
0x1029   : > { %v13230_v17 = vpop.f32.mrb[121].mxu0  ;;  %19986 = vmatmul.mubr.msk.f32.gmra.mrb[230].mxu0 %vm6256_vm3, %v13226_v61  ;;  %v13236_v29 = vadd.f32 %v19894_v21, %v25374_v7 }
0x102a   : > { %v13231_v45 = vadd.f32 %v13230_v17, %v25372_v34  ;;  %v25504_v51 = vpop.permute.xlu1 %13944 }
0x102c   : > { %v19897_v0 = vpop.f32.mrb[122].mxu0  ;;  %19988 = vmatprep.mubr.msk.f32.mxu0 %vm6256_vm3, %v13231_v45 }
0x102d   : > { %v13240_v37 = vpop.f32.mrb[123].mxu0  ;;  %19989 = vmatmul.mubr.msk.f32.gmra.mrb[232].mxu0 %vm6256_vm3, %v13236_v29  ;;  %v13246_v30 = vadd.f32 %v19897_v0, %v25378_v13 }
0x102e   : > { %v13241_v57 = vadd.f32 %v13240_v37, %v25376_v32  ;;  %v25508_v26 = vpop.permute.xlu1 %13954 }
0x1030   : > { %v19900_v35 = vpop.f32.mrb[124].mxu0  ;;  %19991 = vmatprep.mubr.msk.f32.mxu0 %vm6256_vm3, %v13241_v57 }
0x1031   : > { %v13250_v39 = vpop.f32.mrb[125].mxu0  ;;  %19992 = vmatmul.mubr.msk.f32.gmra.mrb[234].mxu0 %vm6256_vm3, %v13246_v30  ;;  %v13256_v7 = vadd.f32 %v19900_v35, %v25382_v36 }
0x1032   : > { %v13251_v34 = vadd.f32 %v13250_v39, %v25380_v31  ;;  %v25512_v46 = vpop.permute.xlu1 %13964 }
0x1034   : > { %v19903_v27 = vpop.f32.mrb[126].mxu0  ;;  %19994 = vmatprep.mubr.msk.f32.mxu0 %vm6256_vm3, %v13251_v34 }
0x1035   : > { %v13260_v11 = vpop.f32.mrb[127].mxu0  ;;  %19995 = vmatmul.mubr.msk.f32.gmra.mrb[236].mxu0 %vm6256_vm3, %v13256_v7  ;;  %v13266_v13 = vadd.f32 %v19903_v27, %v25386_v41  ;;  %v25908_v7 = vmov 0.0|0.0  }
0x1036   : > { %v13261_v32 = vadd.f32 %v13260_v11, %v25384_v48  ;;  %v25516_v0 = vpop.permute.xlu1 %13974 }
0x1038   : > { %v19906_v43 = vpop.f32.mrb[128].mxu0  ;;  %19997 = vmatprep.mubr.msk.f32.mxu0 %vm6256_vm3, %v13261_v32 }
0x1039   : > { %v13270_v15 = vpop.f32.mrb[129].mxu0  ;;  %19998 = vmatmul.mubr.msk.f32.gmra.mrb[238].mxu0 %vm6256_vm3, %v13266_v13  ;;  %v13276_v36 = vadd.f32 %v19906_v43, %v25390_v42 }
0x103a   : > { %v13271_v31 = vadd.f32 %v13270_v15, %v25388_v23 }
0x103c   : > { %v19909_v4 = vpop.f32.mrb[130].mxu0  ;;  %20000 = vmatprep.mubr.msk.f32.mxu0 %vm6256_vm3, %v13271_v31 }
0x103d   : > { %v13280_v52 = vpop.f32.mrb[131].mxu0  ;;  %20001 = vmatmul.mubr.msk.f32.gmra.mrb[240].mxu0 %vm6256_vm3, %v13276_v36  ;;  %v13286_v41 = vadd.f32 %v19909_v4, %v25394_v49  ;;  %v25522_v36 = vpop.permute.xlu1 %13984 }
0x103e   : > { %v13281_v48 = vadd.f32 %v13280_v52, %v25392_v10 }
0x1040   : > { %v19912_v20 = vpop.f32.mrb[132].mxu0  ;;  %20003 = vmatprep.mubr.msk.f32.mxu0 %vm6256_vm3, %v13281_v48 }
0x1041   : > { %v13290_v28 = vpop.f32.mrb[133].mxu0  ;;  %20004 = vmatmul.mubr.msk.f32.gmra.mrb[242].mxu0 %vm6256_vm3, %v13286_v41  ;;  %v13296_v42 = vadd.f32 %v19912_v20, %v25398_v56 }
0x1042   : > { %v13291_v23 = vadd.f32 %v13290_v28, %v25396_v22 }
0x1044   : > { %v19915_v24 = vpop.f32.mrb[134].mxu0  ;;  %20006 = vmatprep.mubr.msk.f32.mxu0 %vm6256_vm3, %v13291_v23 }
0x1045   : > { %v13300_v3 = vpop.f32.mrb[135].mxu0  ;;  %20007 = vmatmul.mubr.msk.f32.gmra.mrb[244].mxu0 %vm6256_vm3, %v13296_v42  ;;  %v13306_v49 = vadd.f32 %v19915_v24, %v25402_v2  ;;  %v13880_v2 = vpop.permute.xlu0 %13879 }
0x1046   : > { %v13301_v10 = vadd.f32 %v13300_v3, %v25400_v40 }
0x1048   : > { %v19918_v63 = vpop.f32.mrb[136].mxu0  ;;  %20009 = vmatprep.mubr.msk.f32.mxu0 %vm6256_vm3, %v13301_v10 }
0x1049   : > { %v13310_v5 = vpop.f32.mrb[137].mxu0  ;;  %20010 = vmatmul.mubr.msk.f32.gmra.mrb[246].mxu0 %vm6256_vm3, %v13306_v49  ;;  %v13316_v56 = vadd.f32 %v19918_v63, %v25406_v12  ;;  %v13890_v40 = vpop.permute.xlu0 %13889 }
0x104a   : > { %v13311_v22 = vadd.f32 %v13310_v5, %v25404_v54  ;;  %v25527_v49 = vpop.permute.xlu1 %13994 }
0x104c   : > { %20012 = vmatprep.mubr.msk.f32.mxu0 %vm6256_vm3, %v13311_v22 }
0x104d   : > { %20013 = vmatmul.mubr.msk.f32.gmra.mrb[248].mxu0 %vm6256_vm3, %v13316_v56  ;;  %v13900_v60 = vpop.permute.xlu0 %13899 }
0x104e   : > { %20047 = vmatprep.mubr.f32.mxu0 %v14215_v58 }
0x1051   : > { %v13910_v53 = vpop.permute.xlu0 %13909 }
0x1055   : > { %v13920_v12 = vpop.permute.xlu0 %13919 }
0x1059   : > { %v13930_v54 = vpop.permute.xlu0 %13929 }
0x105d   : > { %v25506_v62 = vpop.permute.xlu0 %13939 }
0x1061   : > { %v25510_v44 = vpop.permute.xlu0 %13949 }
0x1065   : > { %v25514_v14 = vpop.permute.xlu0 %13959 }
0x1069   : > { %v25518_v57 = vpop.permute.xlu0 %13969 }
0x106d   : > { %v25524_v52 = vpop.permute.xlu0 %13979 }
0x1071   : > { %v25529_v5 = vpop.permute.xlu0 %13989 }
0x10c4   : > { %v19945_v25 = vpop.f32.mrb[202].mxu0 }
0x10c5   : > { %v14118_v6 = vadd.f32 %v19945_v25, %v13885_v8  ;;  %v13542_v19 = vpop.f32.mrb[203].mxu0 }
0x10c6   : > { %v14117_v50 = vadd.f32 %v13880_v2, %v13542_v19 }
0x10c7   : > { %v14166_v1 = vmax.f32 %v14118_v6, 0.0 }
0x10c8   : > { %v14165_v38 = vmax.f32 %v14117_v50, 0.0  ;;  %v19948_v61 = vpop.f32.mrb[204].mxu0 }
0x10c9   : > { %v14120_v55 = vadd.f32 %v19948_v61, %v13895_v59  ;;  %v13552_v21 = vpop.f32.mrb[205].mxu0 }
0x10ca   : > { %v21112_v17 = vpack.c.bf16 %v14166_v1, %v14165_v38  ;;  %v14119_v29 = vadd.f32 %v13890_v40, %v13552_v21 }
0x10cb   : > { %v14168_v45 = vmax.f32 %v14120_v55, 0.0 }
0x10cc   : > { %v14167_v37 = vmax.f32 %v14119_v29, 0.0  ;;  %v19951_v30 = vpop.f32.mrb[206].mxu0  ;;  %21113 = vmatpush1.bf16.msra.mxu1 %v21112_v17 }
0x10cd   : > { %v14122_v35 = vadd.f32 %v19951_v30, %v13905_v33  ;;  %v13562_v39 = vpop.f32.mrb[207].mxu0  ;;  %21114 = vmatprep.subr.bf16.mxu1 %v25908_v7 }
0x10ce   : > { %v21115_v34 = vpack.c.bf16 %v14168_v45, %v14167_v37  ;;  %v14121_v27 = vadd.f32 %v13900_v60, %v13562_v39 }
0x10cf   : > { %v14170_v11 = vmax.f32 %v14122_v35, 0.0 }
0x10d0   : > { %v14169_v13 = vmax.f32 %v14121_v27, 0.0  ;;  %v19954_v32 = vpop.f32.mrb[208].mxu0  ;;  %21116 = vmatpush1.bf16.msra.mxu1 %v21115_v34 }
0x10d1   : > { %v14124_v43 = vadd.f32 %v19954_v32, %v13915_v16  ;;  %v13572_v15 = vpop.f32.mrb[209].mxu0  ;;  %21117 = vmatprep.subr.bf16.mxu1 %v25908_v7  ;;  %v14005_v16 = vpop.permute.xlu1 %14004 }
0x10d2   : > { %v21118_v31 = vpack.c.bf16 %v14170_v11, %v14169_v13  ;;  %v14123_v4 = vadd.f32 %v13910_v53, %v13572_v15 }
0x10d3   : > { %v14172_v41 = vmax.f32 %v14124_v43, 0.0 }
0x10d4   : > { %v14171_v48 = vmax.f32 %v14123_v4, 0.0  ;;  %v19957_v20 = vpop.f32.mrb[210].mxu0  ;;  %21119 = vmatpush1.bf16.msra.mxu1 %v21118_v31 }
0x10d5   : > { %v14126_v28 = vadd.f32 %v19957_v20, %v13925_v18  ;;  %v13582_v42 = vpop.f32.mrb[211].mxu0  ;;  %21120 = vmatprep.subr.bf16.mxu1 %v25908_v7  ;;  %v14000_v18 = vpop.permute.xlu0 %13999 }
0x10d6   : > { %v21121_v23 = vpack.c.bf16 %v14172_v41, %v14171_v48  ;;  %v14125_v24 = vadd.f32 %v13920_v12, %v13582_v42  ;;  %v14015_v1 = vpop.permute.xlu1 %14014 }
0x10d7   : > { %v14174_v3 = vmax.f32 %v14126_v28, 0.0 }
0x10d8   : > { %v14173_v10 = vmax.f32 %v14125_v24, 0.0  ;;  %v19960_v63 = vpop.f32.mrb[212].mxu0  ;;  %21122 = vmatpush1.bf16.msra.mxu1 %v21121_v23 }
0x10d9   : > { %v14128_v56 = vadd.f32 %v19960_v63, %v13935_v47  ;;  %v13592_v22 = vpop.f32.mrb[213].mxu0  ;;  %21123 = vmatprep.subr.bf16.mxu1 %v25908_v7  ;;  %v14010_v55 = vpop.permute.xlu0 %14009 }
0x10da   : > { %v21124_v9 = vpack.c.bf16 %v14174_v3, %v14173_v10  ;;  %v14127_v8 = vadd.f32 %v13930_v54, %v13592_v22  ;;  %v14025_v35 = vpop.permute.xlu1 %14024 }
0x10db   : > { %v14176_v2 = vmax.f32 %v14128_v56, 0.0 }
0x10dc   : > { %v14175_v59 = vmax.f32 %v14127_v8, 0.0  ;;  %v19963_v40 = vpop.f32.mrb[214].mxu0  ;;  %21125 = vmatpush1.bf16.msra.mxu1 %v21124_v9 }
0x10dd   : > { %v14130_v33 = vadd.f32 %v19963_v40, %v25504_v51  ;;  %v13602_v60 = vpop.f32.mrb[215].mxu0  ;;  %21126 = vmatprep.subr.bf16.mxu1 %v25908_v7 }
0x10de   : > { %v21127_v53 = vpack.c.bf16 %v14176_v2, %v14175_v59  ;;  %v14129_v58 = vadd.f32 %v25506_v62, %v13602_v60  ;;  %v14035_v31 = vpop.permute.xlu1 %14034 }
0x10df   : > { %v14178_v12 = vmax.f32 %v14130_v33, 0.0 }
0x10e0   : > { %v14177_v47 = vmax.f32 %v14129_v58, 0.0  ;;  %v19966_v25 = vpop.f32.mrb[216].mxu0  ;;  %21128 = vmatpush1.bf16.msra.mxu1 %v21127_v53 }
0x10e1   : > { %v14132_v54 = vadd.f32 %v19966_v25, %v25508_v26  ;;  %v13612_v6 = vpop.f32.mrb[217].mxu0  ;;  %21129 = vmatprep.subr.bf16.mxu1 %v25908_v7 }
0x10e2   : > { %v21130_v19 = vpack.c.bf16 %v14178_v12, %v14177_v47  ;;  %v14131_v51 = vadd.f32 %v25510_v44, %v13612_v6  ;;  %v14045_v10 = vpop.permute.xlu1 %14044 }
0x10e3   : > { %v14180_v50 = vmax.f32 %v14132_v54, 0.0 }
0x10e4   : > { %v14179_v38 = vmax.f32 %v14131_v51, 0.0  ;;  %v19969_v61 = vpop.f32.mrb[218].mxu0  ;;  %21131 = vmatpush1.bf16.msra.mxu1 %v21130_v19 }
0x10e5   : > { %v14134_v62 = vadd.f32 %v19969_v61, %v25512_v46  ;;  %v13622_v21 = vpop.f32.mrb[219].mxu0  ;;  %21132 = vmatprep.subr.bf16.mxu1 %v25908_v7  ;;  %v14020_v46 = vpop.permute.xlu0 %14019 }
0x10e6   : > { %v21133_v17 = vpack.c.bf16 %v14180_v50, %v14179_v38  ;;  %v14133_v26 = vadd.f32 %v25514_v14, %v13622_v21  ;;  %v14055_v60 = vpop.permute.xlu1 %14054 }
0x10e7   : > { %v14182_v29 = vmax.f32 %v14134_v62, 0.0 }
0x10e8   : > { %v14181_v45 = vmax.f32 %v14133_v26, 0.0  ;;  %v19972_v37 = vpop.f32.mrb[220].mxu0  ;;  %21134 = vmatpush1.bf16.msra.mxu1 %v21133_v17 }
0x10e9   : > { %v14136_v44 = vadd.f32 %v19972_v37, %v25516_v0  ;;  %v13632_v30 = vpop.f32.mrb[221].mxu0  ;;  %21135 = vmatprep.subr.bf16.mxu1 %v25908_v7  ;;  %v14030_v48 = vpop.permute.xlu0 %14029 }
0x10ea   : > { %v21136_v39 = vpack.c.bf16 %v14182_v29, %v14181_v45  ;;  %v14135_v34 = vadd.f32 %v25518_v57, %v13632_v30 }
0x10eb   : > { %v14184_v27 = vmax.f32 %v14136_v44, 0.0 }
0x10ec   : > { %v14183_v11 = vmax.f32 %v14135_v34, 0.0  ;;  %v19975_v13 = vpop.f32.mrb[222].mxu0  ;;  %21137 = vmatpush1.bf16.msra.mxu1 %v21136_v39  ;;  %v14213_v34 = vld [vmem:[#allocation13] sm:$0xff] }
0x10ed   : > { %v14138_v14 = vadd.f32 %v19975_v13, %v25522_v36  ;;  %v13642_v32 = vpop.f32.mrb[223].mxu0  ;;  %21138 = vmatprep.subr.bf16.mxu1 %v25908_v7  ;;  %v14040_v22 = vpop.permute.xlu0 %14039  ;;  %v14217_v13 = vld [vmem:[#allocation13 + $0x20] sm:$0xff] }
0x10ee   : > { %v21139_v43 = vpack.c.bf16 %v14184_v27, %v14183_v11  ;;  %v14137_v0 = vadd.f32 %v25524_v52, %v13642_v32 }
0x10ef   : > { %v14186_v15 = vmax.f32 %v14138_v14, 0.0 }
0x10f0   : > { %v14185_v4 = vmax.f32 %v14137_v0, 0.0  ;;  %v19978_v41 = vpop.f32.mrb[224].mxu0  ;;  %21140 = vmatpush1.bf16.msra.mxu1 %v21139_v43 }
0x10f1   : > { %v14140_v57 = vadd.f32 %v19978_v41, %v25527_v49  ;;  %v13652_v20 = vpop.f32.mrb[225].mxu0  ;;  %21141 = vmatprep.subr.bf16.mxu1 %v25908_v7  ;;  %v14050_v58 = vpop.permute.xlu0 %14049  ;;  %v14220_v41 = vld [vmem:[#allocation13 + $0x38] sm:$0xff] }
0x10f2   : > { %v21142_v28 = vpack.c.bf16 %v14186_v15, %v14185_v4  ;;  %v14139_v36 = vadd.f32 %v25529_v5, %v13652_v20 }
0x10f3   : > { %v14188_v42 = vmax.f32 %v14140_v57, 0.0 }
0x10f4   : > { %v14187_v23 = vmax.f32 %v14139_v36, 0.0  ;;  %v19981_v24 = vpop.f32.mrb[226].mxu0  ;;  %21143 = vmatpush1.bf16.msra.mxu1 %v21142_v28 }
0x10f5   : > { %v14142_v3 = vadd.f32 %v19981_v24, %v14005_v16  ;;  %v13662_v52 = vpop.f32.mrb[227].mxu0  ;;  %21144 = vmatprep.subr.bf16.mxu1 %v25908_v7  ;;  %v14219_v24 = vld [vmem:[#allocation13 + $0x30] sm:$0xff] }
0x10f6   : > { %v21145_v63 = vpack.c.bf16 %v14188_v42, %v14187_v23  ;;  %v14141_v56 = vadd.f32 %v14000_v18, %v13662_v52 }
0x10f7   : > { %v14190_v9 = vmax.f32 %v14142_v3, 0.0 }
0x10f8   : > { %v14189_v49 = vmax.f32 %v14141_v56, 0.0  ;;  %v19984_v8 = vpop.f32.mrb[228].mxu0  ;;  %21146 = vmatpush1.bf16.msra.mxu1 %v21145_v63 }
0x10f9   : > { %v14144_v2 = vadd.f32 %v19984_v8, %v14015_v1  ;;  %v13672_v59 = vpop.f32.mrb[229].mxu0  ;;  %21147 = vmatprep.subr.bf16.mxu1 %v25908_v7  ;;  %v14065_v1 = vpop.permute.xlu1 %14064 }
0x10fa   : > { %v21148_v5 = vpack.c.bf16 %v14190_v9, %v14189_v49  ;;  %v14143_v40 = vadd.f32 %v14010_v55, %v13672_v59  ;;  %v14060_v55 = vpop.permute.xlu0 %14059 }
0x10fb   : > { %v14192_v33 = vmax.f32 %v14144_v2, 0.0  ;;  %v14222_v2 = vld [vmem:[#allocation13 + $0x48] sm:$0xff] }
0x10fc   : > { %v14191_v16 = vmax.f32 %v14143_v40, 0.0  ;;  %v19987_v53 = vpop.f32.mrb[230].mxu0  ;;  %21149 = vmatpush1.bf16.msra.mxu1 %v21148_v5 }
0x10fd   : > { %v14146_v12 = vadd.f32 %v19987_v53, %v14025_v35  ;;  %v13682_v47 = vpop.f32.mrb[231].mxu0  ;;  %21150 = vmatprep.subr.bf16.mxu1 %v25908_v7  ;;  %v14075_v30 = vpop.permute.xlu1 %14074 }
0x10fe   : > { %v21151_v18 = vpack.c.bf16 %v14192_v33, %v14191_v16  ;;  %v14145_v25 = vadd.f32 %v14020_v46, %v13682_v47  ;;  %v14070_v46 = vpop.permute.xlu0 %14069  ;;  %v14226_v33 = vld [vmem:[#allocation13 + $0x68] sm:$0xff]  ;;  %v14225_v47 = vld [vmem:[#allocation13 + $0x60] sm:$0xff] }
0x10ff   : > { %v14194_v54 = vmax.f32 %v14146_v12, 0.0 }
0x1100   : > { %v14193_v6 = vmax.f32 %v14145_v25, 0.0  ;;  %v19990_v19 = vpop.f32.mrb[232].mxu0  ;;  %21152 = vmatpush1.bf16.msra.mxu1 %v21151_v18 }
0x1101   : > { %v14148_v51 = vadd.f32 %v19990_v19, %v14035_v31  ;;  %v13692_v50 = vpop.f32.mrb[233].mxu0  ;;  %21153 = vmatprep.subr.bf16.mxu1 %v25908_v7 }
0x1102   : > { %v21154_v38 = vpack.c.bf16 %v14194_v54, %v14193_v6  ;;  %v14147_v61 = vadd.f32 %v14030_v48, %v13692_v50  ;;  %v14085_v48 = vpop.permute.xlu1 %14084  ;;  %v14080_v28 = vpop.permute.xlu0 %14079  ;;  %v14229_v54 = vld [vmem:[#allocation13 + $0x80] sm:$0xff] }
0x1103   : > { %v14196_v62 = vmax.f32 %v14148_v51, 0.0 }
0x1104   : > { %v14195_v21 = vmax.f32 %v14147_v61, 0.0  ;;  %v19993_v17 = vpop.f32.mrb[234].mxu0  ;;  %21155 = vmatpush1.bf16.msra.mxu1 %v21154_v38 }
0x1105   : > { %v14150_v26 = vadd.f32 %v19993_v17, %v14045_v10  ;;  %v13702_v29 = vpop.f32.mrb[235].mxu0  ;;  %21156 = vmatprep.subr.bf16.mxu1 %v25908_v7  ;;  %v14216_v7 = vld [vmem:[#allocation13 + $0x18] sm:$0xff]  ;;  %v14223_v10 = vld [vmem:[#allocation13 + $0x50] sm:$0xff] }
0x1106   : > { %v21157_v45 = vpack.c.bf16 %v14196_v62, %v14195_v21  ;;  %v14149_v37 = vadd.f32 %v14040_v22, %v13702_v29  ;;  %v14095_v9 = vpop.permute.xlu1 %14094  ;;  %v14090_v59 = vpop.permute.xlu0 %14089  ;;  %v14232_v17 = vld [vmem:[#allocation13 + $0x98] sm:$0xff] }
0x1107   : > { %v14198_v44 = vmax.f32 %v14150_v26, 0.0 }
0x1108   : > { %v14197_v35 = vmax.f32 %v14149_v37, 0.0  ;;  %v19996_v39 = vpop.f32.mrb[236].mxu0  ;;  %21158 = vmatpush1.bf16.msra.mxu1 %v21157_v45 }
0x1109   : > { %v14152_v27 = vadd.f32 %v19996_v39, %v14055_v60  ;;  %v13712_v11 = vpop.f32.mrb[237].mxu0 }
0x110a   : > { %v21159_v14 = vpack.c.bf16 %v14198_v44, %v14197_v35  ;;  %v14151_v32 = vadd.f32 %v14050_v58, %v13712_v11  ;;  %v14105_v6 = vpop.permute.xlu1 %14104  ;;  %v14100_v50 = vpop.permute.xlu0 %14099  ;;  %v14231_v35 = vld [vmem:[#allocation13 + $0x90] sm:$0xff] }
0x110b   : > { %v14200_v43 = vmax.f32 %v14152_v27, 0.0  ;;  %14710 = vmatmul.mubr.f32.vlgmr.msra.gmra.mrb[62].mxu1 %v14213_v34  ;;  %v14235_v27 = vld [vmem:[#allocation13 + $0xb0] sm:$0xff] }
0x110c   : > { %v14199_v0 = vmax.f32 %v14151_v32, 0.0  ;;  %v19999_v15 = vpop.f32.mrb[238].mxu0  ;;  %21160 = vmatprep.subr.bf16.mxu0 %v21159_v14  ;;  %14714 = vmatprep.mubr.f32.mxu1 %v14217_v13 }
0x110d   : > { %v14154_v31 = vadd.f32 %v19999_v15, %v14065_v1  ;;  %v13722_v4 = vpop.f32.mrb[239].mxu0  ;;  %21162 = vmatpush3.bf16.msra.mxu0 %v21159_v14 }
0x110e   : > { %v21163_v57 = vpack.c.bf16 %v14200_v43, %v14199_v0  ;;  %v14153_v20 = vadd.f32 %v14060_v55, %v13722_v4  ;;  %v14228_v55 = vld [vmem:[#allocation13 + $0x78] sm:$0xff]  ;;  %v14115_v37 = vpop.permute.xlu1 %14114  ;;  %v14110_v39 = vpop.permute.xlu0 %14109  ;;  %v14234_v43 = vld [vmem:[#allocation13 + $0xa8] sm:$0xff]  ;;  %v14241_v4 = vld [vmem:[#allocation13 + $0xe0] sm:$0xff] }
0x110f   : > { %v14202_v36 = vmax.f32 %v14154_v31, 0.0  ;;  %14715 = vmatmul.mubr.f32.gmra.mrb[64].mxu1 %v14216_v7  ;;  %v14238_v0 = vld [vmem:[#allocation13 + $0xc8] sm:$0xff]  ;;  %v14237_v7 = vld [vmem:[#allocation13 + $0xc0] sm:$0xff] }
0x1110   : > { %v14201_v42 = vmax.f32 %v14153_v20, 0.0  ;;  %v20002_v23 = vpop.f32.mrb[240].mxu0  ;;  %21164 = vmatprep.subr.bf16.mxu0 %v21163_v57  ;;  %14719 = vmatprep.mubr.f32.mxu1 %v14220_v41  ;;  %v14218_v31 = vld [vmem:[#allocation13 + $0x28] sm:$0xff]  ;;  %v14221_v41 = vld [vmem:[#allocation13 + $0x40] sm:$0xff]  ;;  %v14244_v20 = vld [vmem:[#allocation13 + $0xf8] sm:$0xff] }
0x1111   : > { %v14156_v3 = vadd.f32 %v20002_v23, %v14075_v30  ;;  %v13732_v52 = vpop.f32.mrb[241].mxu0  ;;  %21166 = vmatpush3.bf16.msra.mxu0 %v21163_v57  ;;  %v14224_v57 = vld [vmem:[#allocation13 + $0x58] sm:$0xff]  ;;  %v14247_v23 = vld [vmem:[#allocation13 + $0x110] sm:$0xff] }
0x1112   : > { %v21167_v63 = vpack.c.bf16 %v14202_v36, %v14201_v42  ;;  %v14155_v56 = vadd.f32 %v14070_v46, %v13732_v52  ;;  %v14243_v36 = vld [vmem:[#allocation13 + $0xf0] sm:$0xff]  ;;  %v14230_v42 = vld [vmem:[#allocation13 + $0x88] sm:$0xff]  ;;  %v14236_v52 = vld [vmem:[#allocation13 + $0xb8] sm:$0xff] }
0x1113   : > { %v14204_v22 = vmax.f32 %v14156_v3, 0.0  ;;  %14720 = vmatmul.mubr.f32.gmra.mrb[66].mxu1 %v14219_v24  ;;  %v14233_v24 = vld [vmem:[#allocation13 + $0xa0] sm:$0xff]  ;;  %v14246_v3 = vld [vmem:[#allocation13 + $0x108] sm:$0xff] }
0x1114   : > { %v14203_v49 = vmax.f32 %v14155_v56, 0.0  ;;  %v20005_v8 = vpop.f32.mrb[242].mxu0  ;;  %21168 = vmatprep.subr.bf16.mxu0 %v21167_v63  ;;  %14724 = vmatprep.mubr.f32.mxu1 %v14223_v10  ;;  %v14250_v10 = vld [vmem:[#allocation13 + $0x128] sm:$0xff]  ;;  %v14249_v56 = vld [vmem:[#allocation13 + $0x120] sm:$0xff] }
0x1115   : > { %v14158_v5 = vadd.f32 %v20005_v8, %v14085_v48  ;;  %v13742_v40 = vpop.f32.mrb[243].mxu0  ;;  %21170 = vmatpush3.bf16.msra.mxu0 %v21167_v63  ;;  %v14240_v48 = vld [vmem:[#allocation13 + $0xd8] sm:$0xff]  ;;  %v14239_v63 = vld [vmem:[#allocation13 + $0xd0] sm:$0xff] }
0x1116   : > { %v21171_v60 = vpack.c.bf16 %v14204_v22, %v14203_v49  ;;  %v14157_v16 = vadd.f32 %v14080_v28, %v13742_v40  ;;  %v14227_v28 = vld [vmem:[#allocation13 + $0x70] sm:$0xff]  ;;  %v14242_v22 = vld [vmem:[#allocation13 + $0xe8] sm:$0xff]  ;;  %v14245_v49 = vld [vmem:[#allocation13 + $0x100] sm:$0xff] }
0x1117   : > { %v14206_v53 = vmax.f32 %v14158_v5, 0.0  ;;  %14725 = vmatmul.mubr.f32.gmra.mrb[68].mxu1 %v14222_v2  ;;  %v14252_v8 = vld [vmem:[#allocation13 + $0x138] sm:$0xff]  ;;  %v14251_v5 = vld [vmem:[#allocation13 + $0x130] sm:$0xff] }
0x1118   : > { %v14205_v58 = vmax.f32 %v14157_v16, 0.0  ;;  %v20008_v12 = vpop.f32.mrb[244].mxu0  ;;  %21172 = vmatprep.subr.bf16.mxu0 %v21171_v60  ;;  %14729 = vmatprep.mubr.f32.mxu1 %v14226_v33  ;;  %v14248_v2 = vld [vmem:[#allocation13 + $0x118] sm:$0xff]  ;;  %v14255_v40 = vld [vmem:[#allocation13 + $0x150] sm:$0xff]  ;;  %v14254_v33 = vld [vmem:[#allocation13 + $0x148] sm:$0xff] }
0x1119   : > { %v14160_v18 = vadd.f32 %v20008_v12, %v14095_v9  ;;  %v13752_v25 = vpop.f32.mrb[245].mxu0  ;;  %21174 = vmatpush3.bf16.msra.mxu0 %v21171_v60  ;;  %v14253_v9 = vld [vmem:[#allocation13 + $0x140] sm:$0xff]  ;;  %v14259_v60 = vld [vmem:[#allocation13 + $0x170] sm:$0xff]  ;;  %v14262_v12 = vld [vmem:[#allocation13 + $0x188] sm:$0xff] }
0x111a   : > { %v21175_v19 = vpack.c.bf16 %v14206_v53, %v14205_v58  ;;  %v14159_v51 = vadd.f32 %v14090_v59, %v13752_v25  ;;  %v14256_v59 = vld [vmem:[#allocation13 + $0x158] sm:$0xff]  ;;  %v14257_v16 = vld [vmem:[#allocation13 + $0x160] sm:$0xff]  ;;  %v14258_v53 = vld [vmem:[#allocation13 + $0x168] sm:$0xff] }
0x111b   : > { %v14208_v1 = vmax.f32 %v14160_v18, 0.0  ;;  %14730 = vmatmul.mubr.f32.gmra.mrb[70].mxu1 %v14225_v47  ;;  %v14260_v58 = vld [vmem:[#allocation13 + $0x178] sm:$0xff]  ;;  %v14263_v47 = vld [vmem:[#allocation13 + $0x190] sm:$0xff]  ;;  %v14261_v18 = vld [vmem:[#allocation13 + $0x180] sm:$0xff] }
0x111c   : > { %v14207_v38 = vmax.f32 %v14159_v51, 0.0  ;;  %v20011_v61 = vpop.f32.mrb[246].mxu0  ;;  %21176 = vmatprep.subr.bf16.mxu0 %v21175_v19  ;;  %14734 = vmatprep.mubr.f32.mxu1 %v14229_v54  ;;  %v14266_v25 = vld [vmem:[#allocation13 + $0x1a8] sm:$0xff]  ;;  %v14265_v54 = vld [vmem:[#allocation13 + $0x1a0] sm:$0xff]  ;;  %v14268_v51 = vld [vmem:[#allocation13 + $0x1b8] sm:$0xff] }
0x111d   : > { %v14162_v62 = vadd.f32 %v20011_v61, %v14105_v6  ;;  %v13762_v21 = vpop.f32.mrb[247].mxu0  ;;  %21178 = vmatpush3.bf16.msra.mxu0 %v21175_v19  ;;  %v14269_v6 = vld [vmem:[#allocation13 + $0x1c0] sm:$0xff]  ;;  %v14264_v19 = vld [vmem:[#allocation13 + $0x198] sm:$0xff]  ;;  %v14271_v61 = vld [vmem:[#allocation13 + $0x1d0] sm:$0xff] }
0x111e   : > { %v21179_v26 = vpack.c.bf16 %v14208_v1, %v14207_v38  ;;  %v14161_v29 = vadd.f32 %v14100_v50, %v13762_v21  ;;  %v14272_v50 = vld [vmem:[#allocation13 + $0x1d8] sm:$0xff]  ;;  %v14275_v1 = vld [vmem:[#allocation13 + $0x1f0] sm:$0xff]  ;;  %v14270_v21 = vld [vmem:[#allocation13 + $0x1c8] sm:$0xff] }
0x111f   : > { %v14210_v45 = vmax.f32 %v14162_v62, 0.0  ;;  %14735 = vmatmul.mubr.f32.gmra.mrb[72].mxu1 %v14228_v55  ;;  %v14267_v38 = vld [vmem:[#allocation13 + $0x1b0] sm:$0xff]  ;;  %v14278_v55 = vld [vmem:[#allocation13 + $0x208] sm:$0xff]  ;;  %v14281_v62 = vld [vmem:[#allocation13 + $0x220] sm:$0xff] }
0x1120   : > { %v14209_v44 = vmax.f32 %v14161_v29, 0.0  ;;  %v20014_v30 = vpop.f32.mrb[248].mxu0  ;;  %21180 = vmatprep.subr.bf16.mxu0 %v21179_v26  ;;  %14739 = vmatprep.mubr.f32.mxu1 %v14232_v17  ;;  %v14274_v17 = vld [vmem:[#allocation13 + $0x1e8] sm:$0xff]  ;;  %v14287_v29 = vld [vmem:[#allocation13 + $0x250] sm:$0xff] }
0x1121   : > { %v14164_v34 = vadd.f32 %v20014_v30, %v14115_v37  ;;  %v13772_v46 = vpop.f32.mrb[249].mxu0  ;;  %21182 = vmatpush3.bf16.msra.mxu0 %v21179_v26  ;;  %v14284_v26 = vld [vmem:[#allocation13 + $0x238] sm:$0xff]  ;;  %v14277_v37 = vld [vmem:[#allocation13 + $0x200] sm:$0xff] }
0x1122   : > { %v21183_v11 = vpack.c.bf16 %v14210_v45, %v14209_v44  ;;  %v14163_v13 = vadd.f32 %v14110_v39, %v13772_v46  ;;  %v14273_v45 = vld [vmem:[#allocation13 + $0x1e0] sm:$0xff]  ;;  %v14290_v44 = vld [vmem:[#allocation13 + $0x268] sm:$0xff]  ;;  %v14280_v39 = vld [vmem:[#allocation13 + $0x218] sm:$0xff] }
0x1123   : > { %v14212_v14 = vmax.f32 %v14164_v34, 0.0  ;;  %14740 = vmatmul.mubr.f32.gmra.mrb[74].mxu1 %v14231_v35  ;;  %v14293_v30 = vld [vmem:[#allocation13 + $0x280] sm:$0xff]  ;;  %v14276_v35 = vld [vmem:[#allocation13 + $0x1f8] sm:$0xff]  ;;  %v14299_v46 = vld [vmem:[#allocation13 + $0x2b0] sm:$0xff] }
0x1124   : > { %v14211_v32 = vmax.f32 %v14163_v13, 0.0  ;;  %21184 = vmatprep.subr.bf16.mxu0 %v21183_v11  ;;  %14744 = vmatprep.mubr.f32.mxu1 %v14235_v27  ;;  %v14296_v34 = vld [vmem:[#allocation13 + $0x298] sm:$0xff]  ;;  %v14279_v27 = vld [vmem:[#allocation13 + $0x210] sm:$0xff]  ;;  %v14302_v13 = vld [vmem:[#allocation13 + $0x2c8] sm:$0xff] }
0x1125   : > { %21186 = vmatpush3.bf16.msra.mxu0 %v21183_v11  ;;  %v14283_v11 = vld [vmem:[#allocation13 + $0x230] sm:$0xff] }
0x1126   : > { %v21187_v15 = vpack.c.bf16 %v14212_v14, %v14211_v32  ;;  %v14305_v14 = vld [vmem:[#allocation13 + $0x2e0] sm:$0xff]  ;;  %v14282_v32 = vld [vmem:[#allocation13 + $0x228] sm:$0xff] }
0x1127   : > { %14745 = vmatmul.mubr.f32.gmra.mrb[76].mxu1 %v14234_v43  ;;  %v14286_v43 = vld [vmem:[#allocation13 + $0x248] sm:$0xff] }
0x1128   : > { %21188 = vmatprep.subr.bf16.mxu0 %v21187_v15  ;;  %14749 = vmatprep.mubr.f32.mxu1 %v14238_v0  ;;  %v14308_v0 = vld [vmem:[#allocation13 + $0x2f8] sm:$0xff] }
0x1129   : > { %21190 = vmatpush3.bf16.msra.mxu0 %v21187_v15  ;;  %v14311_v15 = vld [vmem:[#allocation13 + $0x310] sm:$0xff] }
0x112b   : > { %14750 = vmatmul.mubr.f32.gmra.mrb[78].mxu1 %v14237_v7  ;;  %v14285_v7 = vld [vmem:[#allocation13 + $0x240] sm:$0xff] }
0x112c   : > { %20048 = vmatmul.mubr.f32.vlgmr.msra.gmra.mrb[138].mxu0 %v14218_v31  ;;  %14754 = vmatprep.mubr.f32.mxu1 %v14241_v4  ;;  %v14289_v31 = vld [vmem:[#allocation13 + $0x260] sm:$0xff]  ;;  %v14314_v4 = vld [vmem:[#allocation13 + $0x328] sm:$0xff] }
0x112d   : > { %20050 = vmatprep.mubr.f32.mxu0 %v14221_v41  ;;  %v14317_v41 = vld [vmem:[#allocation13 + $0x340] sm:$0xff] }
0x112f   : > { %14755 = vmatmul.mubr.f32.gmra.mrb[80].mxu1 %v14240_v48  ;;  %v14288_v48 = vld [vmem:[#allocation13 + $0x258] sm:$0xff] }
0x1130   : > { %20051 = vmatmul.mubr.f32.gmra.mrb[140].mxu0 %v14224_v57  ;;  %14759 = vmatprep.mubr.f32.mxu1 %v14244_v20  ;;  %v14292_v57 = vld [vmem:[#allocation13 + $0x278] sm:$0xff] }
0x1131   : > { %20053 = vmatprep.mubr.f32.mxu0 %v14227_v28  ;;  %v14320_v20 = vld [vmem:[#allocation13 + $0x358] sm:$0xff]  ;;  %v14323_v28 = vld [vmem:[#allocation13 + $0x370] sm:$0xff] }
0x1133   : > { %14760 = vmatmul.mubr.f32.gmra.mrb[82].mxu1 %v14243_v36  ;;  %v14291_v36 = vld [vmem:[#allocation13 + $0x270] sm:$0xff] }
0x1134   : > { %20054 = vmatmul.mubr.f32.gmra.mrb[142].mxu0 %v14230_v42  ;;  %14764 = vmatprep.mubr.f32.mxu1 %v14247_v23  ;;  %v14295_v42 = vld [vmem:[#allocation13 + $0x290] sm:$0xff]  ;;  %v14326_v23 = vld [vmem:[#allocation13 + $0x388] sm:$0xff] }
0x1135   : > { %20056 = vmatprep.mubr.f32.mxu0 %v14233_v24  ;;  %v14329_v24 = vld [vmem:[#allocation13 + $0x3a0] sm:$0xff] }
0x1137   : > { %14765 = vmatmul.mubr.f32.gmra.mrb[84].mxu1 %v14246_v3  ;;  %v14294_v3 = vld [vmem:[#allocation13 + $0x288] sm:$0xff] }
0x1138   : > { %20057 = vmatmul.mubr.f32.gmra.mrb[144].mxu0 %v14236_v52  ;;  %14769 = vmatprep.mubr.f32.mxu1 %v14250_v10  ;;  %v14298_v52 = vld [vmem:[#allocation13 + $0x2a8] sm:$0xff]  ;;  %v14332_v10 = vld [vmem:[#allocation13 + $0x3b8] sm:$0xff] }
0x1139   : > { %20059 = vmatprep.mubr.f32.mxu0 %v14239_v63  ;;  %v14335_v63 = vld [vmem:[#allocation13 + $0x3d0] sm:$0xff] }
0x113b   : > { %14770 = vmatmul.mubr.f32.gmra.mrb[86].mxu1 %v14249_v56  ;;  %v14297_v56 = vld [vmem:[#allocation13 + $0x2a0] sm:$0xff] }
0x113c   : > { %20060 = vmatmul.mubr.f32.gmra.mrb[146].mxu0 %v14242_v22  ;;  %14774 = vmatprep.mubr.f32.mxu1 %v14253_v9  ;;  %v14301_v22 = vld [vmem:[#allocation13 + $0x2c0] sm:$0xff]  ;;  %v14338_v9 = vld [vmem:[#allocation13 + $0x3e8] sm:$0xff] }
0x113d   : > { %20062 = vmatprep.mubr.f32.mxu0 %v14245_v49  ;;  %v14341_v49 = vld [vmem:[#allocation13 + $0x400] sm:$0xff] }
0x113f   : > { %14775 = vmatmul.mubr.f32.gmra.mrb[88].mxu1 %v14252_v8  ;;  %v14300_v8 = vld [vmem:[#allocation13 + $0x2b8] sm:$0xff] }
0x1140   : > { %20063 = vmatmul.mubr.f32.gmra.mrb[148].mxu0 %v14248_v2  ;;  %14779 = vmatprep.mubr.f32.mxu1 %v14256_v59  ;;  %v14304_v2 = vld [vmem:[#allocation13 + $0x2d8] sm:$0xff] }
0x1141   : > { %20065 = vmatprep.mubr.f32.mxu0 %v14251_v5  ;;  %v14344_v59 = vld [vmem:[#allocation13 + $0x418] sm:$0xff]  ;;  %v14347_v5 = vld [vmem:[#allocation13 + $0x430] sm:$0xff] }
0x1143   : > { %14780 = vmatmul.mubr.f32.gmra.mrb[90].mxu1 %v14255_v40  ;;  %v14303_v40 = vld [vmem:[#allocation13 + $0x2d0] sm:$0xff] }
0x1144   : > { %20066 = vmatmul.mubr.f32.gmra.mrb[150].mxu0 %v14254_v33  ;;  %14784 = vmatprep.mubr.f32.mxu1 %v14259_v60  ;;  %v14307_v33 = vld [vmem:[#allocation13 + $0x2f0] sm:$0xff]  ;;  %v14350_v60 = vld [vmem:[#allocation13 + $0x448] sm:$0xff] }
0x1145   : > { %20068 = vmatprep.mubr.f32.mxu0 %v14257_v16  ;;  %v14353_v16 = vld [vmem:[#allocation13 + $0x460] sm:$0xff] }
0x1147   : > { %14785 = vmatmul.mubr.f32.gmra.mrb[92].mxu1 %v14258_v53  ;;  %v14306_v53 = vld [vmem:[#allocation13 + $0x2e8] sm:$0xff] }
0x1148   : > { %20069 = vmatmul.mubr.f32.gmra.mrb[152].mxu0 %v14260_v58  ;;  %14789 = vmatprep.mubr.f32.mxu1 %v14262_v12  ;;  %v14310_v58 = vld [vmem:[#allocation13 + $0x308] sm:$0xff]  ;;  %v14356_v12 = vld [vmem:[#allocation13 + $0x478] sm:$0xff] }
0x1149   : > { %20071 = vmatprep.mubr.f32.mxu0 %v14263_v47  ;;  %v14309_v47 = vld [vmem:[#allocation13 + $0x300] sm:$0xff] }
0x114b   : > { %14790 = vmatmul.mubr.f32.gmra.mrb[94].mxu1 %v14261_v18  ;;  %v14313_v18 = vld [vmem:[#allocation13 + $0x320] sm:$0xff] }
0x114c   : > { %20072 = vmatmul.mubr.f32.gmra.mrb[154].mxu0 %v14266_v25  ;;  %14794 = vmatprep.mubr.f32.mxu1 %v14265_v54  ;;  %v14312_v25 = vld [vmem:[#allocation13 + $0x318] sm:$0xff] }
0x114d   : > { %20074 = vmatprep.mubr.f32.mxu0 %v14269_v6  ;;  %v14316_v54 = vld [vmem:[#allocation13 + $0x338] sm:$0xff]  ;;  %v14315_v6 = vld [vmem:[#allocation13 + $0x330] sm:$0xff] }
0x114f   : > { %14795 = vmatmul.mubr.f32.gmra.mrb[96].mxu1 %v14264_v19  ;;  %v14319_v19 = vld [vmem:[#allocation13 + $0x350] sm:$0xff] }
0x1150   : > { %14799 = vmatprep.mubr.f32.mxu1 %v14268_v51  ;;  %20075 = vmatmul.mubr.f32.gmra.mrb[156].mxu0 %v14272_v50  ;;  %v14318_v51 = vld [vmem:[#allocation13 + $0x348] sm:$0xff] }
0x1151   : > { %20077 = vmatprep.mubr.f32.mxu0 %v14275_v1  ;;  %v14322_v50 = vld [vmem:[#allocation13 + $0x368] sm:$0xff]  ;;  %v14321_v1 = vld [vmem:[#allocation13 + $0x360] sm:$0xff] }
0x1153   : > { %14800 = vmatmul.mubr.f32.gmra.mrb[98].mxu1 %v14267_v38  ;;  %v14325_v38 = vld [vmem:[#allocation13 + $0x380] sm:$0xff] }
0x1154   : > { %14804 = vmatprep.mubr.f32.mxu1 %v14271_v61  ;;  %20078 = vmatmul.mubr.f32.gmra.mrb[158].mxu0 %v14278_v55  ;;  %v14324_v61 = vld [vmem:[#allocation13 + $0x378] sm:$0xff] }
0x1155   : > { %20080 = vmatprep.mubr.f32.mxu0 %v14281_v62  ;;  %v14328_v55 = vld [vmem:[#allocation13 + $0x398] sm:$0xff]  ;;  %v14327_v62 = vld [vmem:[#allocation13 + $0x390] sm:$0xff] }
0x1157   : > { %14805 = vmatmul.mubr.f32.gmra.mrb[100].mxu1 %v14270_v21  ;;  %v14331_v21 = vld [vmem:[#allocation13 + $0x3b0] sm:$0xff] }
0x1158   : > { %14809 = vmatprep.mubr.f32.mxu1 %v14274_v17  ;;  %20081 = vmatmul.mubr.f32.gmra.mrb[160].mxu0 %v14284_v26  ;;  %v14330_v17 = vld [vmem:[#allocation13 + $0x3a8] sm:$0xff] }
0x1159   : > { %20083 = vmatprep.mubr.f32.mxu0 %v14287_v29  ;;  %v14334_v26 = vld [vmem:[#allocation13 + $0x3c8] sm:$0xff]  ;;  %v14333_v29 = vld [vmem:[#allocation13 + $0x3c0] sm:$0xff] }
0x115b   : > { %14810 = vmatmul.mubr.f32.gmra.mrb[102].mxu1 %v14273_v45  ;;  %v14337_v45 = vld [vmem:[#allocation13 + $0x3e0] sm:$0xff] }
0x115c   : > { %14814 = vmatprep.mubr.f32.mxu1 %v14277_v37  ;;  %20084 = vmatmul.mubr.f32.gmra.mrb[162].mxu0 %v14290_v44  ;;  %v14336_v37 = vld [vmem:[#allocation13 + $0x3d8] sm:$0xff] }
0x115d   : > { %20086 = vmatprep.mubr.f32.mxu0 %v14293_v30  ;;  %v14340_v44 = vld [vmem:[#allocation13 + $0x3f8] sm:$0xff]  ;;  %v14339_v30 = vld [vmem:[#allocation13 + $0x3f0] sm:$0xff] }
0x115f   : > { %14815 = vmatmul.mubr.f32.gmra.mrb[104].mxu1 %v14276_v35  ;;  %v14343_v35 = vld [vmem:[#allocation13 + $0x410] sm:$0xff] }
0x1160   : > { %14819 = vmatprep.mubr.f32.mxu1 %v14280_v39  ;;  %20087 = vmatmul.mubr.f32.gmra.mrb[164].mxu0 %v14296_v34  ;;  %v14342_v39 = vld [vmem:[#allocation13 + $0x408] sm:$0xff] }
0x1161   : > { %20089 = vmatprep.mubr.f32.mxu0 %v14299_v46  ;;  %v14346_v34 = vld [vmem:[#allocation13 + $0x428] sm:$0xff]  ;;  %v14345_v46 = vld [vmem:[#allocation13 + $0x420] sm:$0xff] }
0x1163   : > { %14820 = vmatmul.mubr.f32.gmra.mrb[106].mxu1 %v14279_v27  ;;  %v14349_v27 = vld [vmem:[#allocation13 + $0x440] sm:$0xff] }
0x1164   : > { %14824 = vmatprep.mubr.f32.mxu1 %v14283_v11  ;;  %20090 = vmatmul.mubr.f32.gmra.mrb[166].mxu0 %v14302_v13  ;;  %v14348_v11 = vld [vmem:[#allocation13 + $0x438] sm:$0xff] }
0x1165   : > { %20092 = vmatprep.mubr.f32.mxu0 %v14305_v14  ;;  %v14352_v13 = vld [vmem:[#allocation13 + $0x458] sm:$0xff]  ;;  %v14351_v14 = vld [vmem:[#allocation13 + $0x450] sm:$0xff] }
0x1167   : > { %14825 = vmatmul.mubr.f32.gmra.mrb[108].mxu1 %v14282_v32  ;;  %v14355_v32 = vld [vmem:[#allocation13 + $0x470] sm:$0xff] }
0x1168   : > { %14829 = vmatprep.mubr.f32.mxu1 %v14286_v43  ;;  %20093 = vmatmul.mubr.f32.gmra.mrb[168].mxu0 %v14308_v0  ;;  %v14354_v43 = vld [vmem:[#allocation13 + $0x468] sm:$0xff] }
0x1169   : > { %20095 = vmatprep.mubr.f32.mxu0 %v14311_v15 }
0x116b   : > { %14830 = vmatmul.mubr.f32.gmra.mrb[110].mxu1 %v14285_v7 }
0x116c   : > { %14834 = vmatprep.mubr.f32.mxu1 %v14289_v31  ;;  %20096 = vmatmul.mubr.f32.gmra.mrb[170].mxu0 %v14314_v4 }
0x116d   : > { %20098 = vmatprep.mubr.f32.mxu0 %v14317_v41 }
0x116f   : > { %14835 = vmatmul.mubr.f32.gmra.mrb[112].mxu1 %v14288_v48 }
0x1170   : > { %14839 = vmatprep.mubr.f32.mxu1 %v14292_v57  ;;  %20099 = vmatmul.mubr.f32.gmra.mrb[172].mxu0 %v14320_v20  ;;  %v14408_v20 = vpop.permute.xlu0 %14407 }
0x1171   : > { %20101 = vmatprep.mubr.f32.mxu0 %v14323_v28 }
0x1173   : > { %14840 = vmatmul.mubr.f32.gmra.mrb[114].mxu1 %v14291_v36 }
0x1174   : > { %14844 = vmatprep.mubr.f32.mxu1 %v14295_v42  ;;  %20102 = vmatmul.mubr.f32.gmra.mrb[174].mxu0 %v14326_v23  ;;  %v14413_v42 = vpop.permute.xlu1 %14412 }
0x1175   : > { %20104 = vmatprep.mubr.f32.mxu0 %v14329_v24 }
0x1177   : > { %14845 = vmatmul.mubr.f32.gmra.mrb[116].mxu1 %v14294_v3  ;;  %v14418_v3 = vpop.permute.xlu0 %14417 }
0x1178   : > { %14849 = vmatprep.mubr.f32.mxu1 %v14298_v52  ;;  %20105 = vmatmul.mubr.f32.gmra.mrb[176].mxu0 %v14332_v10  ;;  %v14423_v52 = vpop.permute.xlu1 %14422 }
0x1179   : > { %20107 = vmatprep.mubr.f32.mxu0 %v14335_v63 }
0x117b   : > { %14850 = vmatmul.mubr.f32.gmra.mrb[118].mxu1 %v14297_v56  ;;  %v14428_v56 = vpop.permute.xlu0 %14427 }
0x117c   : > { %14854 = vmatprep.mubr.f32.mxu1 %v14301_v22  ;;  %20108 = vmatmul.mubr.f32.gmra.mrb[178].mxu0 %v14338_v9 }
0x117d   : > { %20110 = vmatprep.mubr.f32.mxu0 %v14341_v49  ;;  %v14433_v49 = vpop.permute.xlu1 %14432 }
0x117f   : > { %14855 = vmatmul.mubr.f32.gmra.mrb[120].mxu1 %v14300_v8 }
0x1180   : > { %14859 = vmatprep.mubr.f32.mxu1 %v14304_v2  ;;  %20111 = vmatmul.mubr.f32.gmra.mrb[180].mxu0 %v14344_v59 }
0x1181   : > { %20113 = vmatprep.mubr.f32.mxu0 %v14347_v5 }
0x1183   : > { %14860 = vmatmul.mubr.f32.gmra.mrb[122].mxu1 %v14303_v40 }
0x1184   : > { %14864 = vmatprep.mubr.f32.mxu1 %v14307_v33  ;;  %20114 = vmatmul.mubr.f32.gmra.mrb[182].mxu0 %v14350_v60  ;;  %v14438_v33 = vpop.permute.xlu0 %14437 }
0x1185   : > { %20116 = vmatprep.mubr.f32.mxu0 %v14353_v16 }
0x1187   : > { %14865 = vmatmul.mubr.f32.gmra.mrb[124].mxu1 %v14306_v53 }
0x1188   : > { %14869 = vmatprep.mubr.f32.mxu1 %v14310_v58  ;;  %20117 = vmatmul.mubr.f32.gmra.mrb[184].mxu0 %v14356_v12  ;;  %v14443_v58 = vpop.permute.xlu1 %14442 }
0x118b   : > { %14870 = vmatmul.mubr.f32.gmra.mrb[126].mxu1 %v14309_v47 }
0x118c   : > { %14874 = vmatprep.mubr.f32.mxu1 %v14313_v18 }
0x118f   : > { %14875 = vmatmul.mubr.f32.gmra.mrb[128].mxu1 %v14312_v25 }
0x1190   : > { %14879 = vmatprep.mubr.f32.mxu1 %v14316_v54 }
0x1193   : > { %14880 = vmatmul.mubr.f32.gmra.mrb[130].mxu1 %v14315_v6 }
0x1194   : > { %14884 = vmatprep.mubr.f32.mxu1 %v14319_v19 }
0x1197   : > { %14885 = vmatmul.mubr.f32.gmra.mrb[132].mxu1 %v14318_v51 }
0x1198   : > { %14889 = vmatprep.mubr.f32.mxu1 %v14322_v50  ;;  %v14448_v50 = vpop.permute.xlu0 %14447 }
0x119b   : > { %14890 = vmatmul.mubr.f32.gmra.mrb[134].mxu1 %v14321_v1 }
0x119c   : > { %14894 = vmatprep.mubr.f32.mxu1 %v14325_v38 }
0x119f   : > { %14895 = vmatmul.mubr.f32.gmra.mrb[136].mxu1 %v14324_v61 }
0x11a0   : > { %14899 = vmatprep.mubr.f32.mxu1 %v14328_v55 }
0x11a3   : > { %14900 = vmatmul.mubr.f32.gmra.mrb[138].mxu1 %v14327_v62 }
0x11a4   : > { %14904 = vmatprep.mubr.f32.mxu1 %v14331_v21  ;;  %v14453_v21 = vpop.permute.xlu1 %14452 }
0x11a7   : > { %14905 = vmatmul.mubr.f32.gmra.mrb[140].mxu1 %v14330_v17 }
0x11a8   : > { %14909 = vmatprep.mubr.f32.mxu1 %v14334_v26 }
0x11ab   : > { %14910 = vmatmul.mubr.f32.gmra.mrb[142].mxu1 %v14333_v29 }
0x11ac   : > { %14914 = vmatprep.mubr.f32.mxu1 %v14337_v45 }
0x11af   : > { %14915 = vmatmul.mubr.f32.gmra.mrb[144].mxu1 %v14336_v37 }
0x11b0   : > { %14919 = vmatprep.mubr.f32.mxu1 %v14340_v44 }
0x11b3   : > { %14920 = vmatmul.mubr.f32.gmra.mrb[146].mxu1 %v14339_v30 }
0x11b4   : > { %14924 = vmatprep.mubr.f32.mxu1 %v14343_v35 }
0x11b7   : > { %14925 = vmatmul.mubr.f32.gmra.mrb[148].mxu1 %v14342_v39  ;;  %v14458_v39 = vpop.permute.xlu0 %14457 }
0x11b8   : > { %14929 = vmatprep.mubr.f32.mxu1 %v14346_v34 }
0x11bb   : > { %14930 = vmatmul.mubr.f32.gmra.mrb[150].mxu1 %v14345_v46 }
0x11bc   : > { %14934 = vmatprep.mubr.f32.mxu1 %v14349_v27 }
0x11bf   : > { %14935 = vmatmul.mubr.f32.gmra.mrb[152].mxu1 %v14348_v11  ;;  %v14463_v11 = vpop.permute.xlu1 %14462 }
0x11c0   : > { %14939 = vmatprep.mubr.f32.mxu1 %v14352_v13 }
0x11c3   : > { %14940 = vmatmul.mubr.f32.gmra.mrb[154].mxu1 %v14351_v14 }
0x11c4   : > { %14944 = vmatprep.mubr.f32.mxu1 %v14355_v32 }
0x11c7   : > { %14945 = vmatmul.mubr.f32.gmra.mrb[156].mxu1 %v14354_v43 }
0x11de   : > { %v14711_v0 = vpop.f32.mrb[62].mxu1 }
0x11df   : > { %v14713_v15 = vpop.f32.mrb[63].mxu1  ;;  %v14712_v59 = vadd.f32 %v14711_v0, %v14408_v20 }
0x11e2   : > { %v14716_v7 = vpop.f32.mrb[64].mxu1 }
0x11e3   : > { %v14718_v31 = vpop.f32.mrb[65].mxu1  ;;  %v14717_v8 = vadd.f32 %v14716_v7, %v14413_v42 }
0x11e6   : > { %v14721_v4 = vpop.f32.mrb[66].mxu1 }
0x11e7   : > { %v14723_v41 = vpop.f32.mrb[67].mxu1  ;;  %v14722_v18 = vadd.f32 %v14721_v4, %v14418_v3  ;;  %v14468_v4 = vpop.permute.xlu0 %14467 }
0x11ea   : > { %v14726_v48 = vpop.f32.mrb[68].mxu1 }
0x11eb   : > { %v14728_v57 = vpop.f32.mrb[69].mxu1  ;;  %v14727_v12 = vadd.f32 %v14726_v48, %v14423_v52 }
0x11ee   : > { %v14731_v28 = vpop.f32.mrb[70].mxu1 }
0x11ef   : > { %v14733_v36 = vpop.f32.mrb[71].mxu1  ;;  %v14732_v61 = vadd.f32 %v14731_v28, %v14428_v56 }
0x11f0   : > { %v14473_v36 = vpop.permute.xlu1 %14472 }
0x11f2   : > { %v14736_v23 = vpop.f32.mrb[72].mxu1 }
0x11f3   : > { %v14738_v24 = vpop.f32.mrb[73].mxu1  ;;  %v14737_v1 = vadd.f32 %v14736_v23, %v14433_v49 }
0x11f6   : > { %v14741_v10 = vpop.f32.mrb[74].mxu1 }
0x11f7   : > { %v14743_v63 = vpop.f32.mrb[75].mxu1  ;;  %v14742_v44 = vadd.f32 %v14741_v10, %v14438_v33 }
0x11fa   : > { %v14746_v22 = vpop.f32.mrb[76].mxu1 }
0x11fb   : > { %v14748_v9 = vpop.f32.mrb[77].mxu1  ;;  %v14747_v45 = vadd.f32 %v14746_v22, %v14443_v58  ;;  %v14478_v22 = vpop.permute.xlu0 %14477 }
0x11fe   : > { %v14751_v2 = vpop.f32.mrb[78].mxu1 }
0x11ff   : > { %v20049_v5 = vpop.f32.mrb[138].mxu0  ;;  %v14753_v40 = vpop.f32.mrb[79].mxu1  ;;  %v14752_v32 = vadd.f32 %v14751_v2, %v14448_v50 }
0x1200   : > { %v15022_v60 = vadd.f32 %v20049_v5, %v14717_v8  ;;  %v15016_v16 = vpop.f32.mrb[139].mxu0  ;;  %v14483_v2 = vpop.permute.xlu1 %14482 }
0x1201   : > { %v15017_v53 = vadd.f32 %v15016_v16, %v14712_v59 }
0x1202   : > { %15256 = vst.msk [vmem:[%s25559_s17 + $0x8] sm:$0xff] %vm6256_vm3, %v15022_v60  ;;  %v14756_v47 = vpop.f32.mrb[80].mxu1 }
0x1203   : > { %15255 = vst.msk [vmem:[%s25559_s17] sm:$0xff] %vm6256_vm3, %v15017_v53  ;;  %v20052_v25 = vpop.f32.mrb[140].mxu0  ;;  %v14758_v54 = vpop.f32.mrb[81].mxu1  ;;  %v14757_v13 = vadd.f32 %v14756_v47, %v14453_v21 }
0x1204   : > { %v15032_v6 = vadd.f32 %v20052_v25, %v14727_v12  ;;  %v15026_v19 = vpop.f32.mrb[141].mxu0  ;;  %v14488_v12 = vpop.permute.xlu0 %14487 }
0x1205   : > { %v15027_v51 = vadd.f32 %v15026_v19, %v14722_v18 }
0x1206   : > { %15258 = vst.msk [vmem:[%s25559_s17 + $0x18] sm:$0xff] %vm6256_vm3, %v15032_v6  ;;  %v14761_v38 = vpop.f32.mrb[82].mxu1 }
0x1207   : > { %15257 = vst.msk [vmem:[%s25559_s17 + $0x10] sm:$0xff] %vm6256_vm3, %v15027_v51  ;;  %v20055_v55 = vpop.f32.mrb[142].mxu0  ;;  %v14763_v62 = vpop.f32.mrb[83].mxu1  ;;  %v14762_v57 = vadd.f32 %v14761_v38, %v14458_v39 }
0x1208   : > { %v15042_v17 = vadd.f32 %v20055_v55, %v14737_v1  ;;  %v15036_v26 = vpop.f32.mrb[143].mxu0  ;;  %v14493_v51 = vpop.permute.xlu1 %14492 }
0x1209   : > { %v15037_v29 = vadd.f32 %v15036_v26, %v14732_v61  ;;  %v14498_v21 = vpop.permute.xlu0 %14497 }
0x120a   : > { %15260 = vst.msk [vmem:[%s25559_s17 + $0x28] sm:$0xff] %vm6256_vm3, %v15042_v17  ;;  %v14766_v37 = vpop.f32.mrb[84].mxu1 }
0x120b   : > { %15259 = vst.msk [vmem:[%s25559_s17 + $0x20] sm:$0xff] %vm6256_vm3, %v15037_v29  ;;  %v20058_v30 = vpop.f32.mrb[144].mxu0  ;;  %v14768_v35 = vpop.f32.mrb[85].mxu1  ;;  %v14767_v41 = vadd.f32 %v14766_v37, %v14463_v11 }
0x120c   : > { %v15052_v34 = vadd.f32 %v20058_v30, %v14747_v45  ;;  %v15046_v46 = vpop.f32.mrb[145].mxu0  ;;  %v14503_v30 = vpop.permute.xlu1 %14502 }
0x120d   : > { %v15047_v27 = vadd.f32 %v15046_v46, %v14742_v44 }
0x120e   : > { %15262 = vst.msk [vmem:[%s25559_s17 + $0x38] sm:$0xff] %vm6256_vm3, %v15052_v34  ;;  %v14771_v14 = vpop.f32.mrb[86].mxu1 }
0x120f   : > { %15261 = vst.msk [vmem:[%s25559_s17 + $0x30] sm:$0xff] %vm6256_vm3, %v15047_v27  ;;  %v20061_v43 = vpop.f32.mrb[146].mxu0  ;;  %v14773_v0 = vpop.f32.mrb[87].mxu1  ;;  %v14772_v10 = vadd.f32 %v14771_v14, %v14468_v4 }
0x1210   : > { %v15062_v15 = vadd.f32 %v20061_v43, %v14757_v13  ;;  %v15056_v7 = vpop.f32.mrb[147].mxu0  ;;  %v14508_v13 = vpop.permute.xlu0 %14507 }
0x1211   : > { %v15057_v31 = vadd.f32 %v15056_v7, %v14752_v32 }
0x1212   : > { %15264 = vst.msk [vmem:[%s25559_s17 + $0x48] sm:$0xff] %vm6256_vm3, %v15062_v15  ;;  %v14776_v48 = vpop.f32.mrb[88].mxu1 }
0x1213   : > { %15263 = vst.msk [vmem:[%s25559_s17 + $0x40] sm:$0xff] %vm6256_vm3, %v15057_v31  ;;  %v20064_v20 = vpop.f32.mrb[148].mxu0  ;;  %v14778_v28 = vpop.f32.mrb[89].mxu1  ;;  %v14777_v3 = vadd.f32 %v14776_v48, %v14473_v36 }
0x1214   : > { %v15072_v42 = vadd.f32 %v20064_v20, %v14767_v41  ;;  %v15066_v23 = vpop.f32.mrb[149].mxu0  ;;  %v14513_v31 = vpop.permute.xlu1 %14512 }
0x1215   : > { %v15067_v24 = vadd.f32 %v15066_v23, %v14762_v57  ;;  %v14518_v36 = vpop.permute.xlu0 %14517 }
0x1216   : > { %15266 = vst.msk [vmem:[%s25559_s17 + $0x58] sm:$0xff] %vm6256_vm3, %v15072_v42  ;;  %v14781_v52 = vpop.f32.mrb[90].mxu1 }
0x1217   : > { %15265 = vst.msk [vmem:[%s25559_s17 + $0x50] sm:$0xff] %vm6256_vm3, %v15067_v24  ;;  %v20067_v63 = vpop.f32.mrb[150].mxu0  ;;  %v14783_v56 = vpop.f32.mrb[91].mxu1  ;;  %v14782_v5 = vadd.f32 %v14781_v52, %v14478_v22 }
0x1218   : > { %v15082_v9 = vadd.f32 %v20067_v63, %v14777_v3  ;;  %v15076_v49 = vpop.f32.mrb[151].mxu0  ;;  %v14523_v63 = vpop.permute.xlu1 %14522 }
0x1219   : > { %v15077_v8 = vadd.f32 %v15076_v49, %v14772_v10 }
0x121a   : > { %15268 = vst.msk [vmem:[%s25559_s17 + $0x68] sm:$0xff] %vm6256_vm3, %v15082_v9  ;;  %v14786_v59 = vpop.f32.mrb[92].mxu1 }
0x121b   : > { %15267 = vst.msk [vmem:[%s25559_s17 + $0x60] sm:$0xff] %vm6256_vm3, %v15077_v8  ;;  %v14787_v40 = vadd.f32 %v14786_v59, %v14483_v2  ;;  %v20070_v33 = vpop.f32.mrb[152].mxu0  ;;  %v14788_v60 = vpop.f32.mrb[93].mxu1 }
0x121c   : > { %v15086_v16 = vpop.f32.mrb[153].mxu0  ;;  %v14528_v59 = vpop.permute.xlu0 %14527 }
0x121d   : > { %v15092_v53 = vadd.f32 %v20070_v33, %v14787_v40  ;;  %v15087_v58 = vadd.f32 %v15086_v16, %v14782_v5 }
0x121e   : > { %v14791_v47 = vpop.f32.mrb[94].mxu1 }
0x121f   : > { %15270 = vst.msk [vmem:[%s25559_s17 + $0x78] sm:$0xff] %vm6256_vm3, %v15092_v53  ;;  %15269 = vst.msk [vmem:[%s25559_s17 + $0x70] sm:$0xff] %vm6256_vm3, %v15087_v58  ;;  %v14792_v18 = vadd.f32 %v14791_v47, %v14488_v12  ;;  %v20073_v25 = vpop.f32.mrb[154].mxu0  ;;  %v14793_v54 = vpop.f32.mrb[95].mxu1 }
0x1220   : > { %v15096_v6 = vpop.f32.mrb[155].mxu0  ;;  %v14533_v58 = vpop.permute.xlu1 %14532 }
0x1221   : > { %v15097_v19 = vadd.f32 %v15096_v6, %v14792_v18 }
0x1222   : > { %v14796_v50 = vpop.f32.mrb[96].mxu1 }
0x1223   : > { %15271 = vst.msk [vmem:[%s25559_s17 + $0x80] sm:$0xff] %vm6256_vm3, %v15097_v19  ;;  %v14797_v1 = vadd.f32 %v14796_v50, %v14493_v51  ;;  %v14798_v38 = vpop.f32.mrb[97].mxu1  ;;  %v20076_v61 = vpop.f32.mrb[156].mxu0 }
0x1224   : > { %v15106_v55 = vpop.f32.mrb[157].mxu0  ;;  %v14538_v19 = vpop.permute.xlu0 %14537 }
0x1225   : > { %v15102_v62 = vadd.f32 %v20073_v25, %v14797_v1 }
0x1226   : > { %v14801_v17 = vpop.f32.mrb[98].mxu1 }
0x1227   : > { %15272 = vst.msk [vmem:[%s25559_s17 + $0x88] sm:$0xff] %vm6256_vm3, %v15102_v62  ;;  %v14802_v26 = vadd.f32 %v14801_v17, %v14498_v21  ;;  %v14803_v29 = vpop.f32.mrb[99].mxu1  ;;  %v20079_v45 = vpop.f32.mrb[158].mxu0 }
0x1228   : > { %v15116_v37 = vpop.f32.mrb[159].mxu0  ;;  %v14543_v62 = vpop.permute.xlu1 %14542 }
0x1229   : > { %v15107_v44 = vadd.f32 %v15106_v55, %v14802_v26 }
0x122a   : > { %v14806_v35 = vpop.f32.mrb[100].mxu1 }
0x122b   : > { %15273 = vst.msk [vmem:[%s25559_s17 + $0x90] sm:$0xff] %vm6256_vm3, %v15107_v44  ;;  %v14807_v39 = vadd.f32 %v14806_v35, %v14503_v30  ;;  %v14808_v34 = vpop.f32.mrb[101].mxu1  ;;  %v20082_v46 = vpop.f32.mrb[160].mxu0 }
0x122c   : > { %v15126_v27 = vpop.f32.mrb[161].mxu0  ;;  %v14548_v44 = vpop.permute.xlu0 %14547 }
0x122d   : > { %v15112_v11 = vadd.f32 %v20076_v61, %v14807_v39 }
0x122e   : > { %v14811_v14 = vpop.f32.mrb[102].mxu1 }
0x122f   : > { %15274 = vst.msk [vmem:[%s25559_s17 + $0x98] sm:$0xff] %vm6256_vm3, %v15112_v11  ;;  %v14812_v32 = vadd.f32 %v14811_v14, %v14508_v13  ;;  %v14813_v43 = vpop.f32.mrb[103].mxu1  ;;  %v20085_v0 = vpop.f32.mrb[162].mxu0 }
0x1230   : > { %v15136_v15 = vpop.f32.mrb[163].mxu0  ;;  %v14553_v11 = vpop.permute.xlu1 %14552 }
0x1231   : > { %v15117_v7 = vadd.f32 %v15116_v37, %v14812_v32 }
0x1232   : > { %v14816_v4 = vpop.f32.mrb[104].mxu1 }
0x1233   : > { %15275 = vst.msk [vmem:[%s25559_s17 + $0xa0] sm:$0xff] %vm6256_vm3, %v15117_v7  ;;  %v14817_v41 = vadd.f32 %v14816_v4, %v14513_v31  ;;  %v14818_v48 = vpop.f32.mrb[105].mxu1  ;;  %v20088_v57 = vpop.f32.mrb[164].mxu0 }
0x1234   : > { %v15146_v20 = vpop.f32.mrb[165].mxu0  ;;  %v14558_v7 = vpop.permute.xlu0 %14557 }
0x1235   : > { %v15122_v28 = vadd.f32 %v20079_v45, %v14817_v41 }
0x1236   : > { %v14821_v42 = vpop.f32.mrb[106].mxu1 }
0x1237   : > { %15276 = vst.msk [vmem:[%s25559_s17 + $0xa8] sm:$0xff] %vm6256_vm3, %v15122_v28  ;;  %v14822_v23 = vadd.f32 %v14821_v42, %v14518_v36  ;;  %v14823_v24 = vpop.f32.mrb[107].mxu1  ;;  %v20091_v3 = vpop.f32.mrb[166].mxu0 }
0x1238   : > { %v15156_v52 = vpop.f32.mrb[167].mxu0  ;;  %v14563_v28 = vpop.permute.xlu1 %14562 }
0x1239   : > { %v15127_v10 = vadd.f32 %v15126_v27, %v14822_v23 }
0x123a   : > { %v14826_v56 = vpop.f32.mrb[108].mxu1 }
0x123b   : > { %15277 = vst.msk [vmem:[%s25559_s17 + $0xb0] sm:$0xff] %vm6256_vm3, %v15127_v10  ;;  %v14827_v22 = vadd.f32 %v14826_v56, %v14523_v63  ;;  %v14828_v9 = vpop.f32.mrb[109].mxu1  ;;  %v25607_v49 = vpop.f32.mrb[168].mxu0 }
0x123c   : > { %v15166_v8 = vpop.f32.mrb[169].mxu0  ;;  %v14568_v10 = vpop.permute.xlu0 %14567 }
0x123d   : > { %v15132_v2 = vadd.f32 %v20082_v46, %v14827_v22 }
0x123e   : > { %v14831_v5 = vpop.f32.mrb[110].mxu1 }
0x123f   : > { %15278 = vst.msk [vmem:[%s25559_s17 + $0xb8] sm:$0xff] %vm6256_vm3, %v15132_v2  ;;  %v14832_v40 = vadd.f32 %v14831_v5, %v14528_v59  ;;  %v14833_v33 = vpop.f32.mrb[111].mxu1  ;;  %v25611_v60 = vpop.f32.mrb[170].mxu0 }
0x1240   : > { %v25613_v16 = vpop.f32.mrb[171].mxu0  ;;  %v14578_v33 = vpop.permute.xlu0 %14577 }
0x1241   : > { %v15137_v53 = vadd.f32 %v15136_v15, %v14832_v40 }
0x1242   : > { %v14836_v12 = vpop.f32.mrb[112].mxu1 }
0x1243   : > { %15279 = vst.msk [vmem:[%s25559_s17 + $0xc0] sm:$0xff] %vm6256_vm3, %v15137_v53  ;;  %v14837_v47 = vadd.f32 %v14836_v12, %v14533_v58  ;;  %v14838_v18 = vpop.f32.mrb[113].mxu1  ;;  %v25617_v25 = vpop.f32.mrb[172].mxu0 }
0x1244   : > { %v25619_v54 = vpop.f32.mrb[173].mxu0 }
0x1245   : > { %v15142_v6 = vadd.f32 %v20085_v0, %v14837_v47 }
0x1246   : > { %v14841_v51 = vpop.f32.mrb[114].mxu1 }
0x1247   : > { %15280 = vst.msk [vmem:[%s25559_s17 + $0xc8] sm:$0xff] %vm6256_vm3, %v15142_v6  ;;  %v14842_v50 = vadd.f32 %v14841_v51, %v14538_v19  ;;  %v14843_v1 = vpop.f32.mrb[115].mxu1  ;;  %v25623_v38 = vpop.f32.mrb[174].mxu0 }
0x1248   : > { %v25625_v61 = vpop.f32.mrb[175].mxu0  ;;  %v14588_v51 = vpop.permute.xlu0 %14587 }
0x1249   : > { %v15147_v55 = vadd.f32 %v15146_v20, %v14842_v50 }
0x124a   : > { %v14846_v21 = vpop.f32.mrb[116].mxu1 }
0x124b   : > { %15281 = vst.msk [vmem:[%s25559_s17 + $0xd0] sm:$0xff] %vm6256_vm3, %v15147_v55  ;;  %v14847_v17 = vadd.f32 %v14846_v21, %v14543_v62  ;;  %v14848_v26 = vpop.f32.mrb[117].mxu1  ;;  %v25629_v29 = vpop.f32.mrb[176].mxu0 }
0x124c   : > { %v25631_v45 = vpop.f32.mrb[177].mxu0 }
0x124d   : > { %v15152_v37 = vadd.f32 %v20088_v57, %v14847_v17 }
0x124e   : > { %v14851_v30 = vpop.f32.mrb[118].mxu1 }
0x124f   : > { %15282 = vst.msk [vmem:[%s25559_s17 + $0xd8] sm:$0xff] %vm6256_vm3, %v15152_v37  ;;  %v14852_v35 = vadd.f32 %v14851_v30, %v14548_v44  ;;  %v14853_v39 = vpop.f32.mrb[119].mxu1  ;;  %v25635_v34 = vpop.f32.mrb[178].mxu0 }
0x1250   : > { %v25637_v46 = vpop.f32.mrb[179].mxu0  ;;  %v14598_v37 = vpop.permute.xlu0 %14597 }
0x1251   : > { %v15157_v27 = vadd.f32 %v15156_v52, %v14852_v35 }
0x1252   : > { %v14856_v13 = vpop.f32.mrb[120].mxu1 }
0x1253   : > { %15283 = vst.msk [vmem:[%s25559_s17 + $0xe0] sm:$0xff] %vm6256_vm3, %v15157_v27  ;;  %v14857_v14 = vadd.f32 %v14856_v13, %v14553_v11  ;;  %v14858_v32 = vpop.f32.mrb[121].mxu1  ;;  %v25641_v43 = vpop.f32.mrb[180].mxu0 }
0x1254   : > { %v25643_v0 = vpop.f32.mrb[181].mxu0 }
0x1255   : > { %v15162_v15 = vadd.f32 %v20091_v3, %v14857_v14  ;;  %v14608_v14 = vpop.permute.xlu0 %14607 }
0x1256   : > { %v14861_v31 = vpop.f32.mrb[122].mxu1 }
0x1257   : > { %15284 = vst.msk [vmem:[%s25559_s17 + $0xe8] sm:$0xff] %vm6256_vm3, %v15162_v15  ;;  %v14862_v4 = vadd.f32 %v14861_v31, %v14558_v7  ;;  %v14863_v41 = vpop.f32.mrb[123].mxu1  ;;  %v25647_v48 = vpop.f32.mrb[182].mxu0 }
0x1258   : > { %v25649_v57 = vpop.f32.mrb[183].mxu0 }
0x1259   : > { %v15167_v20 = vadd.f32 %v15166_v8, %v14862_v4  ;;  %v14573_v8 = vpop.permute.xlu1 %14572 }
0x125a   : > { %v14866_v36 = vpop.f32.mrb[124].mxu1 }
0x125b   : > { %15285 = vst.msk [vmem:[%s25559_s17 + $0xf0] sm:$0xff] %vm6256_vm3, %v15167_v20  ;;  %v14867_v42 = vadd.f32 %v14866_v36, %v14563_v28  ;;  %v14868_v23 = vpop.f32.mrb[125].mxu1  ;;  %v25653_v24 = vpop.f32.mrb[184].mxu0 }
0x125c   : > { %v25655_v3 = vpop.f32.mrb[185].mxu0  ;;  %v14618_v28 = vpop.permute.xlu0 %14617 }
0x125d   : > { %v15172_v52 = vadd.f32 %v25607_v49, %v14867_v42  ;;  %v14583_v47 = vpop.permute.xlu1 %14582 }
0x125e   : > { %v14871_v63 = vpop.f32.mrb[126].mxu1 }
0x125f   : > { %15286 = vst.msk [vmem:[%s25559_s17 + $0xf8] sm:$0xff] %vm6256_vm3, %v15172_v52  ;;  %v14872_v56 = vadd.f32 %v14871_v63, %v14568_v10  ;;  %v14873_v22 = vpop.f32.mrb[127].mxu1 }
0x1260   : > { %v14628_v22 = vpop.permute.xlu0 %14627 }
0x1261   : > { %v15177_v9 = vadd.f32 %v25613_v16, %v14872_v56  ;;  %v14593_v62 = vpop.permute.xlu1 %14592 }
0x1262   : > { %v14876_v2 = vpop.f32.mrb[128].mxu1 }
0x1263   : > { %15287 = vst.msk [vmem:[%s25559_s17 + $0x100] sm:$0xff] %vm6256_vm3, %v15177_v9  ;;  %v14877_v59 = vadd.f32 %v14876_v2, %v14573_v8  ;;  %v14878_v5 = vpop.f32.mrb[129].mxu1 }
0x1265   : > { %v15182_v40 = vadd.f32 %v25611_v60, %v14877_v59  ;;  %v14603_v39 = vpop.permute.xlu1 %14602 }
0x1266   : > { %v14881_v49 = vpop.f32.mrb[130].mxu1 }
0x1267   : > { %15288 = vst.msk [vmem:[%s25559_s17 + $0x108] sm:$0xff] %vm6256_vm3, %v15182_v40  ;;  %v14882_v53 = vadd.f32 %v14881_v49, %v14578_v33  ;;  %v14883_v58 = vpop.f32.mrb[131].mxu1  ;;  %v14638_v49 = vpop.permute.xlu0 %14637 }
0x1269   : > { %v15187_v12 = vadd.f32 %v25619_v54, %v14882_v53  ;;  %v14613_v31 = vpop.permute.xlu1 %14612 }
0x126a   : > { %v14886_v16 = vpop.f32.mrb[132].mxu1 }
0x126b   : > { %15289 = vst.msk [vmem:[%s25559_s17 + $0x110] sm:$0xff] %vm6256_vm3, %v15187_v12  ;;  %v14887_v18 = vadd.f32 %v14886_v16, %v14583_v47  ;;  %v14888_v6 = vpop.f32.mrb[133].mxu1 }
0x126d   : > { %v15192_v19 = vadd.f32 %v25617_v25, %v14887_v18  ;;  %v14623_v52 = vpop.permute.xlu1 %14622 }
0x126e   : > { %v14891_v60 = vpop.f32.mrb[134].mxu1 }
0x126f   : > { %15290 = vst.msk [vmem:[%s25559_s17 + $0x118] sm:$0xff] %vm6256_vm3, %v15192_v19  ;;  %v14892_v50 = vadd.f32 %v14891_v60, %v14588_v51  ;;  %v14893_v1 = vpop.f32.mrb[135].mxu1 }
0x1271   : > { %v15197_v55 = vadd.f32 %v25625_v61, %v14892_v50  ;;  %v14633_v59 = vpop.permute.xlu1 %14632 }
0x1272   : > { %v14896_v54 = vpop.f32.mrb[136].mxu1 }
0x1273   : > { %15291 = vst.msk [vmem:[%s25559_s17 + $0x120] sm:$0xff] %vm6256_vm3, %v15197_v55  ;;  %v14897_v21 = vadd.f32 %v14896_v54, %v14593_v62  ;;  %v14898_v17 = vpop.f32.mrb[137].mxu1 }
0x1275   : > { %v15202_v26 = vadd.f32 %v25623_v38, %v14897_v21  ;;  %v14643_v47 = vpop.permute.xlu1 %14642 }
0x1276   : > { %v14901_v25 = vpop.f32.mrb[138].mxu1 }
0x1277   : > { %15292 = vst.msk [vmem:[%s25559_s17 + $0x128] sm:$0xff] %vm6256_vm3, %v15202_v26  ;;  %v14902_v44 = vadd.f32 %v14901_v25, %v14598_v37  ;;  %v14903_v30 = vpop.f32.mrb[139].mxu1 }
0x1279   : > { %v15207_v35 = vadd.f32 %v25631_v45, %v14902_v44 }
0x127a   : > { %v14906_v61 = vpop.f32.mrb[140].mxu1 }
0x127b   : > { %15293 = vst.msk [vmem:[%s25559_s17 + $0x130] sm:$0xff] %vm6256_vm3, %v15207_v35  ;;  %v14907_v27 = vadd.f32 %v14906_v61, %v14603_v39  ;;  %v14908_v11 = vpop.f32.mrb[141].mxu1 }
0x127d   : > { %v15212_v13 = vadd.f32 %v25629_v29, %v14907_v27 }
0x127e   : > { %v14911_v38 = vpop.f32.mrb[142].mxu1 }
0x127f   : > { %15294 = vst.msk [vmem:[%s25559_s17 + $0x138] sm:$0xff] %vm6256_vm3, %v15212_v13  ;;  %v14912_v32 = vadd.f32 %v14911_v38, %v14608_v14  ;;  %v14913_v15 = vpop.f32.mrb[143].mxu1 }
0x1281   : > { %v15217_v7 = vadd.f32 %v25637_v46, %v14912_v32 }
0x1282   : > { %v14916_v45 = vpop.f32.mrb[144].mxu1 }
0x1283   : > { %15295 = vst.msk [vmem:[%s25559_s17 + $0x140] sm:$0xff] %vm6256_vm3, %v15217_v7  ;;  %v14917_v4 = vadd.f32 %v14916_v45, %v14613_v31  ;;  %v14918_v41 = vpop.f32.mrb[145].mxu1 }
0x1285   : > { %v15222_v20 = vadd.f32 %v25635_v34, %v14917_v4 }
0x1286   : > { %v14921_v29 = vpop.f32.mrb[146].mxu1 }
0x1287   : > { %15296 = vst.msk [vmem:[%s25559_s17 + $0x148] sm:$0xff] %vm6256_vm3, %v15222_v20  ;;  %v14922_v36 = vadd.f32 %v14921_v29, %v14618_v28  ;;  %v14923_v42 = vpop.f32.mrb[147].mxu1 }
0x1289   : > { %v15227_v23 = vadd.f32 %v25643_v0, %v14922_v36 }
0x128a   : > { %v14926_v46 = vpop.f32.mrb[148].mxu1 }
0x128b   : > { %15297 = vst.msk [vmem:[%s25559_s17 + $0x150] sm:$0xff] %vm6256_vm3, %v15227_v23  ;;  %v14927_v10 = vadd.f32 %v14926_v46, %v14623_v52  ;;  %v14928_v63 = vpop.f32.mrb[149].mxu1 }
0x128d   : > { %v15232_v56 = vadd.f32 %v25641_v43, %v14927_v10 }
0x128e   : > { %v14931_v34 = vpop.f32.mrb[150].mxu1 }
0x128f   : > { %15298 = vst.msk [vmem:[%s25559_s17 + $0x158] sm:$0xff] %vm6256_vm3, %v15232_v56  ;;  %v14932_v9 = vadd.f32 %v14931_v34, %v14628_v22  ;;  %v14933_v8 = vpop.f32.mrb[151].mxu1 }
0x1291   : > { %v15237_v2 = vadd.f32 %v25649_v57, %v14932_v9 }
0x1292   : > { %v14936_v0 = vpop.f32.mrb[152].mxu1 }
0x1293   : > { %15299 = vst.msk [vmem:[%s25559_s17 + $0x160] sm:$0xff] %vm6256_vm3, %v15237_v2  ;;  %v14937_v5 = vadd.f32 %v14936_v0, %v14633_v59  ;;  %v14938_v40 = vpop.f32.mrb[153].mxu1 }
0x1295   : > { %v15242_v33 = vadd.f32 %v25647_v48, %v14937_v5 }
0x1296   : > { %v14941_v43 = vpop.f32.mrb[154].mxu1 }
0x1297   : > { %15300 = vst.msk [vmem:[%s25559_s17 + $0x168] sm:$0xff] %vm6256_vm3, %v15242_v33  ;;  %v14942_v53 = vadd.f32 %v14941_v43, %v14638_v49  ;;  %v14943_v58 = vpop.f32.mrb[155].mxu1 }
0x1299   : > { %v15247_v12 = vadd.f32 %v25655_v3, %v14942_v53 }
0x129a   : > { %v14946_v16 = vpop.f32.mrb[156].mxu1 }
0x129b   : > { %15301 = vst.msk [vmem:[%s25559_s17 + $0x170] sm:$0xff] %vm6256_vm3, %v15247_v12  ;;  %v14947_v57 = vadd.f32 %v14946_v16, %v14643_v47  ;;  %v14948_v18 = vpop.f32.mrb[157].mxu1 }
0x129d   : > { %v15252_v6 = vadd.f32 %v25653_v24, %v14947_v57 }
0x129f   : > { %15302 = vst.msk [vmem:[%s25559_s17 + $0x178] sm:$0xff] %vm6256_vm3, %v15252_v6 }
0x12a0 PF: > { %s25910_s22 = sld [smem:[#allocation20_spill]] }
0x12a6   : > { %s31_s21 = sadd.s32 1, %s25910_s22  }
0x12a7   : > { %p28_p11 = scmp.ge.s32.totalorder %s31_s21, 4  }
0x12a9   :  { %30 = sbr.rel (!%p28_p11) target bundleno = 10 (0xa), region = 171 }
0x12b0   :  { %15324 = vsyncpa [#allocation3], 1 }
0x12b1   :  { %15326 = vsyncpa [#allocation3 + $0x1], 1 }
0x12b2   :  { %15327 = vsyncpa [#allocation5], 1 }
0x12b3   :  { %15328 = vsyncpa [#allocation8], 1 }
0x12b4   :  { %15329 = vsyncpa [#allocation11], 1 }
0x12b5   :  { %15330 = vsyncpa [#allocation14], 1 }

</bundles_post_ra>
